<compile_context>
chip_gen: v6e
topology: v6e:2x2x1
jax: 0.10.0
libtpu: 0.0.40
codegen_flags: <defaults>
</compile_context>

<pallas_src>
import jax
import jax.numpy as jnp
from jax.experimental import pallas as pl
from jax.experimental.pallas import tpu as pltpu

H1, H2, H3 = 1024, 512, 256


def _round_up(n, m):
    return ((n + m - 1) // m) * m


def _leaky_relu(x, slope=0.2):
    return jnp.where(x > 0, x, slope * x)


def strong_discriminator_kernel(
    x_ref,
    w1_ref, b1_ref,
    w2_ref, b2_ref,
    w3_ref, b3_ref,
    w4_ref, b4_ref,
    out_ref, f_ref,
):
    x = x_ref[...]

    # Linear(input_dim, 1024) + LeakyReLU(0.2)   [bf16 matmul, f32 accumulate]
    h = jnp.dot(x.astype(jnp.bfloat16), w1_ref[...],
                preferred_element_type=jnp.float32) + b1_ref[...]
    h = _leaky_relu(h)

    # Linear(1024, 512) + LeakyReLU(0.2) + Dropout(0.3) [identity in eval]
    h = jnp.dot(h.astype(jnp.bfloat16), w2_ref[...],
                preferred_element_type=jnp.float32) + b2_ref[...]
    h = _leaky_relu(h)

    # Linear(512, 256) + LeakyReLU(0.2)  -> features f
    f = jnp.dot(h.astype(jnp.bfloat16), w3_ref[...],
                preferred_element_type=jnp.float32) + b3_ref[...]
    f = _leaky_relu(f)
    f_ref[...] = f.astype(f_ref.dtype)

    # classifier: Linear(256, 1) + Sigmoid.
    # N=1 would waste MXU columns; do it as a VPU multiply + lane reduction.
    logits = jnp.sum(f * w4_ref[...], axis=-1, keepdims=True) + b4_ref[...]
    out_ref[...] = jax.nn.sigmoid(logits).astype(out_ref.dtype)


def strong_discriminator(x, params, *, tb=256):
    """x: (B, input_dim) float32. Returns (out (B, 1), f (B, 256))."""
    B, input_dim = x.shape
    w1, b1, w2, b2, w3, b3, w4, b4 = params

    # bf16 weights for the three MXU matmuls; classifier row stays f32 (VPU).
    w1b = w1.astype(jnp.bfloat16)
    w2b = w2.astype(jnp.bfloat16)
    w3b = w3.astype(jnp.bfloat16)
    w4r = w4.reshape(1, H3).astype(jnp.float32)
    b4r = b4.reshape(1, 1).astype(jnp.float32)

    # Batch tile: multiple of 8 sublanes, capped at 256 (MXU tile on v6e/v7x,
    # 2x the 128-row MXU tile on v5e). Pad B up to a whole number of tiles.
    tb = min(tb, max(8, _round_up(B, 8)))
    tb = _round_up(tb, 8)
    Bp = _round_up(B, tb)
    if Bp != B:
        x = jnp.pad(x, ((0, Bp - B), (0, 0)))
    grid = (Bp // tb,)

    def row_spec(d):
        return pl.BlockSpec((tb, d), lambda i: (i, 0))

    def resident(a):  # full array, constant block index -> stays in VMEM
        return pl.BlockSpec(a.shape, lambda i: (0, 0))

    flops = 2 * Bp * (input_dim * H1 + H1 * H2 + H2 * H3 + H3)
    bytes_accessed = (
        Bp * input_dim * 4                       # x
        + (w1b.size + w2b.size + w3b.size) * 2   # bf16 weights
        + (b1.size + b2.size + b3.size + w4r.size + b4r.size) * 4
        + Bp * (H3 + 1) * 4                      # f + out
    )
    cost = pl.CostEstimate(flops=flops, transcendentals=Bp,
                           bytes_accessed=bytes_accessed)

    out, f = pl.pallas_call(
        strong_discriminator_kernel,
        grid=grid,
        out_shape=(
            jax.ShapeDtypeStruct((Bp, 1), jnp.float32),
            jax.ShapeDtypeStruct((Bp, H3), jnp.float32),
        ),
        in_specs=[
            row_spec(input_dim),
            resident(w1b), resident(b1),
            resident(w2b), resident(b2),
            resident(w3b), resident(b3),
            resident(w4r), resident(b4r),
        ],
        out_specs=(row_spec(1), row_spec(H3)),
        compiler_params=pltpu.CompilerParams(
            dimension_semantics=("parallel",),
        ),
        cost_estimate=cost,
    )(x, w1b, b1, w2b, b2, w3b, b3, w4r, b4r)

    return out[:B], f[:B]


def init_params(key, input_dim):
    """Deterministic synthetic parameters (shapes match the nn.Linear layers)."""
    ks = jax.random.split(key, 8)

    def lin(kw, kb, fan_in, fan_out):
        bound = 1.0 / jnp.sqrt(fan_in)
        w = jax.random.uniform(kw, (fan_in, fan_out), jnp.float32, -bound, bound)
        b = jax.random.uniform(kb, (1, fan_out), jnp.float32, -bound, bound)
        return w, b

    w1, b1 = lin(ks[0], ks[1], input_dim, H1)
    w2, b2 = lin(ks[2], ks[3], H1, H2)
    w3, b3 = lin(ks[4], ks[5], H2, H3)
    w4, b4 = lin(ks[6], ks[7], H3, 1)
    return (w1, b1, w2, b2, w3, b3, w4, b4)


def reference_f32(x, params):
    """Pure-f32 reference (original PyTorch math)."""
    w1, b1, w2, b2, w3, b3, w4, b4 = params
    h = _leaky_relu(x @ w1 + b1)
    h = _leaky_relu(h @ w2 + b2)
    f = _leaky_relu(h @ w3 + b3)
    out = jax.nn.sigmoid(f @ w4 + b4)
    return out, f


def reference_bf16(x, params):
    """Reference mirroring the kernel's bf16-matmul / f32-accumulate math."""
    w1, b1, w2, b2, w3, b3, w4, b4 = params
    bf = jnp.bfloat16
    h = _leaky_relu(jnp.dot(x.astype(bf), w1.astype(bf),
                            preferred_element_type=jnp.float32) + b1)
    h = _leaky_relu(jnp.dot(h.astype(bf), w2.astype(bf),
                            preferred_element_type=jnp.float32) + b2)
    f = _leaky_relu(jnp.dot(h.astype(bf), w3.astype(bf),
                            preferred_element_type=jnp.float32) + b3)
    logits = jnp.sum(f * w4.reshape(1, -1), axis=-1, keepdims=True) + b4.reshape(1, 1)
    return jax.nn.sigmoid(logits), f


if __name__ == "__main__":
    key = jax.random.PRNGKey(0)
    k_x, k_p = jax.random.split(key)

    # Small demo shapes: B deliberately not a tile multiple to exercise the
    # pad-and-clip path (tiles of 256 -> grid of 2 with a ragged last tile).
    B, INPUT_DIM = 300, 64
    x = jax.random.normal(k_x, (B, INPUT_DIM), jnp.float32)
    params = init_params(k_p, INPUT_DIM)

    out, f = jax.block_until_ready(strong_discriminator(x, params))
    assert out.shape == (B, 1) and f.shape == (B, H3)

    # Tight check against a reference that mirrors the kernel's bf16 matmul math.
    ref_out_bf, ref_f_bf = reference_bf16(x, params)
    assert jnp.allclose(out, ref_out_bf, atol=1e-2, rtol=1e-2)
    assert jnp.allclose(f, ref_f_bf, atol=1e-2, rtol=1e-2)

    # Loose sanity check against the full-f32 forward (bf16 weight rounding drift).
    ref_out, ref_f = reference_f32(x, params)
    assert jnp.allclose(out, ref_out, atol=5e-2, rtol=5e-2)
    assert jnp.allclose(f, ref_f, atol=5e-2, rtol=5e-2)

    print("KERNEL_OK")
</pallas_src>

<mosaic_0001>
module attributes {stable_mosaic.version = 11 : i64} {
  func.func @strong_discriminator_kernel(%arg0: i32, %arg1: memref<256x64xf32, #tpu.memory_space<vmem>>, %arg2: memref<64x1024xbf16, #tpu.memory_space<vmem>>, %arg3: memref<1x1024xf32, #tpu.memory_space<vmem>>, %arg4: memref<1024x512xbf16, #tpu.memory_space<vmem>>, %arg5: memref<1x512xf32, #tpu.memory_space<vmem>>, %arg6: memref<512x256xbf16, #tpu.memory_space<vmem>>, %arg7: memref<1x256xf32, #tpu.memory_space<vmem>>, %arg8: memref<1x256xf32, #tpu.memory_space<vmem>>, %arg9: memref<1x1xf32, #tpu.memory_space<vmem>>, %arg10: memref<256x1xf32, #tpu.memory_space<vmem>>, %arg11: memref<256x256xf32, #tpu.memory_space<vmem>>) attributes {dimension_semantics = [#tpu.dimension_semantics<parallel>], iteration_bounds = array<i64: 2>, scalar_prefetch = 0 : i64, scratch_operands = 0 : i64, tpu.core_type = #tpu.core_type<tc>, window_params = [{transform_indices = @transform_0, window_bounds = array<i64: 256, 64>}, {pipeline_mode = #tpu.pipeline_mode<synchronous>, transform_indices = @transform_1, window_bounds = array<i64: 64, 1024>}, {pipeline_mode = #tpu.pipeline_mode<synchronous>, transform_indices = @transform_2, window_bounds = array<i64: 1, 1024>}, {pipeline_mode = #tpu.pipeline_mode<synchronous>, transform_indices = @transform_3, window_bounds = array<i64: 1024, 512>}, {pipeline_mode = #tpu.pipeline_mode<synchronous>, transform_indices = @transform_4, window_bounds = array<i64: 1, 512>}, {pipeline_mode = #tpu.pipeline_mode<synchronous>, transform_indices = @transform_5, window_bounds = array<i64: 512, 256>}, {pipeline_mode = #tpu.pipeline_mode<synchronous>, transform_indices = @transform_6, window_bounds = array<i64: 1, 256>}, {pipeline_mode = #tpu.pipeline_mode<synchronous>, transform_indices = @transform_7, window_bounds = array<i64: 1, 256>}, {pipeline_mode = #tpu.pipeline_mode<synchronous>, transform_indices = @transform_8, window_bounds = array<i64: 1, 1>}, {transform_indices = @transform_9, window_bounds = array<i64: 256, 1>}, {transform_indices = @transform_10, window_bounds = array<i64: 256, 256>}]} {
    %c0 = arith.constant 0 : index
    %c0_0 = arith.constant 0 : index
    %0 = vector.load %arg1[%c0, %c0_0] : memref<256x64xf32, #tpu.memory_space<vmem>>, vector<256x64xf32>
    %1 = arith.truncf %0 : vector<256x64xf32> to vector<256x64xbf16>
    %c0_1 = arith.constant 0 : index
    %c0_2 = arith.constant 0 : index
    %2 = vector.load %arg2[%c0_1, %c0_2] : memref<64x1024xbf16, #tpu.memory_space<vmem>>, vector<64x1024xbf16>
    %cst = arith.constant dense<0.000000e+00> : vector<256x1024xf32>
    %3 = tpu.matmul %1, %2, %cst {dimension_numbers = #tpu.dot_dimension_numbers<[1], [0], [0], [1], [0, 0, 1, 1], [], []>} : vector<256x64xbf16>, vector<64x1024xbf16>, vector<256x1024xf32> -> vector<256x1024xf32>
    %c0_3 = arith.constant 0 : index
    %c0_4 = arith.constant 0 : index
    %4 = vector.load %arg3[%c0_3, %c0_4] : memref<1x1024xf32, #tpu.memory_space<vmem>>, vector<1x1024xf32>
    %5 = vector.broadcast %4 : vector<1x1024xf32> to vector<256x1024xf32>
    %6 = arith.addf %3, %5 : vector<256x1024xf32>
    %cst_5 = arith.constant 0.000000e+00 : f32
    %7 = vector.broadcast %cst_5 : f32 to vector<256x1024xf32>
    %8 = arith.cmpf ogt, %6, %7 : vector<256x1024xf32>
    %cst_6 = arith.constant 2.000000e-01 : f32
    %9 = vector.broadcast %cst_6 : f32 to vector<256x1024xf32>
    %10 = arith.mulf %9, %6 : vector<256x1024xf32>
    %11 = arith.select %8, %6, %10 : vector<256x1024xi1>, vector<256x1024xf32>
    %12 = arith.truncf %11 : vector<256x1024xf32> to vector<256x1024xbf16>
    %c0_7 = arith.constant 0 : index
    %c0_8 = arith.constant 0 : index
    %13 = vector.load %arg4[%c0_7, %c0_8] : memref<1024x512xbf16, #tpu.memory_space<vmem>>, vector<1024x512xbf16>
    %cst_9 = arith.constant dense<0.000000e+00> : vector<256x512xf32>
    %14 = tpu.matmul %12, %13, %cst_9 {dimension_numbers = #tpu.dot_dimension_numbers<[1], [0], [0], [1], [0, 0, 1, 1], [], []>} : vector<256x1024xbf16>, vector<1024x512xbf16>, vector<256x512xf32> -> vector<256x512xf32>
    %c0_10 = arith.constant 0 : index
    %c0_11 = arith.constant 0 : index
    %15 = vector.load %arg5[%c0_10, %c0_11] : memref<1x512xf32, #tpu.memory_space<vmem>>, vector<1x512xf32>
    %16 = vector.broadcast %15 : vector<1x512xf32> to vector<256x512xf32>
    %17 = arith.addf %14, %16 : vector<256x512xf32>
    %cst_12 = arith.constant 0.000000e+00 : f32
    %18 = vector.broadcast %cst_12 : f32 to vector<256x512xf32>
    %19 = arith.cmpf ogt, %17, %18 : vector<256x512xf32>
    %cst_13 = arith.constant 2.000000e-01 : f32
    %20 = vector.broadcast %cst_13 : f32 to vector<256x512xf32>
    %21 = arith.mulf %20, %17 : vector<256x512xf32>
    %22 = arith.select %19, %17, %21 : vector<256x512xi1>, vector<256x512xf32>
    %23 = arith.truncf %22 : vector<256x512xf32> to vector<256x512xbf16>
    %c0_14 = arith.constant 0 : index
    %c0_15 = arith.constant 0 : index
    %24 = vector.load %arg6[%c0_14, %c0_15] : memref<512x256xbf16, #tpu.memory_space<vmem>>, vector<512x256xbf16>
    %cst_16 = arith.constant dense<0.000000e+00> : vector<256x256xf32>
    %25 = tpu.matmul %23, %24, %cst_16 {dimension_numbers = #tpu.dot_dimension_numbers<[1], [0], [0], [1], [0, 0, 1, 1], [], []>} : vector<256x512xbf16>, vector<512x256xbf16>, vector<256x256xf32> -> vector<256x256xf32>
    %c0_17 = arith.constant 0 : index
    %c0_18 = arith.constant 0 : index
    %26 = vector.load %arg7[%c0_17, %c0_18] : memref<1x256xf32, #tpu.memory_space<vmem>>, vector<1x256xf32>
    %27 = vector.broadcast %26 : vector<1x256xf32> to vector<256x256xf32>
    %28 = arith.addf %25, %27 : vector<256x256xf32>
    %cst_19 = arith.constant 0.000000e+00 : f32
    %29 = vector.broadcast %cst_19 : f32 to vector<256x256xf32>
    %30 = arith.cmpf ogt, %28, %29 : vector<256x256xf32>
    %cst_20 = arith.constant 2.000000e-01 : f32
    %31 = vector.broadcast %cst_20 : f32 to vector<256x256xf32>
    %32 = arith.mulf %31, %28 : vector<256x256xf32>
    %33 = arith.select %30, %28, %32 : vector<256x256xi1>, vector<256x256xf32>
    %c0_21 = arith.constant 0 : index
    %c0_22 = arith.constant 0 : index
    %34 = vector.load %arg11[%c0_21, %c0_22] : memref<256x256xf32, #tpu.memory_space<vmem>>, vector<256x256xf32>
    tpu.vector_store %arg11[%c0_21, %c0_22], %33 {strides = array<i32>} : memref<256x256xf32, #tpu.memory_space<vmem>>, vector<256x256xf32>,
    %c0_23 = arith.constant 0 : index
    %c0_24 = arith.constant 0 : index
    %35 = vector.load %arg8[%c0_23, %c0_24] : memref<1x256xf32, #tpu.memory_space<vmem>>, vector<1x256xf32>
    %36 = vector.broadcast %35 : vector<1x256xf32> to vector<256x256xf32>
    %37 = arith.mulf %33, %36 : vector<256x256xf32>
    %cst_25 = arith.constant dense<0.000000e+00> : vector<256xf32>
    %38 = vector.multi_reduction <add>, %37, %cst_25 [1] : vector<256x256xf32> to vector<256xf32>
    %39 = vector.shape_cast %38 : vector<256xf32> to vector<256x1xf32>
    %c0_26 = arith.constant 0 : index
    %c0_27 = arith.constant 0 : index
    %40 = vector.load %arg9[%c0_26, %c0_27] : memref<1x1xf32, #tpu.memory_space<vmem>>, vector<1x1xf32>
    %41 = vector.broadcast %40 : vector<1x1xf32> to vector<256x1xf32>
    %42 = arith.addf %39, %41 : vector<256x1xf32>
    %43 = arith.negf %42 : vector<256x1xf32>
    %44 = math.exp %43 : vector<256x1xf32>
    %cst_28 = arith.constant 1.000000e+00 : f32
    %45 = vector.broadcast %cst_28 : f32 to vector<256x1xf32>
    %46 = arith.addf %45, %44 : vector<256x1xf32>
    %47 = arith.divf %45, %46 : vector<256x1xf32>
    %c0_29 = arith.constant 0 : index
    %c0_30 = arith.constant 0 : index
    %48 = vector.load %arg10[%c0_29, %c0_30] : memref<256x1xf32, #tpu.memory_space<vmem>>, vector<256x1xf32>
    tpu.vector_store %arg10[%c0_29, %c0_30], %47 {strides = array<i32>} : memref<256x1xf32, #tpu.memory_space<vmem>>, vector<256x1xf32>,
    return
  }
  func.func @transform_0(%arg0: i32) -> (i32, i32) {
    %c0_i32 = arith.constant 0 : i32
    %c0_i32_0 = arith.constant 0 : i32
    return %arg0, %c0_i32 : i32, i32
  }
  func.func @transform_1(%arg0: i32) -> (i32, i32) {
    %c0_i32 = arith.constant 0 : i32
    %c0_i32_0 = arith.constant 0 : i32
    %c0_i32_1 = arith.constant 0 : i32
    return %c0_i32, %c0_i32_0 : i32, i32
  }
  func.func @transform_2(%arg0: i32) -> (i32, i32) {
    %c0_i32 = arith.constant 0 : i32
    %c0_i32_0 = arith.constant 0 : i32
    %c0_i32_1 = arith.constant 0 : i32
    return %c0_i32, %c0_i32_0 : i32, i32
  }
  func.func @transform_3(%arg0: i32) -> (i32, i32) {
    %c0_i32 = arith.constant 0 : i32
    %c0_i32_0 = arith.constant 0 : i32
    %c0_i32_1 = arith.constant 0 : i32
    return %c0_i32, %c0_i32_0 : i32, i32
  }
  func.func @transform_4(%arg0: i32) -> (i32, i32) {
    %c0_i32 = arith.constant 0 : i32
    %c0_i32_0 = arith.constant 0 : i32
    %c0_i32_1 = arith.constant 0 : i32
    return %c0_i32, %c0_i32_0 : i32, i32
  }
  func.func @transform_5(%arg0: i32) -> (i32, i32) {
    %c0_i32 = arith.constant 0 : i32
    %c0_i32_0 = arith.constant 0 : i32
    %c0_i32_1 = arith.constant 0 : i32
    return %c0_i32, %c0_i32_0 : i32, i32
  }
  func.func @transform_6(%arg0: i32) -> (i32, i32) {
    %c0_i32 = arith.constant 0 : i32
    %c0_i32_0 = arith.constant 0 : i32
    %c0_i32_1 = arith.constant 0 : i32
    return %c0_i32, %c0_i32_0 : i32, i32
  }
  func.func @transform_7(%arg0: i32) -> (i32, i32) {
    %c0_i32 = arith.constant 0 : i32
    %c0_i32_0 = arith.constant 0 : i32
    %c0_i32_1 = arith.constant 0 : i32
    return %c0_i32, %c0_i32_0 : i32, i32
  }
  func.func @transform_8(%arg0: i32) -> (i32, i32) {
    %c0_i32 = arith.constant 0 : i32
    %c0_i32_0 = arith.constant 0 : i32
    %c0_i32_1 = arith.constant 0 : i32
    return %c0_i32, %c0_i32_0 : i32, i32
  }
  func.func @transform_9(%arg0: i32) -> (i32, i32) {
    %c0_i32 = arith.constant 0 : i32
    %c0_i32_0 = arith.constant 0 : i32
    return %arg0, %c0_i32 : i32, i32
  }
  func.func @transform_10(%arg0: i32) -> (i32, i32) {
    %c0_i32 = arith.constant 0 : i32
    %c0_i32_0 = arith.constant 0 : i32
    return %arg0, %c0_i32 : i32, i32
  }
}

</mosaic_0001>

<bundles_post_ra>
// kernel: tpu_custom_call.1
= control target key start
LH: loop header
LB: loop body
LE: loop exit
PB: predicated region body
PF: predicated region fallthrough
CT: control target
= control target key end

     0   :  { %s14051_s0 = inlined_call_operand.vmem [shape: f32[512,64], index: 0, kind: input, shape index: {}]   ;;  %s14052_s1 = inlined_call_operand.vmem [shape: bf16[64,1024], index: 1, kind: input, shape index: {}]   ;;  %s14053_s2 = inlined_call_operand.vmem [shape: f32[1,1024], index: 2, kind: input, shape index: {}]   ;;  %s14054_s3 = inlined_call_operand.hbm [shape: bf16[1024,512], index: 3, kind: input, shape index: {}]   ;;  %s14055_s4 = inlined_call_operand.hbm [shape: f32[1,512], index: 4, kind: input, shape index: {}]   ;;  %s14056_s5 = inlined_call_operand.vmem [shape: bf16[512,256], index: 5, kind: input, shape index: {}]   ;;  %s14057_s6 = inlined_call_operand.vmem [shape: f32[1,256], index: 6, kind: input, shape index: {}]   ;;  %s14058_s7 = inlined_call_operand.hbm [shape: f32[1,256], index: 7, kind: input, shape index: {}]   ;;  %s14059_s8 = inlined_call_operand.<no memory space> [shape: f32[1,1], index: 8, kind: input, shape index: {}]   ;;  %s14060_s9 = inlined_call_operand.vmem [shape: f32[512,1], index: 9, kind: output, shape index: {0}]   ;;  %s14061_s10 = inlined_call_operand.hbm [shape: f32[512,256], index: 10, kind: output, shape index: {1}]  }
   0x1   :  { %v16_v0 = vstv %s14059_s8 }
   0x2   :  { %17 = vst [vmem:[#allocation2] sm:$0x1] %v16_v0 }
   0x3   :  { %18 = vsyncpa [#allocation4], 0 }
   0x4   :  { %19 = vsyncpa [#allocation7], 0 }
   0x5   :  { %20 = vsyncpa [#allocation5], 0 }
   0x6   :  { %22 = vsyncpa [#allocation5 + $0x1], 0  ;;  %s8955_s15 = smov 0   ;;  %s8957_s16 = smov 0  }
   0x7   :  { %s8959_s17 = smov 0   ;;  %s8961_s18 = smov 0  }
   0x8 LB: > { %s8976_s8 = sadd.s32 4294967295, %s8886_s18   ;;  %s7583_s19 = sadd.s32 4294967294, %s8886_s18   ;;  %s8886_s18 = sphi %s8961_s18, %s15022_s18   ;;  %s8882_s17 = sphi %s8959_s17, %s15021_s17   ;;  %s8878_s16 = sphi %s8957_s16, %s15020_s16   ;;  %s8874_s15 = sphi %s8955_s15, %s15019_s15  }
   0x9   : > { %s8980_s20 = sadd.s32 1, %s8886_s18   ;;  %s255_s21 = sadd.s32 1, %s8882_s17 }
   0xa   : > { %s252_s22 = ssub.s32 %s8886_s18, %s8980_s20  ;;  %p265_p0 = scmp.ne.s32.totalorder %s8882_s17, %s8878_s16 }
   0xb   : > { %p253_p1 = scmp.eq.s32.totalorder %s252_s22, 0  ;;  %p266_p2 = scmp.eq.s32.totalorder %s8976_s8, 1 }
   0xc   : > { %p271_p3 = scmp.ne.s32.totalorder %s8878_s16, %s8874_s15  ;;  %p272_p4 = scmp.eq.s32.totalorder %s7583_s19, 1 }
   0xd   : > { %s8991_s23 = scalar_select %p253_p1, %s8882_s17, %s255_s21  }
   0xe   : > { %p8993_p5 = por %p266_p2, %p265_p0  ;;  %p8997_p6 = por %p272_p4, %p271_p3 }
   0xf   : > { %p7584_p7 = scmp.ge.s32.totalorder %s8886_s18, 1  ;;  %p279_p8 = scmp.lt.s32.totalorder %s8886_s18, 3 }
  0x10   : > { %s14230_s24 = scalar_select %p8993_p5, 1, 0 }
  0x11   : > { %s14231_s25 = scalar_select %p8997_p6, 1, 0 }
  0x12   : > { %p14062_p9 = scmp.eq.s32.totalorder %s8976_s8, 0  ;;  %p9004_p10 = pnand %p7584_p7, %p279_p8 }
  0x13   : > { %s8888_s27 = smov [#allocation6]   ;;  %s8889_s29 = smov [#allocation3]  }
  0x14   : > { %s14232_s26 = scalar_select %p9004_p10, 1, 0 }
  0x15   : > { %s311_s28 = sshll.u32 %s8888_s27, 4  ;;  %p8069_p11 = pneg %p9004_p10  ;;  %s312_s28 = int_to_ptr.vmem [resolvable:$true] %s311_s28 }
  0x16   : > { %s297_s30 = sshll.u32 %s8889_s29, 4  ;;  %s8890_s12 = smov [#allocation8]   ;;  %s298_s30 = int_to_ptr.vmem [resolvable:$true] %s297_s30 }
  0x17   : > { %p9012_p12 = pnand %p14062_p9, %p8069_p11  ;;  %s328_s13 = sshll.u32 %s8890_s12, 4  ;;  %s329_s13 = int_to_ptr.vmem [resolvable:$true] %s328_s13 }
  0x18   : > { %s8751_s14 = scalar_lea.vmem %s312_s28, 64  ;;  %p8759_p3 = scmp.lt.s32.totalorder %s312_s28, %s312_s28 }
  0x19   : > { %p8742_p13 = pneg %p9012_p12  ;;  %p8752_p0 = scmp.ne.s32.totalorder %s312_s28, %s8751_s14 }
  0x1a   : > { %p8760_p4 = scmp.lt.s32.totalorder %s8751_s14, %s8751_s14 }
  0x1b   : > { %p8754_p1 = pnand %p8752_p0, %p8742_p13 }
  0x1c   : > { %p8761_p7 = por %p8760_p4, %p8759_p3 }
  0x1d   : > { %p8755_p2 = pneg %p8754_p1 }
  0x1f   : > { %p8762_p8 = pnand %p8761_p7, %p8755_p2 }
  0x21   : > { %8765 = shalt.err (!%p8762_p8)
}
  0x22   : > { %8075 = dma.hbm_to_vmem [thread:$0]  (!%p9012_p12), %s14055_s4, 64, %s312_s28, [#allocation7]  }
  0x23   : > { %s8777_s22 = scalar_lea.vmem %s298_s30, 32768  ;;  %p8785_p0 = scmp.lt.s32.totalorder %s298_s30, %s298_s30 }
  0x24   : > { %p8778_p11 = scmp.ne.s32.totalorder %s298_s30, %s8777_s22  ;;  %p8786_p1 = scmp.lt.s32.totalorder %s8777_s22, %s8777_s22 }
  0x26   : > { %p8780_p9 = pnand %p8778_p11, %p8742_p13  ;;  %p8787_p5 = por %p8786_p1, %p8785_p0 }
  0x28   : > { %p8781_p6 = pneg %p8780_p9 }
  0x2a   : > { %p8788_p10 = pnand %p8787_p5, %p8781_p6 }
  0x2c   : > { %8791 = shalt.err (!%p8788_p10)
}
  0x2d   : > { %s8891_s27 = smov 256   ;;  %s8892_s29 = smov 16  }
  0x2e   : > { %8072 = dma.hbm_to_vmem [thread:$0]  (!%p9012_p12), %s14054_s3, 32768, %s298_s30, [#allocation4], %s8891_s27, %s8891_s27, %s8892_s29  }
  0x2f   : > { %s8803_s28 = scalar_lea.vmem %s329_s13, 32  ;;  %p8811_p4 = scmp.lt.s32.totalorder %s329_s13, %s329_s13 }
  0x30   : > { %p8804_p2 = scmp.ne.s32.totalorder %s329_s13, %s8803_s28  ;;  %p8812_p7 = scmp.lt.s32.totalorder %s8803_s28, %s8803_s28 }
  0x32   : > { %p8806_p9 = pnand %p8804_p2, %p8742_p13  ;;  %p8813_p5 = por %p8812_p7, %p8811_p4 }
  0x34   : > { %p8807_p3 = pneg %p8806_p9 }
  0x36   : > { %p8814_p6 = pnand %p8813_p5, %p8807_p3 }
  0x38   : > { %8817 = shalt.err (!%p8814_p6)
}
  0x39   : > { %8078 = dma.hbm_to_vmem [thread:$0]  (!%p9012_p12), %s14058_s7, 32, %s329_s13, [#allocation7]  }
  0x3a   : > { %p14234_p10 = scmp.ne.s32.totalorder %s14232_s26, 0 }
  0x3c   : > { %353 = sbr.rel (%p14234_p10) target bundleno = 1500 (0x5dc), region = 56 }
  0x41   : > { %p14235_p8 = scmp.eq.s32.totalorder %s8976_s8, 0 }
  0x43   : > { %8861 = dma.done.wait (%p14235_p8), [#allocation4], 32768   ;;  %p14236_p13 = pmov %p14235_p8 }
  0x44   : > { %p14237_p11 = pmov %p14235_p8 }
  0x45   : > { %8863 = vsyncadd (%p14236_p13), [#allocation4], 4294934528 }
  0x46   : > { %8865 = dma.done.wait (%p14237_p11), [#allocation7], 96   ;;  %p14238_p0 = pmov %p14235_p8 }
  0x47   : > { %v14067_v1 = vmov 0   ;;  %s7594_s26 = sshll.u32 %s8976_s8, 5  ;;  %v490_v2 = vld [vmem:[%s14052_s1 + $0xc0] sm:$0xff]  ;;  %v491_v4 = vld [vmem:[%s14052_s1 + $0xc8] sm:$0xff]  ;;  %v492_v32 = vld [vmem:[%s14052_s1 + $0xd0] sm:$0xff]  ;;  %vm700_vm0 = vcmask 523264  }
  0x48   : > { %8867 = vsyncadd (%p14238_p0), [#allocation7], 4294967200  ;;  %781 = vmatprep.mubr.bf16.mxu0 %v14067_v1  ;;  %974 = vmatprep.mubr.bf16.mxu1 %v14067_v1  ;;  %p9055_p12 = scmp.lt.s32.totalorder %s7594_s26, 63  ;;  %v494_v3 = vld [vmem:[%s14052_s1 + $0xe0] sm:$0xff]  ;;  %v495_v6 = vld [vmem:[%s14052_s1 + $0xe8] sm:$0xff]  ;;  %s401_s27 = sand.u32 1, %s8878_s16  }
  0x49   : > { %v7623_v5 = vcombine.high %v490_v2, %v494_v3  ;;  %v7622_v7 = vcombine.low %v490_v2, %v494_v3  ;;  %v482_v8 = vld [vmem:[%s14052_s1 + $0x80] sm:$0xff]  ;;  %v7625_v10 = vcombine.high %v491_v4, %v495_v6  ;;  %v7624_v11 = vcombine.low %v491_v4, %v495_v6  ;;  %v483_v13 = vld [vmem:[%s14052_s1 + $0x88] sm:$0xff]  ;;  %v496_v33 = vld [vmem:[%s14052_s1 + $0xf0] sm:$0xff]  ;;  %s7593_s29 = sshll.u32 %s401_s27, 9  ;;  %p15017_p2 = scmp.ne.s32.totalorder %s14230_s24, 0 }
  0x4a   : > { %v486_v9 = vld [vmem:[%s14052_s1 + $0xa0] sm:$0xff]  ;;  %v487_v14 = vld [vmem:[%s14052_s1 + $0xa8] sm:$0xff]  ;;  %s15024_s26 = smov (!%p9055_p12, %s7594_s26), 63  ;;  %v493_v34 = vld [vmem:[%s14052_s1 + $0xd8] sm:$0xff]  ;;  %v7627_v40 = vcombine.high %v492_v32, %v496_v33  ;;  %v7626_v45 = vcombine.low %v492_v32, %v496_v33  ;;  %s13604_s12 = scalar_lea.vmem [#allocation9], %s7593_s29 }
  0x4b   : > { %v7615_v12 = vcombine.high %v482_v8, %v486_v9  ;;  %v474_v15 = vld [vmem:[%s14052_s1 + $0x40] sm:$0xff]  ;;  %757 = vmatprep.subr.bf16.mxu0 %v7623_v5  ;;  %v7617_v16 = vcombine.high %v483_v13, %v487_v14  ;;  %v475_v18 = vld [vmem:[%s14052_s1 + $0x48] sm:$0xff]  ;;  %950 = vmatprep.subr.bf16.mxu1 %v7625_v10  ;;  %v7614_v20 = vcombine.low %v482_v8, %v486_v9  ;;  %s7595_s28 = sshll.u32 %s15024_s26, 3  ;;  %v497_v35 = vld [vmem:[%s14052_s1 + $0xf8] sm:$0xff]  ;;  %s7465_s22 = sshll.u32 %s13604_s12, 4  ;;  %s13920_s22 = int_to_ptr.vmem [resolvable:$true] %s7465_s22 }
  0x4c   : > { %v478_v17 = vld [vmem:[%s14052_s1 + $0x60] sm:$0xff]  ;;  %v479_v19 = vld [vmem:[%s14052_s1 + $0x68] sm:$0xff]  ;;  %758 = vmatpush1.bf16.msra.mxu0 %v7622_v7  ;;  %951 = vmatpush1.bf16.msra.mxu1 %v7624_v11  ;;  %v7616_v21 = vcombine.low %v483_v13, %v487_v14  ;;  %s9117_s30 = scalar_lea.vmem %s14051_s0, %s7595_s28  ;;  %v7629_v41 = vcombine.high %v493_v34, %v497_v35  ;;  %v484_v43 = vld [vmem:[%s14052_s1 + $0x90] sm:$0xff]  ;;  %v7628_v48 = vcombine.low %v493_v34, %v497_v35  ;;  %s13910_s21 = scalar_lea.vmem %s14060_s9, %s7595_s28 }
  0x4d   : > { %759 = vmatprep.subr.bf16.mxu0 %v7615_v12  ;;  %v7607_v22 = vcombine.high %v474_v15, %v478_v17  ;;  %952 = vmatprep.subr.bf16.mxu1 %v7617_v16  ;;  %v7609_v23 = vcombine.high %v475_v18, %v479_v19  ;;  %v466_v24 = vld [vmem:[%s14052_s1] sm:$0xff]  ;;  %v467_v26 = vld [vmem:[%s14052_s1 + $0x8] sm:$0xff]  ;;  %v7606_v28 = vcombine.low %v474_v15, %v478_v17  ;;  %v488_v44 = vld [vmem:[%s14052_s1 + $0xb0] sm:$0xff]  ;;  %s8818_s28 = scalar_lea.vmem %s13920_s22, 8192  ;;  %s8894_s29 = smov [#allocation9]  }
  0x4e   : > { %v470_v25 = vld [vmem:[%s14052_s1 + $0x20] sm:$0xff]  ;;  %v471_v27 = vld [vmem:[%s14052_s1 + $0x28] sm:$0xff]  ;;  %v7608_v29 = vcombine.low %v475_v18, %v479_v19  ;;  %v485_v46 = vld [vmem:[%s14052_s1 + $0x98] sm:$0xff]  ;;  %v7619_v49 = vcombine.high %v484_v43, %v488_v44  ;;  %v7618_v57 = vcombine.low %v484_v43, %v488_v44  ;;  %p8819_p1 = scmp.ne.s32.totalorder %s13920_s22, %s8818_s28 }
  0x4f   : > { %v7599_v30 = vcombine.high %v466_v24, %v470_v25  ;;  %v7601_v31 = vcombine.high %v467_v26, %v471_v27  ;;  %v7598_v36 = vcombine.low %v466_v24, %v470_v25  ;;  %v418_v37 = vld [vmem:[%s9117_s30] sm:$0xff]  ;;  %v419_v38 = vld [vmem:[%s9117_s30 + $0x8] sm:$0xff]  ;;  %v7600_v39 = vcombine.low %v467_v26, %v471_v27  ;;  %v489_v47 = vld [vmem:[%s14052_s1 + $0xb8] sm:$0xff] }
  0x50   : > { %760 = vmatpush1.bf16.msra.mxu0 %v7614_v20  ;;  %953 = vmatpush1.bf16.msra.mxu1 %v7616_v21  ;;  %v9133_v42 = vpack.c.bf16 %v419_v38, %v418_v37  ;;  %v476_v50 = vld [vmem:[%s14052_s1 + $0x50] sm:$0xff]  ;;  %v7621_v52 = vcombine.high %v485_v46, %v489_v47  ;;  %v477_v53 = vld [vmem:[%s14052_s1 + $0x58] sm:$0xff]  ;;  %v7620_v58 = vcombine.low %v485_v46, %v489_v47  ;;  %v422_v7 = vld [vmem:[%s9117_s30 + $0x20] sm:$0xff]  ;;  %p8820_p9 = pnand %p8819_p1, %p15017_p2 }
  0x51   : > { %761 = vmatprep.subr.bf16.mxu0 %v7607_v22  ;;  %954 = vmatprep.subr.bf16.mxu1 %v7609_v23  ;;  %v480_v51 = vld [vmem:[%s14052_s1 + $0x70] sm:$0xff]  ;;  %v481_v54 = vld [vmem:[%s14052_s1 + $0x78] sm:$0xff]  ;;  %v423_v8 = vld [vmem:[%s9117_s30 + $0x28] sm:$0xff] }
  0x52   : > { %v420_v55 = vld [vmem:[%s9117_s30 + $0x10] sm:$0xff]  ;;  %v421_v56 = vld [vmem:[%s9117_s30 + $0x18] sm:$0xff]  ;;  %v7611_v59 = vcombine.high %v476_v50, %v480_v51  ;;  %v7613_v60 = vcombine.high %v477_v53, %v481_v54  ;;  %v7610_v3 = vcombine.low %v476_v50, %v480_v51  ;;  %v7612_v4 = vcombine.low %v477_v53, %v481_v54  ;;  %v426_v17 = vld [vmem:[%s9117_s30 + $0x40] sm:$0xff]  ;;  %p8821_p3 = pneg %p8820_p9 }
  0x53   : > { %v468_v61 = vld [vmem:[%s14052_s1 + $0x10] sm:$0xff]  ;;  %v9173_v63 = vpack.c.bf16 %v421_v56, %v420_v55  ;;  %v469_v0 = vld [vmem:[%s14052_s1 + $0x18] sm:$0xff]  ;;  %v9189_v13 = vpack.c.bf16 %v423_v8, %v422_v7  ;;  %v427_v18 = vld [vmem:[%s9117_s30 + $0x48] sm:$0xff] }
  0x54   : > { %762 = vmatpush1.bf16.msra.mxu0 %v7606_v28  ;;  %955 = vmatpush1.bf16.msra.mxu1 %v7608_v29  ;;  %v472_v62 = vld [vmem:[%s14052_s1 + $0x30] sm:$0xff]  ;;  %v473_v2 = vld [vmem:[%s14052_s1 + $0x38] sm:$0xff]  ;;  %v9209_v19 = vpack.c.bf16 %v427_v18, %v426_v17  ;;  %v430_v23 = vld [vmem:[%s9117_s30 + $0x60] sm:$0xff] }
  0x55   : > { %763 = vmatprep.subr.bf16.mxu0 %v7599_v30  ;;  %956 = vmatprep.subr.bf16.mxu1 %v7601_v31  ;;  %v7603_v5 = vcombine.high %v468_v61, %v472_v62  ;;  %v7605_v6 = vcombine.high %v469_v0, %v473_v2  ;;  %v8132_v9 = vld [vmem:[#allocation3 + $0xe4] ss:$16 sps:$4 sm:$0xff]   ;;  %v7602_v10 = vcombine.low %v468_v61, %v472_v62  ;;  %v8130_v54 = vld [vmem:[#allocation3 + $0xe0] ss:$16 sps:$4 sm:$0xff]  }
  0x56   : > { %v8135_v11 = vld [vmem:[#allocation3 + $0x2e4] ss:$16 sps:$4 sm:$0xff]   ;;  %v7604_v12 = vcombine.low %v469_v0, %v473_v2  ;;  %v8133_v55 = vld [vmem:[#allocation3 + $0x2e0] ss:$16 sps:$4 sm:$0xff]  }
  0x57   : > { %v424_v14 = vld [vmem:[%s9117_s30 + $0x30] sm:$0xff]  ;;  %v425_v15 = vld [vmem:[%s9117_s30 + $0x38] sm:$0xff]  ;;  %v431_v24 = vld [vmem:[%s9117_s30 + $0x68] sm:$0xff] }
  0x58   : > { %764 = vmatpush1.bf16.msra.mxu0 %v7598_v36  ;;  %957 = vmatpush1.bf16.msra.mxu1 %v7600_v39  ;;  %v9199_v16 = vpack.c.bf16 %v425_v15, %v424_v14  ;;  %v428_v20 = vld [vmem:[%s9117_s30 + $0x50] sm:$0xff]  ;;  %v429_v21 = vld [vmem:[%s9117_s30 + $0x58] sm:$0xff]  ;;  %v9229_v25 = vpack.c.bf16 %v431_v24, %v430_v23  ;;  %v434_v29 = vld [vmem:[%s9117_s30 + $0x80] sm:$0xff] }
  0x59   : > { %1143 = vmatprep.subr.bf16.mxu0 %v7627_v40  ;;  %1336 = vmatprep.subr.bf16.mxu1 %v7629_v41  ;;  %v9219_v22 = vpack.c.bf16 %v429_v21, %v428_v20  ;;  %v432_v26 = vld [vmem:[%s9117_s30 + $0x70] sm:$0xff]  ;;  %v433_v27 = vld [vmem:[%s9117_s30 + $0x78] sm:$0xff]  ;;  %v435_v30 = vld [vmem:[%s9117_s30 + $0x88] sm:$0xff] }
  0x5a   : > { %v9239_v28 = vpack.c.bf16 %v433_v27, %v432_v26  ;;  %v9249_v31 = vpack.c.bf16 %v435_v30, %v434_v29  ;;  %v436_v32 = vld [vmem:[%s9117_s30 + $0x90] sm:$0xff]  ;;  %v437_v33 = vld [vmem:[%s9117_s30 + $0x98] sm:$0xff]  ;;  %v438_v35 = vld [vmem:[%s9117_s30 + $0xa0] sm:$0xff] }
  0x5b   : > { %7630 = vmatmul.mubr.msk.bf16.vlgmr.msra.gmra.mxu0 %vm700_vm0, %v9133_v42  ;;  %7646 = vmatmul.mubr.msk.bf16.vlgmr.msra.gmra.mxu1 %vm700_vm0, %v9133_v42  ;;  %v9259_v34 = vpack.c.bf16 %v437_v33, %v436_v32  ;;  %v439_v36 = vld [vmem:[%s9117_s30 + $0xa8] sm:$0xff]  ;;  %v440_v38 = vld [vmem:[%s9117_s30 + $0xb0] sm:$0xff]  ;;  %v441_v39 = vld [vmem:[%s9117_s30 + $0xb8] sm:$0xff] }
  0x5c   : > { %1144 = vmatpush1.bf16.msra.mxu0 %v7626_v45  ;;  %1337 = vmatpush1.bf16.msra.mxu1 %v7628_v48  ;;  %v9269_v37 = vpack.c.bf16 %v439_v36, %v438_v35  ;;  %v9279_v40 = vpack.c.bf16 %v441_v39, %v440_v38  ;;  %v442_v41 = vld [vmem:[%s9117_s30 + $0xc0] sm:$0xff]  ;;  %v443_v43 = vld [vmem:[%s9117_s30 + $0xc8] sm:$0xff]  ;;  %v444_v45 = vld [vmem:[%s9117_s30 + $0xd0] sm:$0xff] }
  0x5d   : > { %791 = vmatprep.mubr.bf16.mxu0 %v14067_v1  ;;  %984 = vmatprep.mubr.bf16.mxu1 %v14067_v1  ;;  %v9289_v44 = vpack.c.bf16 %v443_v43, %v442_v41  ;;  %v445_v46 = vld [vmem:[%s9117_s30 + $0xd8] sm:$0xff]  ;;  %v446_v48 = vld [vmem:[%s9117_s30 + $0xe0] sm:$0xff]  ;;  %v448_v51 = vld [vmem:[%s9117_s30 + $0xf0] sm:$0xff] }
  0x5e   : > { %1145 = vmatprep.subr.bf16.mxu0 %v7619_v49  ;;  %1338 = vmatprep.subr.bf16.mxu1 %v7621_v52  ;;  %v9299_v47 = vpack.c.bf16 %v445_v46, %v444_v45  ;;  %v447_v49 = vld [vmem:[%s9117_s30 + $0xe8] sm:$0xff]  ;;  %v449_v52 = vld [vmem:[%s9117_s30 + $0xf8] sm:$0xff]  ;;  %v8142_v62 = vld [vmem:[#allocation3 + $0xa0] ss:$16 sps:$4 sm:$0xff]   ;;  %s8054_s30 = sshll.u32 %s8976_s8, 13  ;;  %s13926_s8 = scalar_lea.sflag [#allocation5], %s401_s27 }
  0x5f   : > { %v9309_v50 = vpack.c.bf16 %v447_v49, %v446_v48  ;;  %v9319_v53 = vpack.c.bf16 %v449_v52, %v448_v51  ;;  %v8138_v56 = vld [vmem:[#allocation3 + $0xc4] ss:$16 sps:$4 sm:$0xff]   ;;  %v8145_v0 = vld [vmem:[#allocation3 + $0x2a0] ss:$16 sps:$4 sm:$0xff]   ;;  %s13917_s26 = scalar_lea.hbm %s14061_s10, %s8054_s30 }
  0x60   : > { %1146 = vmatpush1.bf16.msra.mxu0 %v7618_v57  ;;  %1339 = vmatpush1.bf16.msra.mxu1 %v7620_v58  ;;  %v8136_v57 = vld [vmem:[#allocation3 + $0xc0] ss:$16 sps:$4 sm:$0xff]   ;;  %v8141_v58 = vld [vmem:[#allocation3 + $0x2c4] ss:$16 sps:$4 sm:$0xff]  }
  0x61   : > { %1147 = vmatprep.subr.bf16.mxu0 %v7611_v59  ;;  %1340 = vmatprep.subr.bf16.mxu1 %v7613_v60  ;;  %v8139_v59 = vld [vmem:[#allocation3 + $0x2c0] ss:$16 sps:$4 sm:$0xff]   ;;  %v8144_v60 = vld [vmem:[#allocation3 + $0xa4] ss:$16 sps:$4 sm:$0xff]  }
  0x62   : > { %v8147_v61 = vld [vmem:[#allocation3 + $0x2a4] ss:$16 sps:$4 sm:$0xff]   ;;  %v8154_v7 = vld [vmem:[#allocation3 + $0x60] ss:$16 sps:$4 sm:$0xff]  }
  0x63   : > { %7631 = vmatmul.mubr.msk.bf16.gmra.mxu0 %vm700_vm0, %v9173_v63  ;;  %7647 = vmatmul.mubr.msk.bf16.gmra.mxu1 %vm700_vm0, %v9173_v63  ;;  %v8150_v2 = vld [vmem:[#allocation3 + $0x84] ss:$16 sps:$4 sm:$0xff]   ;;  %v8157_v8 = vld [vmem:[#allocation3 + $0x260] ss:$16 sps:$4 sm:$0xff]  }
  0x64   : > { %801 = vmatprep.mubr.bf16.mxu0 %v14067_v1  ;;  %994 = vmatprep.mubr.bf16.mxu1 %v14067_v1  ;;  %v8171_v14 = vld [vmem:[#allocation3 + $0x224] ss:$16 sps:$4 sm:$0xff]   ;;  %v8166_v15 = vld [vmem:[#allocation3 + $0x20] ss:$16 sps:$4 sm:$0xff]  }
  0x65   : > { %1148 = vmatpush1.bf16.msra.mxu0 %v7610_v3  ;;  %1341 = vmatpush1.bf16.msra.mxu1 %v7612_v4  ;;  %v8148_v3 = vld [vmem:[#allocation3 + $0x80] ss:$16 sps:$4 sm:$0xff]   ;;  %v8174_v18 = vld [vmem:[#allocation3 + $0x4] ss:$16 sps:$4 sm:$0xff]  }
  0x66   : > { %1149 = vmatprep.subr.bf16.mxu0 %v7603_v5  ;;  %1342 = vmatprep.subr.bf16.mxu1 %v7605_v6  ;;  %v8151_v4 = vld [vmem:[#allocation3 + $0x280] ss:$16 sps:$4 sm:$0xff]   ;;  %v8156_v5 = vld [vmem:[#allocation3 + $0x64] ss:$16 sps:$4 sm:$0xff]  }
  0x67   : > { %v8159_v6 = vld [vmem:[#allocation3 + $0x264] ss:$16 sps:$4 sm:$0xff]   ;;  %v8169_v17 = vld [vmem:[#allocation3 + $0x220] ss:$16 sps:$4 sm:$0xff]  }
  0x68   : > { %v8172_v20 = vld [vmem:[#allocation3] ss:$16 sps:$4 sm:$0xff]   ;;  %v8180_v23 = vld [vmem:[#allocation3 + $0x1e4] ss:$16 sps:$4 sm:$0xff]  }
  0x69   : > { %1150 = vmatpush1.bf16.msra.mxu0 %v7602_v10  ;;  %1343 = vmatpush1.bf16.msra.mxu1 %v7604_v12  ;;  %v8160_v10 = vld [vmem:[#allocation3 + $0x40] ss:$16 sps:$4 sm:$0xff]   ;;  %v8168_v12 = vld [vmem:[#allocation3 + $0x24] ss:$16 sps:$4 sm:$0xff]  }
  0x6a   : > { %3975 = vmatprep.subr.bf16.mxu0 %v8132_v9  ;;  %4168 = vmatprep.subr.bf16.mxu1 %v8135_v11  ;;  %v8162_v9 = vld [vmem:[#allocation3 + $0x44] ss:$16 sps:$4 sm:$0xff]   ;;  %v8163_v11 = vld [vmem:[#allocation3 + $0x240] ss:$16 sps:$4 sm:$0xff]  }
  0x6b   : > { %7632 = vmatmul.mubr.msk.bf16.gmra.mxu0 %vm700_vm0, %v9189_v13  ;;  %7648 = vmatmul.mubr.msk.bf16.gmra.mxu1 %vm700_vm0, %v9189_v13  ;;  %v8175_v21 = vld [vmem:[#allocation3 + $0x200] ss:$16 sps:$4 sm:$0xff]   ;;  %v8183_v24 = vld [vmem:[#allocation3 + $0x3e4] ss:$16 sps:$4 sm:$0xff]  }
  0x6c   : > { %811 = vmatprep.mubr.bf16.mxu0 %v14067_v1  ;;  %1004 = vmatprep.mubr.bf16.mxu1 %v14067_v1  ;;  %v8178_v26 = vld [vmem:[#allocation3 + $0x1e0] ss:$16 sps:$4 sm:$0xff]   ;;  %v8186_v29 = vld [vmem:[#allocation3 + $0x1c4] ss:$16 sps:$4 sm:$0xff]  }
  0x6d   : > { %v8181_v27 = vld [vmem:[#allocation3 + $0x3e0] ss:$16 sps:$4 sm:$0xff]   ;;  %v8192_v33 = vld [vmem:[#allocation3 + $0x1a4] ss:$16 sps:$4 sm:$0xff]  }
  0x6e   : > { %v8184_v30 = vld [vmem:[#allocation3 + $0x1c0] ss:$16 sps:$4 sm:$0xff]   ;;  %v8195_v35 = vld [vmem:[#allocation3 + $0x3a4] ss:$16 sps:$4 sm:$0xff]  }
  0x6f   : > { %v8187_v32 = vld [vmem:[#allocation3 + $0x3c0] ss:$16 sps:$4 sm:$0xff]   ;;  %v8198_v39 = vld [vmem:[#allocation3 + $0x184] ss:$16 sps:$4 sm:$0xff]  }
  0x70   : > { %v8190_v36 = vld [vmem:[#allocation3 + $0x1a0] ss:$16 sps:$4 sm:$0xff]   ;;  %v8204_v45 = vld [vmem:[#allocation3 + $0x164] ss:$16 sps:$4 sm:$0xff]  }
  0x71   : > { %v8193_v38 = vld [vmem:[#allocation3 + $0x3a0] ss:$16 sps:$4 sm:$0xff]   ;;  %v8207_v46 = vld [vmem:[#allocation3 + $0x364] ss:$16 sps:$4 sm:$0xff]  }
  0x72   : > { %v8196_v41 = vld [vmem:[#allocation3 + $0x180] ss:$16 sps:$4 sm:$0xff]   ;;  %v8210_v51 = vld [vmem:[#allocation3 + $0x144] ss:$16 sps:$4 sm:$0xff]  }
  0x73   : > { %7633 = vmatmul.mubr.msk.bf16.gmra.mxu0 %vm700_vm0, %v9199_v16  ;;  %7649 = vmatmul.mubr.msk.bf16.gmra.mxu1 %vm700_vm0, %v9199_v16  ;;  %v8199_v43 = vld [vmem:[#allocation3 + $0x380] ss:$16 sps:$4 sm:$0xff]  }
  0x74   : > { %821 = vmatprep.mubr.bf16.mxu0 %v14067_v1  ;;  %1014 = vmatprep.mubr.bf16.mxu1 %v14067_v1  ;;  %v8202_v48 = vld [vmem:[#allocation3 + $0x160] ss:$16 sps:$4 sm:$0xff]  }
  0x75   : > { %v8205_v49 = vld [vmem:[#allocation3 + $0x360] ss:$16 sps:$4 sm:$0xff]  }
  0x76   : > { %v8208_v52 = vld [vmem:[#allocation3 + $0x140] ss:$16 sps:$4 sm:$0xff]  }
  0x7b   : > { %7634 = vmatmul.mubr.msk.bf16.gmra.mxu0 %vm700_vm0, %v9209_v19  ;;  %7650 = vmatmul.mubr.msk.bf16.gmra.mxu1 %vm700_vm0, %v9209_v19 }
  0x7c   : > { %831 = vmatprep.mubr.bf16.mxu0 %v14067_v1  ;;  %1024 = vmatprep.mubr.bf16.mxu1 %v14067_v1 }
  0x83   : > { %7635 = vmatmul.mubr.msk.bf16.gmra.mxu0 %vm700_vm0, %v9219_v22  ;;  %7651 = vmatmul.mubr.msk.bf16.gmra.mxu1 %vm700_vm0, %v9219_v22 }
  0x84   : > { %841 = vmatprep.mubr.bf16.mxu0 %v14067_v1  ;;  %1034 = vmatprep.mubr.bf16.mxu1 %v14067_v1 }
  0x8b   : > { %7636 = vmatmul.mubr.msk.bf16.gmra.mxu0 %vm700_vm0, %v9229_v25  ;;  %7652 = vmatmul.mubr.msk.bf16.gmra.mxu1 %vm700_vm0, %v9229_v25 }
  0x8c   : > { %851 = vmatprep.mubr.bf16.mxu0 %v14067_v1  ;;  %1044 = vmatprep.mubr.bf16.mxu1 %v14067_v1 }
  0x93   : > { %7637 = vmatmul.mubr.msk.bf16.gmra.mxu0 %vm700_vm0, %v9239_v28  ;;  %7653 = vmatmul.mubr.msk.bf16.gmra.mxu1 %vm700_vm0, %v9239_v28 }
  0x94   : > { %861 = vmatprep.mubr.bf16.mxu0 %v14067_v1  ;;  %1054 = vmatprep.mubr.bf16.mxu1 %v14067_v1 }
  0x9b   : > { %7638 = vmatmul.mubr.msk.bf16.gmra.mxu0 %vm700_vm0, %v9249_v31  ;;  %7654 = vmatmul.mubr.msk.bf16.gmra.mxu1 %vm700_vm0, %v9249_v31 }
  0x9c   : > { %871 = vmatprep.mubr.bf16.mxu0 %v14067_v1  ;;  %1064 = vmatprep.mubr.bf16.mxu1 %v14067_v1 }
  0xa3   : > { %7639 = vmatmul.mubr.msk.bf16.gmra.mxu0 %vm700_vm0, %v9259_v34  ;;  %7655 = vmatmul.mubr.msk.bf16.gmra.mxu1 %vm700_vm0, %v9259_v34 }
  0xa4   : > { %881 = vmatprep.mubr.bf16.mxu0 %v14067_v1  ;;  %1074 = vmatprep.mubr.bf16.mxu1 %v14067_v1 }
  0xab   : > { %7640 = vmatmul.mubr.msk.bf16.gmra.mxu0 %vm700_vm0, %v9269_v37  ;;  %7656 = vmatmul.mubr.msk.bf16.gmra.mxu1 %vm700_vm0, %v9269_v37 }
  0xac   : > { %891 = vmatprep.mubr.bf16.mxu0 %v14067_v1  ;;  %1084 = vmatprep.mubr.bf16.mxu1 %v14067_v1 }
  0xb3   : > { %7641 = vmatmul.mubr.msk.bf16.gmra.mxu0 %vm700_vm0, %v9279_v40  ;;  %7657 = vmatmul.mubr.msk.bf16.gmra.mxu1 %vm700_vm0, %v9279_v40 }
  0xb4   : > { %901 = vmatprep.mubr.bf16.mxu0 %v14067_v1  ;;  %1094 = vmatprep.mubr.bf16.mxu1 %v14067_v1 }
  0xbb   : > { %7642 = vmatmul.mubr.msk.bf16.gmra.mxu0 %vm700_vm0, %v9289_v44  ;;  %7658 = vmatmul.mubr.msk.bf16.gmra.mxu1 %vm700_vm0, %v9289_v44 }
  0xbc   : > { %911 = vmatprep.mubr.bf16.mxu0 %v14067_v1  ;;  %1104 = vmatprep.mubr.bf16.mxu1 %v14067_v1 }
  0xc3   : > { %7643 = vmatmul.mubr.msk.bf16.gmra.mxu0 %vm700_vm0, %v9299_v47  ;;  %7659 = vmatmul.mubr.msk.bf16.gmra.mxu1 %vm700_vm0, %v9299_v47 }
  0xc4   : > { %921 = vmatprep.mubr.bf16.mxu0 %v14067_v1  ;;  %1114 = vmatprep.mubr.bf16.mxu1 %v14067_v1 }
  0xcb   : > { %7644 = vmatmul.mubr.msk.bf16.gmra.mxu0 %vm700_vm0, %v9309_v50  ;;  %7660 = vmatmul.mubr.msk.bf16.gmra.mxu1 %vm700_vm0, %v9309_v50 }
  0xcc   : > { %931 = vmatprep.mubr.bf16.mxu0 %v14067_v1  ;;  %1124 = vmatprep.mubr.bf16.mxu1 %v14067_v1 }
  0xd3   : > { %7645 = vmatmul.mubr.msk.bf16.gmra.mxu0 %vm700_vm0, %v9319_v53  ;;  %7661 = vmatmul.mubr.msk.bf16.gmra.mxu1 %vm700_vm0, %v9319_v53 }
  0xd4   : > { %1167 = vmatprep.mubr.bf16.mxu0 %v14067_v1  ;;  %1360 = vmatprep.mubr.bf16.mxu1 %v14067_v1 }
  0xdb   : > { %7662 = vmatmul.mubr.msk.bf16.vlgmr.msra.gmra.mxu0 %vm700_vm0, %v9133_v42  ;;  %7678 = vmatmul.mubr.msk.bf16.vlgmr.msra.gmra.mxu1 %vm700_vm0, %v9133_v42  ;;  %v8153_v42 = vld [vmem:[#allocation3 + $0x284] ss:$16 sps:$4 sm:$0xff]  }
  0xdc   : > { %3976 = vmatpush1.bf16.msra.mxu0 %v8130_v54  ;;  %4169 = vmatpush1.bf16.msra.mxu1 %v8133_v55  ;;  %v8211_v54 = vld [vmem:[#allocation3 + $0x340] ss:$16 sps:$4 sm:$0xff]   ;;  %v8216_v55 = vld [vmem:[#allocation3 + $0x124] ss:$16 sps:$4 sm:$0xff]  }
  0xdd   : > { %1177 = vmatprep.mubr.bf16.mxu0 %v14067_v1  ;;  %1370 = vmatprep.mubr.bf16.mxu1 %v14067_v1 }
  0xde   : > { %3977 = vmatprep.subr.bf16.mxu0 %v8138_v56  ;;  %4170 = vmatprep.subr.bf16.mxu1 %v8141_v58  ;;  %v8219_v56 = vld [vmem:[#allocation3 + $0x324] ss:$16 sps:$4 sm:$0xff]   ;;  %v8217_v58 = vld [vmem:[#allocation3 + $0x320] ss:$16 sps:$4 sm:$0xff]  }
  0xe0   : > { %3978 = vmatpush1.bf16.msra.mxu0 %v8136_v57  ;;  %4171 = vmatpush1.bf16.msra.mxu1 %v8139_v59  ;;  %v8214_v57 = vld [vmem:[#allocation3 + $0x120] ss:$16 sps:$4 sm:$0xff]   ;;  %v8222_v59 = vld [vmem:[#allocation3 + $0x104] ss:$16 sps:$4 sm:$0xff]  }
  0xe1   : > { %3979 = vmatprep.subr.bf16.mxu0 %v8144_v60  ;;  %4172 = vmatprep.subr.bf16.mxu1 %v8147_v61  ;;  %v8220_v60 = vld [vmem:[#allocation3 + $0x100] ss:$16 sps:$4 sm:$0xff]  }
  0xe2   : > { %v8223_v61 = vld [vmem:[#allocation3 + $0x300] ss:$16 sps:$4 sm:$0xff]  }
  0xe3   : > { %7663 = vmatmul.mubr.msk.bf16.gmra.mxu0 %vm700_vm0, %v9173_v63  ;;  %7679 = vmatmul.mubr.msk.bf16.gmra.mxu1 %vm700_vm0, %v9173_v63  ;;  %v8165_v63 = vld [vmem:[#allocation3 + $0x244] ss:$16 sps:$4 sm:$0xff]  }
  0xe4   : > { %1187 = vmatprep.mubr.bf16.mxu0 %v14067_v1  ;;  %1380 = vmatprep.mubr.bf16.mxu1 %v14067_v1 }
  0xe5   : > { %3980 = vmatpush1.bf16.msra.mxu0 %v8142_v62  ;;  %4173 = vmatpush1.bf16.msra.mxu1 %v8145_v0  ;;  %v8228_v62 = vld [vmem:[#allocation3 + $0x4e4] ss:$16 sps:$4 sm:$0xff]  }
  0xe6   : > { %3981 = vmatprep.subr.bf16.mxu0 %v8150_v2  ;;  %4174 = vmatprep.subr.bf16.mxu1 %v8153_v42  ;;  %v8231_v0 = vld [vmem:[#allocation3 + $0x6e4] ss:$16 sps:$4 sm:$0xff]  }
  0xe9   : > { %3982 = vmatpush1.bf16.msra.mxu0 %v8148_v3  ;;  %4175 = vmatpush1.bf16.msra.mxu1 %v8151_v4 }
  0xea   : > { %3983 = vmatprep.subr.bf16.mxu0 %v8156_v5  ;;  %4176 = vmatprep.subr.bf16.mxu1 %v8159_v6 }
  0xeb   : > { %7664 = vmatmul.mubr.msk.bf16.gmra.mxu0 %vm700_vm0, %v9189_v13  ;;  %7680 = vmatmul.mubr.msk.bf16.gmra.mxu1 %vm700_vm0, %v9189_v13  ;;  %v8177_v13 = vld [vmem:[#allocation3 + $0x204] ss:$16 sps:$4 sm:$0xff]  }
  0xec   : > { %1197 = vmatprep.mubr.bf16.mxu0 %v14067_v1  ;;  %1390 = vmatprep.mubr.bf16.mxu1 %v14067_v1 }
  0xed   : > { %3984 = vmatpush1.bf16.msra.mxu0 %v8154_v7  ;;  %4177 = vmatpush1.bf16.msra.mxu1 %v8157_v8 }
  0xee   : > { %3985 = vmatprep.subr.bf16.mxu0 %v8162_v9  ;;  %4178 = vmatprep.subr.bf16.mxu1 %v8165_v63 }
  0xf1   : > { %3986 = vmatpush1.bf16.msra.mxu0 %v8160_v10  ;;  %4179 = vmatpush1.bf16.msra.mxu1 %v8163_v11 }
  0xf2   : > { %3987 = vmatprep.subr.bf16.mxu0 %v8168_v12  ;;  %4180 = vmatprep.subr.bf16.mxu1 %v8171_v14 }
  0xf3   : > { %7665 = vmatmul.mubr.msk.bf16.gmra.mxu0 %vm700_vm0, %v9199_v16  ;;  %7681 = vmatmul.mubr.msk.bf16.gmra.mxu1 %vm700_vm0, %v9199_v16  ;;  %v8189_v16 = vld [vmem:[#allocation3 + $0x3c4] ss:$16 sps:$4 sm:$0xff]  }
  0xf4   : > { %1207 = vmatprep.mubr.bf16.mxu0 %v14067_v1  ;;  %1400 = vmatprep.mubr.bf16.mxu1 %v14067_v1 }
  0xf5   : > { %3988 = vmatpush1.bf16.msra.mxu0 %v8166_v15  ;;  %4181 = vmatpush1.bf16.msra.mxu1 %v8169_v17 }
  0xf6   : > { %3989 = vmatprep.subr.bf16.mxu0 %v8174_v18  ;;  %4182 = vmatprep.subr.bf16.mxu1 %v8177_v13 }
  0xf9   : > { %3990 = vmatpush1.bf16.msra.mxu0 %v8172_v20  ;;  %4183 = vmatpush1.bf16.msra.mxu1 %v8175_v21 }
  0xfa   : > { %3991 = vmatprep.subr.bf16.mxu0 %v8180_v23  ;;  %4184 = vmatprep.subr.bf16.mxu1 %v8183_v24  ;;  %v500_v24 = vlaneseq }
  0xfb   : > { %7666 = vmatmul.mubr.msk.bf16.gmra.mxu0 %vm700_vm0, %v9209_v19  ;;  %7682 = vmatmul.mubr.msk.bf16.gmra.mxu1 %vm700_vm0, %v9209_v19  ;;  %v8201_v19 = vld [vmem:[#allocation3 + $0x384] ss:$16 sps:$4 sm:$0xff]  }
  0xfc   : > { %1217 = vmatprep.mubr.bf16.mxu0 %v14067_v1  ;;  %1410 = vmatprep.mubr.bf16.mxu1 %v14067_v1 }
  0xfd   : > { %3992 = vmatpush2.bf16.msra.mxu0 %v8178_v26  ;;  %4185 = vmatpush2.bf16.msra.mxu1 %v8181_v27 }
  0xfe   : > { %3993 = vmatprep.subr.bf16.mxu0 %v8186_v29  ;;  %4186 = vmatprep.subr.bf16.mxu1 %v8189_v16  ;;  %v9455_v16 = vshrl.u32 %v500_v24, 7 }
 0x100   : > { %14240 = vst [vmem:[#allocation13_spill] sm:$0xff] %v9455_v16 }
 0x101   : > { %3994 = vmatpush2.bf16.msra.mxu0 %v8184_v30  ;;  %4187 = vmatpush2.bf16.msra.mxu1 %v8187_v32 }
 0x102   : > { %3995 = vmatprep.subr.bf16.mxu0 %v8192_v33  ;;  %4188 = vmatprep.subr.bf16.mxu1 %v8195_v35 }
 0x103   : > { %7667 = vmatmul.mubr.msk.bf16.gmra.mxu0 %vm700_vm0, %v9219_v22  ;;  %7683 = vmatmul.mubr.msk.bf16.gmra.mxu1 %vm700_vm0, %v9219_v22  ;;  %v8213_v22 = vld [vmem:[#allocation3 + $0x344] ss:$16 sps:$4 sm:$0xff]  }
 0x104   : > { %1227 = vmatprep.mubr.bf16.mxu0 %v14067_v1  ;;  %1420 = vmatprep.mubr.bf16.mxu1 %v14067_v1 }
 0x105   : > { %3996 = vmatpush2.bf16.msra.mxu0 %v8190_v36  ;;  %4189 = vmatpush2.bf16.msra.mxu1 %v8193_v38  ;;  %v498_v38 = vld [vmem:[%s14053_s2] sm:$0xff] }
 0x106   : > { %3997 = vmatprep.subr.bf16.mxu0 %v8198_v39  ;;  %4190 = vmatprep.subr.bf16.mxu1 %v8201_v19  ;;  %v14066_v39 = vsub.s32 2, %v9455_v16 }
 0x109   : > { %3998 = vmatpush2.bf16.msra.mxu0 %v8196_v41  ;;  %4191 = vmatpush2.bf16.msra.mxu1 %v8199_v43  ;;  %v9482_v41 = vsub.s32 1, %v9455_v16 }
 0x10a   : > { %3999 = vmatprep.subr.bf16.mxu0 %v8204_v45  ;;  %4192 = vmatprep.subr.bf16.mxu1 %v8207_v46 }
 0x10b   : > { %7668 = vmatmul.mubr.msk.bf16.gmra.mxu0 %vm700_vm0, %v9229_v25  ;;  %7684 = vmatmul.mubr.msk.bf16.gmra.mxu1 %vm700_vm0, %v9229_v25  ;;  %v8225_v25 = vld [vmem:[#allocation3 + $0x304] ss:$16 sps:$4 sm:$0xff]   ;;  %14242 = vst [vmem:[#allocation15_spill] sm:$0xff] %v9482_v41 }
 0x10c   : > { %1237 = vmatprep.mubr.bf16.mxu0 %v14067_v1  ;;  %1430 = vmatprep.mubr.bf16.mxu1 %v14067_v1 }
 0x10d   : > { %4000 = vmatpush2.bf16.msra.mxu0 %v8202_v48  ;;  %4193 = vmatpush2.bf16.msra.mxu1 %v8205_v49  ;;  %v14065_v48 = vsub.s32 3, %v9455_v16 }
 0x10e   : > { %4001 = vmatprep.subr.bf16.mxu0 %v8210_v51  ;;  %4194 = vmatprep.subr.bf16.mxu1 %v8213_v22  ;;  %v9502_v22 = vrot.slane %v498_v38, %v9482_v41 }
 0x111   : > { %4002 = vmatpush2.bf16.msra.mxu0 %v8208_v52  ;;  %4195 = vmatpush2.bf16.msra.mxu1 %v8211_v54 }
 0x112   : > { %4003 = vmatprep.subr.bf16.mxu0 %v8216_v55  ;;  %4196 = vmatprep.subr.bf16.mxu1 %v8219_v56  ;;  %v9512_v56 = vrot.slane %v498_v38, %v14065_v48 }
 0x113   : > { %7669 = vmatmul.mubr.msk.bf16.gmra.mxu0 %vm700_vm0, %v9239_v28  ;;  %7685 = vmatmul.mubr.msk.bf16.gmra.mxu1 %vm700_vm0, %v9239_v28 }
 0x114   : > { %1247 = vmatprep.mubr.bf16.mxu0 %v14067_v1  ;;  %1440 = vmatprep.mubr.bf16.mxu1 %v14067_v1 }
 0x115   : > { %4004 = vmatpush2.bf16.msra.mxu0 %v8214_v57  ;;  %4197 = vmatpush2.bf16.msra.mxu1 %v8217_v58 }
 0x116   : > { %4005 = vmatprep.subr.bf16.mxu0 %v8222_v59  ;;  %4198 = vmatprep.subr.bf16.mxu1 %v8225_v25 }
 0x119   : > { %4006 = vmatpush2.bf16.msra.mxu0 %v8220_v60  ;;  %4199 = vmatpush2.bf16.msra.mxu1 %v8223_v61 }
 0x11a   : > { %4361 = vmatprep.subr.bf16.mxu0 %v8228_v62  ;;  %4554 = vmatprep.subr.bf16.mxu1 %v8231_v0 }
 0x11b   : > { %v9375_v2 = vpop.f32.mrf.mxu0  ;;  %7670 = vmatmul.mubr.msk.bf16.gmra.mxu0 %vm700_vm0, %v9249_v31  ;;  %v9379_v28 = vpop.f32.mrf.mxu1  ;;  %7686 = vmatmul.mubr.msk.bf16.gmra.mxu1 %vm700_vm0, %v9249_v31 }
 0x11c   : > { %1257 = vmatprep.mubr.bf16.mxu0 %v14067_v1  ;;  %1450 = vmatprep.mubr.bf16.mxu1 %v14067_v1 }
 0x11d   : > { %v9384_v42 = vpop.f32.mrf.mxu0  ;;  %v9387_v3 = vpop.f32.mrf.mxu1 }
 0x11e   : > { %v786_v25 = vadd.f32 %v9384_v42, %v9502_v22 }
 0x11f   : > { %v9389_v4 = vpop.f32.mrf.mxu0  ;;  %v9391_v5 = vpop.f32.mrf.mxu1 }
 0x120   : > { %vm1522_vm3 = vcmp.gt.f32.partialorder %v786_v25, 0.0 }
 0x121   : > { %v9393_v6 = vpop.f32.mrf.mxu0  ;;  %v9395_v7 = vpop.f32.mrf.mxu1 }
 0x123   : > { %v9397_v8 = vpop.f32.mrf.mxu0  ;;  %7671 = vmatmul.mubr.msk.bf16.gmra.mxu0 %vm700_vm0, %v9259_v34  ;;  %v9401_v31 = vpop.f32.mrf.mxu1  ;;  %7687 = vmatmul.mubr.msk.bf16.gmra.mxu1 %vm700_vm0, %v9259_v34 }
 0x124   : > { %1267 = vmatprep.mubr.bf16.mxu0 %v14067_v1  ;;  %1460 = vmatprep.mubr.bf16.mxu1 %v14067_v1 }
 0x125   : > { %v9406_v9 = vpop.f32.mrf.mxu0  ;;  %v9409_v63 = vpop.f32.mrf.mxu1 }
 0x127   : > { %v9411_v10 = vpop.f32.mrf.mxu0  ;;  %v9413_v11 = vpop.f32.mrf.mxu1 }
 0x129   : > { %v9415_v12 = vpop.f32.mrf.mxu0  ;;  %v9417_v14 = vpop.f32.mrf.mxu1 }
 0x12b   : > { %v9419_v15 = vpop.f32.mrf.mxu0  ;;  %7672 = vmatmul.mubr.msk.bf16.gmra.mxu0 %vm700_vm0, %v9269_v37  ;;  %v9423_v34 = vpop.f32.mrf.mxu1  ;;  %7688 = vmatmul.mubr.msk.bf16.gmra.mxu1 %vm700_vm0, %v9269_v37 }
 0x12c   : > { %1277 = vmatprep.mubr.bf16.mxu0 %v14067_v1  ;;  %1470 = vmatprep.mubr.bf16.mxu1 %v14067_v1 }
 0x12d   : > { %v9428_v17 = vpop.f32.mrf.mxu0  ;;  %v9431_v18 = vpop.f32.mrf.mxu1 }
 0x12f   : > { %v9433_v13 = vpop.f32.mrf.mxu0  ;;  %v9435_v20 = vpop.f32.mrf.mxu1 }
 0x131   : > { %v9437_v21 = vpop.f32.mrf.mxu0  ;;  %v9439_v23 = vpop.f32.mrf.mxu1 }
 0x133   : > { %v9441_v26 = vpop.f32.mrf.mxu0  ;;  %7673 = vmatmul.mubr.msk.bf16.gmra.mxu0 %vm700_vm0, %v9279_v40  ;;  %v9445_v37 = vpop.f32.mrf.mxu1  ;;  %7689 = vmatmul.mubr.msk.bf16.gmra.mxu1 %vm700_vm0, %v9279_v40  ;;  %v9466_v40 = vsub.s32 0, %v9455_v16 }
 0x134   : > { %1287 = vmatprep.mubr.bf16.mxu0 %v14067_v1  ;;  %1480 = vmatprep.mubr.bf16.mxu1 %v14067_v1 }
 0x135   : > { %v9450_v27 = vpop.f32.mrf.mxu0  ;;  %v9453_v29 = vpop.f32.mrf.mxu1  ;;  %14241 = vst [vmem:[#allocation14_spill] sm:$0xff] %v9466_v40  ;;  %v9490_v46 = vrot.slane %v498_v38, %v9466_v40 }
 0x137   : > { %v9457_v30 = vpop.f32.mrf.mxu0  ;;  %v9459_v32 = vpop.f32.mrf.mxu1  ;;  %v784_v55 = vadd.f32 %v9375_v2, %v9490_v46  ;;  %v788_v60 = vadd.f32 %v9389_v4, %v9490_v46  ;;  %v983_v4 = vadd.f32 %v9395_v7, %v9512_v56 }
 0x139   : > { %v9461_v33 = vpop.f32.mrf.mxu0  ;;  %v9463_v35 = vpop.f32.mrf.mxu1  ;;  %v1777_v2 = vmul.f32 0.2, %v784_v55  ;;  %vm1521_vm1 = vcmp.gt.f32.partialorder %v784_v55, 0.0  ;;  %v1785_v48 = vmul.f32 0.2, %v788_v60  ;;  %vm1529_vm4 = vcmp.gt.f32.partialorder %v788_v60, 0.0 }
 0x13a   : > { %vm1532_vm8 = vcmp.gt.f32.partialorder %v983_v4, 0.0 }
 0x13b   : > { %v9468_v36 = vpop.f32.mrf.mxu0  ;;  %7674 = vmatmul.mubr.msk.bf16.gmra.mxu0 %vm700_vm0, %v9289_v44  ;;  %v9476_v19 = vpop.f32.mrf.mxu1  ;;  %7690 = vmatmul.mubr.msk.bf16.gmra.mxu1 %vm700_vm0, %v9289_v44  ;;  %v9497_v44 = vrot.slane %v498_v38, %v14066_v39  ;;  %v2033_v41 = vsel %vm1521_vm1, %v784_v55, %v1777_v2  ;;  %v2041_v2 = vsel %vm1529_vm4, %v788_v60, %v1785_v48 }
 0x13c   : > { %1297 = vmatprep.mubr.bf16.mxu0 %v14067_v1  ;;  %1490 = vmatprep.mubr.bf16.mxu1 %v14067_v1  ;;  %v800_v48 = vadd.f32 %v9415_v12, %v9502_v22  ;;  %v796_v12 = vadd.f32 %v9406_v9, %v9502_v22 }
 0x13d   : > { %v9484_v43 = vpop.f32.mrf.mxu0  ;;  %v9487_v45 = vpop.f32.mrf.mxu1  ;;  %v977_v58 = vadd.f32 %v9379_v28, %v9497_v44  ;;  %v981_v62 = vadd.f32 %v9391_v5, %v9497_v44  ;;  %v790_v28 = vadd.f32 %v9393_v6, %v9502_v22  ;;  %v1778_v5 = vmul.f32 0.2, %v786_v25 }
 0x13e   : > { %v794_v6 = vadd.f32 %v9397_v8, %v9490_v46  ;;  %v14252_v8 = vmov 0   ;;  %vm1546_vm13 = vcmp.gt.f32.partialorder %v800_v48, 0.0  ;;  %vm1538_vm14 = vcmp.gt.f32.partialorder %v796_v12, 0.0 }
 0x13f   : > { %v9493_v49 = vpop.f32.mrf.mxu0  ;;  %v9499_v51 = vpop.f32.mrf.mxu1  ;;  %vm1523_vm2 = vcmp.gt.f32.partialorder %v977_v58, 0.0  ;;  %v1779_v38 = vmul.f32 0.2, %v977_v58  ;;  %vm1531_vm5 = vcmp.gt.f32.partialorder %v981_v62, 0.0  ;;  %vm1530_vm7 = vcmp.gt.f32.partialorder %v790_v28, 0.0 }
 0x140   : > { %vm1537_vm9 = vcmp.gt.f32.partialorder %v794_v6, 0.0 }
 0x141   : > { %v9504_v52 = vpop.f32.mrf.mxu0  ;;  %v9506_v54 = vpop.f32.mrf.mxu1  ;;  %v2035_v55 = vsel %vm1523_vm2, %v977_v58, %v1779_v38 }
 0x142   : > { %14243 = vst [vmem:[#allocation16_spill] sm:$0xff] %v9506_v54  ;;  %v1793_v54 = vmul.f32 0.2, %v794_v6 }
 0x143   : > { %v9514_v57 = vpop.f32.mrf.mxu0  ;;  %7675 = vmatmul.mubr.msk.bf16.gmra.mxu0 %vm700_vm0, %v9299_v47  ;;  %v9520_v59 = vpop.f32.mrf.mxu1  ;;  %7691 = vmatmul.mubr.msk.bf16.gmra.mxu1 %vm700_vm0, %v9299_v47  ;;  %v979_v47 = vadd.f32 %v9387_v3, %v9512_v56  ;;  %v1787_v3 = vmul.f32 0.2, %v981_v62 }
 0x144   : > { %1307 = vmatprep.mubr.bf16.mxu0 %v14067_v1  ;;  %1500 = vmatprep.mubr.bf16.mxu1 %v14067_v1 }
 0x145   : > { %v9529_v61 = vpop.f32.mrf.mxu0  ;;  %v9534_v0 = vpop.f32.mrf.mxu1  ;;  %v1780_v40 = vmul.f32 0.2, %v979_v47  ;;  %vm1524_vm6 = vcmp.gt.f32.partialorder %v979_v47, 0.0 }
 0x146   : > { %14244 = vst [vmem:[#allocation17_spill] sm:$0xff] %v9529_v61  ;;  %14245 = vst [vmem:[#allocation18_spill] sm:$0xff] %v9534_v0  ;;  %v1786_v0 = vmul.f32 0.2, %v790_v28 }
 0x147   : > { %v9540_v42 = vpop.f32.mrf.mxu0  ;;  %v9544_v24 = vpop.f32.mrf.mxu1 }
 0x148   : > { %14246 = vst [vmem:[#allocation19_spill] sm:$0xff] %v9540_v42  ;;  %14247 = vst [vmem:[#allocation20_spill] sm:$0xff] %v9544_v24  ;;  %v798_v24 = vadd.f32 %v9411_v10, %v9490_v46  ;;  %v2043_v10 = vsel %vm1531_vm5, %v981_v62, %v1787_v3  ;;  %v2042_v60 = vsel %vm1530_vm7, %v790_v28, %v1786_v0 }
 0x149   : > { %v9546_v39 = vpop.f32.mrf.mxu0  ;;  %v9550_v1 = vpop.f32.mrf.mxu1  ;;  %v9582_v62 = vpack.c.bf16 %v2041_v2, %v2033_v41  ;;  %v9589_v3 = vpack.c.bf16 %v2043_v10, %v2035_v55  ;;  %v989_v0 = vadd.f32 %v9409_v63, %v9512_v56  ;;  %v2049_v41 = vsel %vm1537_vm9, %v794_v6, %v1793_v54 }
 0x14a   : > { %14248 = vst [vmem:[#allocation21_spill] sm:$0xff] %v9546_v39  ;;  %14249 = vst [vmem:[#allocation22_spill] sm:$0xff] %v9550_v1  ;;  %v1788_v39 = vmul.f32 0.2, %v983_v4  ;;  %v1801_v38 = vmul.f32 0.2, %v798_v24  ;;  %v804_v54 = vadd.f32 %v9419_v15, %v9490_v46 }
 0x14b   : > { %v9552_v7 = vpop.f32.mrf.mxu0  ;;  %7676 = vmatmul.mubr.msk.bf16.gmra.mxu0 %vm700_vm0, %v9309_v50  ;;  %v9558_v61 = vpop.f32.mrf.mxu1  ;;  %7692 = vmatmul.mubr.msk.bf16.gmra.mxu1 %vm700_vm0, %v9309_v50  ;;  %v991_v50 = vadd.f32 %v9413_v11, %v9497_v44  ;;  %14253 = vst [vmem:[#allocation25_spill] sm:$0xff] %v9582_v62  ;;  %14254 = vst [vmem:[#allocation26_spill] sm:$0xff] %v9589_v3  ;;  %vm1545_vm10 = vcmp.gt.f32.partialorder %v798_v24, 0.0  ;;  %vm1540_vm15 = vcmp.gt.f32.partialorder %v989_v0, 0.0  ;;  %v1796_v10 = vmul.f32 0.2, %v989_v0 }
 0x14c   : > { %14250 = vst [vmem:[#allocation23_spill] sm:$0xff] %v9552_v7  ;;  %14251 = vst [vmem:[#allocation24_spill] sm:$0xff] %v9558_v61  ;;  %1317 = vmatprep.mubr.bf16.mxu0 %v14252_v8  ;;  %1510 = vmatprep.mubr.bf16.mxu1 %v14252_v8  ;;  %v2034_v7 = vsel %vm1522_vm3, %v786_v25, %v1778_v5  ;;  %v987_v61 = vadd.f32 %v9401_v31, %v9497_v44 }
 0x14d   : > { %v9565_v1 = vpop.f32.mrf.mxu0  ;;  %v9574_v42 = vpop.f32.mrf.mxu1  ;;  %v2036_v25 = vsel %vm1524_vm6, %v979_v47, %v1780_v40  ;;  %v993_v31 = vadd.f32 %v9417_v14, %v9512_v56  ;;  %v2044_v11 = vsel %vm1532_vm8, %v983_v4, %v1788_v39  ;;  %v1803_v28 = vmul.f32 0.2, %v991_v50 }
 0x14e   : > { %v1795_v47 = vmul.f32 0.2, %v987_v61  ;;  %v9599_v14 = vpack.c.bf16 %v2042_v60, %v2034_v7  ;;  %vm1539_vm11 = vcmp.gt.f32.partialorder %v987_v61, 0.0  ;;  %vm1547_vm12 = vcmp.gt.f32.partialorder %v991_v50, 0.0 }
 0x14f   : > { %v9578_v58 = vpop.f32.mrf.mxu0  ;;  %v9586_v5 = vpop.f32.mrf.mxu1  ;;  %v1802_v39 = vmul.f32 0.2, %v800_v48  ;;  %v9605_v9 = vpack.c.bf16 %v2044_v11, %v2036_v25  ;;  %v2057_v63 = vsel %vm1545_vm10, %v798_v24, %v1801_v38  ;;  %v1804_v55 = vmul.f32 0.2, %v993_v31 }
 0x150   : > { %14255 = vst [vmem:[#allocation27_spill] sm:$0xff] %v9599_v14  ;;  %v1794_v7 = vmul.f32 0.2, %v796_v12  ;;  %vm1548_vm1 = vcmp.gt.f32.partialorder %v993_v31, 0.0  ;;  %v2051_v24 = vsel %vm1539_vm11, %v987_v61, %v1795_v47  ;;  %v2059_v15 = vsel %vm1547_vm12, %v991_v50, %v1803_v28 }
 0x151   : > { %v9595_v40 = vpop.f32.mrf.mxu0  ;;  %v9597_v8 = vpop.f32.mrf.mxu1  ;;  %14256 = vst [vmem:[#allocation28_spill] sm:$0xff] %v9605_v9  ;;  %v997_v60 = vadd.f32 %v9423_v34, %v9497_v44  ;;  %v808_v38 = vadd.f32 %v9433_v13, %v9490_v46  ;;  %v810_v11 = vadd.f32 %v9437_v21, %v9502_v22  ;;  %v2058_v61 = vsel %vm1546_vm13, %v800_v48, %v1802_v39  ;;  %v8226_v48 = vld [vmem:[#allocation3 + $0x4e0] ss:$16 sps:$4 sm:$0xff]  }
 0x152   : > { %v1001_v50 = vadd.f32 %v9435_v20, %v9497_v44  ;;  %v1003_v34 = vadd.f32 %v9439_v23, %v9512_v56  ;;  %v9639_v28 = vpack.c.bf16 %v2059_v15, %v2051_v24  ;;  %v1809_v13 = vmul.f32 0.2, %v804_v54  ;;  %v8237_v24 = vld [vmem:[#allocation3 + $0x6c4] ss:$16 sps:$4 sm:$0xff]  }
 0x153   : > { %v9601_v4 = vpop.f32.mrf.mxu0  ;;  %7677 = vmatmul.mubr.msk.bf16.gmra.mxu0 %vm700_vm0, %v9319_v53  ;;  %v9609_v6 = vpop.f32.mrf.mxu1  ;;  %7693 = vmatmul.mubr.msk.bf16.gmra.mxu1 %vm700_vm0, %v9319_v53  ;;  %v9623_v53 = vpack.c.bf16 %v2057_v63, %v2049_v41  ;;  %vm1553_vm0 = vcmp.gt.f32.partialorder %v804_v54, 0.0  ;;  %v2060_v41 = vsel %vm1548_vm1, %v993_v31, %v1804_v55  ;;  %v806_v21 = vadd.f32 %v9428_v17, %v9502_v22  ;;  %v8234_v55 = vld [vmem:[#allocation3 + $0x4c4] ss:$16 sps:$4 sm:$0xff]  }
 0x154   : > { %4007 = vmatprep.mubr.bf16.mxu0 %v9599_v14  ;;  %4200 = vmatprep.mubr.bf16.mxu1 %v9605_v9  ;;  %14260 = vst [vmem:[#allocation32_spill] sm:$0xff] %v9639_v28  ;;  %v2050_v39 = vsel %vm1538_vm14, %v796_v12, %v1794_v7  ;;  %v8229_v14 = vld [vmem:[#allocation3 + $0x6e0] ss:$16 sps:$4 sm:$0xff]   ;;  %vm1555_vm2 = vcmp.gt.f32.partialorder %v997_v60, 0.0  ;;  %v999_v20 = vadd.f32 %v9431_v18, %v9512_v56  ;;  %v1811_v15 = vmul.f32 0.2, %v997_v60 }
 0x155   : > { %v9615_v2 = vpop.f32.mrf.mxu0  ;;  %v9621_v25 = vpop.f32.mrf.mxu1  ;;  %14259 = vst [vmem:[#allocation31_spill] sm:$0xff] %v9623_v53  ;;  %v2052_v31 = vsel %vm1540_vm15, %v989_v0, %v1796_v10  ;;  %v1817_v17 = vmul.f32 0.2, %v808_v38  ;;  %v8232_v7 = vld [vmem:[#allocation3 + $0x4c0] ss:$16 sps:$4 sm:$0xff]   ;;  %vm1561_vm3 = vcmp.gt.f32.partialorder %v808_v38, 0.0  ;;  %v814_v10 = vadd.f32 %v9441_v26, %v9490_v46 }
 0x156   : > { %14257 = vst [vmem:[#allocation29_spill] sm:$0xff] %v9615_v2  ;;  %14258 = vst [vmem:[#allocation30_spill] sm:$0xff] %v9621_v25  ;;  %v9650_v25 = vpack.c.bf16 %v2058_v61, %v2050_v39  ;;  %v1818_v2 = vmul.f32 0.2, %v810_v11  ;;  %v9656_v12 = vpack.c.bf16 %v2060_v41, %v2052_v31  ;;  %v1819_v18 = vmul.f32 0.2, %v1001_v50 }
 0x157   : > { %v9629_v9 = vpop.f32.mrf.mxu0  ;;  %v9636_v47 = vpop.f32.mrf.mxu1  ;;  %vm1562_vm4 = vcmp.gt.f32.partialorder %v810_v11, 0.0  ;;  %v1810_v0 = vmul.f32 0.2, %v806_v21  ;;  %vm1563_vm5 = vcmp.gt.f32.partialorder %v1001_v50, 0.0  ;;  %vm1564_vm6 = vcmp.gt.f32.partialorder %v1003_v34, 0.0 }
 0x158   : > { %14263 = vst [vmem:[#allocation35_spill] sm:$0xff] %v9650_v25  ;;  %14264 = vst [vmem:[#allocation36_spill] sm:$0xff] %v9656_v12  ;;  %v8235_v39 = vld [vmem:[#allocation3 + $0x6c0] ss:$16 sps:$4 sm:$0xff]   ;;  %v2065_v31 = vsel %vm1553_vm0, %v804_v54, %v1809_v13  ;;  %vm1554_vm7 = vcmp.gt.f32.partialorder %v806_v21, 0.0  ;;  %vm1556_vm8 = vcmp.gt.f32.partialorder %v999_v20, 0.0  ;;  %v2073_v26 = vsel %vm1561_vm3, %v808_v38, %v1817_v17 }
 0x159   : > { %v9643_v63 = vpop.f32.mrf.mxu0  ;;  %v9648_v23 = vpop.f32.mrf.mxu1  ;;  %v8243_v54 = vld [vmem:[#allocation3 + $0x6a4] ss:$16 sps:$4 sm:$0xff]   ;;  %v2075_v13 = vsel %vm1563_vm5, %v1001_v50, %v1819_v18  ;;  %v2066_v50 = vsel %vm1554_vm7, %v806_v21, %v1810_v0  ;;  %vm1569_vm9 = vcmp.gt.f32.partialorder %v814_v10, 0.0  ;;  %v8241_v17 = vld [vmem:[#allocation3 + $0x6a0] ss:$16 sps:$4 sm:$0xff]   ;;  %v9704_v21 = vadd.f32 %v9453_v29, %v9512_v56 }
 0x15a   : > { %14261 = vst [vmem:[#allocation33_spill] sm:$0xff] %v9643_v63  ;;  %14262 = vst [vmem:[#allocation34_spill] sm:$0xff] %v9648_v23  ;;  %v1820_v23 = vmul.f32 0.2, %v1003_v34  ;;  %v8246_v0 = vld [vmem:[#allocation3 + $0x484] ss:$16 sps:$4 sm:$0xff]  }
 0x15b   : > { %v9653_v63 = vpop.f32.mrf.mxu0  ;;  %4008 = vmatmul.mubr.bf16.vlgmr.msra.gmra.mxu0 %v9582_v62  ;;  %v9658_v61 = vpop.f32.mrf.mxu1  ;;  %4201 = vmatmul.mubr.bf16.vlgmr.msra.gmra.mxu1 %v9589_v3  ;;  %v1812_v62 = vmul.f32 0.2, %v999_v20  ;;  %v8244_v29 = vld [vmem:[#allocation3 + $0x480] ss:$16 sps:$4 sm:$0xff]   ;;  %vm1572_vm15 = vcmp.gt.f32.partialorder %v9704_v21, 0.0 }
 0x15c   : > { %14265 = vst [vmem:[#allocation37_spill] sm:$0xff] %v9658_v61  ;;  %4017 = vmatprep.mubr.bf16.mxu0 %v9650_v25  ;;  %4210 = vmatprep.mubr.bf16.mxu1 %v9656_v12  ;;  %v8240_v25 = vld [vmem:[#allocation3 + $0x4a4] ss:$16 sps:$4 sm:$0xff]   ;;  %v2067_v61 = vsel %vm1555_vm2, %v997_v60, %v1811_v15  ;;  %v2076_v60 = vsel %vm1564_vm6, %v1003_v34, %v1820_v23  ;;  %v1825_v15 = vmul.f32 0.2, %v814_v10 }
 0x15d   : > { %4362 = vmatpush1.bf16.msra.mxu0 %v8226_v48  ;;  %v9665_v41 = vpop.f32.mrf.mxu0  ;;  %v9668_v3 = vpop.f32.mrf.mxu1  ;;  %4555 = vmatpush1.bf16.msra.mxu1 %v8229_v14  ;;  %v820_v48 = vadd.f32 %v9461_v33, %v9502_v22  ;;  %v818_v14 = vadd.f32 %v9457_v30, %v9490_v46  ;;  %v9686_v33 = vadd.f32 %v9450_v27, %v9502_v22  ;;  %v8238_v27 = vld [vmem:[#allocation3 + $0x4a0] ss:$16 sps:$4 sm:$0xff]   ;;  %v8252_v38 = vld [vmem:[#allocation3 + $0x464] ss:$16 sps:$4 sm:$0xff]  }
 0x15e   : > { %14266 = vst [vmem:[#allocation38_spill] sm:$0xff] %v9665_v41  ;;  %4363 = vmatprep.subr.bf16.mxu0 %v8234_v55  ;;  %v2074_v41 = vsel %vm1562_vm4, %v810_v11, %v1818_v2  ;;  %4556 = vmatprep.subr.bf16.mxu1 %v8237_v24  ;;  %v1011_v2 = vadd.f32 %v9459_v32, %v9497_v44 }
 0x15f   : > { %v9674_v12 = vpop.f32.mrf.mxu0  ;;  %v9680_v55 = vpop.f32.mrf.mxu1  ;;  %v1007_v30 = vadd.f32 %v9445_v37, %v9497_v44  ;;  %v9697_v23 = vpack.c.bf16 %v2074_v41, %v2066_v50  ;;  %v2068_v24 = vsel %vm1556_vm8, %v999_v20, %v1812_v62  ;;  %v9700_v32 = vpack.c.bf16 %v2073_v26, %v2065_v31  ;;  %v8249_v62 = vld [vmem:[#allocation3 + $0x684] ss:$16 sps:$4 sm:$0xff]   ;;  %v8247_v31 = vld [vmem:[#allocation3 + $0x680] ss:$16 sps:$4 sm:$0xff]  }
 0x160   : > { %v9709_v37 = vpack.c.bf16 %v2076_v60, %v2068_v24  ;;  %v9711_v20 = vpack.c.bf16 %v2075_v13, %v2067_v61  ;;  %vm1578_vm10 = vcmp.gt.f32.partialorder %v820_v48, 0.0  ;;  %v824_v41 = vadd.f32 %v9468_v36, %v9490_v46 }
 0x161   : > { %v9690_v11 = vpop.f32.mrf.mxu0  ;;  %4364 = vmatpush1.bf16.msra.mxu0 %v8232_v7  ;;  %v9695_v34 = vpop.f32.mrf.mxu1  ;;  %14267 = vst [vmem:[#allocation39_spill] sm:$0xff] %v9697_v23  ;;  %4557 = vmatpush1.bf16.msra.mxu1 %v8235_v39  ;;  %14268 = vst [vmem:[#allocation40_spill] sm:$0xff] %v9700_v32  ;;  %v1834_v7 = vmul.f32 0.2, %v820_v48  ;;  %v2081_v26 = vsel %vm1569_vm9, %v814_v10, %v1825_v15  ;;  %vm1577_vm11 = vcmp.gt.f32.partialorder %v818_v14, 0.0  ;;  %vm1571_vm12 = vcmp.gt.f32.partialorder %v1007_v30, 0.0 }
 0x162   : > { %4365 = vmatprep.subr.bf16.mxu0 %v8240_v25  ;;  %14269 = vst [vmem:[#allocation41_spill] sm:$0xff] %v9709_v37  ;;  %4558 = vmatprep.subr.bf16.mxu1 %v8243_v54  ;;  %14270 = vst [vmem:[#allocation42_spill] sm:$0xff] %v9711_v20  ;;  %v1833_v25 = vmul.f32 0.2, %v818_v14  ;;  %v1826_v54 = vmul.f32 0.2, %v9686_v33  ;;  %v9733_v15 = vadd.f32 %v9463_v35, %v9512_v56 }
 0x163   : > { %v9706_v18 = vpop.f32.mrf.mxu0  ;;  %4018 = vmatmul.mubr.bf16.gmra.mxu0 %v9623_v53  ;;  %v9715_v39 = vpop.f32.mrf.mxu1  ;;  %4211 = vmatmul.mubr.bf16.gmra.mxu1 %v9639_v28  ;;  %v1835_v61 = vmul.f32 0.2, %v1011_v2  ;;  %v1827_v36 = vmul.f32 0.2, %v1007_v30  ;;  %vm1570_vm13 = vcmp.gt.f32.partialorder %v9686_v33, 0.0  ;;  %vm1579_vm14 = vcmp.gt.f32.partialorder %v1011_v2, 0.0 }
 0x164   : > { %4027 = vmatprep.mubr.bf16.mxu0 %v9697_v23  ;;  %4220 = vmatprep.mubr.bf16.mxu1 %v9709_v37  ;;  %v9729_v10 = vmul.f32 0.2, %v9704_v21  ;;  %v2090_v24 = vsel %vm1578_vm10, %v820_v48, %v1834_v7  ;;  %v2089_v37 = vsel %vm1577_vm11, %v818_v14, %v1833_v25  ;;  %v828_v23 = vadd.f32 %v9493_v49, %v9490_v46 }
 0x165   : > { %v9722_v13 = vpop.f32.mrf.mxu0  ;;  %v9725_v60 = vpop.f32.mrf.mxu1  ;;  %4366 = vmatpush1.bf16.msra.mxu0 %v8238_v27  ;;  %4559 = vmatpush1.bf16.msra.mxu1 %v8241_v17  ;;  %v1841_v27 = vmul.f32 0.2, %v824_v41  ;;  %v9741_v17 = vadd.f32 %v9476_v19, %v9497_v44  ;;  %v2091_v35 = vsel %vm1579_vm14, %v1011_v2, %v1835_v61  ;;  %vm1585_vm1 = vcmp.gt.f32.partialorder %v824_v41, 0.0  ;;  %v8255_v19 = vld [vmem:[#allocation3 + $0x664] ss:$16 sps:$4 sm:$0xff]  }
 0x166   : > { %4367 = vmatprep.subr.bf16.mxu0 %v8246_v0  ;;  %4560 = vmatprep.subr.bf16.mxu1 %v8249_v62  ;;  %v1021_v48 = vadd.f32 %v9499_v51, %v9497_v44  ;;  %v2082_v14 = vsel %vm1570_vm13, %v9686_v33, %v1826_v54  ;;  %v8250_v0 = vld [vmem:[#allocation3 + $0x460] ss:$16 sps:$4 sm:$0xff]   ;;  %v2083_v62 = vsel %vm1571_vm12, %v1007_v30, %v1827_v36  ;;  %v8258_v61 = vld [vmem:[#allocation3 + $0x444] ss:$16 sps:$4 sm:$0xff]   ;;  %vm1580_vm0 = vcmp.gt.f32.partialorder %v9733_v15, 0.0 }
 0x167   : > { %v9735_v50 = vpop.f32.mrf.mxu0  ;;  %v9745_v28 = vpop.f32.mrf.mxu1  ;;  %v9758_v49 = vadd.f32 %v9484_v43, %v9502_v22  ;;  %v9762_v2 = vpack.c.bf16 %v2090_v24, %v2082_v14  ;;  %v8253_v51 = vld [vmem:[#allocation3 + $0x660] ss:$16 sps:$4 sm:$0xff]   ;;  %v1836_v33 = vmul.f32 0.2, %v9733_v15  ;;  %v9771_v43 = vadd.f32 %v9487_v45, %v9512_v56 }
 0x168   : > { %v2097_v54 = vsel %vm1585_vm1, %v824_v41, %v1841_v27  ;;  %vm1587_vm2 = vcmp.gt.f32.partialorder %v9741_v17, 0.0  ;;  %vm1593_vm3 = vcmp.gt.f32.partialorder %v828_v23, 0.0  ;;  %v1851_v45 = vmul.f32 0.2, %v1021_v48  ;;  %v8256_v41 = vld [vmem:[#allocation3 + $0x440] ss:$16 sps:$4 sm:$0xff]  }
 0x169   : > { %v9750_v7 = vpop.f32.mrf.mxu0  ;;  %v9760_v25 = vpop.f32.mrf.mxu1  ;;  %14273 = vst [vmem:[#allocation45_spill] sm:$0xff] %v9762_v2  ;;  %4368 = vmatpush1.bf16.msra.mxu0 %v8244_v29  ;;  %4561 = vmatpush1.bf16.msra.mxu1 %v8247_v31  ;;  %v8261_v29 = vld [vmem:[#allocation3 + $0x644] ss:$16 sps:$4 sm:$0xff]   ;;  %v9776_v31 = vpack.c.bf16 %v2091_v35, %v2083_v62  ;;  %v834_v36 = vadd.f32 %v9514_v57, %v9490_v46  ;;  %v1843_v27 = vmul.f32 0.2, %v9741_v17  ;;  %vm1586_vm4 = vcmp.gt.f32.partialorder %v9758_v49, 0.0 }
 0x16a   : > { %14271 = vst [vmem:[#allocation43_spill] sm:$0xff] %v9750_v7  ;;  %14272 = vst [vmem:[#allocation44_spill] sm:$0xff] %v9760_v25  ;;  %v9765_v7 = vpack.c.bf16 %v2089_v37, %v2081_v26  ;;  %4369 = vmatprep.subr.bf16.mxu0 %v8252_v38  ;;  %v1849_v37 = vmul.f32 0.2, %v828_v23  ;;  %v1027_v38 = vadd.f32 %v9520_v59, %v9497_v44  ;;  %4562 = vmatprep.subr.bf16.mxu1 %v8255_v19  ;;  %v14278_v19 = vld [vmem:[#allocation19_spill] sm:$0xff] }
 0x16b   : > { %v9773_v30 = vpop.f32.mrf.mxu0  ;;  %4028 = vmatmul.mubr.bf16.gmra.mxu0 %v9700_v32  ;;  %14275 = vst [vmem:[#allocation47_spill] sm:$0xff] %v9776_v31  ;;  %v9780_v26 = vpop.f32.mrf.mxu1  ;;  %4221 = vmatmul.mubr.bf16.gmra.mxu1 %v9711_v20  ;;  %v9793_v35 = vmul.f32 0.2, %v9758_v49  ;;  %vm1595_vm5 = vcmp.gt.f32.partialorder %v1021_v48, 0.0  ;;  %vm1588_vm6 = vcmp.gt.f32.partialorder %v9771_v43, 0.0  ;;  %v9803_v59 = vadd.f32 %v9504_v52, %v9502_v22 }
 0x16c   : > { %14274 = vst [vmem:[#allocation46_spill] sm:$0xff] %v9765_v7  ;;  %4037 = vmatprep.mubr.bf16.mxu0 %v9762_v2  ;;  %v9799_v57 = vmul.f32 0.2, %v9771_v43  ;;  %v838_v62 = vadd.f32 %v14278_v19, %v9490_v46  ;;  %v2105_v2 = vsel %vm1593_vm3, %v828_v23, %v1849_v37  ;;  %v2084_v20 = vsel %vm1572_vm15, %v9704_v21, %v9729_v10  ;;  %v8264_v32 = vld [vmem:[#allocation3 + $0x424] ss:$16 sps:$4 sm:$0xff]  }
 0x16d   : > { %v9788_v24 = vpop.f32.mrf.mxu0  ;;  %v9795_v14 = vpop.f32.mrf.mxu1  ;;  %4370 = vmatpush1.bf16.msra.mxu0 %v8250_v0  ;;  %4563 = vmatpush1.bf16.msra.mxu1 %v8253_v51  ;;  %v14280_v0 = vld [vmem:[#allocation16_spill] sm:$0xff]  ;;  %v2092_v52 = vsel %vm1580_vm0, %v9733_v15, %v1836_v33  ;;  %v1859_v23 = vmul.f32 0.2, %v1027_v38  ;;  %vm1601_vm7 = vcmp.gt.f32.partialorder %v834_v36, 0.0  ;;  %vm1603_vm8 = vcmp.gt.f32.partialorder %v1027_v38, 0.0  ;;  %v14284_v21 = vld [vmem:[#allocation17_spill] sm:$0xff] }
 0x16e   : > { %14276 = vst [vmem:[#allocation48_spill] sm:$0xff] %v9788_v24  ;;  %14277 = vst [vmem:[#allocation49_spill] sm:$0xff] %v9795_v14  ;;  %4371 = vmatprep.subr.bf16.mxu0 %v8258_v61  ;;  %4564 = vmatprep.subr.bf16.mxu1 %v8261_v29  ;;  %v9812_v51 = vadd.f32 %v14280_v0, %v9512_v56  ;;  %v2107_v61 = vsel %vm1595_vm5, %v1021_v48, %v1851_v45  ;;  %v1857_v29 = vmul.f32 0.2, %v834_v36  ;;  %v8259_v14 = vld [vmem:[#allocation3 + $0x640] ss:$16 sps:$4 sm:$0xff]  }
 0x16f   : > { %v9807_v53 = vpop.f32.mrf.mxu0  ;;  %v9821_v19 = vpop.f32.mrf.mxu1  ;;  %v9824_v37 = vpack.c.bf16 %v2092_v52, %v2084_v20  ;;  %v9830_v10 = vadd.f32 %v14284_v21, %v9502_v22  ;;  %v14285_v15 = vld [vmem:[#allocation20_spill] sm:$0xff]  ;;  %v2099_v20 = vsel %vm1587_vm2, %v9741_v17, %v1843_v27  ;;  %v9839_v52 = vpack.c.bf16 %v2105_v2, %v2097_v54 }
 0x170   : > { %14279 = vst [vmem:[#allocation19_spill] sm:$0xff] %v9807_v53  ;;  %14281 = vst [vmem:[#allocation16_spill] sm:$0xff] %v9821_v19  ;;  %v1031_v33 = vadd.f32 %v14285_v15, %v9497_v44  ;;  %v8262_v48 = vld [vmem:[#allocation3 + $0x420] ss:$16 sps:$4 sm:$0xff]   ;;  %v8267_v45 = vld [vmem:[#allocation3 + $0x624] ss:$16 sps:$4 sm:$0xff]   ;;  %v2113_v27 = vsel %vm1601_vm7, %v834_v36, %v1857_v29 }
 0x171   : > { %14282 = vst [vmem:[#allocation50_spill] sm:$0xff] %v9824_v37  ;;  %v9826_v0 = vpop.f32.mrf.mxu0  ;;  %v9834_v24 = vpop.f32.mrf.mxu1  ;;  %4372 = vmatpush1.bf16.msra.mxu0 %v8256_v41  ;;  %14287 = vst [vmem:[#allocation20_spill] sm:$0xff] %v9839_v52  ;;  %vm1594_vm9 = vcmp.gt.f32.partialorder %v9803_v59, 0.0  ;;  %4230 = vmatprep.mubr.bf16.mxu1 %v9824_v37  ;;  %v8270_v15 = vld [vmem:[#allocation3 + $0x404] ss:$16 sps:$4 sm:$0xff]   ;;  %vm1609_vm10 = vcmp.gt.f32.partialorder %v838_v62, 0.0 }
 0x172   : > { %14283 = vst [vmem:[#allocation51_spill] sm:$0xff] %v9826_v0  ;;  %14286 = vst [vmem:[#allocation17_spill] sm:$0xff] %v9834_v24  ;;  %v1865_v0 = vmul.f32 0.2, %v838_v62  ;;  %v9846_v24 = vpack.c.bf16 %v2107_v61, %v2099_v20  ;;  %v1850_v41 = vmul.f32 0.2, %v9803_v59  ;;  %4373 = vmatprep.subr.bf16.mxu0 %v8264_v32  ;;  %v2115_v61 = vsel %vm1603_vm8, %v1027_v38, %v1859_v23 }
 0x173   : > { %v9843_v21 = vpop.f32.mrf.mxu0  ;;  %4038 = vmatmul.mubr.bf16.gmra.mxu0 %v9765_v7  ;;  %v14290_v19 = vld [vmem:[#allocation18_spill] sm:$0xff]  ;;  %v9853_v17 = vpop.f32.mrf.mxu1  ;;  %4231 = vmatmul.mubr.bf16.gmra.mxu1 %v9776_v31  ;;  %vm1596_vm11 = vcmp.gt.f32.partialorder %v9812_v51, 0.0  ;;  %v1852_v54 = vmul.f32 0.2, %v9812_v51  ;;  %vm1602_vm12 = vcmp.gt.f32.partialorder %v9830_v10, 0.0  ;;  %v14293_v32 = vld [vmem:[#allocation21_spill] sm:$0xff] }
 0x174   : > { %14288 = vst [vmem:[#allocation52_spill] sm:$0xff] %v9843_v21  ;;  %14289 = vst [vmem:[#allocation53_spill] sm:$0xff] %v9846_v24  ;;  %v9851_v25 = vadd.f32 %v14290_v19, %v9512_v56  ;;  %v8265_v2 = vld [vmem:[#allocation3 + $0x620] ss:$16 sps:$4 sm:$0xff]   ;;  %4565 = vmatpush1.bf16.msra.mxu1 %v8259_v14  ;;  %v9864_v7 = vmul.f32 0.2, %v9830_v10  ;;  %v9868_v37 = vadd.f32 %v14293_v32, %v9502_v22 }
 0x175   : > { %14291 = vst [vmem:[#allocation18_spill] sm:$0xff] %v9853_v17  ;;  %v9860_v20 = vpop.f32.mrf.mxu0  ;;  %v8268_v19 = vld [vmem:[#allocation3 + $0x400] ss:$16 sps:$4 sm:$0xff]   ;;  %v1867_v31 = vmul.f32 0.2, %v1031_v33  ;;  %v9870_v17 = vpop.f32.mrf.mxu1  ;;  %4374 = vmatpush1.bf16.msra.mxu0 %v8262_v48  ;;  %v2121_v36 = vsel %vm1609_vm10, %v838_v62, %v1865_v0  ;;  %vm1611_vm13 = vcmp.gt.f32.partialorder %v1031_v33, 0.0  ;;  %4566 = vmatprep.subr.bf16.mxu1 %v8267_v45  ;;  %v9889_v48 = vadd.f32 %v9578_v58, %v9490_v46 }
 0x176   : > { %14292 = vst [vmem:[#allocation54_spill] sm:$0xff] %v9860_v20  ;;  %14294 = vst [vmem:[#allocation21_spill] sm:$0xff] %v9870_v17  ;;  %v14295_v38 = vld [vmem:[#allocation23_spill] sm:$0xff]  ;;  %v14296_v29 = vld [vmem:[#allocation24_spill] sm:$0xff]  ;;  %4375 = vmatprep.subr.bf16.mxu0 %v8270_v15  ;;  %vm1604_vm14 = vcmp.gt.f32.partialorder %v9851_v25, 0.0  ;;  %v2098_v15 = vsel %vm1586_vm4, %v9758_v49, %v9793_v35  ;;  %v2100_v58 = vsel %vm1588_vm6, %v9771_v43, %v9799_v57  ;;  %vm1610_vm15 = vcmp.gt.f32.partialorder %v9868_v37, 0.0 }
 0x177   : > { %v844_v14 = vadd.f32 %v14295_v38, %v9490_v46  ;;  %v1037_v23 = vadd.f32 %v14296_v29, %v9497_v44  ;;  %v9877_v20 = vpop.f32.mrf.mxu0  ;;  %v8273_v21 = vld [vmem:[#allocation3 + $0x604] ss:$16 sps:$4 sm:$0xff]   ;;  %v9881_v32 = vmul.f32 0.2, %v9851_v25  ;;  %v9893_v38 = vadd.f32 %v9586_v5, %v9497_v44  ;;  %v9895_v45 = vpop.f32.mrf.mxu1  ;;  %v8271_v17 = vld [vmem:[#allocation3 + $0x600] ss:$16 sps:$4 sm:$0xff]  }
 0x178   : > { %14297 = vst [vmem:[#allocation23_spill] sm:$0xff] %v9877_v20  ;;  %v8276_v53 = vld [vmem:[#allocation3 + $0x5e4] ss:$16 sps:$4 sm:$0xff]   ;;  %14299 = vst [vmem:[#allocation24_spill] sm:$0xff] %v9895_v45  ;;  %v2106_v29 = vsel %vm1594_vm9, %v9803_v59, %v1850_v41  ;;  %v2108_v5 = vsel %vm1596_vm11, %v9812_v51, %v1852_v54  ;;  %4567 = vmatpush1.bf16.msra.mxu1 %v8265_v2  ;;  %v9913_v45 = vpack.c.bf16 %v2121_v36, %v2113_v27  ;;  %v8274_v43 = vld [vmem:[#allocation3 + $0x5e0] ss:$16 sps:$4 sm:$0xff]  }
 0x179   : > { %v14298_v62 = vld [vmem:[#allocation22_spill] sm:$0xff]  ;;  %v2123_v49 = vsel %vm1611_vm13, %v1031_v33, %v1867_v31  ;;  %v9916_v35 = vpack.c.bf16 %v2106_v29, %v2098_v15  ;;  %v9918_v59 = vpack.c.bf16 %v2108_v5, %v2100_v58  ;;  %v9920_v41 = vpop.f32.mrf.mxu1  ;;  %4376 = vmatpush1.bf16.msra.mxu0 %v8268_v19  ;;  %v1873_v51 = vmul.f32 0.2, %v844_v14  ;;  %4568 = vmatprep.subr.bf16.mxu1 %v8273_v21 }
 0x17a   : > { %v9885_v0 = vadd.f32 %v14298_v62, %v9512_v56  ;;  %v9911_v62 = vpop.f32.mrf.mxu0  ;;  %14300 = vst [vmem:[#allocation22_spill] sm:$0xff] %v9913_v45  ;;  %v8279_v57 = vld [vmem:[#allocation3 + $0x7e4] ss:$16 sps:$4 sm:$0xff]   ;;  %v1875_v54 = vmul.f32 0.2, %v1037_v23  ;;  %v9925_v2 = vadd.f32 %v9565_v1, %v9502_v22  ;;  %4377 = vmatprep.subr.bf16.mxu0 %v8276_v53  ;;  %vm1617_vm1 = vcmp.gt.f32.partialorder %v844_v14, 0.0 }
 0x17b   : > { %14301 = vst [vmem:[#allocation55_spill] sm:$0xff] %v9916_v35  ;;  %14302 = vst [vmem:[#allocation56_spill] sm:$0xff] %v9918_v59  ;;  %v8282_v20 = vld [vmem:[#allocation3 + $0x5c4] ss:$16 sps:$4 sm:$0xff]   ;;  %v1866_v31 = vmul.f32 0.2, %v9868_v37  ;;  %v9932_v33 = vadd.f32 %v9574_v42, %v9512_v56  ;;  %4047 = vmatprep.mubr.bf16.mxu0 %v9916_v35  ;;  %4240 = vmatprep.mubr.bf16.mxu1 %v9918_v59  ;;  %v9936_v19 = vpop.f32.mrf.mxu1  ;;  %v9938_v36 = vpack.c.bf16 %v2123_v49, %v2115_v61 }
 0x17c   : > { %v9927_v27 = vpop.f32.mrf.mxu0  ;;  %vm1619_vm0 = vcmp.gt.f32.partialorder %v1037_v23, 0.0  ;;  %v8277_v1 = vld [vmem:[#allocation3 + $0x7e0] ss:$16 sps:$4 sm:$0xff]   ;;  %vm1612_vm2 = vcmp.gt.f32.partialorder %v9885_v0, 0.0  ;;  %v1881_v53 = vmul.f32 0.2, %v9889_v48  ;;  %4048 = vmatmul.mubr.bf16.gmra.mxu0 %v9839_v52  ;;  %4241 = vmatmul.mubr.bf16.gmra.mxu1 %v9846_v24  ;;  %v854_v61 = vadd.f32 %v9601_v4, %v9490_v46 }
 0x17d   : > { %14303 = vst [vmem:[#allocation57_spill] sm:$0xff] %v9938_v36  ;;  %v1883_v21 = vmul.f32 0.2, %v9893_v38  ;;  %v1868_v15 = vmul.f32 0.2, %v9885_v0  ;;  %vm1625_vm3 = vcmp.gt.f32.partialorder %v9889_v48, 0.0  ;;  %v9952_v29 = vpop.f32.mrf.mxu1  ;;  %4569 = vmatpush1.bf16.msra.mxu1 %v8271_v17  ;;  %4378 = vmatpush2.bf16.msra.mxu0 %v8274_v43  ;;  %v2129_v5 = vsel %vm1617_vm1, %v844_v14, %v1873_v51 }
 0x17e   : > { %v9945_v42 = vpop.f32.mrf.mxu0  ;;  %vm1627_vm4 = vcmp.gt.f32.partialorder %v9893_v38, 0.0  ;;  %v8280_v58 = vld [vmem:[#allocation3 + $0x5c0] ss:$16 sps:$4 sm:$0xff]   ;;  %v2131_v49 = vsel %vm1619_vm0, %v1037_v23, %v1875_v54  ;;  %vm1618_vm5 = vcmp.gt.f32.partialorder %v9925_v2, 0.0  ;;  %v1047_v24 = vadd.f32 %v9609_v6, %v9497_v44  ;;  %4570 = vmatprep.subr.bf16.mxu1 %v8279_v57  ;;  %4379 = vmatprep.subr.bf16.mxu0 %v8282_v20  ;;  %v8285_v59 = vld [vmem:[#allocation3 + $0x7c4] ss:$16 sps:$4 sm:$0xff]  }
 0x17f   : > { %v9962_v4 = vmul.f32 0.2, %v9925_v2  ;;  %v9965_v17 = vmul.f32 0.2, %v9932_v33  ;;  %v850_v14 = vadd.f32 %v9595_v40, %v9502_v22  ;;  %v9971_v23 = vadd.f32 %v9597_v8, %v9512_v56  ;;  %v9973_v43 = vpop.f32.mrf.mxu1  ;;  %v8288_v51 = vld [vmem:[#allocation3 + $0x5a4] ss:$16 sps:$4 sm:$0xff]  }
 0x180   : > { %v9959_v52 = vpop.f32.mrf.mxu0  ;;  %vm1620_vm6 = vcmp.gt.f32.partialorder %v9932_v33, 0.0  ;;  %v2137_v6 = vsel %vm1625_vm3, %v9889_v48, %v1881_v53  ;;  %v2139_v20 = vsel %vm1627_vm4, %v9893_v38, %v1883_v21  ;;  %v2114_v40 = vsel %vm1602_vm12, %v9830_v10, %v9864_v7  ;;  %v8283_v21 = vld [vmem:[#allocation3 + $0x7c0] ss:$16 sps:$4 sm:$0xff]  }
 0x181   : > { %v2122_v8 = vsel %vm1610_vm15, %v9868_v37, %v1866_v31  ;;  %vm1633_vm7 = vcmp.gt.f32.partialorder %v854_v61, 0.0  ;;  %v1889_v54 = vmul.f32 0.2, %v854_v61  ;;  %v858_v48 = vadd.f32 %v9629_v9, %v9490_v46  ;;  %v9995_v38 = vpop.f32.mrf.mxu1  ;;  %4571 = vmatpush2.bf16.msra.mxu1 %v8277_v1  ;;  %4380 = vmatpush2.bf16.msra.mxu0 %v8280_v58  ;;  %v14306_v58 = vld [vmem:[#allocation29_spill] sm:$0xff] }
 0x182   : > { %v9989_v57 = vpop.f32.mrf.mxu0  ;;  %v9993_v53 = vpack.c.bf16 %v2122_v8, %v2114_v40  ;;  %14305 = vst [vmem:[#allocation59_spill] sm:$0xff] %v9995_v38  ;;  %v1891_v7 = vmul.f32 0.2, %v1047_v24  ;;  %v1051_v10 = vadd.f32 %v9636_v47, %v9497_v44  ;;  %v2116_v37 = vsel %vm1604_vm14, %v9851_v25, %v9881_v32  ;;  %4572 = vmatprep.subr.bf16.mxu1 %v8285_v59  ;;  %v8286_v40 = vld [vmem:[#allocation3 + $0x5a0] ss:$16 sps:$4 sm:$0xff]  }
 0x183   : > { %v2124_v9 = vsel %vm1612_vm2, %v9885_v0, %v1868_v15  ;;  %v1882_v1 = vmul.f32 0.2, %v850_v14  ;;  %vm1635_vm8 = vcmp.gt.f32.partialorder %v1047_v24, 0.0  ;;  %v10010_v8 = vadd.f32 %v14306_v58, %v9502_v22  ;;  %v10015_v35 = vpop.f32.mrf.mxu1  ;;  %v8289_v25 = vld [vmem:[#allocation3 + $0x7a0] ss:$16 sps:$4 sm:$0xff]   ;;  %4381 = vmatprep.subr.bf16.mxu0 %v8288_v51  ;;  %v14313_v51 = vld [vmem:[#allocation33_spill] sm:$0xff] }
 0x184   : > { %14304 = vst [vmem:[#allocation58_spill] sm:$0xff] %v9993_v53  ;;  %v10006_v31 = vpop.f32.mrf.mxu0  ;;  %4057 = vmatprep.mubr.bf16.mxu0 %v9993_v53  ;;  %v10013_v47 = vpack.c.bf16 %v2124_v9, %v2116_v37  ;;  %v10017_v32 = vpack.c.bf16 %v2137_v6, %v2129_v5  ;;  %v10019_v0 = vpack.c.bf16 %v2139_v20, %v2131_v49  ;;  %vm1626_vm9 = vcmp.gt.f32.partialorder %v850_v14, 0.0  ;;  %v14310_v59 = vld [vmem:[#allocation30_spill] sm:$0xff] }
 0x185   : > { %v10023_v15 = vadd.f32 %v14310_v59, %v9512_v56  ;;  %4058 = vmatmul.mubr.bf16.gmra.mxu0 %v9913_v45  ;;  %v8291_v53 = vld [vmem:[#allocation3 + $0x7a4] ss:$16 sps:$4 sm:$0xff]   ;;  %vm1628_vm10 = vcmp.gt.f32.partialorder %v9971_v23, 0.0  ;;  %v1884_v9 = vmul.f32 0.2, %v9971_v23  ;;  %v10031_v5 = vsel %vm1633_vm7, %v854_v61, %v1889_v54  ;;  %v10034_v6 = vpop.f32.mrf.mxu1  ;;  %4573 = vmatpush2.bf16.msra.mxu1 %v8283_v21 }
 0x186   : > { %14307 = vst [vmem:[#allocation29_spill] sm:$0xff] %v10013_v47  ;;  %14308 = vst [vmem:[#allocation60_spill] sm:$0xff] %v10017_v32  ;;  %v10026_v58 = vpop.f32.mrf.mxu0  ;;  %v8294_v37 = vld [vmem:[#allocation3 + $0x584] ss:$16 sps:$4 sm:$0xff]   ;;  %v1897_v49 = vmul.f32 0.2, %v858_v48  ;;  %4250 = vmatprep.mubr.bf16.mxu1 %v10013_v47  ;;  %v2147_v20 = vsel %vm1635_vm8, %v1047_v24, %v1891_v7  ;;  %v10039_v45 = vadd.f32 %v14313_v51, %v9502_v22  ;;  %4382 = vmatpush2.bf16.msra.mxu0 %v8286_v40 }
 0x187   : > { %14309 = vst [vmem:[#allocation61_spill] sm:$0xff] %v10019_v0  ;;  %14311 = vst [vmem:[#allocation30_spill] sm:$0xff] %v10026_v58  ;;  %vm1641_vm11 = vcmp.gt.f32.partialorder %v858_v48, 0.0  ;;  %v1899_v59 = vmul.f32 0.2, %v1051_v10  ;;  %4251 = vmatmul.mubr.bf16.gmra.mxu1 %v9938_v36  ;;  %vm1634_vm12 = vcmp.gt.f32.partialorder %v10010_v8, 0.0  ;;  %v868_v54 = vadd.f32 %v9674_v12, %v9490_v46  ;;  %v10048_v24 = vpop.f32.mrf.mxu1  ;;  %4574 = vmatprep.subr.bf16.mxu1 %v8291_v53 }
 0x188   : > { %14312 = vst [vmem:[#allocation62_spill] sm:$0xff] %v10034_v6  ;;  %v10042_v58 = vpop.f32.mrf.mxu0  ;;  %v8297_v61 = vld [vmem:[#allocation3 + $0x784] ss:$16 sps:$4 sm:$0xff]   ;;  %vm1643_vm13 = vcmp.gt.f32.partialorder %v1051_v10, 0.0  ;;  %v2138_v21 = vsel %vm1626_vm9, %v850_v14, %v1882_v1  ;;  %v8292_v7 = vld [vmem:[#allocation3 + $0x580] ss:$16 sps:$4 sm:$0xff]   ;;  %v864_v47 = vadd.f32 %v9653_v63, %v9490_v46  ;;  %4383 = vmatprep.subr.bf16.mxu0 %v8294_v37  ;;  %v2153_v12 = vsel %vm1641_vm11, %v858_v48, %v1897_v49 }
 0x189   : > { %14314 = vst [vmem:[#allocation33_spill] sm:$0xff] %v10042_v58  ;;  %v10051_v51 = vmul.f32 0.2, %v10010_v8  ;;  %v10054_v36 = vmul.f32 0.2, %v10023_v15  ;;  %v14315_v6 = vld [vmem:[#allocation37_spill] sm:$0xff]  ;;  %v2130_v63 = vsel %vm1618_vm5, %v9925_v2, %v9962_v4  ;;  %v10072_v1 = vpop.f32.mrf.mxu1  ;;  %4575 = vmatpush2.bf16.msra.mxu1 %v8289_v25  ;;  %v2155_v37 = vsel %vm1643_vm13, %v1051_v10, %v1899_v59 }
 0x18a   : > { %v1057_v38 = vadd.f32 %v14315_v6, %v9497_v44  ;;  %v10060_v58 = vpop.f32.mrf.mxu0  ;;  %vm1636_vm14 = vcmp.gt.f32.partialorder %v10023_v15, 0.0  ;;  %v14317_v14 = vld [vmem:[#allocation34_spill] sm:$0xff]  ;;  %vm1642_vm15 = vcmp.gt.f32.partialorder %v10039_v45, 0.0  ;;  %v1061_v48 = vadd.f32 %v9680_v55, %v9497_v44  ;;  %4576 = vmatprep.subr.bf16.mxu1 %v8297_v61  ;;  %4384 = vmatpush2.bf16.msra.mxu0 %v8292_v7 }
 0x18b   : > { %14316 = vst [vmem:[#allocation37_spill] sm:$0xff] %v10060_v58  ;;  %v10066_v40 = vadd.f32 %v14317_v14, %v9512_v56  ;;  %v8295_v53 = vld [vmem:[#allocation3 + $0x780] ss:$16 sps:$4 sm:$0xff]   ;;  %v10079_v49 = vpack.c.bf16 %v2138_v21, %v2130_v63  ;;  %v8300_v58 = vld [vmem:[#allocation3 + $0x564] ss:$16 sps:$4 sm:$0xff]   ;;  %v2132_v25 = vsel %vm1620_vm6, %v9932_v33, %v9965_v17  ;;  %v2140_v10 = vsel %vm1628_vm10, %v9971_v23, %v1884_v9  ;;  %v10091_v59 = vpop.f32.mrf.mxu1 }
 0x18c   : > { %v10081_v14 = vpop.f32.mrf.mxu0  ;;  %v1898_v2 = vmul.f32 0.2, %v10039_v45  ;;  %v1913_v4 = vmul.f32 0.2, %v868_v54  ;;  %v8298_v55 = vld [vmem:[#allocation3 + $0x560] ss:$16 sps:$4 sm:$0xff]   ;;  %v10094_v61 = vpack.c.bf16 %v2140_v10, %v2132_v25  ;;  %v10104_v23 = vadd.f32 %v9668_v3, %v9512_v56  ;;  %4385 = vmatprep.subr.bf16.mxu0 %v8300_v58 }
 0x18d   : > { %14318 = vst [vmem:[#allocation34_spill] sm:$0xff] %v10079_v49  ;;  %v1905_v21 = vmul.f32 0.2, %v864_v47  ;;  %v1907_v63 = vmul.f32 0.2, %v1057_v38  ;;  %vm1657_vm1 = vcmp.gt.f32.partialorder %v868_v54, 0.0  ;;  %4067 = vmatprep.mubr.bf16.mxu0 %v10079_v49  ;;  %v10107_v9 = vpop.f32.mrf.mxu1  ;;  %4577 = vmatpush2.bf16.msra.mxu1 %v8295_v53  ;;  %v10110_v10 = vpack.c.bf16 %v2153_v12, %v10031_v5 }
 0x18e   : > { %14319 = vst [vmem:[#allocation63_spill] sm:$0xff] %v10094_v61  ;;  %v10096_v6 = vpop.f32.mrf.mxu0  ;;  %vm1649_vm0 = vcmp.gt.f32.partialorder %v864_v47, 0.0  ;;  %vm1651_vm2 = vcmp.gt.f32.partialorder %v1057_v38, 0.0  ;;  %v14321_v33 = vld [vmem:[#allocation38_spill] sm:$0xff]  ;;  %4068 = vmatmul.mubr.bf16.gmra.mxu0 %v10017_v32  ;;  %v10112_v49 = vpack.c.bf16 %v2155_v37, %v2147_v20  ;;  %vm1644_vm3 = vcmp.gt.f32.partialorder %v10066_v40, 0.0  ;;  %4260 = vmatprep.mubr.bf16.mxu1 %v10094_v61 }
 0x18f   : > { %14320 = vst [vmem:[#allocation64_spill] sm:$0xff] %v10096_v6  ;;  %v10100_v17 = vadd.f32 %v14321_v33, %v9502_v22  ;;  %v8303_v7 = vld [vmem:[#allocation3 + $0x764] ss:$16 sps:$4 sm:$0xff]   ;;  %14322 = vst [vmem:[#allocation38_spill] sm:$0xff] %v10110_v10  ;;  %v1915_v33 = vmul.f32 0.2, %v1061_v48  ;;  %v2169_v53 = vsel %vm1657_vm1, %v868_v54, %v1913_v4  ;;  %v10122_v5 = vadd.f32 %v9690_v11, %v9502_v22  ;;  %v10125_v20 = vpop.f32.mrf.mxu1 }
 0x190   : > { %v8306_v25 = vld [vmem:[#allocation3 + $0x544] ss:$16 sps:$4 sm:$0xff]   ;;  %14323 = vst [vmem:[#allocation65_spill] sm:$0xff] %v10112_v49  ;;  %v10116_v6 = vpop.f32.mrf.mxu0  ;;  %v8301_v3 = vld [vmem:[#allocation3 + $0x760] ss:$16 sps:$4 sm:$0xff]   ;;  %vm1659_vm4 = vcmp.gt.f32.partialorder %v1061_v48, 0.0  ;;  %4261 = vmatmul.mubr.bf16.gmra.mxu1 %v10019_v0  ;;  %v2161_v37 = vsel %vm1649_vm0, %v864_v47, %v1905_v21  ;;  %v2163_v61 = vsel %vm1651_vm2, %v1057_v38, %v1907_v63  ;;  %v874_v58 = vadd.f32 %v9706_v18, %v9490_v46 }
 0x191   : > { %v1900_v32 = vmul.f32 0.2, %v10066_v40  ;;  %v8309_v12 = vld [vmem:[#allocation3 + $0x744] ss:$16 sps:$4 sm:$0xff]   ;;  %v2154_v54 = vsel %vm1642_vm15, %v10039_v45, %v1898_v2  ;;  %4386 = vmatpush2.bf16.msra.mxu0 %v8298_v55  ;;  %v8304_v11 = vld [vmem:[#allocation3 + $0x540] ss:$16 sps:$4 sm:$0xff]   ;;  %v1067_v38 = vadd.f32 %v9715_v39, %v9497_v44  ;;  %v10145_v18 = vpop.f32.mrf.mxu1  ;;  %4578 = vmatprep.subr.bf16.mxu1 %v8303_v7  ;;  %v10148_v45 = vpack.c.bf16 %v2169_v53, %v2161_v37 }
 0x192   : > { %v10134_v4 = vpop.f32.mrf.mxu0  ;;  %vm1650_vm5 = vcmp.gt.f32.partialorder %v10100_v17, 0.0  ;;  %v10138_v0 = vmul.f32 0.2, %v10100_v17  ;;  %v10141_v47 = vmul.f32 0.2, %v10104_v23  ;;  %4387 = vmatprep.subr.bf16.mxu0 %v8306_v25  ;;  %vm1652_vm6 = vcmp.gt.f32.partialorder %v10104_v23, 0.0  ;;  %4579 = vmatpush2.bf16.msra.mxu1 %v8301_v3 }
 0x193   : > { %14324 = vst [vmem:[#allocation66_spill] sm:$0xff] %v10148_v45  ;;  %v2171_v2 = vsel %vm1659_vm4, %v1061_v48, %v1915_v33  ;;  %v10153_v55 = vadd.f32 %v9695_v34, %v9512_v56  ;;  %v2146_v21 = vsel %vm1634_vm12, %v10010_v8, %v10051_v51  ;;  %v8307_v63 = vld [vmem:[#allocation3 + $0x740] ss:$16 sps:$4 sm:$0xff]   ;;  %vm1658_vm7 = vcmp.gt.f32.partialorder %v10122_v5, 0.0  ;;  %v10168_v34 = vpop.f32.mrf.mxu1  ;;  %4580 = vmatprep.subr.bf16.mxu1 %v8309_v12  ;;  %v8312_v33 = vld [vmem:[#allocation3 + $0x524] ss:$16 sps:$4 sm:$0xff]  }
 0x194   : > { %v10159_v39 = vpop.f32.mrf.mxu0  ;;  %v878_v7 = vadd.f32 %v9735_v50, %v9490_v46  ;;  %v1071_v48 = vadd.f32 %v9745_v28, %v9497_v44  ;;  %v10166_v25 = vpack.c.bf16 %v2154_v54, %v2146_v21  ;;  %14326 = vst [vmem:[#allocation68_spill] sm:$0xff] %v10168_v34  ;;  %v1914_v8 = vmul.f32 0.2, %v10122_v5  ;;  %v8310_v28 = vld [vmem:[#allocation3 + $0x520] ss:$16 sps:$4 sm:$0xff]  }
 0x195   : > { %v1921_v51 = vmul.f32 0.2, %v874_v58  ;;  %v2148_v3 = vsel %vm1636_vm14, %v10023_v15, %v10054_v36  ;;  %v2156_v50 = vsel %vm1644_vm3, %v10066_v40, %v1900_v32  ;;  %4388 = vmatpush2.bf16.msra.mxu0 %v8304_v11  ;;  %v10180_v37 = vpack.c.bf16 %v2171_v2, %v2163_v61  ;;  %v10185_v21 = vpop.f32.mrf.mxu1  ;;  %v8315_v34 = vld [vmem:[#allocation3 + $0x724] ss:$16 sps:$4 sm:$0xff]  }
 0x196   : > { %14325 = vst [vmem:[#allocation67_spill] sm:$0xff] %v10166_v25  ;;  %v10178_v53 = vpop.f32.mrf.mxu0  ;;  %vm1665_vm8 = vcmp.gt.f32.partialorder %v874_v58, 0.0  ;;  %v1923_v12 = vmul.f32 0.2, %v1067_v38  ;;  %4077 = vmatprep.mubr.bf16.mxu0 %v10166_v25  ;;  %v10183_v54 = vpack.c.bf16 %v2156_v50, %v2148_v3  ;;  %14330 = vst [vmem:[#allocation72_spill] sm:$0xff] %v10185_v21  ;;  %vm1660_vm9 = vcmp.gt.f32.partialorder %v10153_v55, 0.0  ;;  %4581 = vmatpush2.bf16.msra.mxu1 %v8307_v63 }
 0x197   : > { %14327 = vst [vmem:[#allocation69_spill] sm:$0xff] %v10178_v53  ;;  %14328 = vst [vmem:[#allocation70_spill] sm:$0xff] %v10180_v37  ;;  %v1916_v36 = vmul.f32 0.2, %v10153_v55  ;;  %vm1667_vm10 = vcmp.gt.f32.partialorder %v1067_v38, 0.0  ;;  %v10191_v32 = vadd.f32 %v9722_v13, %v9502_v22  ;;  %4078 = vmatmul.mubr.bf16.gmra.mxu0 %v10110_v10  ;;  %v10198_v61 = vadd.f32 %v9725_v60, %v9512_v56  ;;  %v14331_v3 = vld [vmem:[#allocation43_spill] sm:$0xff]  ;;  %v10205_v13 = vpop.f32.mrf.mxu1 }
 0x198   : > { %14329 = vst [vmem:[#allocation71_spill] sm:$0xff] %v10183_v54  ;;  %v10194_v15 = vpop.f32.mrf.mxu0  ;;  %v8318_v40 = vld [vmem:[#allocation3 + $0x504] ss:$16 sps:$4 sm:$0xff]   ;;  %v1929_v11 = vmul.f32 0.2, %v878_v7  ;;  %v10202_v50 = vadd.f32 %v14331_v3, %v9502_v22  ;;  %4270 = vmatprep.mubr.bf16.mxu1 %v10183_v54  ;;  %4389 = vmatprep.subr.bf16.mxu0 %v8312_v33  ;;  %v2177_v25 = vsel %vm1665_vm8, %v874_v58, %v1921_v51  ;;  %vm1673_vm11 = vcmp.gt.f32.partialorder %v878_v7, 0.0 }
 0x199   : > { %v1931_v2 = vmul.f32 0.2, %v1071_v48  ;;  %v8313_v10 = vld [vmem:[#allocation3 + $0x720] ss:$16 sps:$4 sm:$0xff]   ;;  %vm1675_vm12 = vcmp.gt.f32.partialorder %v1071_v48, 0.0  ;;  %v884_v60 = vadd.f32 %v9773_v30, %v9490_v46  ;;  %4271 = vmatmul.mubr.bf16.gmra.mxu1 %v10112_v49  ;;  %v2179_v3 = vsel %vm1667_vm10, %v1067_v38, %v1923_v12  ;;  %v14333_v33 = vld [vmem:[#allocation19_spill] sm:$0xff]  ;;  %v10221_v51 = vpop.f32.mrf.mxu1  ;;  %4390 = vmatpush2.bf16.msra.mxu0 %v8310_v28 }
 0x19a   : > { %v10211_v63 = vpop.f32.mrf.mxu0  ;;  %v8321_v21 = vld [vmem:[#allocation3 + $0x704] ss:$16 sps:$4 sm:$0xff]   ;;  %v1077_v54 = vadd.f32 %v9780_v26, %v9497_v44  ;;  %v888_v53 = vadd.f32 %v14333_v33, %v9490_v46  ;;  %v2170_v58 = vsel %vm1658_vm7, %v10122_v5, %v1914_v8  ;;  %14334 = vst [vmem:[#allocation19_spill] sm:$0xff] %v10221_v51  ;;  %v8316_v30 = vld [vmem:[#allocation3 + $0x500] ss:$16 sps:$4 sm:$0xff]   ;;  %vm1666_vm13 = vcmp.gt.f32.partialorder %v10191_v32, 0.0  ;;  %4582 = vmatprep.subr.bf16.mxu1 %v8315_v34 }
 0x19b   : > { %14332 = vst [vmem:[#allocation43_spill] sm:$0xff] %v10211_v63  ;;  %v10225_v49 = vmul.f32 0.2, %v10191_v32  ;;  %v14335_v38 = vld [vmem:[#allocation44_spill] sm:$0xff]  ;;  %4391 = vmatprep.subr.bf16.mxu0 %v8318_v40  ;;  %vm1668_vm14 = vcmp.gt.f32.partialorder %v10198_v61, 0.0  ;;  %v2185_v5 = vsel %vm1673_vm11, %v878_v7, %v1929_v11  ;;  %v2187_v8 = vsel %vm1675_vm12, %v1071_v48, %v1931_v2  ;;  %v10243_v51 = vpop.f32.mrf.mxu1  ;;  %4583 = vmatpush2.bf16.msra.mxu1 %v8313_v10 }
 0x19c   : > { %v10229_v12 = vadd.f32 %v14335_v38, %v9512_v56  ;;  %v14336_v26 = vld [vmem:[#allocation16_spill] sm:$0xff]  ;;  %v10233_v63 = vpop.f32.mrf.mxu0  ;;  %v1930_v28 = vmul.f32 0.2, %v10202_v50  ;;  %v2162_v38 = vsel %vm1650_vm5, %v10100_v17, %v10138_v0  ;;  %14337 = vst [vmem:[#allocation44_spill] sm:$0xff] %v10243_v51  ;;  %vm1674_vm15 = vcmp.gt.f32.partialorder %v10202_v50, 0.0  ;;  %4584 = vmatprep.subr.bf16.mxu1 %v8321_v21 }
 0x19d   : > { %v1081_v33 = vadd.f32 %v14336_v26, %v9497_v44  ;;  %v8319_v26 = vld [vmem:[#allocation3 + $0x700] ss:$16 sps:$4 sm:$0xff]   ;;  %vm1681_vm1 = vcmp.gt.f32.partialorder %v884_v60, 0.0  ;;  %v1937_v34 = vmul.f32 0.2, %v884_v60  ;;  %v10246_v40 = vpack.c.bf16 %v2170_v58, %v2162_v38  ;;  %v10257_v10 = vpop.f32.mrf.mxu1  ;;  %4392 = vmatpush2.bf16.msra.mxu0 %v8316_v30 }
 0x19e   : > { %v10248_v7 = vpop.f32.mrf.mxu0  ;;  %v8324_v48 = vld [vmem:[#allocation3 + $0xec] ss:$16 sps:$4 sm:$0xff]   ;;  %v1939_v11 = vmul.f32 0.2, %v1077_v54  ;;  %v1945_v2 = vmul.f32 0.2, %v888_v53  ;;  %v2164_v0 = vsel %vm1652_vm6, %v10104_v23, %v10141_v47  ;;  %v2172_v17 = vsel %vm1660_vm9, %v10153_v55, %v1916_v36 }
 0x19f   : > { %14338 = vst [vmem:[#allocation16_spill] sm:$0xff] %v10246_v40  ;;  %14339 = vst [vmem:[#allocation73_spill] sm:$0xff] %v10248_v7  ;;  %vm1683_vm0 = vcmp.gt.f32.partialorder %v1077_v54, 0.0  ;;  %vm1689_vm2 = vcmp.gt.f32.partialorder %v888_v53, 0.0  ;;  %v1947_v58 = vmul.f32 0.2, %v1081_v33  ;;  %4087 = vmatprep.mubr.bf16.mxu0 %v10246_v40  ;;  %v10260_v21 = vpack.c.bf16 %v2172_v17, %v2164_v0  ;;  %v10277_v0 = vpop.f32.mrf.mxu1  ;;  %4585 = vmatpush2.bf16.msra.mxu1 %v8319_v26 }
 0x1a0   : > { %14340 = vst [vmem:[#allocation74_spill] sm:$0xff] %v10257_v10  ;;  %v10262_v38 = vpop.f32.mrf.mxu0  ;;  %v8327_v7 = vld [vmem:[#allocation3 + $0x2ec] ss:$16 sps:$4 sm:$0xff]   ;;  %vm1691_vm3 = vcmp.gt.f32.partialorder %v1081_v33, 0.0  ;;  %4088 = vmatmul.mubr.bf16.gmra.mxu0 %v10148_v45  ;;  %v1924_v17 = vmul.f32 0.2, %v10198_v61  ;;  %v10280_v40 = vpack.c.bf16 %v2185_v5, %v2177_v25  ;;  %4747 = vmatprep.subr.bf16.mxu0 %v8324_v48  ;;  %v2193_v45 = vsel %vm1681_vm1, %v884_v60, %v1937_v34 }
 0x1a1   : > { %14341 = vst [vmem:[#allocation75_spill] sm:$0xff] %v10260_v21  ;;  %v14342_v51 = vld [vmem:[#allocation48_spill] sm:$0xff]  ;;  %v14343_v47 = vld [vmem:[#allocation49_spill] sm:$0xff]  ;;  %v14344_v36 = vld [vmem:[#allocation51_spill] sm:$0xff]  ;;  %vm1676_vm4 = vcmp.gt.f32.partialorder %v10229_v12, 0.0  ;;  %4280 = vmatprep.mubr.bf16.mxu1 %v10260_v21  ;;  %v2201_v10 = vsel %vm1689_vm2, %v888_v53, %v1945_v2  ;;  %v10294_v25 = vpop.f32.mrf.mxu1  ;;  %v2203_v5 = vsel %vm1691_vm3, %v1081_v33, %v1947_v58  ;;  %v2186_v60 = vsel %vm1674_vm15, %v10202_v50, %v1930_v28 }
 0x1a2   : > { %v10266_v23 = vadd.f32 %v14342_v51, %v9502_v22  ;;  %v10270_v55 = vadd.f32 %v14343_v47, %v9512_v56  ;;  %v10274_v30 = vadd.f32 %v14344_v36, %v9502_v22  ;;  %14345 = vst [vmem:[#allocation48_spill] sm:$0xff] %v10277_v0  ;;  %14346 = vst [vmem:[#allocation49_spill] sm:$0xff] %v10280_v40  ;;  %v10286_v47 = vpop.f32.mrf.mxu0  ;;  %v1932_v36 = vmul.f32 0.2, %v10229_v12  ;;  %v14348_v26 = vld [vmem:[#allocation23_spill] sm:$0xff]  ;;  %v14350_v33 = vld [vmem:[#allocation18_spill] sm:$0xff] }
 0x1a3   : > { %v10282_v51 = vpack.c.bf16 %v2187_v8, %v2179_v3  ;;  %v898_v0 = vadd.f32 %v14348_v26, %v9490_v46  ;;  %4281 = vmatmul.mubr.bf16.gmra.mxu1 %v10180_v37  ;;  %v2195_v3 = vsel %vm1683_vm0, %v1077_v54, %v1939_v11  ;;  %v14349_v8 = vld [vmem:[#allocation52_spill] sm:$0xff]  ;;  %4940 = vmatprep.subr.bf16.mxu1 %v8327_v7  ;;  %v10316_v58 = vpop.f32.mrf.mxu1  ;;  %v14353_v28 = vld [vmem:[#allocation17_spill] sm:$0xff] }
 0x1a4   : > { %v894_v48 = vadd.f32 %v14349_v8, %v9490_v46  ;;  %v10303_v34 = vpop.f32.mrf.mxu0  ;;  %v10306_v53 = vmul.f32 0.2, %v10266_v23  ;;  %v10309_v2 = vmul.f32 0.2, %v10270_v55  ;;  %v10312_v54 = vmul.f32 0.2, %v10274_v30 }
 0x1a5   : > { %14347 = vst [vmem:[#allocation51_spill] sm:$0xff] %v10282_v51  ;;  %v1087_v11 = vadd.f32 %v14350_v33, %v9497_v44  ;;  %14351 = vst [vmem:[#allocation23_spill] sm:$0xff] %v10316_v58  ;;  %vm1682_vm5 = vcmp.gt.f32.partialorder %v10266_v23, 0.0  ;;  %vm1684_vm6 = vcmp.gt.f32.partialorder %v10270_v55, 0.0  ;;  %v10320_v50 = vpack.c.bf16 %v2201_v10, %v2193_v45  ;;  %v14354_v26 = vld [vmem:[#allocation24_spill] sm:$0xff]  ;;  %v10342_v58 = vpop.f32.mrf.mxu1 }
 0x1a6   : > { %vm1690_vm7 = vcmp.gt.f32.partialorder %v10274_v30, 0.0  ;;  %v10325_v7 = vadd.f32 %v14353_v28, %v9512_v56  ;;  %v1091_v8 = vadd.f32 %v14354_v26, %v9497_v44  ;;  %v2178_v33 = vsel %vm1666_vm13, %v10191_v32, %v10225_v49  ;;  %v10333_v37 = vpop.f32.mrf.mxu0  ;;  %14358 = vst [vmem:[#allocation76_spill] sm:$0xff] %v10342_v58 }
 0x1a7   : > { %14352 = vst [vmem:[#allocation52_spill] sm:$0xff] %v10320_v50  ;;  %14355 = vst [vmem:[#allocation18_spill] sm:$0xff] %v10333_v37  ;;  %v10335_v21 = vpack.c.bf16 %v2203_v5, %v2195_v3  ;;  %v1961_v45 = vmul.f32 0.2, %v898_v0  ;;  %v10337_v10 = vpack.c.bf16 %v2186_v60, %v2178_v33  ;;  %v2188_v28 = vsel %vm1676_vm4, %v10229_v12, %v1932_v36  ;;  %v14359_v5 = vld [vmem:[#allocation54_spill] sm:$0xff]  ;;  %v10356_v36 = vpop.f32.mrf.mxu1  ;;  %v14361_v33 = vld [vmem:[#allocation21_spill] sm:$0xff] }
 0x1a8   : > { %vm1697_vm8 = vcmp.gt.f32.partialorder %v894_v48, 0.0  ;;  %v1953_v26 = vmul.f32 0.2, %v894_v48  ;;  %vm1705_vm9 = vcmp.gt.f32.partialorder %v898_v0, 0.0  ;;  %v2180_v49 = vsel %vm1668_vm14, %v10198_v61, %v1924_v17  ;;  %v10347_v32 = vpop.f32.mrf.mxu0 }
 0x1a9   : > { %14356 = vst [vmem:[#allocation17_spill] sm:$0xff] %v10335_v21  ;;  %14357 = vst [vmem:[#allocation24_spill] sm:$0xff] %v10337_v10  ;;  %vm1699_vm10 = vcmp.gt.f32.partialorder %v1087_v11, 0.0  ;;  %v1955_v3 = vmul.f32 0.2, %v1087_v11  ;;  %v10351_v60 = vadd.f32 %v14359_v5, %v9502_v22  ;;  %4097 = vmatprep.mubr.bf16.mxu0 %v10337_v10  ;;  %v10354_v12 = vpack.c.bf16 %v2188_v28, %v2180_v49  ;;  %v10376_v10 = vpop.f32.mrf.mxu1 }
 0x1aa   : > { %v10360_v58 = vadd.f32 %v14361_v33, %v9512_v56  ;;  %vm1707_vm11 = vcmp.gt.f32.partialorder %v1091_v8, 0.0  ;;  %v1963_v61 = vmul.f32 0.2, %v1091_v8  ;;  %v10364_v17 = vadd.f32 %v9911_v62, %v9502_v22  ;;  %4098 = vmatmul.mubr.bf16.gmra.mxu0 %v10280_v40  ;;  %v10367_v5 = vpop.f32.mrf.mxu0  ;;  %14362 = vst [vmem:[#allocation21_spill] sm:$0xff] %v10376_v10 }
 0x1ab   : > { %14360 = vst [vmem:[#allocation54_spill] sm:$0xff] %v10354_v12  ;;  %v2217_v37 = vsel %vm1705_vm9, %v898_v0, %v1961_v45  ;;  %v904_v28 = vadd.f32 %v9927_v27, %v9490_v46  ;;  %v1097_v49 = vadd.f32 %v9936_v19, %v9497_v44  ;;  %v908_v33 = vadd.f32 %v9959_v52, %v9490_v46  ;;  %v10395_v10 = vpop.f32.mrf.mxu1 }
 0x1ac   : > { %4290 = vmatprep.mubr.bf16.mxu1 %v10354_v12  ;;  %vm1692_vm12 = vcmp.gt.f32.partialorder %v10325_v7, 0.0  ;;  %v1948_v62 = vmul.f32 0.2, %v10325_v7  ;;  %v2209_v40 = vsel %vm1697_vm8, %v894_v48, %v1953_v26  ;;  %v1101_v0 = vadd.f32 %v9973_v43, %v9497_v44  ;;  %v10384_v27 = vpop.f32.mrf.mxu0  ;;  %14364 = vst [vmem:[#allocation78_spill] sm:$0xff] %v10395_v10 }
 0x1ad   : > { %4291 = vmatmul.mubr.bf16.gmra.mxu1 %v10282_v51  ;;  %14363 = vst [vmem:[#allocation77_spill] sm:$0xff] %v10384_v27  ;;  %v2211_v19 = vsel %vm1699_vm10, %v1087_v11, %v1955_v3  ;;  %v10388_v52 = vmul.f32 0.2, %v10351_v60  ;;  %v10392_v45 = vadd.f32 %v9920_v41, %v9512_v56  ;;  %v10398_v48 = vmul.f32 0.2, %v10360_v58  ;;  %v10411_v51 = vpop.f32.mrf.mxu1 }
 0x1ae   : > { %v10400_v43 = vpack.c.bf16 %v2217_v37, %v2209_v40  ;;  %v2219_v26 = vsel %vm1707_vm11, %v1091_v8, %v1963_v61  ;;  %v10404_v11 = vmul.f32 0.2, %v10364_v17  ;;  %v10406_v3 = vpop.f32.mrf.mxu0  ;;  %vm1698_vm13 = vcmp.gt.f32.partialorder %v10351_v60, 0.0  ;;  %14367 = vst [vmem:[#allocation81_spill] sm:$0xff] %v10411_v51 }
 0x1af   : > { %14366 = vst [vmem:[#allocation80_spill] sm:$0xff] %v10406_v3  ;;  %vm1700_vm14 = vcmp.gt.f32.partialorder %v10360_v58, 0.0  ;;  %vm1706_vm15 = vcmp.gt.f32.partialorder %v10364_v17, 0.0  ;;  %vm1713_vm1 = vcmp.gt.f32.partialorder %v904_v28, 0.0  ;;  %v1969_v41 = vmul.f32 0.2, %v904_v28 }
 0x1b0   : > { %14365 = vst [vmem:[#allocation79_spill] sm:$0xff] %v10400_v43  ;;  %vm1715_vm0 = vcmp.gt.f32.partialorder %v1097_v49, 0.0  ;;  %v1977_v12 = vmul.f32 0.2, %v908_v33  ;;  %v1971_v37 = vmul.f32 0.2, %v1097_v49  ;;  %v10415_v40 = vadd.f32 %v9945_v42, %v9502_v22  ;;  %v10417_v61 = vpop.f32.mrf.mxu0 }
 0x1b1   : > { %vm1721_vm2 = vcmp.gt.f32.partialorder %v908_v33, 0.0  ;;  %v1979_v8 = vmul.f32 0.2, %v1101_v0  ;;  %14368 = vst [vmem:[#allocation82_spill] sm:$0xff] %v10417_v61  ;;  %v2194_v3 = vsel %vm1682_vm5, %v10266_v23, %v10306_v53  ;;  %v2202_v10 = vsel %vm1690_vm7, %v10274_v30, %v10312_v54  ;;  %v10434_v61 = vpop.f32.mrf.mxu1 }
 0x1b2   : > { %v2196_v42 = vsel %vm1684_vm6, %v10270_v55, %v10309_v2  ;;  %v2204_v51 = vsel %vm1692_vm12, %v10325_v7, %v1948_v62  ;;  %v10438_v27 = vadd.f32 %v9952_v29, %v9512_v56  ;;  %vm1723_vm3 = vcmp.gt.f32.partialorder %v1101_v0, 0.0  ;;  %v10444_v30 = vpop.f32.mrf.mxu0 }
 0x1b3   : > { %v10440_v23 = vpack.c.bf16 %v2202_v10, %v2194_v3  ;;  %v10442_v53 = vpack.c.bf16 %v2204_v51, %v2196_v42  ;;  %v2233_v54 = vsel %vm1721_vm2, %v908_v33, %v1977_v12  ;;  %v10448_v55 = vadd.f32 %v9989_v57, %v9502_v22  ;;  %v10458_v7 = vpop.f32.mrf.mxu1  ;;  %v14372_v51 = vld [vmem:[#allocation33_spill] sm:$0xff] }
 0x1b4   : > { %v10452_v2 = vadd.f32 %v10006_v31, %v9490_v46  ;;  %v10456_v29 = vadd.f32 %v10015_v35, %v9497_v44  ;;  %v10460_v10 = vpack.c.bf16 %v2219_v26, %v2211_v19  ;;  %vm1708_vm4 = vcmp.gt.f32.partialorder %v10392_v45, 0.0  ;;  %v10469_v31 = vpop.f32.mrf.mxu0 }
 0x1b5   : > { %14369 = vst [vmem:[#allocation83_spill] sm:$0xff] %v10440_v23  ;;  %14370 = vst [vmem:[#allocation84_spill] sm:$0xff] %v10442_v53  ;;  %v918_v12 = vadd.f32 %v14372_v51, %v9490_v46  ;;  %v1111_v57 = vadd.f32 %v10048_v24, %v9497_v44  ;;  %4107 = vmatprep.mubr.bf16.mxu0 %v10440_v23  ;;  %4300 = vmatprep.mubr.bf16.mxu1 %v10442_v53  ;;  %v1964_v35 = vmul.f32 0.2, %v10392_v45  ;;  %v10477_v26 = vpop.f32.mrf.mxu1  ;;  %v14380_v53 = vld [vmem:[#allocation62_spill] sm:$0xff] }
 0x1b6   : > { %14371 = vst [vmem:[#allocation85_spill] sm:$0xff] %v10460_v10  ;;  %v2225_v33 = vsel %vm1713_vm1, %v904_v28, %v1969_v41  ;;  %v2227_v62 = vsel %vm1715_vm0, %v1097_v49, %v1971_v37  ;;  %v2235_v19 = vsel %vm1723_vm3, %v1101_v0, %v1979_v8  ;;  %4108 = vmatmul.mubr.bf16.gmra.mxu0 %v10320_v50  ;;  %v10480_v24 = vmul.f32 0.2, %v10415_v40  ;;  %v14374_v28 = vld [vmem:[#allocation59_spill] sm:$0xff]  ;;  %v10491_v49 = vpop.f32.mrf.mxu0 }
 0x1b7   : > { %4301 = vmatmul.mubr.bf16.gmra.mxu1 %v10335_v21  ;;  %v10483_v3 = vmul.f32 0.2, %v10438_v27  ;;  %v10485_v42 = vpack.c.bf16 %v2233_v54, %v2225_v33  ;;  %v10489_v41 = vadd.f32 %v14374_v28, %v9512_v56  ;;  %14375 = vst [vmem:[#allocation59_spill] sm:$0xff] %v10491_v49  ;;  %vm1722_vm5 = vcmp.gt.f32.partialorder %v10448_v55, 0.0  ;;  %v10497_v37 = vpop.f32.mrf.mxu1  ;;  %v14379_v21 = vld [vmem:[#allocation30_spill] sm:$0xff] }
 0x1b8   : > { %vm1729_vm6 = vcmp.gt.f32.partialorder %v10452_v2, 0.0  ;;  %v1985_v0 = vmul.f32 0.2, %v10452_v2  ;;  %vm1731_vm7 = vcmp.gt.f32.partialorder %v10456_v29, 0.0  ;;  %14376 = vst [vmem:[#allocation86_spill] sm:$0xff] %v10497_v37  ;;  %vm1714_vm8 = vcmp.gt.f32.partialorder %v10415_v40, 0.0  ;;  %v10503_v28 = vpop.f32.mrf.mxu0 }
 0x1b9   : > { %14373 = vst [vmem:[#allocation33_spill] sm:$0xff] %v10485_v42  ;;  %v10500_v8 = vpack.c.bf16 %v2235_v19, %v2227_v62  ;;  %v1987_v54 = vmul.f32 0.2, %v10456_v29  ;;  %v1993_v51 = vmul.f32 0.2, %v918_v12  ;;  %14378 = vst [vmem:[#allocation88_spill] sm:$0xff] %v10503_v28  ;;  %v10508_v50 = vadd.f32 %v14379_v21, %v9502_v22  ;;  %v10514_v62 = vpop.f32.mrf.mxu1 }
 0x1ba   : > { %v1995_v33 = vmul.f32 0.2, %v1111_v57  ;;  %vm1716_vm9 = vcmp.gt.f32.partialorder %v10438_v27, 0.0  ;;  %v10512_v23 = vadd.f32 %v14380_v53, %v9512_v56  ;;  %vm1737_vm10 = vcmp.gt.f32.partialorder %v918_v12, 0.0  ;;  %14381 = vst [vmem:[#allocation30_spill] sm:$0xff] %v10514_v62  ;;  %v10531_v49 = vpop.f32.mrf.mxu0  ;;  %v14383_v62 = vld [vmem:[#allocation37_spill] sm:$0xff] }
 0x1bb   : > { %14377 = vst [vmem:[#allocation87_spill] sm:$0xff] %v10500_v8  ;;  %vm1739_vm11 = vcmp.gt.f32.partialorder %v1111_v57, 0.0  ;;  %v2210_v19 = vsel %vm1698_vm13, %v10351_v60, %v10388_v52  ;;  %v2218_v37 = vsel %vm1706_vm15, %v10364_v17, %v10404_v11  ;;  %v2212_v21 = vsel %vm1700_vm14, %v10360_v58, %v10398_v48  ;;  %14382 = vst [vmem:[#allocation62_spill] sm:$0xff] %v10531_v49  ;;  %v10545_v11 = vpop.f32.mrf.mxu1 }
 0x1bc   : > { %v2220_v53 = vsel %vm1708_vm4, %v10392_v45, %v1964_v35  ;;  %v10535_v28 = vadd.f32 %v14383_v62, %v9502_v22  ;;  %v10539_v60 = vadd.f32 %v10072_v1, %v9512_v56  ;;  %v10541_v17 = vpack.c.bf16 %v2218_v37, %v2210_v19  ;;  %v10551_v62 = vpop.f32.mrf.mxu0 }
 0x1bd   : > { %v10543_v52 = vpack.c.bf16 %v2220_v53, %v2212_v21  ;;  %v2249_v58 = vsel %vm1737_vm10, %v918_v12, %v1993_v51  ;;  %v2251_v48 = vsel %vm1739_vm11, %v1111_v57, %v1995_v33  ;;  %v924_v45 = vadd.f32 %v10081_v14, %v9490_v46  ;;  %v10561_v14 = vpop.f32.mrf.mxu1 }
 0x1be   : > { %14384 = vst [vmem:[#allocation37_spill] sm:$0xff] %v10541_v17  ;;  %v1117_v35 = vadd.f32 %v10091_v59, %v9497_v44  ;;  %v1978_v49 = vmul.f32 0.2, %v10448_v55  ;;  %vm1724_vm12 = vcmp.gt.f32.partialorder %v10489_v41, 0.0  ;;  %v928_v1 = vadd.f32 %v10116_v6, %v9490_v46  ;;  %4117 = vmatprep.mubr.bf16.mxu0 %v10541_v17 }
 0x1bf   : > { %14385 = vst [vmem:[#allocation89_spill] sm:$0xff] %v10543_v52  ;;  %v1121_v37 = vadd.f32 %v10125_v20, %v9497_v44  ;;  %4310 = vmatprep.mubr.bf16.mxu1 %v10543_v52  ;;  %v1980_v59 = vmul.f32 0.2, %v10489_v41  ;;  %v2241_v12 = vsel %vm1729_vm6, %v10452_v2, %v1985_v0  ;;  %v2243_v57 = vsel %vm1731_vm7, %v10456_v29, %v1987_v54  ;;  %v10575_v20 = vpop.f32.mrf.mxu0  ;;  %v10587_v29 = vpop.f32.mrf.mxu1 }
 0x1c0   : > { %v10571_v6 = vmul.f32 0.2, %v10508_v50  ;;  %4118 = vmatmul.mubr.bf16.gmra.mxu0 %v10400_v43  ;;  %4311 = vmatmul.mubr.bf16.gmra.mxu1 %v10460_v10  ;;  %14386 = vst [vmem:[#allocation90_spill] sm:$0xff] %v10575_v20  ;;  %v10578_v51 = vmul.f32 0.2, %v10512_v23  ;;  %v10580_v33 = vpack.c.bf16 %v2249_v58, %v2241_v12  ;;  %v10582_v19 = vpack.c.bf16 %v2251_v48, %v2243_v57  ;;  %v14391_v58 = vld [vmem:[#allocation64_spill] sm:$0xff] }
 0x1c1   : > { %v10585_v2 = vmul.f32 0.2, %v10535_v28  ;;  %14389 = vst [vmem:[#allocation93_spill] sm:$0xff] %v10587_v29  ;;  %vm1738_vm13 = vcmp.gt.f32.partialorder %v10535_v28, 0.0  ;;  %v10591_v0 = vmul.f32 0.2, %v10539_v60  ;;  %v10593_v21 = vpop.f32.mrf.mxu0  ;;  %v10598_v48 = vadd.f32 %v14391_v58, %v9502_v22  ;;  %v10600_v10 = vpop.f32.mrf.mxu1 }
 0x1c2   : > { %14387 = vst [vmem:[#allocation91_spill] sm:$0xff] %v10580_v33  ;;  %14388 = vst [vmem:[#allocation92_spill] sm:$0xff] %v10582_v19  ;;  %vm1745_vm14 = vcmp.gt.f32.partialorder %v924_v45, 0.0  ;;  %v2001_v54 = vmul.f32 0.2, %v924_v45  ;;  %vm1747_vm15 = vcmp.gt.f32.partialorder %v1117_v35, 0.0  ;;  %v934_v43 = vadd.f32 %v10159_v39, %v9490_v46 }
 0x1c3   : > { %14390 = vst [vmem:[#allocation94_spill] sm:$0xff] %v10593_v21  ;;  %vm1730_vm1 = vcmp.gt.f32.partialorder %v10508_v50, 0.0  ;;  %v2003_v53 = vmul.f32 0.2, %v1117_v35  ;;  %v2009_v12 = vmul.f32 0.2, %v928_v1  ;;  %v2234_v52 = vsel %vm1722_vm5, %v10448_v55, %v1978_v49  ;;  %v10609_v17 = vpop.f32.mrf.mxu0  ;;  %v10627_v55 = vpop.f32.mrf.mxu1 }
 0x1c4   : > { %v2011_v57 = vmul.f32 0.2, %v1121_v37  ;;  %14392 = vst [vmem:[#allocation64_spill] sm:$0xff] %v10600_v10  ;;  %vm1732_vm0 = vcmp.gt.f32.partialorder %v10512_v23, 0.0  ;;  %vm1740_vm2 = vcmp.gt.f32.partialorder %v10539_v60, 0.0  ;;  %vm1753_vm3 = vcmp.gt.f32.partialorder %v928_v1, 0.0 }
 0x1c5   : > { %vm1755_vm4 = vcmp.gt.f32.partialorder %v1121_v37, 0.0  ;;  %14393 = vst [vmem:[#allocation95_spill] sm:$0xff] %v10609_v17  ;;  %v10613_v58 = vadd.f32 %v10107_v9, %v9512_v56  ;;  %v10617_v29 = vadd.f32 %v10134_v4, %v9502_v22  ;;  %v10621_v20 = vadd.f32 %v10145_v18, %v9512_v56  ;;  %14394 = vst [vmem:[#allocation96_spill] sm:$0xff] %v10627_v55  ;;  %v10640_v17 = vpop.f32.mrf.mxu0 }
 0x1c6   : > { %v2226_v39 = vsel %vm1714_vm8, %v10415_v40, %v10480_v24  ;;  %v938_v49 = vadd.f32 %v10194_v15, %v9490_v46  ;;  %v2228_v4 = vsel %vm1716_vm9, %v10438_v27, %v10483_v3  ;;  %v2236_v18 = vsel %vm1724_vm12, %v10489_v41, %v1980_v59  ;;  %v14396_v24 = vld [vmem:[#allocation68_spill] sm:$0xff]  ;;  %v10646_v46 = vpop.f32.mrf.mxu1 }
 0x1c7   : > { %v10631_v9 = vpack.c.bf16 %v2234_v52, %v2226_v39  ;;  %v2265_v10 = vsel %vm1753_vm3, %v928_v1, %v2009_v12  ;;  %v2267_v40 = vsel %vm1755_vm4, %v1121_v37, %v2011_v57  ;;  %v1127_v55 = vadd.f32 %v14396_v24, %v9497_v44  ;;  %v10653_v41 = vpop.f32.mrf.mxu0 }
 0x1c8   : > { %v10644_v21 = vpack.c.bf16 %v2236_v18, %v2228_v4  ;;  %v2257_v15 = vsel %vm1745_vm14, %v924_v45, %v2001_v54  ;;  %v2259_v52 = vsel %vm1747_vm15, %v1117_v35, %v2003_v53  ;;  %v2017_v27 = vmul.f32 0.2, %v934_v43  ;;  %14398 = vst [vmem:[#allocation98_spill] sm:$0xff] %v10653_v41  ;;  %v8738_v45 = vld [vmem:[%s14053_s2] sm:$0xff] }
 0x1c9   : > { %14395 = vst [vmem:[#allocation97_spill] sm:$0xff] %v10631_v9  ;;  %v1131_v3 = vadd.f32 %v10205_v13, %v9497_v44  ;;  %4127 = vmatprep.mubr.bf16.mxu0 %v10631_v9  ;;  %v10656_v1 = vmul.f32 0.2, %v10598_v48  ;;  %v10659_v37 = vmul.f32 0.2, %v10613_v58  ;;  %vm1761_vm5 = vcmp.gt.f32.partialorder %v934_v43, 0.0  ;;  %v10670_v44 = vpop.f32.mrf.mxu1  ;;  %v10680_v57 = vpop.f32.mrf.mxu0 }
 0x1ca   : > { %14397 = vst [vmem:[#allocation68_spill] sm:$0xff] %v10644_v21  ;;  %v14399_v35 = vsub.s32 4, %v9455_v16  ;;  %4320 = vmatprep.mubr.bf16.mxu1 %v10644_v21  ;;  %4128 = vmatmul.mubr.bf16.gmra.mxu0 %v10485_v42  ;;  %14400 = vst [vmem:[#allocation99_spill] sm:$0xff] %v10670_v44  ;;  %v10672_v13 = vpack.c.bf16 %v2265_v10, %v2257_v15  ;;  %v10674_v54 = vpack.c.bf16 %v2267_v40, %v2259_v52  ;;  %v14403_v40 = vld [vmem:[#allocation69_spill] sm:$0xff]  ;;  %v14406_v42 = vld [vmem:[#allocation72_spill] sm:$0xff] }
 0x1cb   : > { %v10677_v53 = vmul.f32 0.2, %v10617_v29  ;;  %v2025_v12 = vmul.f32 0.2, %v938_v49  ;;  %4321 = vmatmul.mubr.bf16.gmra.mxu1 %v10500_v8  ;;  %vm1754_vm6 = vcmp.gt.f32.partialorder %v10617_v29, 0.0  ;;  %vm1763_vm7 = vcmp.gt.f32.partialorder %v1127_v55, 0.0  ;;  %v10686_v10 = vpop.f32.mrf.mxu1  ;;  %v10698_v8 = vpop.f32.mrf.mxu0 }
 0x1cc   : > { %v10666_v59 = vrot.slane %v8738_v45, %v14399_v35  ;;  %14401 = vst [vmem:[#allocation100_spill] sm:$0xff] %v10672_v13  ;;  %14402 = vst [vmem:[#allocation101_spill] sm:$0xff] %v10674_v54  ;;  %v10684_v39 = vmul.f32 0.2, %v10621_v20  ;;  %v2019_v4 = vmul.f32 0.2, %v1127_v55  ;;  %v2273_v18 = vsel %vm1761_vm5, %v934_v43, %v2017_v27 }
 0x1cd   : > { %vm1769_vm8 = vcmp.gt.f32.partialorder %v938_v49, 0.0  ;;  %vm1746_vm9 = vcmp.gt.f32.partialorder %v10598_v48, 0.0  ;;  %v10692_v24 = vadd.f32 %v14403_v40, %v9502_v22  ;;  %v2027_v15 = vmul.f32 0.2, %v1131_v3  ;;  %14405 = vst [vmem:[#allocation69_spill] sm:$0xff] %v10698_v8  ;;  %v10712_v40 = vpop.f32.mrf.mxu1  ;;  %v14407_v9 = vld [vmem:[#allocation43_spill] sm:$0xff]  ;;  %v10724_v44 = vpop.f32.mrf.mxu0 }
 0x1ce   : > { %v14404_v52 = vsub.s32 6, %v9455_v16  ;;  %vm1748_vm10 = vcmp.gt.f32.partialorder %v10613_v58, 0.0  ;;  %vm1756_vm11 = vcmp.gt.f32.partialorder %v10621_v20, 0.0  ;;  %v10704_v21 = vadd.f32 %v14406_v42, %v9512_v56  ;;  %v14408_v41 = vld [vmem:[#allocation48_spill] sm:$0xff] }
 0x1cf   : > { %vm1771_vm12 = vcmp.gt.f32.partialorder %v1131_v3, 0.0  ;;  %v1170_v43 = vadd.f32 %v10233_v63, %v10666_v59  ;;  %v2250_v27 = vsel %vm1738_vm13, %v10535_v28, %v10585_v2  ;;  %v10716_v8 = vadd.f32 %v14407_v9, %v9502_v22 }
 0x1d0   : > { %v10696_v35 = vrot.slane %v8738_v45, %v14404_v52  ;;  %v2281_v52 = vsel %vm1769_vm8, %v938_v49, %v2025_v12  ;;  %v1174_v42 = vadd.f32 %v10262_v38, %v10666_v59  ;;  %v2242_v63 = vsel %vm1730_vm1, %v10508_v50, %v10571_v6  ;;  %v10738_v49 = vpop.f32.mrf.mxu1  ;;  %v14410_v6 = vld [vmem:[#allocation19_spill] sm:$0xff] }
 0x1d1   : > { %v10728_v2 = vpack.c.bf16 %v2250_v27, %v2242_v63  ;;  %v2244_v22 = vsel %vm1732_vm0, %v10512_v23, %v10578_v51  ;;  %v2252_v38 = vsel %vm1740_vm2, %v10539_v60, %v10591_v0  ;;  %v2283_v50 = vsel %vm1771_vm12, %v1131_v3, %v2027_v15  ;;  %v10748_v63 = vpop.f32.mrf.mxu0 }
 0x1d2   : > { %v1367_v28 = vadd.f32 %v14408_v41, %v10696_v35  ;;  %v10742_v9 = vadd.f32 %v14410_v6, %v9512_v56  ;;  %v14411_v41 = vld [vmem:[#allocation44_spill] sm:$0xff]  ;;  %v10746_v27 = vpack.c.bf16 %v2252_v38, %v2244_v22  ;;  %14413 = vst [vmem:[#allocation48_spill] sm:$0xff] %v10748_v63  ;;  %v2275_v23 = vsel %vm1763_vm7, %v1127_v55, %v2019_v4  ;;  %v10759_v56 = vpop.f32.mrf.mxu1 }
 0x1d3   : > { %14409 = vst [vmem:[#allocation72_spill] sm:$0xff] %v10728_v2  ;;  %v1363_v12 = vadd.f32 %v14411_v41, %v10696_v35  ;;  %v10752_v51 = vmul.f32 0.2, %v10692_v24  ;;  %v1781_v60 = vmul.f32 0.2, %v1170_v43  ;;  %v14414_v0 = vsub.s32 5, %v9455_v16  ;;  %4137 = vmatprep.mubr.bf16.mxu0 %v10728_v2  ;;  %v10772_v38 = vpop.f32.mrf.mxu0 }
 0x1d4   : > { %14412 = vst [vmem:[#allocation43_spill] sm:$0xff] %v10746_v27  ;;  %14415 = vst [vmem:[#allocation19_spill] sm:$0xff] %v10759_v56  ;;  %v10762_v15 = vmul.f32 0.2, %v10704_v21  ;;  %v10764_v22 = vpack.c.bf16 %v2281_v52, %v2273_v18  ;;  %vm1525_vm13 = vcmp.gt.f32.partialorder %v1170_v43, 0.0  ;;  %v14417_v55 = vsub.s32 7, %v9455_v16  ;;  %4330 = vmatprep.mubr.bf16.mxu1 %v10746_v27  ;;  %4138 = vmatmul.mubr.bf16.gmra.mxu0 %v10580_v33  ;;  %v10780_v18 = vpop.f32.mrf.mxu1 }
 0x1d5   : > { %v10756_v3 = vrot.slane %v8738_v45, %v14414_v0  ;;  %v10774_v6 = vpack.c.bf16 %v2283_v50, %v2275_v23  ;;  %v10777_v41 = vmul.f32 0.2, %v10716_v8  ;;  %v1789_v0 = vmul.f32 0.2, %v1174_v42  ;;  %4331 = vmatmul.mubr.bf16.gmra.mxu1 %v10582_v19  ;;  %14419 = vst [vmem:[#allocation103_spill] sm:$0xff] %v10780_v18  ;;  %v10786_v52 = vpop.f32.mrf.mxu0  ;;  %v14423_v27 = vld [vmem:[#allocation74_spill] sm:$0xff] }
 0x1d6   : > { %14416 = vst [vmem:[#allocation44_spill] sm:$0xff] %v10764_v22  ;;  %v10768_v4 = vrot.slane %v8738_v45, %v14417_v55  ;;  %v1791_v2 = vmul.f32 0.2, %v1367_v28  ;;  %vm1770_vm14 = vcmp.gt.f32.partialorder %v10716_v8, 0.0  ;;  %v10784_v45 = vmul.f32 0.2, %v10742_v9  ;;  %v10796_v33 = vpop.f32.mrf.mxu1 }
 0x1d7   : > { %14418 = vst [vmem:[#allocation102_spill] sm:$0xff] %v10774_v6  ;;  %vm1527_vm15 = vcmp.gt.f32.partialorder %v1363_v12, 0.0  ;;  %vm1533_vm1 = vcmp.gt.f32.partialorder %v1174_v42, 0.0  ;;  %vm1535_vm0 = vcmp.gt.f32.partialorder %v1367_v28, 0.0  ;;  %14420 = vst [vmem:[#allocation104_spill] sm:$0xff] %v10786_v52  ;;  %vm1762_vm2 = vcmp.gt.f32.partialorder %v10692_v24, 0.0 }
 0x1d8   : > { %v2037_v50 = vsel %vm1525_vm13, %v1170_v43, %v1781_v60  ;;  %v1783_v23 = vmul.f32 0.2, %v1363_v12  ;;  %v14421_v55 = vld [vmem:[#allocation73_spill] sm:$0xff]  ;;  %v1180_v19 = vadd.f32 %v10303_v34, %v10666_v59  ;;  %vm1764_vm3 = vcmp.gt.f32.partialorder %v10704_v21, 0.0  ;;  %v14425_v56 = vld [vmem:[#allocation23_spill] sm:$0xff] }
 0x1d9   : > { %v10792_v16 = vadd.f32 %v14421_v55, %v10756_v3  ;;  %14422 = vst [vmem:[#allocation73_spill] sm:$0xff] %v10796_v33  ;;  %vm1772_vm4 = vcmp.gt.f32.partialorder %v10742_v9, 0.0  ;;  %v10802_v52 = vadd.f32 %v14423_v27, %v10768_v4  ;;  %v10806_v43 = vadd.f32 %v10286_v47, %v10756_v3  ;;  %v10816_v55 = vpop.f32.mrf.mxu0 }
 0x1da   : > { %v10810_v60 = vadd.f32 %v10294_v25, %v10768_v4  ;;  %v2266_v34 = vsel %vm1754_vm6, %v10617_v29, %v10677_v53  ;;  %14424 = vst [vmem:[#allocation74_spill] sm:$0xff] %v10816_v55  ;;  %v2045_v33 = vsel %vm1533_vm1, %v1174_v42, %v1789_v0  ;;  %v2047_v27 = vsel %vm1535_vm0, %v1367_v28, %v1791_v2  ;;  %v10828_v25 = vpop.f32.mrf.mxu1 }
 0x1db   : > { %v10822_v63 = vadd.f32 %v14425_v56, %v10696_v35  ;;  %v2258_v47 = vsel %vm1746_vm9, %v10598_v48, %v10656_v1  ;;  %14426 = vst [vmem:[#allocation23_spill] sm:$0xff] %v10828_v25  ;;  %v1184_v29 = vadd.f32 %v10347_v32, %v10666_v59  ;;  %v2260_v42 = vsel %vm1748_vm10, %v10613_v58, %v10659_v37  ;;  %v10842_v2 = vpop.f32.mrf.mxu0 }
 0x1dc   : > { %v10832_v53 = vpack.c.bf16 %v2266_v34, %v2258_v47  ;;  %v2268_v28 = vsel %vm1756_vm11, %v10621_v20, %v10684_v39  ;;  %14428 = vst [vmem:[#allocation106_spill] sm:$0xff] %v10842_v2  ;;  %v2039_v48 = vsel %vm1527_vm15, %v1363_v12, %v1783_v23  ;;  %v1797_v1 = vmul.f32 0.2, %v1180_v19  ;;  %v10849_v0 = vpop.f32.mrf.mxu1  ;;  %v14434_v12 = vld [vmem:[#allocation18_spill] sm:$0xff]  ;;  %v14435_v47 = vld [vmem:[#allocation76_spill] sm:$0xff] }
 0x1dd   : > { %v1377_v32 = vadd.f32 %v10356_v36, %v10696_v35  ;;  %v10847_v56 = vpack.c.bf16 %v2268_v28, %v2260_v42  ;;  %14430 = vst [vmem:[#allocation108_spill] sm:$0xff] %v10849_v0  ;;  %v10852_v34 = vmul.f32 0.2, %v10792_v16  ;;  %v10855_v58 = vmul.f32 0.2, %v10802_v52  ;;  %v10860_v20 = vpop.f32.mrf.mxu0  ;;  %v14441_v0 = vld [vmem:[#allocation78_spill] sm:$0xff] }
 0x1de   : > { %14427 = vst [vmem:[#allocation105_spill] sm:$0xff] %v10832_v53  ;;  %v10857_v37 = vpack.c.bf16 %v2045_v33, %v2037_v50  ;;  %vm1541_vm5 = vcmp.gt.f32.partialorder %v1180_v19, 0.0  ;;  %4147 = vmatprep.mubr.bf16.mxu0 %v10832_v53  ;;  %14432 = vst [vmem:[#allocation110_spill] sm:$0xff] %v10860_v20  ;;  %v10862_v39 = vpack.c.bf16 %v2047_v27, %v2039_v48  ;;  %v10865_v36 = vmul.f32 0.2, %v10806_v43  ;;  %v10877_v33 = vpop.f32.mrf.mxu1 }
 0x1df   : > { %14429 = vst [vmem:[#allocation107_spill] sm:$0xff] %v10847_v56  ;;  %v10869_v23 = vadd.f32 %v14434_v12, %v10756_v3  ;;  %v10873_v42 = vadd.f32 %v14435_v47, %v10768_v4  ;;  %4340 = vmatprep.mubr.bf16.mxu1 %v10847_v56  ;;  %4148 = vmatmul.mubr.bf16.gmra.mxu0 %v10672_v13  ;;  %14436 = vst [vmem:[#allocation18_spill] sm:$0xff] %v10877_v33  ;;  %v10880_v50 = vmul.f32 0.2, %v10810_v60  ;;  %v10888_v48 = vpop.f32.mrf.mxu0 }
 0x1e0   : > { %14431 = vst [vmem:[#allocation109_spill] sm:$0xff] %v10857_v37  ;;  %14433 = vst [vmem:[#allocation111_spill] sm:$0xff] %v10862_v39  ;;  %vm1543_vm6 = vcmp.gt.f32.partialorder %v10822_v63, 0.0  ;;  %v1805_v27 = vmul.f32 0.2, %v1184_v29  ;;  %v10885_v28 = vadd.f32 %v10367_v5, %v10756_v3  ;;  %4341 = vmatmul.mubr.bf16.gmra.mxu1 %v10674_v54  ;;  %vm1534_vm7 = vcmp.gt.f32.partialorder %v10806_v43, 0.0  ;;  %v10893_v56 = vpop.f32.mrf.mxu1 }
 0x1e1   : > { %14437 = vst [vmem:[#allocation76_spill] sm:$0xff] %v10888_v48  ;;  %v2053_v12 = vsel %vm1541_vm5, %v1180_v19, %v1797_v1  ;;  %v1799_v47 = vmul.f32 0.2, %v10822_v63  ;;  %vm1549_vm8 = vcmp.gt.f32.partialorder %v1184_v29, 0.0  ;;  %v1807_v13 = vmul.f32 0.2, %v1377_v32  ;;  %v10904_v19 = vpop.f32.mrf.mxu0 }
 0x1e2   : > { %14438 = vst [vmem:[#allocation112_spill] sm:$0xff] %v10893_v56  ;;  %vm1526_vm9 = vcmp.gt.f32.partialorder %v10792_v16, 0.0  ;;  %vm1551_vm10 = vcmp.gt.f32.partialorder %v1377_v32, 0.0  ;;  %v14439_v5 = vld [vmem:[#allocation21_spill] sm:$0xff]  ;;  %v1383_v2 = vadd.f32 %v14441_v0, %v10696_v35  ;;  %vm1528_vm11 = vcmp.gt.f32.partialorder %v10802_v52, 0.0  ;;  %v10920_v0 = vpop.f32.mrf.mxu1 }
 0x1e3   : > { %v10898_v53 = vadd.f32 %v14439_v5, %v10768_v4  ;;  %v14440_v54 = vld [vmem:[#allocation77_spill] sm:$0xff]  ;;  %14442 = vst [vmem:[#allocation21_spill] sm:$0xff] %v10904_v19  ;;  %vm1536_vm12 = vcmp.gt.f32.partialorder %v10810_v60, 0.0  ;;  %v10909_v1 = vmul.f32 0.2, %v10869_v23  ;;  %v14443_v5 = vld [vmem:[#allocation82_spill] sm:$0xff]  ;;  %v2061_v19 = vsel %vm1549_vm8, %v1184_v29, %v1805_v27  ;;  %v10932_v20 = vpop.f32.mrf.mxu0 }
 0x1e4   : > { %v1190_v48 = vadd.f32 %v14440_v54, %v10666_v59  ;;  %v10912_v56 = vmul.f32 0.2, %v10873_v42  ;;  %v1194_v25 = vadd.f32 %v14443_v5, %v10666_v59  ;;  %v2282_v54 = vsel %vm1770_vm14, %v10716_v8, %v10777_v41  ;;  %v10945_v29 = vpop.f32.mrf.mxu1 }
 0x1e5   : > { %v10924_v55 = vmul.f32 0.2, %v10885_v28  ;;  %v1387_v33 = vadd.f32 %v10434_v61, %v10696_v35  ;;  %v2274_v5 = vsel %vm1762_vm2, %v10692_v24, %v10752_v51  ;;  %v2063_v18 = vsel %vm1551_vm10, %v1377_v32, %v1807_v13  ;;  %14445 = vst [vmem:[#allocation78_spill] sm:$0xff] %v10945_v29  ;;  %v10949_v13 = vpop.f32.mrf.mxu0  ;;  %v14448_v32 = vld [vmem:[#allocation80_spill] sm:$0xff] }
 0x1e6   : > { %v10935_v8 = vpack.c.bf16 %v2282_v54, %v2274_v5  ;;  %v2276_v41 = vsel %vm1764_vm3, %v10704_v21, %v10762_v15  ;;  %v2284_v61 = vsel %vm1772_vm4, %v10742_v9, %v10784_v45  ;;  %vm1557_vm13 = vcmp.gt.f32.partialorder %v1190_v48, 0.0  ;;  %14447 = vst [vmem:[#allocation113_spill] sm:$0xff] %v10949_v13  ;;  %v14449_v21 = vld [vmem:[#allocation81_spill] sm:$0xff]  ;;  %v10960_v9 = vpop.f32.mrf.mxu1 }
 0x1e7   : > { %v1813_v24 = vmul.f32 0.2, %v1190_v48  ;;  %v1815_v51 = vmul.f32 0.2, %v1383_v2  ;;  %v10947_v27 = vpack.c.bf16 %v2284_v61, %v2276_v41  ;;  %vm1559_vm14 = vcmp.gt.f32.partialorder %v1383_v2, 0.0  ;;  %14450 = vst [vmem:[#allocation80_spill] sm:$0xff] %v10960_v9 }
 0x1e8   : > { %14444 = vst [vmem:[#allocation77_spill] sm:$0xff] %v10935_v8  ;;  %v10953_v54 = vadd.f32 %v14448_v32, %v10756_v3  ;;  %v10957_v15 = vadd.f32 %v14449_v21, %v10768_v4  ;;  %v1821_v5 = vmul.f32 0.2, %v1194_v25  ;;  %4157 = vmatprep.mubr.bf16.mxu0 %v10935_v8  ;;  %v2055_v45 = vsel %vm1543_vm6, %v10822_v63, %v1799_v47  ;;  %v10970_v32 = vpop.f32.mrf.mxu0  ;;  %v10979_v47 = vpop.f32.mrf.mxu1 }
 0x1e9   : > { %14446 = vst [vmem:[#allocation82_spill] sm:$0xff] %v10947_v27  ;;  %v10966_v41 = vmul.f32 0.2, %v10898_v53  ;;  %vm1565_vm15 = vcmp.gt.f32.partialorder %v1194_v25, 0.0  ;;  %v1823_v61 = vmul.f32 0.2, %v1387_v33  ;;  %4350 = vmatprep.mubr.bf16.mxu1 %v10947_v27  ;;  %4158 = vmatmul.mubr.bf16.gmra.mxu0 %v10764_v22  ;;  %v10972_v21 = vpack.c.bf16 %v2061_v19, %v2053_v12 }
 0x1ea   : > { %14451 = vst [vmem:[#allocation81_spill] sm:$0xff] %v10970_v32  ;;  %vm1567_vm1 = vcmp.gt.f32.partialorder %v1387_v33, 0.0  ;;  %v1200_v8 = vadd.f32 %v10469_v31, %v10666_v59  ;;  %v1393_v63 = vadd.f32 %v10477_v26, %v10696_v35  ;;  %4351 = vmatmul.mubr.bf16.gmra.mxu1 %v10774_v6  ;;  %14453 = vst [vmem:[#allocation115_spill] sm:$0xff] %v10979_v47  ;;  %vm1550_vm0 = vcmp.gt.f32.partialorder %v10885_v28, 0.0  ;;  %v10990_v31 = vpop.f32.mrf.mxu0  ;;  %v14458_v6 = vld [vmem:[#allocation30_spill] sm:$0xff] }
 0x1eb   : > { %14452 = vst [vmem:[#allocation114_spill] sm:$0xff] %v10972_v21  ;;  %v10981_v9 = vpack.c.bf16 %v2063_v18, %v2055_v45  ;;  %v2069_v22 = vsel %vm1557_vm13, %v1190_v48, %v1813_v24  ;;  %v2071_v12 = vsel %vm1559_vm14, %v1383_v2, %v1815_v51  ;;  %v10988_v19 = vadd.f32 %v10444_v30, %v10756_v3  ;;  %v11004_v2 = vpop.f32.mrf.mxu1  ;;  %v14457_v24 = vld [vmem:[#allocation88_spill] sm:$0xff] }
 0x1ec   : > { %14455 = vst [vmem:[#allocation117_spill] sm:$0xff] %v10990_v31  ;;  %vm1542_vm2 = vcmp.gt.f32.partialorder %v10869_v23, 0.0  ;;  %v10994_v26 = vmul.f32 0.2, %v10953_v54  ;;  %v10997_v18 = vmul.f32 0.2, %v10957_v15  ;;  %v2077_v45 = vsel %vm1565_vm15, %v1194_v25, %v1821_v5  ;;  %v11017_v25 = vpop.f32.mrf.mxu0 }
 0x1ed   : > { %14454 = vst [vmem:[#allocation116_spill] sm:$0xff] %v10981_v9  ;;  %v11002_v48 = vadd.f32 %v10458_v7, %v10768_v4  ;;  %14456 = vst [vmem:[#allocation118_spill] sm:$0xff] %v11004_v2  ;;  %vm1544_vm3 = vcmp.gt.f32.partialorder %v10873_v42, 0.0  ;;  %vm1552_vm4 = vcmp.gt.f32.partialorder %v10898_v53, 0.0  ;;  %v2079_v30 = vsel %vm1567_vm1, %v1387_v33, %v1823_v61  ;;  %v11023_v61 = vpop.f32.mrf.mxu1  ;;  %v8330_v2 = vld [vmem:[#allocation3 + $0xcc] ss:$16 sps:$4 sm:$0xff]  }
 0x1ee   : > { %v1204_v51 = vadd.f32 %v14457_v24, %v10666_v59  ;;  %v1397_v27 = vadd.f32 %v14458_v6, %v10696_v35  ;;  %v2046_v7 = vsel %vm1534_vm7, %v10806_v43, %v10865_v36  ;;  %14459 = vst [vmem:[#allocation88_spill] sm:$0xff] %v11017_v25  ;;  %vm1573_vm5 = vcmp.gt.f32.partialorder %v1200_v8, 0.0  ;;  %14460 = vst [vmem:[#allocation30_spill] sm:$0xff] %v11023_v61  ;;  %v8322_v36 = vld [vmem:[#allocation3 + $0xe8] ss:$16 sps:$4 sm:$0xff]   ;;  %v11035_v25 = vpop.f32.mrf.mxu0  ;;  %v14465_v61 = vld [vmem:[#allocation62_spill] sm:$0xff] }
 0x1ef   : > { %v1829_v5 = vmul.f32 0.2, %v1200_v8  ;;  %vm1575_vm6 = vcmp.gt.f32.partialorder %v1393_v63, 0.0  ;;  %v2038_v33 = vsel %vm1526_vm9, %v10792_v16, %v10852_v34  ;;  %v1831_v24 = vmul.f32 0.2, %v1393_v63  ;;  %14462 = vst [vmem:[#allocation120_spill] sm:$0xff] %v11035_v25 }
 0x1f0   : > { %v11025_v47 = vpack.c.bf16 %v2046_v7, %v2038_v33  ;;  %v2040_v6 = vsel %vm1528_vm11, %v10802_v52, %v10855_v58  ;;  %v2048_v43 = vsel %vm1536_vm12, %v10810_v60, %v10880_v50  ;;  %v14463_v16 = vld [vmem:[#allocation59_spill] sm:$0xff]  ;;  %v14464_v7 = vld [vmem:[#allocation86_spill] sm:$0xff]  ;;  %v11047_v32 = vadd.f32 %v14465_v61, %v10756_v3  ;;  %v11051_v50 = vpop.f32.mrf.mxu1 }
 0x1f1   : > { %v11039_v34 = vadd.f32 %v14463_v16, %v10756_v3  ;;  %v11043_v33 = vadd.f32 %v14464_v7, %v10768_v4  ;;  %v11049_v52 = vpack.c.bf16 %v2048_v43, %v2040_v6  ;;  %v8325_v58 = vld [vmem:[#allocation3 + $0x2e8] ss:$16 sps:$4 sm:$0xff]   ;;  %v8333_v60 = vld [vmem:[#allocation3 + $0x2cc] ss:$16 sps:$4 sm:$0xff]   ;;  %14467 = vst [vmem:[#allocation86_spill] sm:$0xff] %v11051_v50  ;;  %v11053_v25 = vpack.c.bf16 %v2077_v45, %v2069_v22  ;;  %v11059_v7 = vpop.f32.mrf.mxu0 }
 0x1f2   : > { %14461 = vst [vmem:[#allocation119_spill] sm:$0xff] %v11025_v47  ;;  %v11056_v16 = vmul.f32 0.2, %v10988_v19  ;;  %v1837_v31 = vmul.f32 0.2, %v1204_v51  ;;  %4393 = vmatprep.mubr.bf16.mxu0 %v11025_v47  ;;  %14469 = vst [vmem:[#allocation121_spill] sm:$0xff] %v11059_v7  ;;  %v11063_v61 = vadd.f32 %v10551_v62, %v10666_v59  ;;  %v11067_v6 = vadd.f32 %v10561_v14, %v10696_v35  ;;  %v11071_v22 = vpop.f32.mrf.mxu1 }
 0x1f3   : > { %14466 = vst [vmem:[#allocation59_spill] sm:$0xff] %v11049_v52  ;;  %14468 = vst [vmem:[#allocation62_spill] sm:$0xff] %v11053_v25  ;;  %v1839_v13 = vmul.f32 0.2, %v1397_v27  ;;  %vm1581_vm7 = vcmp.gt.f32.partialorder %v1204_v51, 0.0  ;;  %vm1583_vm8 = vcmp.gt.f32.partialorder %v1397_v27, 0.0  ;;  %4586 = vmatprep.mubr.bf16.mxu1 %v11049_v52  ;;  %4394 = vmatmul.mubr.bf16.vlgmr.msra.gmra.mxu0 %v10857_v37  ;;  %v11073_v45 = vpack.c.bf16 %v2079_v30, %v2071_v12  ;;  %v11081_v50 = vpop.f32.mrf.mxu0 }
 0x1f4   : > { %14470 = vst [vmem:[#allocation122_spill] sm:$0xff] %v11071_v22  ;;  %v11076_v43 = vmul.f32 0.2, %v11002_v48  ;;  %v2085_v47 = vsel %vm1573_vm5, %v1200_v8, %v1829_v5  ;;  %v2087_v62 = vsel %vm1575_vm6, %v1393_v63, %v1831_v24  ;;  %4587 = vmatmul.mubr.bf16.vlgmr.msra.gmra.mxu1 %v10862_v39  ;;  %4748 = vmatpush1.bf16.msra.mxu0 %v8322_v36  ;;  %v8328_v14 = vld [vmem:[#allocation3 + $0xc8] ss:$16 sps:$4 sm:$0xff]   ;;  %14472 = vst [vmem:[#allocation124_spill] sm:$0xff] %v11081_v50  ;;  %v11097_v63 = vpop.f32.mrf.mxu1 }
 0x1f5   : > { %14471 = vst [vmem:[#allocation123_spill] sm:$0xff] %v11073_v45  ;;  %v8331_v7 = vld [vmem:[#allocation3 + $0x2c8] ss:$16 sps:$4 sm:$0xff]   ;;  %vm1566_vm9 = vcmp.gt.f32.partialorder %v10988_v19, 0.0  ;;  %v11085_v37 = vmul.f32 0.2, %v11039_v34  ;;  %v11095_v8 = vadd.f32 %v10545_v11, %v10768_v4  ;;  %4941 = vmatpush1.bf16.msra.mxu1 %v8325_v58  ;;  %4749 = vmatprep.subr.bf16.mxu0 %v8330_v2  ;;  %v2093_v5 = vsel %vm1581_vm7, %v1204_v51, %v1837_v31  ;;  %v11106_v11 = vpop.f32.mrf.mxu0 }
 0x1f6   : > { %v11088_v12 = vmul.f32 0.2, %v11043_v33  ;;  %v11091_v30 = vmul.f32 0.2, %v11047_v32  ;;  %14473 = vst [vmem:[#allocation125_spill] sm:$0xff] %v11097_v63  ;;  %vm1558_vm10 = vcmp.gt.f32.partialorder %v10953_v54, 0.0  ;;  %v2095_v24 = vsel %vm1583_vm8, %v1397_v27, %v1839_v13  ;;  %4942 = vmatprep.subr.bf16.mxu1 %v8333_v60  ;;  %v11117_v13 = vpop.f32.mrf.mxu1 }
 0x1f7   : > { %v14474_v36 = vld [vmem:[#allocation94_spill] sm:$0xff]  ;;  %v14475_v52 = vld [vmem:[#allocation64_spill] sm:$0xff]  ;;  %vm1560_vm11 = vcmp.gt.f32.partialorder %v10957_v15, 0.0  ;;  %vm1568_vm12 = vcmp.gt.f32.partialorder %v11002_v48, 0.0  ;;  %vm1589_vm13 = vcmp.gt.f32.partialorder %v11063_v61, 0.0  ;;  %vm1591_vm14 = vcmp.gt.f32.partialorder %v11067_v6, 0.0 }
 0x1f8   : > { %v1214_v39 = vadd.f32 %v14474_v36, %v10666_v59  ;;  %v1407_v22 = vadd.f32 %v14475_v52, %v10696_v35  ;;  %v8336_v50 = vld [vmem:[#allocation3 + $0xac] ss:$16 sps:$4 sm:$0xff]   ;;  %14476 = vst [vmem:[#allocation94_spill] sm:$0xff] %v11106_v11  ;;  %v1845_v31 = vmul.f32 0.2, %v11063_v61  ;;  %v2062_v27 = vsel %vm1550_vm0, %v10885_v28, %v10924_v55  ;;  %14477 = vst [vmem:[#allocation64_spill] sm:$0xff] %v11117_v13  ;;  %v11132_v55 = vpop.f32.mrf.mxu0 }
 0x1f9   : > { %v8339_v2 = vld [vmem:[#allocation3 + $0x2ac] ss:$16 sps:$4 sm:$0xff]   ;;  %v1847_v51 = vmul.f32 0.2, %v11067_v6  ;;  %v2054_v11 = vsel %vm1542_vm2, %v10869_v23, %v10909_v1  ;;  %4750 = vmatpush1.bf16.msra.mxu0 %v8328_v14  ;;  %4943 = vmatpush1.bf16.msra.mxu1 %v8331_v7  ;;  %v8334_v23 = vld [vmem:[#allocation3 + $0xa8] ss:$16 sps:$4 sm:$0xff]   ;;  %v11148_v14 = vpop.f32.mrf.mxu1 }
 0x1fa   : > { %v14478_v52 = vld [vmem:[#allocation90_spill] sm:$0xff]  ;;  %v14479_v60 = vld [vmem:[#allocation93_spill] sm:$0xff]  ;;  %v14481_v28 = vld [vmem:[#allocation95_spill] sm:$0xff]  ;;  %v11138_v63 = vpack.c.bf16 %v2062_v27, %v2054_v11  ;;  %4751 = vmatprep.subr.bf16.mxu0 %v8336_v50  ;;  %vm1597_vm15 = vcmp.gt.f32.partialorder %v1214_v39, 0.0  ;;  %vm1599_vm1 = vcmp.gt.f32.partialorder %v1407_v22, 0.0  ;;  %4944 = vmatprep.subr.bf16.mxu1 %v8339_v2  ;;  %v11169_v50 = vpack.c.bf16 %v2093_v5, %v2085_v47 }
 0x1fb   : > { %v11122_v58 = vadd.f32 %v14478_v52, %v10756_v3  ;;  %v11126_v36 = vadd.f32 %v14479_v60, %v10768_v4  ;;  %14480 = vst [vmem:[#allocation90_spill] sm:$0xff] %v11132_v55  ;;  %v11136_v13 = vadd.f32 %v14481_v28, %v10756_v3  ;;  %v2056_v52 = vsel %vm1544_vm3, %v10873_v42, %v10912_v56  ;;  %v8337_v1 = vld [vmem:[#allocation3 + $0x2a8] ss:$16 sps:$4 sm:$0xff]   ;;  %v14483_v11 = vld [vmem:[#allocation96_spill] sm:$0xff]  ;;  %v11156_v56 = vpop.f32.mrf.mxu0  ;;  %v11167_v7 = vpop.f32.mrf.mxu1 }
 0x1fc   : > { %14482 = vst [vmem:[#allocation93_spill] sm:$0xff] %v11138_v63  ;;  %v2064_v60 = vsel %vm1552_vm4, %v10898_v53, %v10966_v41  ;;  %v1853_v55 = vmul.f32 0.2, %v1214_v39  ;;  %v1855_v28 = vmul.f32 0.2, %v1407_v22  ;;  %v11152_v27 = vadd.f32 %v14483_v11, %v10768_v4  ;;  %4403 = vmatprep.mubr.bf16.mxu0 %v11138_v63  ;;  %14485 = vst [vmem:[#allocation96_spill] sm:$0xff] %v11167_v7 }
 0x1fd   : > { %v11154_v29 = vpack.c.bf16 %v2064_v60, %v2056_v52  ;;  %v8342_v42 = vld [vmem:[#allocation3 + $0x8c] ss:$16 sps:$4 sm:$0xff]   ;;  %v11160_v53 = vadd.f32 %v10640_v17, %v10666_v59  ;;  %v11164_v41 = vadd.f32 %v10646_v46, %v10696_v35  ;;  %14486 = vst [vmem:[#allocation126_spill] sm:$0xff] %v11169_v50  ;;  %v11171_v60 = vpack.c.bf16 %v2095_v24, %v2087_v62  ;;  %v11180_v46 = vpop.f32.mrf.mxu0  ;;  %v8340_v24 = vld [vmem:[#allocation3 + $0x88] ss:$16 sps:$4 sm:$0xff]  }
 0x1fe   : > { %v8345_v52 = vld [vmem:[#allocation3 + $0x28c] ss:$16 sps:$4 sm:$0xff]   ;;  %v11174_v11 = vmul.f32 0.2, %v11095_v8  ;;  %v1224_v17 = vadd.f32 %v10680_v57, %v10666_v59  ;;  %4404 = vmatmul.mubr.bf16.gmra.mxu0 %v10972_v21  ;;  %14488 = vst [vmem:[#allocation128_spill] sm:$0xff] %v11180_v46  ;;  %v2101_v2 = vsel %vm1589_vm13, %v11063_v61, %v1845_v31  ;;  %v2103_v47 = vsel %vm1591_vm14, %v11067_v6, %v1847_v51  ;;  %v11195_v57 = vpop.f32.mrf.mxu1 }
 0x1ff   : > { %14484 = vst [vmem:[#allocation95_spill] sm:$0xff] %v11154_v29  ;;  %14487 = vst [vmem:[#allocation127_spill] sm:$0xff] %v11171_v60  ;;  %4596 = vmatprep.mubr.bf16.mxu1 %v11154_v29  ;;  %v11189_v62 = vmul.f32 0.2, %v11122_v58  ;;  %v11192_v5 = vmul.f32 0.2, %v11126_v36  ;;  %4752 = vmatpush1.bf16.msra.mxu0 %v8334_v23  ;;  %v2109_v61 = vsel %vm1597_vm15, %v1214_v39, %v1853_v55  ;;  %v11206_v21 = vpop.f32.mrf.mxu0 }
 0x200   : > { %4597 = vmatmul.mubr.bf16.gmra.mxu1 %v10981_v9  ;;  %14489 = vst [vmem:[#allocation129_spill] sm:$0xff] %v11195_v57  ;;  %vm1582_vm0 = vcmp.gt.f32.partialorder %v11047_v32, 0.0  ;;  %v2111_v31 = vsel %vm1599_vm1, %v1407_v22, %v1855_v28  ;;  %v11201_v6 = vmul.f32 0.2, %v11136_v13  ;;  %v11204_v51 = vmul.f32 0.2, %v11152_v27  ;;  %4753 = vmatprep.subr.bf16.mxu0 %v8342_v42  ;;  %v11214_v22 = vpop.f32.mrf.mxu1 }
 0x201   : > { %4945 = vmatpush1.bf16.msra.mxu1 %v8337_v1  ;;  %14490 = vst [vmem:[#allocation130_spill] sm:$0xff] %v11206_v21  ;;  %v8343_v23 = vld [vmem:[#allocation3 + $0x288] ss:$16 sps:$4 sm:$0xff]   ;;  %vm1574_vm2 = vcmp.gt.f32.partialorder %v11039_v34, 0.0  ;;  %vm1605_vm3 = vcmp.gt.f32.partialorder %v11160_v53, 0.0  ;;  %vm1607_vm4 = vcmp.gt.f32.partialorder %v11164_v41, 0.0  ;;  %v1417_v39 = vadd.f32 %v10686_v10, %v10696_v35  ;;  %v11227_v63 = vpop.f32.mrf.mxu0 }
 0x202   : > { %v1861_v9 = vmul.f32 0.2, %v11160_v53  ;;  %14491 = vst [vmem:[#allocation131_spill] sm:$0xff] %v11214_v22  ;;  %4946 = vmatprep.subr.bf16.mxu1 %v8345_v52  ;;  %v8348_v55 = vld [vmem:[#allocation3 + $0x6c] ss:$16 sps:$4 sm:$0xff]   ;;  %vm1576_vm5 = vcmp.gt.f32.partialorder %v11043_v33, 0.0  ;;  %v2078_v10 = vsel %vm1566_vm9, %v10988_v19, %v11056_v16  ;;  %v11241_v7 = vpop.f32.mrf.mxu1  ;;  %v11245_v19 = vadd.f32 %v10712_v40, %v10768_v4 }
 0x203   : > { %vm1584_vm6 = vcmp.gt.f32.partialorder %v11095_v8, 0.0  ;;  %v1863_v1 = vmul.f32 0.2, %v11164_v41  ;;  %v14492_v28 = vld [vmem:[#allocation98_spill] sm:$0xff]  ;;  %v1869_v29 = vmul.f32 0.2, %v1224_v17  ;;  %4754 = vmatpush1.bf16.msra.mxu0 %v8340_v24  ;;  %v11259_v24 = vpack.c.bf16 %v2109_v61, %v2101_v2 }
 0x204   : > { %v11221_v42 = vadd.f32 %v14492_v28, %v10756_v3  ;;  %v8351_v52 = vld [vmem:[#allocation3 + $0x26c] ss:$16 sps:$4 sm:$0xff]   ;;  %vm1613_vm7 = vcmp.gt.f32.partialorder %v1224_v17, 0.0  ;;  %v2070_v28 = vsel %vm1558_vm10, %v10953_v54, %v10994_v26  ;;  %14495 = vst [vmem:[#allocation98_spill] sm:$0xff] %v11241_v7  ;;  %v11257_v54 = vpop.f32.mrf.mxu0  ;;  %v8346_v26 = vld [vmem:[#allocation3 + $0x68] ss:$16 sps:$4 sm:$0xff]   ;;  %v11267_v7 = vpop.f32.mrf.mxu1  ;;  %4755 = vmatprep.subr.bf16.mxu0 %v8348_v55  ;;  %v1234_v2 = vadd.f32 %v10772_v38, %v10666_v59 }
 0x205   : > { %v14493_v22 = vld [vmem:[#allocation99_spill] sm:$0xff]  ;;  %v14494_v57 = vld [vmem:[#allocation69_spill] sm:$0xff]  ;;  %v11247_v16 = vpack.c.bf16 %v2078_v10, %v2070_v28  ;;  %4947 = vmatpush1.bf16.msra.mxu1 %v8343_v23  ;;  %14498 = vst [vmem:[#allocation132_spill] sm:$0xff] %v11259_v24  ;;  %v1871_v40 = vmul.f32 0.2, %v1417_v39  ;;  %v11263_v10 = vadd.f32 %v10724_v44, %v10666_v59  ;;  %14500 = vst [vmem:[#allocation134_spill] sm:$0xff] %v11267_v7 }
 0x206   : > { %v11231_v21 = vadd.f32 %v14493_v22, %v10768_v4  ;;  %v11235_v46 = vadd.f32 %v14494_v57, %v10756_v3  ;;  %v2072_v57 = vsel %vm1560_vm11, %v10957_v15, %v10997_v18  ;;  %v2080_v22 = vsel %vm1568_vm12, %v11002_v48, %v11076_v43  ;;  %14497 = vst [vmem:[#allocation69_spill] sm:$0xff] %v11257_v54  ;;  %v8349_v15 = vld [vmem:[#allocation3 + $0x268] ss:$16 sps:$4 sm:$0xff]   ;;  %v8354_v18 = vld [vmem:[#allocation3 + $0x4c] ss:$16 sps:$4 sm:$0xff]   ;;  %v11277_v44 = vpop.f32.mrf.mxu0  ;;  %v11292_v38 = vpop.f32.mrf.mxu1 }
 0x207   : > { %14496 = vst [vmem:[#allocation99_spill] sm:$0xff] %v11247_v16  ;;  %v11265_v28 = vpack.c.bf16 %v2080_v22, %v2072_v57  ;;  %v2125_v48 = vsel %vm1613_vm7, %v1224_v17, %v1869_v29  ;;  %vm1615_vm8 = vcmp.gt.f32.partialorder %v1417_v39, 0.0  ;;  %v11272_v43 = vadd.f32 %v10738_v49, %v10696_v35  ;;  %4413 = vmatprep.mubr.bf16.mxu0 %v11247_v16  ;;  %v8357_v61 = vld [vmem:[#allocation3 + $0x24c] ss:$16 sps:$4 sm:$0xff]   ;;  %v8352_v55 = vld [vmem:[#allocation3 + $0x48] ss:$16 sps:$4 sm:$0xff]  }
 0x208   : > { %4948 = vmatprep.subr.bf16.mxu1 %v8351_v52  ;;  %v11279_v23 = vpack.c.bf16 %v2111_v31, %v2103_v47  ;;  %v2117_v29 = vsel %vm1605_vm3, %v11160_v53, %v1861_v9  ;;  %v2119_v49 = vsel %vm1607_vm4, %v11164_v41, %v1863_v1  ;;  %v11288_v17 = vmul.f32 0.2, %v11221_v42  ;;  %4414 = vmatmul.mubr.bf16.gmra.mxu0 %v11053_v25  ;;  %v8355_v47 = vld [vmem:[#allocation3 + $0x248] ss:$16 sps:$4 sm:$0xff]   ;;  %v11308_v52 = vpop.f32.mrf.mxu0 }
 0x209   : > { %14499 = vst [vmem:[#allocation133_spill] sm:$0xff] %v11265_v28  ;;  %4606 = vmatprep.mubr.bf16.mxu1 %v11265_v28  ;;  %14502 = vst [vmem:[#allocation136_spill] sm:$0xff] %v11292_v38  ;;  %v11295_v31 = vmul.f32 0.2, %v11231_v21  ;;  %v11298_v9 = vmul.f32 0.2, %v11235_v46  ;;  %4756 = vmatpush1.bf16.msra.mxu0 %v8346_v26  ;;  %v11311_v57 = vpack.c.bf16 %v2125_v48, %v2117_v29  ;;  %v11316_v28 = vpop.f32.mrf.mxu1 }
 0x20a   : > { %14501 = vst [vmem:[#allocation135_spill] sm:$0xff] %v11279_v23  ;;  %v11301_v53 = vmul.f32 0.2, %v11245_v19  ;;  %v14503_v41 = vld [vmem:[#allocation103_spill] sm:$0xff]  ;;  %4607 = vmatmul.mubr.bf16.gmra.mxu1 %v11073_v45  ;;  %vm1598_vm9 = vcmp.gt.f32.partialorder %v11136_v13, 0.0  ;;  %v2127_v22 = vsel %vm1615_vm8, %v1417_v39, %v1871_v40  ;;  %vm1621_vm10 = vcmp.gt.f32.partialorder %v11263_v10, 0.0  ;;  %4757 = vmatprep.subr.bf16.mxu0 %v8354_v18  ;;  %v11325_v40 = vpop.f32.mrf.mxu0 }
 0x20b   : > { %v11305_v1 = vadd.f32 %v14503_v41, %v10696_v35  ;;  %14504 = vst [vmem:[#allocation103_spill] sm:$0xff] %v11308_v52  ;;  %14505 = vst [vmem:[#allocation137_spill] sm:$0xff] %v11311_v57  ;;  %v1877_v25 = vmul.f32 0.2, %v11263_v10  ;;  %4949 = vmatpush1.bf16.msra.mxu1 %v8349_v15  ;;  %v8360_v41 = vld [vmem:[#allocation3 + $0x2c] ss:$16 sps:$4 sm:$0xff]  }
 0x20c   : > { %14506 = vst [vmem:[#allocation138_spill] sm:$0xff] %v11316_v28  ;;  %vm1590_vm11 = vcmp.gt.f32.partialorder %v11122_v58, 0.0  ;;  %vm1623_vm12 = vcmp.gt.f32.partialorder %v11272_v43, 0.0  ;;  %v1879_v26 = vmul.f32 0.2, %v11272_v43  ;;  %v14507_v48 = vld [vmem:[#allocation48_spill] sm:$0xff]  ;;  %4950 = vmatprep.subr.bf16.mxu1 %v8357_v61  ;;  %v11341_v28 = vpop.f32.mrf.mxu1  ;;  %v11356_v38 = vpop.f32.mrf.mxu0 }
 0x20d   : > { %v11323_v29 = vadd.f32 %v14507_v48, %v10756_v3  ;;  %v1885_v39 = vmul.f32 0.2, %v1234_v2  ;;  %14508 = vst [vmem:[#allocation48_spill] sm:$0xff] %v11325_v40  ;;  %vm1592_vm13 = vcmp.gt.f32.partialorder %v11126_v36, 0.0  ;;  %vm1600_vm14 = vcmp.gt.f32.partialorder %v11152_v27, 0.0  ;;  %v14509_v15 = vld [vmem:[#allocation19_spill] sm:$0xff]  ;;  %4758 = vmatpush1.bf16.msra.mxu0 %v8352_v55 }
 0x20e   : > { %v11331_v18 = vadd.f32 %v14509_v15, %v10768_v4  ;;  %vm1629_vm15 = vcmp.gt.f32.partialorder %v1234_v2, 0.0  ;;  %v14510_v45 = vld [vmem:[#allocation104_spill] sm:$0xff]  ;;  %v2094_v48 = vsel %vm1582_vm0, %v11047_v32, %v11091_v30  ;;  %14511 = vst [vmem:[#allocation19_spill] sm:$0xff] %v11341_v28  ;;  %v1887_v52 = vmul.f32 0.2, %v11305_v1  ;;  %v14512_v7 = vld [vmem:[#allocation73_spill] sm:$0xff]  ;;  %4759 = vmatprep.subr.bf16.mxu0 %v8360_v41 }
 0x20f   : > { %v11335_v16 = vadd.f32 %v14510_v45, %v10756_v3  ;;  %v8363_v61 = vld [vmem:[#allocation3 + $0x22c] ss:$16 sps:$4 sm:$0xff]   ;;  %v11346_v54 = vadd.f32 %v14512_v7, %v10768_v4  ;;  %v2086_v45 = vsel %vm1574_vm2, %v11039_v34, %v11085_v37  ;;  %14514 = vst [vmem:[#allocation104_spill] sm:$0xff] %v11356_v38  ;;  %v2088_v7 = vsel %vm1576_vm5, %v11043_v33, %v11088_v12  ;;  %v11372_v37 = vpop.f32.mrf.mxu1  ;;  %v8358_v34 = vld [vmem:[#allocation3 + $0x28] ss:$16 sps:$4 sm:$0xff]   ;;  %v11382_v33 = vpop.f32.mrf.mxu0 }
 0x210   : > { %v14513_v15 = vld [vmem:[#allocation110_spill] sm:$0xff]  ;;  %v11362_v28 = vpack.c.bf16 %v2094_v48, %v2086_v45  ;;  %4951 = vmatpush1.bf16.msra.mxu1 %v8355_v47  ;;  %v2141_v55 = vsel %vm1629_vm15, %v1234_v2, %v1885_v39  ;;  %vm1631_vm1 = vcmp.gt.f32.partialorder %v11305_v1, 0.0  ;;  %v8361_v12 = vld [vmem:[#allocation3 + $0x228] ss:$16 sps:$4 sm:$0xff]   ;;  %v11390_v2 = vmul.f32 0.2, %v11323_v29 }
 0x211   : > { %v11350_v40 = vadd.f32 %v14513_v15, %v10666_v59  ;;  %v14515_v32 = vld [vmem:[#allocation18_spill] sm:$0xff]  ;;  %v2096_v15 = vsel %vm1584_vm6, %v11095_v8, %v11174_v11  ;;  %14517 = vst [vmem:[#allocation110_spill] sm:$0xff] %v11372_v37  ;;  %v11384_v8 = vpack.c.bf16 %v2127_v22, %v2119_v49  ;;  %v2133_v11 = vsel %vm1621_vm10, %v11263_v10, %v1877_v25  ;;  %v14521_v47 = vld [vmem:[#allocation23_spill] sm:$0xff]  ;;  %v14533_v37 = vld [vmem:[#allocation112_spill] sm:$0xff] }
 0x212   : > { %v11360_v30 = vadd.f32 %v14515_v32, %v10696_v35  ;;  %14516 = vst [vmem:[#allocation73_spill] sm:$0xff] %v11362_v28  ;;  %v14518_v48 = vld [vmem:[#allocation74_spill] sm:$0xff]  ;;  %v11380_v32 = vpack.c.bf16 %v2096_v15, %v2088_v7  ;;  %v11394_v39 = vadd.f32 %v14521_v47, %v10696_v35  ;;  %4423 = vmatprep.mubr.bf16.mxu0 %v11362_v28  ;;  %v11397_v7 = vpop.f32.mrf.mxu1  ;;  %v8364_v41 = vld [vmem:[#allocation3 + $0x8] ss:$16 sps:$4 sm:$0xff]   ;;  %v11405_v25 = vmul.f32 0.2, %v11331_v18 }
 0x213   : > { %v11378_v45 = vadd.f32 %v14518_v48, %v10666_v59  ;;  %v8366_v38 = vld [vmem:[#allocation3 + $0xc] ss:$16 sps:$4 sm:$0xff]   ;;  %14520 = vst [vmem:[#allocation74_spill] sm:$0xff] %v11384_v8  ;;  %14522 = vst [vmem:[#allocation23_spill] sm:$0xff] %v11397_v7  ;;  %4952 = vmatprep.subr.bf16.mxu1 %v8363_v61  ;;  %v11402_v49 = vsel %vm1623_vm12, %v11272_v43, %v1879_v26  ;;  %v11408_v10 = vmul.f32 0.2, %v11335_v16  ;;  %4424 = vmatmul.mubr.bf16.gmra.mxu0 %v11169_v50  ;;  %v11415_v61 = vpop.f32.mrf.mxu0 }
 0x214   : > { %14519 = vst [vmem:[#allocation18_spill] sm:$0xff] %v11380_v32  ;;  %v8369_v15 = vld [vmem:[#allocation3 + $0x20c] ss:$16 sps:$4 sm:$0xff]   ;;  %v11411_v22 = vmul.f32 0.2, %v11346_v54  ;;  %4616 = vmatprep.mubr.bf16.mxu1 %v11380_v32  ;;  %14523 = vst [vmem:[#allocation139_spill] sm:$0xff] %v11415_v61  ;;  %v11417_v48 = vpack.c.bf16 %v2141_v55, %v2133_v11  ;;  %v2143_v43 = vsel %vm1631_vm1, %v11305_v1, %v1887_v52  ;;  %v11425_v28 = vpop.f32.mrf.mxu1  ;;  %4760 = vmatpush1.bf16.msra.mxu0 %v8358_v34 }
 0x215   : > { %v1901_v26 = vmul.f32 0.2, %v11350_v40  ;;  %v1903_v47 = vmul.f32 0.2, %v11360_v30  ;;  %4617 = vmatmul.mubr.bf16.gmra.mxu1 %v11171_v60  ;;  %14525 = vst [vmem:[#allocation141_spill] sm:$0xff] %v11425_v28  ;;  %vm1614_vm0 = vcmp.gt.f32.partialorder %v11235_v46, 0.0  ;;  %v11435_v55 = vpop.f32.mrf.mxu0  ;;  %4761 = vmatprep.subr.bf16.mxu0 %v8366_v38  ;;  %v1443_v50 = vadd.f32 %v10920_v0, %v10696_v35 }
 0x216   : > { %14524 = vst [vmem:[#allocation140_spill] sm:$0xff] %v11417_v48  ;;  %v8367_v32 = vld [vmem:[#allocation3 + $0x208] ss:$16 sps:$4 sm:$0xff]   ;;  %vm1637_vm2 = vcmp.gt.f32.partialorder %v11378_v45, 0.0  ;;  %vm1645_vm3 = vcmp.gt.f32.partialorder %v11350_v40, 0.0  ;;  %vm1647_vm4 = vcmp.gt.f32.partialorder %v11360_v30, 0.0  ;;  %4953 = vmatpush1.bf16.msra.mxu1 %v8361_v12  ;;  %v11443_v28 = vpop.f32.mrf.mxu1  ;;  %v2110_v0 = vsel %vm1598_vm9, %v11136_v13, %v11201_v6 }
 0x217   : > { %v14526_v1 = vld [vmem:[#allocation21_spill] sm:$0xff]  ;;  %vm1606_vm5 = vcmp.gt.f32.partialorder %v11221_v42, 0.0  ;;  %v1893_v34 = vmul.f32 0.2, %v11378_v45  ;;  %vm1639_vm6 = vcmp.gt.f32.partialorder %v11394_v39, 0.0  ;;  %14528 = vst [vmem:[#allocation142_spill] sm:$0xff] %v11443_v28  ;;  %4954 = vmatprep.subr.bf16.mxu1 %v8369_v15  ;;  %v11463_v15 = vpop.f32.mrf.mxu0  ;;  %v2102_v13 = vsel %vm1590_vm11, %v11122_v58, %v11189_v62 }
 0x218   : > { %v11433_v52 = vadd.f32 %v14526_v1, %v10666_v59  ;;  %14527 = vst [vmem:[#allocation21_spill] sm:$0xff] %v11435_v55  ;;  %v8372_v11 = vld [vmem:[#allocation3 + $0x1ec] ss:$16 sps:$4 sm:$0xff]   ;;  %v1895_v60 = vmul.f32 0.2, %v11394_v39  ;;  %vm1608_vm7 = vcmp.gt.f32.partialorder %v11231_v21, 0.0  ;;  %v11479_v6 = vpop.f32.mrf.mxu1  ;;  %4762 = vmatpush1.bf16.msra.mxu0 %v8364_v41 }
 0x219   : > { %vm1616_vm8 = vcmp.gt.f32.partialorder %v11245_v19, 0.0  ;;  %v14529_v38 = vld [vmem:[#allocation106_spill] sm:$0xff]  ;;  %v14530_v1 = vld [vmem:[#allocation108_spill] sm:$0xff]  ;;  %v8370_v58 = vld [vmem:[#allocation3 + $0x1e8] ss:$16 sps:$4 sm:$0xff]   ;;  %4763 = vmatprep.subr.bf16.mxu0 %v8372_v11  ;;  %vm1655_vm10 = vcmp.gt.f32.partialorder %v1443_v50, 0.0  ;;  %v11515_v11 = vpack.c.bf16 %v2143_v43, %v11402_v49 }
 0x21a   : > { %v11449_v12 = vadd.f32 %v14529_v38, %v10756_v3  ;;  %v11453_v55 = vadd.f32 %v14530_v1, %v10768_v4  ;;  %v14531_v61 = vld [vmem:[#allocation76_spill] sm:$0xff]  ;;  %14532 = vst [vmem:[#allocation106_spill] sm:$0xff] %v11463_v15  ;;  %v2157_v38 = vsel %vm1645_vm3, %v11350_v40, %v1901_v26  ;;  %v2159_v1 = vsel %vm1647_vm4, %v11360_v30, %v1903_v47  ;;  %v8373_v62 = vld [vmem:[#allocation3 + $0x3e8] ss:$16 sps:$4 sm:$0xff]  }
 0x21b   : > { %v11457_v7 = vadd.f32 %v14531_v61, %v10756_v3  ;;  %v8375_v28 = vld [vmem:[#allocation3 + $0x3ec] ss:$16 sps:$4 sm:$0xff]   ;;  %v11473_v61 = vadd.f32 %v14533_v37, %v10768_v4  ;;  %14534 = vst [vmem:[#allocation108_spill] sm:$0xff] %v11479_v6  ;;  %vm1653_vm9 = vcmp.gt.f32.partialorder %v11433_v52, 0.0  ;;  %v11482_v15 = vpack.c.bf16 %v2110_v0, %v2102_v13  ;;  %v11492_v37 = vpop.f32.mrf.mxu0  ;;  %4955 = vmatpush1.bf16.msra.mxu1 %v8367_v32 }
 0x21c   : > { %v2104_v40 = vsel %vm1592_vm13, %v11126_v36, %v11192_v5  ;;  %v2112_v30 = vsel %vm1600_vm14, %v11152_v27, %v11204_v51  ;;  %14536 = vst [vmem:[#allocation112_spill] sm:$0xff] %v11492_v37  ;;  %v1909_v41 = vmul.f32 0.2, %v11433_v52  ;;  %v1911_v26 = vmul.f32 0.2, %v1443_v50  ;;  %v11501_v36 = vpop.f32.mrf.mxu1  ;;  %v14539_v27 = vld [vmem:[#allocation78_spill] sm:$0xff]  ;;  %4956 = vmatprep.subr.bf16.mxu1 %v8375_v28  ;;  %4764 = vmatpush2.bf16.msra.mxu0 %v8370_v58 }
 0x21d   : > { %14535 = vst [vmem:[#allocation76_spill] sm:$0xff] %v11482_v15  ;;  %v11497_v47 = vadd.f32 %v10932_v20, %v10756_v3  ;;  %v11499_v0 = vpack.c.bf16 %v2112_v30, %v2104_v40  ;;  %14538 = vst [vmem:[#allocation144_spill] sm:$0xff] %v11501_v36  ;;  %v8378_v5 = vld [vmem:[#allocation3 + $0x1cc] ss:$16 sps:$4 sm:$0xff]   ;;  %v11505_v51 = vadd.f32 %v14539_v27, %v10768_v4  ;;  %4433 = vmatprep.mubr.bf16.mxu0 %v11482_v15  ;;  %v11512_v20 = vpop.f32.mrf.mxu0 }
 0x21e   : > { %v14540_v32 = vld [vmem:[#allocation113_spill] sm:$0xff]  ;;  %v14541_v37 = vld [vmem:[#allocation80_spill] sm:$0xff]  ;;  %14542 = vst [vmem:[#allocation78_spill] sm:$0xff] %v11512_v20  ;;  %v2149_v30 = vsel %vm1637_vm2, %v11378_v45, %v1893_v34  ;;  %v2151_v27 = vsel %vm1639_vm6, %v11394_v39, %v1895_v60  ;;  %4434 = vmatmul.mubr.bf16.gmra.mxu0 %v11259_v24  ;;  %v11528_v28 = vpop.f32.mrf.mxu1  ;;  %v11531_v49 = vmul.f32 0.2, %v11453_v55  ;;  %vm1630_vm11 = vcmp.gt.f32.partialorder %v11335_v16, 0.0  ;;  %4765 = vmatprep.subr.bf16.mxu0 %v8378_v5 }
 0x21f   : > { %14537 = vst [vmem:[#allocation143_spill] sm:$0xff] %v11499_v0  ;;  %v1254_v13 = vadd.f32 %v14540_v32, %v10666_v59  ;;  %v1447_v6 = vadd.f32 %v14541_v37, %v10696_v35  ;;  %v8381_v40 = vld [vmem:[#allocation3 + $0x3cc] ss:$16 sps:$4 sm:$0xff]   ;;  %14543 = vst [vmem:[#allocation113_spill] sm:$0xff] %v11515_v11  ;;  %v11524_v32 = vmul.f32 0.2, %v11449_v12  ;;  %4626 = vmatprep.mubr.bf16.mxu1 %v11499_v0  ;;  %v11542_v39 = vpop.f32.mrf.mxu0  ;;  %4957 = vmatpush2.bf16.msra.mxu1 %v8373_v62 }
 0x220   : > { %14544 = vst [vmem:[#allocation80_spill] sm:$0xff] %v11528_v28  ;;  %v8376_v37 = vld [vmem:[#allocation3 + $0x1c8] ss:$16 sps:$4 sm:$0xff]   ;;  %v11533_v43 = vpack.c.bf16 %v2157_v38, %v2149_v30  ;;  %v11536_v45 = vmul.f32 0.2, %v11457_v7  ;;  %4627 = vmatmul.mubr.bf16.gmra.mxu1 %v11279_v23  ;;  %14546 = vst [vmem:[#allocation146_spill] sm:$0xff] %v11542_v39  ;;  %v11545_v34 = vpack.c.bf16 %v2159_v1, %v2151_v27  ;;  %v11556_v0 = vpop.f32.mrf.mxu1  ;;  %4958 = vmatprep.subr.bf16.mxu1 %v8381_v40 }
 0x221   : > { %v11539_v60 = vmul.f32 0.2, %v11473_v61  ;;  %v2165_v38 = vsel %vm1653_vm9, %v11433_v52, %v1909_v41  ;;  %v11551_v30 = vsel %vm1655_vm10, %v1443_v50, %v1911_v26  ;;  %v11554_v24 = vmul.f32 0.2, %v11497_v47  ;;  %14548 = vst [vmem:[#allocation148_spill] sm:$0xff] %v11556_v0  ;;  %v14550_v52 = vld [vmem:[#allocation117_spill] sm:$0xff]  ;;  %v11564_v41 = vpop.f32.mrf.mxu0  ;;  %4766 = vmatpush2.bf16.msra.mxu0 %v8376_v37 }
 0x222   : > { %14545 = vst [vmem:[#allocation145_spill] sm:$0xff] %v11533_v43  ;;  %14547 = vst [vmem:[#allocation147_spill] sm:$0xff] %v11545_v34  ;;  %v8379_v23 = vld [vmem:[#allocation3 + $0x3c8] ss:$16 sps:$4 sm:$0xff]   ;;  %v8384_v58 = vld [vmem:[#allocation3 + $0x1ac] ss:$16 sps:$4 sm:$0xff]   ;;  %v1260_v50 = vadd.f32 %v14550_v52, %v10666_v59  ;;  %v2126_v5 = vsel %vm1614_vm0, %v11235_v46, %v11298_v9  ;;  %v11574_v0 = vpop.f32.mrf.mxu1 }
 0x223   : > { %vm1622_vm12 = vcmp.gt.f32.partialorder %v11323_v29, 0.0  ;;  %v11560_v1 = vmul.f32 0.2, %v11505_v51  ;;  %v1917_v27 = vmul.f32 0.2, %v1254_v13  ;;  %14551 = vst [vmem:[#allocation117_spill] sm:$0xff] %v11564_v41  ;;  %v11590_v46 = vpop.f32.mrf.mxu0  ;;  %4959 = vmatpush2.bf16.msra.mxu1 %v8379_v23  ;;  %4767 = vmatprep.subr.bf16.mxu0 %v8384_v58 }
 0x224   : > { %v1919_v15 = vmul.f32 0.2, %v1447_v6  ;;  %vm1624_vm13 = vcmp.gt.f32.partialorder %v11331_v18, 0.0  ;;  %vm1632_vm14 = vcmp.gt.f32.partialorder %v11346_v54, 0.0  ;;  %vm1661_vm15 = vcmp.gt.f32.partialorder %v1254_v13, 0.0  ;;  %v14552_v62 = vld [vmem:[#allocation118_spill] sm:$0xff] }
 0x225   : > { %14549 = vst [vmem:[#allocation149_spill] sm:$0xff] %v11560_v1  ;;  %vm1663_vm1 = vcmp.gt.f32.partialorder %v1447_v6, 0.0  ;;  %v1453_v26 = vadd.f32 %v14552_v62, %v10696_v35  ;;  %14553 = vst [vmem:[#allocation118_spill] sm:$0xff] %v11574_v0  ;;  %v8387_v52 = vld [vmem:[#allocation3 + $0x3ac] ss:$16 sps:$4 sm:$0xff]   ;;  %v2118_v62 = vsel %vm1606_vm5, %v11221_v42, %v11288_v17  ;;  %v11606_v42 = vpop.f32.mrf.mxu1  ;;  %v2173_v37 = vsel %vm1661_vm15, %v1254_v13, %v1917_v27 }
 0x226   : > { %v14554_v39 = vld [vmem:[#allocation81_spill] sm:$0xff]  ;;  %v14555_v28 = vld [vmem:[#allocation115_spill] sm:$0xff]  ;;  %v14556_v41 = vld [vmem:[#allocation120_spill] sm:$0xff]  ;;  %vm1669_vm0 = vcmp.gt.f32.partialorder %v1260_v50, 0.0  ;;  %4960 = vmatprep.subr.bf16.mxu1 %v8387_v52  ;;  %vm1646_vm4 = vcmp.gt.f32.partialorder %v11457_v7, 0.0  ;;  %vm1638_vm6 = vcmp.gt.f32.partialorder %v11449_v12, 0.0 }
 0x227   : > { %v11578_v40 = vadd.f32 %v14554_v39, %v10756_v3  ;;  %v11582_v20 = vadd.f32 %v14555_v28, %v10768_v4  ;;  %v1264_v36 = vadd.f32 %v14556_v41, %v10666_v59  ;;  %14557 = vst [vmem:[#allocation81_spill] sm:$0xff] %v11590_v46  ;;  %v14558_v9 = vld [vmem:[#allocation86_spill] sm:$0xff]  ;;  %v11596_v39 = vpack.c.bf16 %v2126_v5, %v2118_v62  ;;  %v8382_v17 = vld [vmem:[#allocation3 + $0x1a8] ss:$16 sps:$4 sm:$0xff]   ;;  %v11612_v46 = vpop.f32.mrf.mxu0 }
 0x228   : > { %v11594_v0 = vadd.f32 %v14558_v9, %v10696_v35  ;;  %v2120_v28 = vsel %vm1608_vm7, %v11231_v21, %v11295_v31  ;;  %v2128_v41 = vsel %vm1616_vm8, %v11245_v19, %v11301_v53  ;;  %14560 = vst [vmem:[#allocation120_spill] sm:$0xff] %v11606_v42  ;;  %v2175_v9 = vsel %vm1663_vm1, %v1447_v6, %v1919_v15  ;;  %v8385_v21 = vld [vmem:[#allocation3 + $0x3a8] ss:$16 sps:$4 sm:$0xff]   ;;  %v8390_v31 = vld [vmem:[#allocation3 + $0x18c] ss:$16 sps:$4 sm:$0xff]   ;;  %v11623_v15 = vpop.f32.mrf.mxu1 }
 0x229   : > { %14559 = vst [vmem:[#allocation115_spill] sm:$0xff] %v11596_v39  ;;  %v1925_v5 = vmul.f32 0.2, %v1260_v50  ;;  %v11610_v62 = vpack.c.bf16 %v2128_v41, %v2120_v28  ;;  %14562 = vst [vmem:[#allocation150_spill] sm:$0xff] %v11612_v46  ;;  %v1927_v1 = vmul.f32 0.2, %v1453_v26  ;;  %4443 = vmatprep.mubr.bf16.mxu0 %v11596_v39  ;;  %4768 = vmatpush2.bf16.msra.mxu0 %v8382_v17 }
 0x22a   : > { %v14563_v19 = vld [vmem:[#allocation88_spill] sm:$0xff]  ;;  %v14564_v23 = vld [vmem:[#allocation30_spill] sm:$0xff]  ;;  %v8388_v6 = vld [vmem:[#allocation3 + $0x188] ss:$16 sps:$4 sm:$0xff]   ;;  %v11626_v58 = vmul.f32 0.2, %v11578_v40  ;;  %4444 = vmatmul.mubr.bf16.gmra.mxu0 %v11311_v57  ;;  %4961 = vmatpush2.bf16.msra.mxu1 %v8385_v21 }
 0x22b   : > { %14561 = vst [vmem:[#allocation86_spill] sm:$0xff] %v11610_v62  ;;  %v11616_v53 = vadd.f32 %v14563_v19, %v10756_v3  ;;  %v11620_v42 = vadd.f32 %v14564_v23, %v10768_v4  ;;  %14565 = vst [vmem:[#allocation88_spill] sm:$0xff] %v11623_v15  ;;  %v8393_v13 = vld [vmem:[#allocation3 + $0x38c] ss:$16 sps:$4 sm:$0xff]   ;;  %vm1671_vm2 = vcmp.gt.f32.partialorder %v1453_v26, 0.0  ;;  %4636 = vmatprep.mubr.bf16.mxu1 %v11610_v62  ;;  %v11634_v19 = vpop.f32.mrf.mxu0  ;;  %vm1677_vm3 = vcmp.gt.f32.partialorder %v1264_v36, 0.0  ;;  %v11643_v15 = vpop.f32.mrf.mxu1 }
 0x22c   : > { %v1933_v27 = vmul.f32 0.2, %v1264_v36  ;;  %v14566_v28 = vld [vmem:[#allocation121_spill] sm:$0xff]  ;;  %14567 = vst [vmem:[#allocation30_spill] sm:$0xff] %v11634_v19  ;;  %v11636_v23 = vpack.c.bf16 %v2173_v37, %v2165_v38  ;;  %v11639_v52 = vmul.f32 0.2, %v11582_v20  ;;  %4637 = vmatmul.mubr.bf16.gmra.mxu1 %v11384_v8  ;;  %v2181_v57 = vsel %vm1669_vm0, %v1260_v50, %v1925_v5  ;;  %4769 = vmatprep.subr.bf16.mxu0 %v8390_v31 }
 0x22d   : > { %v11630_v41 = vadd.f32 %v14566_v28, %v10756_v3  ;;  %v1935_v39 = vmul.f32 0.2, %v11594_v0  ;;  %14569 = vst [vmem:[#allocation151_spill] sm:$0xff] %v11643_v15  ;;  %v11647_v28 = vpack.c.bf16 %v2175_v9, %v11551_v30  ;;  %vm1679_vm5 = vcmp.gt.f32.partialorder %v11594_v0, 0.0  ;;  %v14571_v38 = vld [vmem:[#allocation124_spill] sm:$0xff]  ;;  %v11655_v62 = vpop.f32.mrf.mxu0  ;;  %v14573_v9 = vld [vmem:[#allocation125_spill] sm:$0xff]  ;;  %4962 = vmatprep.subr.bf16.mxu1 %v8393_v13  ;;  %4770 = vmatpush2.bf16.msra.mxu0 %v8388_v6 }
 0x22e   : > { %14568 = vst [vmem:[#allocation121_spill] sm:$0xff] %v11636_v23  ;;  %v11653_v37 = vadd.f32 %v14571_v38, %v10666_v59  ;;  %14572 = vst [vmem:[#allocation124_spill] sm:$0xff] %v11655_v62  ;;  %v8391_v8 = vld [vmem:[#allocation3 + $0x388] ss:$16 sps:$4 sm:$0xff]   ;;  %v2183_v17 = vsel %vm1671_vm2, %v1453_v26, %v1927_v1  ;;  %v11660_v30 = vmul.f32 0.2, %v11616_v53  ;;  %v1463_v5 = vadd.f32 %v14573_v9, %v10696_v35  ;;  %v11667_v38 = vpop.f32.mrf.mxu1 }
 0x22f   : > { %14570 = vst [vmem:[#allocation152_spill] sm:$0xff] %v11647_v28  ;;  %v11663_v50 = vmul.f32 0.2, %v11620_v42  ;;  %14574 = vst [vmem:[#allocation125_spill] sm:$0xff] %v11667_v38  ;;  %v8396_v15 = vld [vmem:[#allocation3 + $0x16c] ss:$16 sps:$4 sm:$0xff]   ;;  %v2189_v21 = vsel %vm1677_vm3, %v1264_v36, %v1933_v27  ;;  %v2142_v9 = vsel %vm1630_vm11, %v11335_v16, %v11408_v10  ;;  %v11683_v13 = vpop.f32.mrf.mxu0  ;;  %v2191_v46 = vsel %vm1679_vm5, %v11594_v0, %v1935_v39 }
 0x230   : > { %vm1640_vm7 = vcmp.gt.f32.partialorder %v11453_v55, 0.0  ;;  %vm1648_vm8 = vcmp.gt.f32.partialorder %v11473_v61, 0.0  ;;  %v11673_v1 = vmul.f32 0.2, %v11630_v41  ;;  %v14575_v26 = vld [vmem:[#allocation122_spill] sm:$0xff]  ;;  %v2134_v16 = vsel %vm1622_vm12, %v11323_v29, %v11390_v2  ;;  %v11700_v10 = vpop.f32.mrf.mxu1  ;;  %4963 = vmatpush2.bf16.msra.mxu1 %v8391_v8  ;;  %4771 = vmatprep.subr.bf16.mxu0 %v8396_v15 }
 0x231   : > { %v11677_v31 = vadd.f32 %v14575_v26, %v10768_v4  ;;  %v8399_v19 = vld [vmem:[#allocation3 + $0x36c] ss:$16 sps:$4 sm:$0xff]   ;;  %v11694_v26 = vadd.f32 %v11148_v14, %v10696_v35  ;;  %14577 = vst [vmem:[#allocation122_spill] sm:$0xff] %v11700_v10  ;;  %vm1685_vm9 = vcmp.gt.f32.partialorder %v11653_v37, 0.0  ;;  %v11703_v38 = vpack.c.bf16 %v2142_v9, %v2134_v16  ;;  %v11713_v39 = vpop.f32.mrf.mxu0  ;;  %v8394_v29 = vld [vmem:[#allocation3 + $0x168] ss:$16 sps:$4 sm:$0xff]  }
 0x232   : > { %v14576_v36 = vld [vmem:[#allocation90_spill] sm:$0xff]  ;;  %v2136_v0 = vsel %vm1624_vm13, %v11331_v18, %v11405_v25  ;;  %v2144_v14 = vsel %vm1632_vm14, %v11346_v54, %v11411_v22  ;;  %14579 = vst [vmem:[#allocation153_spill] sm:$0xff] %v11713_v39  ;;  %v8397_v2 = vld [vmem:[#allocation3 + $0x368] ss:$16 sps:$4 sm:$0xff]   ;;  %v1941_v6 = vmul.f32 0.2, %v11653_v37  ;;  %v11722_v18 = vpop.f32.mrf.mxu1  ;;  %v11730_v8 = vadd.f32 %v11156_v56, %v10756_v3  ;;  %4964 = vmatprep.subr.bf16.mxu1 %v8399_v19 }
 0x233   : > { %v11690_v27 = vadd.f32 %v14576_v36, %v10666_v59  ;;  %14578 = vst [vmem:[#allocation90_spill] sm:$0xff] %v11703_v38  ;;  %v1943_v36 = vmul.f32 0.2, %v1463_v5  ;;  %v14580_v9 = vld [vmem:[#allocation94_spill] sm:$0xff]  ;;  %v11720_v62 = vpack.c.bf16 %v2144_v14, %v2136_v0  ;;  %14582 = vst [vmem:[#allocation154_spill] sm:$0xff] %v11722_v18  ;;  %vm1687_vm10 = vcmp.gt.f32.partialorder %v1463_v5, 0.0  ;;  %4453 = vmatprep.mubr.bf16.mxu0 %v11703_v38  ;;  %v11737_v0 = vpop.f32.mrf.mxu0 }
 0x234   : > { %v11718_v16 = vadd.f32 %v14580_v9, %v10756_v3  ;;  %v8402_v25 = vld [vmem:[#allocation3 + $0x14c] ss:$16 sps:$4 sm:$0xff]   ;;  %v11739_v14 = vpack.c.bf16 %v2189_v21, %v2181_v57  ;;  %v11742_v9 = vmul.f32 0.2, %v11677_v31  ;;  %v1951_v56 = vmul.f32 0.2, %v11694_v26  ;;  %4454 = vmatmul.mubr.bf16.gmra.mxu0 %v11417_v48  ;;  %4965 = vmatpush2.bf16.msra.mxu1 %v8397_v2 }
 0x235   : > { %14581 = vst [vmem:[#allocation94_spill] sm:$0xff] %v11720_v62  ;;  %v14583_v54 = vld [vmem:[#allocation64_spill] sm:$0xff]  ;;  %4646 = vmatprep.mubr.bf16.mxu1 %v11720_v62  ;;  %vm1693_vm11 = vcmp.gt.f32.partialorder %v11690_v27, 0.0  ;;  %vm1695_vm12 = vcmp.gt.f32.partialorder %v11694_v26, 0.0  ;;  %v14588_v21 = vld [vmem:[#allocation129_spill] sm:$0xff]  ;;  %v11761_v18 = vpop.f32.mrf.mxu0  ;;  %4772 = vmatpush2.bf16.msra.mxu0 %v8394_v29  ;;  %vm1662_vm13 = vcmp.gt.f32.partialorder %v11578_v40, 0.0  ;;  %v11764_v62 = vpack.c.bf16 %v2191_v46, %v2183_v17 }
 0x236   : > { %v11726_v22 = vadd.f32 %v14583_v54, %v10768_v4  ;;  %v14584_v39 = vld [vmem:[#allocation96_spill] sm:$0xff]  ;;  %14585 = vst [vmem:[#allocation64_spill] sm:$0xff] %v11739_v14  ;;  %v1949_v54 = vmul.f32 0.2, %v11690_v27  ;;  %v11758_v38 = vadd.f32 %v14588_v21, %v10696_v35  ;;  %4647 = vmatmul.mubr.bf16.gmra.mxu1 %v11515_v11  ;;  %v8400_v48 = vld [vmem:[#allocation3 + $0x148] ss:$16 sps:$4 sm:$0xff]   ;;  %v2197_v14 = vsel %vm1685_vm9, %v11653_v37, %v1941_v6 }
 0x237   : > { %v11734_v10 = vadd.f32 %v14584_v39, %v10768_v4  ;;  %v8405_v15 = vld [vmem:[#allocation3 + $0x34c] ss:$16 sps:$4 sm:$0xff]   ;;  %v11748_v39 = vpop.f32.mrf.mxu1  ;;  %4773 = vmatprep.subr.bf16.mxu0 %v8402_v25  ;;  %v8403_v11 = vld [vmem:[#allocation3 + $0x348] ss:$16 sps:$4 sm:$0xff]   ;;  %vm1654_vm14 = vcmp.gt.f32.partialorder %v11497_v47, 0.0  ;;  %v11787_v6 = vpop.f32.mrf.mxu0  ;;  %vm1656_vm15 = vcmp.gt.f32.partialorder %v11505_v51, 0.0 }
 0x238   : > { %14586 = vst [vmem:[#allocation96_spill] sm:$0xff] %v11748_v39  ;;  %v14587_v57 = vld [vmem:[#allocation128_spill] sm:$0xff]  ;;  %v11771_v39 = vmul.f32 0.2, %v11718_v16  ;;  %v11777_v46 = vmul.f32 0.2, %v11726_v22  ;;  %4966 = vmatprep.subr.bf16.mxu1 %v8405_v15  ;;  %v2205_v2 = vsel %vm1693_vm11, %v11690_v27, %v1949_v54 }
 0x239   : > { %v11754_v19 = vadd.f32 %v14587_v57, %v10666_v59  ;;  %14589 = vst [vmem:[#allocation128_spill] sm:$0xff] %v11764_v62  ;;  %v2199_v57 = vsel %vm1687_vm10, %v1463_v5, %v1943_v36  ;;  %v11773_v21 = vpop.f32.mrf.mxu1  ;;  %v8408_v29 = vld [vmem:[#allocation3 + $0x12c] ss:$16 sps:$4 sm:$0xff]   ;;  %v11780_v17 = vmul.f32 0.2, %v11730_v8  ;;  %v1284_v5 = vadd.f32 %v11227_v63, %v10666_v59  ;;  %v11812_v54 = vpop.f32.mrf.mxu0  ;;  %4774 = vmatpush2.bf16.msra.mxu0 %v8400_v48 }
 0x23a   : > { %14590 = vst [vmem:[#allocation129_spill] sm:$0xff] %v11773_v21  ;;  %14591 = vst [vmem:[#allocation155_spill] sm:$0xff] %v11777_v46  ;;  %v11783_v37 = vmul.f32 0.2, %v11734_v10  ;;  %vm1664_vm1 = vcmp.gt.f32.partialorder %v11582_v20, 0.0  ;;  %v2207_v36 = vsel %vm1695_vm12, %v11694_v26, %v1951_v56  ;;  %v14593_v25 = vld [vmem:[#allocation98_spill] sm:$0xff]  ;;  %v2158_v63 = vsel %vm1646_vm4, %v11457_v7, %v11536_v45  ;;  %4967 = vmatpush2.bf16.msra.mxu1 %v8403_v11 }
 0x23b   : > { %v11803_v15 = vpop.f32.mrf.mxu1  ;;  %v8411_v46 = vld [vmem:[#allocation3 + $0x32c] ss:$16 sps:$4 sm:$0xff]   ;;  %vm1701_vm0 = vcmp.gt.f32.partialorder %v11754_v19, 0.0  ;;  %v1957_v62 = vmul.f32 0.2, %v11754_v19  ;;  %v2150_v26 = vsel %vm1638_vm6, %v11449_v12, %v11524_v32  ;;  %14595 = vst [vmem:[#allocation157_spill] sm:$0xff] %v11812_v54  ;;  %v2160_v21 = vsel %vm1648_vm8, %v11473_v61, %v11539_v60  ;;  %4775 = vmatprep.subr.bf16.mxu0 %v8408_v29 }
 0x23c   : > { %14592 = vst [vmem:[#allocation156_spill] sm:$0xff] %v11783_v37  ;;  %v1477_v37 = vadd.f32 %v14593_v25, %v10696_v35  ;;  %14594 = vst [vmem:[#allocation98_spill] sm:$0xff] %v11803_v15  ;;  %v1959_v27 = vmul.f32 0.2, %v11758_v38  ;;  %v14596_v56 = vld [vmem:[#allocation130_spill] sm:$0xff]  ;;  %v11818_v45 = vpack.c.bf16 %v2158_v63, %v2150_v26  ;;  %v2152_v25 = vsel %vm1640_vm7, %v11453_v55, %v11531_v49  ;;  %v14599_v63 = vld [vmem:[#allocation131_spill] sm:$0xff]  ;;  %v11837_v55 = vpop.f32.mrf.mxu0 }
 0x23d   : > { %v11816_v7 = vadd.f32 %v14596_v56, %v10756_v3  ;;  %v11828_v12 = vpop.f32.mrf.mxu1  ;;  %v8406_v48 = vld [vmem:[#allocation3 + $0x128] ss:$16 sps:$4 sm:$0xff]   ;;  %vm1703_vm2 = vcmp.gt.f32.partialorder %v11758_v38, 0.0  ;;  %v11833_v26 = vadd.f32 %v14599_v63, %v10768_v4  ;;  %v1965_v56 = vmul.f32 0.2, %v1284_v5  ;;  %14601 = vst [vmem:[#allocation159_spill] sm:$0xff] %v11837_v55  ;;  %4968 = vmatprep.subr.bf16.mxu1 %v8411_v46 }
 0x23e   : > { %14597 = vst [vmem:[#allocation130_spill] sm:$0xff] %v11818_v45  ;;  %14598 = vst [vmem:[#allocation158_spill] sm:$0xff] %v11828_v12  ;;  %v8409_v32 = vld [vmem:[#allocation3 + $0x328] ss:$16 sps:$4 sm:$0xff]   ;;  %v11835_v54 = vpack.c.bf16 %v2160_v21, %v2152_v25  ;;  %v8414_v49 = vld [vmem:[#allocation3 + $0x10c] ss:$16 sps:$4 sm:$0xff]   ;;  %v11841_v11 = vadd.f32 %v11277_v44, %v10666_v59  ;;  %4463 = vmatprep.mubr.bf16.mxu0 %v11818_v45  ;;  %v11850_v25 = vpack.c.bf16 %v2205_v2, %v2197_v14  ;;  %v11858_v44 = vpop.f32.mrf.mxu0 }
 0x23f   : > { %vm1709_vm3 = vcmp.gt.f32.partialorder %v1284_v5, 0.0  ;;  %v1967_v61 = vmul.f32 0.2, %v1477_v37  ;;  %v14602_v60 = vld [vmem:[#allocation136_spill] sm:$0xff]  ;;  %v11848_v63 = vpop.f32.mrf.mxu1  ;;  %v11852_v29 = vpack.c.bf16 %v2207_v36, %v2199_v57  ;;  %vm1711_vm4 = vcmp.gt.f32.partialorder %v1477_v37, 0.0  ;;  %4464 = vmatmul.mubr.bf16.gmra.mxu0 %v11533_v43  ;;  %v14607_v46 = vld [vmem:[#allocation19_spill] sm:$0xff]  ;;  %4969 = vmatpush2.bf16.msra.mxu1 %v8409_v32 }
 0x240   : > { %14600 = vst [vmem:[#allocation131_spill] sm:$0xff] %v11835_v54  ;;  %v11845_v12 = vadd.f32 %v14602_v60, %v10696_v35  ;;  %v8417_v21 = vld [vmem:[#allocation3 + $0x30c] ss:$16 sps:$4 sm:$0xff]   ;;  %14603 = vst [vmem:[#allocation136_spill] sm:$0xff] %v11850_v25  ;;  %4656 = vmatprep.mubr.bf16.mxu1 %v11835_v54  ;;  %v2213_v60 = vsel %vm1701_vm0, %v11754_v19, %v1957_v62  ;;  %v2215_v14 = vsel %vm1703_vm2, %v11758_v38, %v1959_v27  ;;  %v8415_v43 = vld [vmem:[#allocation3 + $0x308] ss:$16 sps:$4 sm:$0xff]  }
 0x241   : > { %14604 = vst [vmem:[#allocation160_spill] sm:$0xff] %v11852_v29  ;;  %v14605_v55 = vld [vmem:[#allocation48_spill] sm:$0xff]  ;;  %v11867_v57 = vmul.f32 0.2, %v11816_v7  ;;  %v1487_v2 = vadd.f32 %v14607_v46, %v10696_v35  ;;  %4657 = vmatmul.mubr.bf16.gmra.mxu1 %v11545_v34  ;;  %v11872_v36 = vpop.f32.mrf.mxu1  ;;  %4776 = vmatpush2.bf16.msra.mxu0 %v8406_v48  ;;  %vm1670_vm5 = vcmp.gt.f32.partialorder %v11616_v53, 0.0  ;;  %vm1672_vm6 = vcmp.gt.f32.partialorder %v11620_v42, 0.0  ;;  %v11889_v48 = vpop.f32.mrf.mxu0 }
 0x242   : > { %v1294_v15 = vadd.f32 %v14605_v55, %v10666_v59  ;;  %v8412_v55 = vld [vmem:[#allocation3 + $0x108] ss:$16 sps:$4 sm:$0xff]   ;;  %vm1678_vm7 = vcmp.gt.f32.partialorder %v11630_v41, 0.0  ;;  %v11878_v62 = vmul.f32 0.2, %v11833_v26  ;;  %v2221_v38 = vsel %vm1709_vm3, %v1284_v5, %v1965_v56  ;;  %v14610_v46 = vld [vmem:[#allocation134_spill] sm:$0xff]  ;;  %4777 = vmatprep.subr.bf16.mxu0 %v8414_v49  ;;  %4970 = vmatprep.subr.bf16.mxu1 %v8417_v21 }
 0x243   : > { %14606 = vst [vmem:[#allocation48_spill] sm:$0xff] %v11867_v57  ;;  %v14609_v19 = vld [vmem:[#allocation69_spill] sm:$0xff]  ;;  %v11887_v34 = vadd.f32 %v14610_v46, %v10768_v4  ;;  %vm1680_vm8 = vcmp.gt.f32.partialorder %v11677_v31, 0.0  ;;  %v2223_v54 = vsel %vm1711_vm4, %v1477_v37, %v1967_v61  ;;  %vm1717_vm9 = vcmp.gt.f32.partialorder %v11841_v11, 0.0  ;;  %v11896_v56 = vpop.f32.mrf.mxu1  ;;  %v14611_v49 = vld [vmem:[#allocation103_spill] sm:$0xff]  ;;  %v11908_v61 = vpop.f32.mrf.mxu0  ;;  %4971 = vmatpush2.bf16.msra.mxu1 %v8415_v43 }
 0x244   : > { %14608 = vst [vmem:[#allocation19_spill] sm:$0xff] %v11878_v62  ;;  %v11883_v27 = vadd.f32 %v14609_v19, %v10756_v3  ;;  %v1973_v5 = vmul.f32 0.2, %v11841_v11  ;;  %vm1719_vm10 = vcmp.gt.f32.partialorder %v11845_v12, 0.0  ;;  %v8420_v19 = vld [vmem:[#allocation3 + $0x4ec] ss:$16 sps:$4 sm:$0xff]   ;;  %v11902_v46 = vadd.f32 %v14611_v49, %v10756_v3 }
 0x245   : > { %vm1686_vm11 = vcmp.gt.f32.partialorder %v11718_v16, 0.0  ;;  %v1975_v32 = vmul.f32 0.2, %v11845_v12  ;;  %v1981_v45 = vmul.f32 0.2, %v1294_v15  ;;  %v2174_v37 = vsel %vm1662_vm13, %v11578_v40, %v11626_v58  ;;  %14612 = vst [vmem:[#allocation69_spill] sm:$0xff] %v11908_v61  ;;  %v11917_v62 = vpop.f32.mrf.mxu1  ;;  %4778 = vmatpush2.bf16.msra.mxu0 %v8412_v55  ;;  %v11929_v61 = vpop.f32.mrf.mxu0 }
 0x246   : > { %v8423_v29 = vld [vmem:[#allocation3 + $0x6ec] ss:$16 sps:$4 sm:$0xff]   ;;  %vm1694_vm12 = vcmp.gt.f32.partialorder %v11730_v8, 0.0  ;;  %vm1725_vm0 = vcmp.gt.f32.partialorder %v1294_v15, 0.0  ;;  %v1983_v21 = vmul.f32 0.2, %v1487_v2  ;;  %v1300_v25 = vadd.f32 %v11382_v33, %v10666_v59  ;;  %5133 = vmatprep.subr.bf16.mxu0 %v8420_v19 }
 0x247   : > { %v2166_v49 = vsel %vm1654_vm14, %v11497_v47, %v11554_v24  ;;  %14613 = vst [vmem:[#allocation134_spill] sm:$0xff] %v11917_v62  ;;  %vm1727_vm2 = vcmp.gt.f32.partialorder %v1487_v2, 0.0  ;;  %v14615_v58 = vld [vmem:[#allocation149_spill] sm:$0xff]  ;;  %v2176_v33 = vsel %vm1664_vm1, %v11582_v20, %v11639_v52  ;;  %vm1688_vm13 = vcmp.gt.f32.partialorder %v11726_v22, 0.0  ;;  %v14617_v24 = vld [vmem:[#allocation138_spill] sm:$0xff]  ;;  %v14618_v55 = vld [vmem:[#allocation104_spill] sm:$0xff]  ;;  %v11947_v52 = vpop.f32.mrf.mxu1  ;;  %5326 = vmatprep.subr.bf16.mxu1 %v8423_v29 }
 0x248   : > { %v11919_v40 = vpack.c.bf16 %v2174_v37, %v2166_v49  ;;  %v2168_v57 = vsel %vm1656_vm15, %v11505_v51, %v14615_v58  ;;  %14616 = vst [vmem:[#allocation149_spill] sm:$0xff] %v11929_v61  ;;  %vm1696_vm14 = vcmp.gt.f32.partialorder %v11734_v10, 0.0  ;;  %v11935_v47 = vadd.f32 %v14617_v24, %v10768_v4  ;;  %v14619_v51 = vld [vmem:[#allocation110_spill] sm:$0xff]  ;;  %14621 = vst [vmem:[#allocation104_spill] sm:$0xff] %v11947_v52  ;;  %v2673_v61 = vld [vmem:[#allocation6] sm:$0xf] }
 0x249   : > { %v11939_v37 = vadd.f32 %v14618_v55, %v10756_v3  ;;  %v11943_v49 = vadd.f32 %v14619_v51, %v10768_v4  ;;  %v11945_v20 = vpack.c.bf16 %v2176_v33, %v2168_v57  ;;  %v11950_v43 = vmul.f32 0.2, %v11883_v27  ;;  %v14622_v55 = vld [vmem:[#allocation23_spill] sm:$0xff]  ;;  %v11961_v51 = vpop.f32.mrf.mxu0 }
 0x24a   : > { %14614 = vst [vmem:[#allocation103_spill] sm:$0xff] %v11919_v40  ;;  %v11953_v58 = vmul.f32 0.2, %v11887_v34  ;;  %v2237_v24 = vsel %vm1725_vm0, %v1294_v15, %v1981_v45  ;;  %v11958_v62 = vadd.f32 %v14622_v55, %v10696_v35  ;;  %4473 = vmatprep.mubr.bf16.mxu0 %v11919_v40  ;;  %v11963_v57 = vpack.c.bf16 %v2221_v38, %v2213_v60  ;;  %v11970_v15 = vpop.f32.mrf.mxu1 }
 0x24b   : > { %14620 = vst [vmem:[#allocation138_spill] sm:$0xff] %v11945_v20  ;;  %v11965_v19 = vpack.c.bf16 %v2223_v54, %v2215_v14  ;;  %v2239_v33 = vsel %vm1727_vm2, %v1487_v2, %v1983_v21  ;;  %v1989_v52 = vmul.f32 0.2, %v1300_v25  ;;  %4666 = vmatprep.mubr.bf16.mxu1 %v11945_v20  ;;  %4474 = vmatmul.mubr.bf16.gmra.mxu0 %v11636_v23  ;;  %vm1710_vm15 = vcmp.gt.f32.partialorder %v11883_v27, 0.0  ;;  %v11983_v60 = vpop.f32.mrf.mxu0  ;;  %v14627_v21 = vld [vmem:[#allocation139_spill] sm:$0xff] }
 0x24c   : > { %14623 = vst [vmem:[#allocation110_spill] sm:$0xff] %v11963_v57  ;;  %v2229_v45 = vsel %vm1717_vm9, %v11841_v11, %v1973_v5  ;;  %v2231_v54 = vsel %vm1719_vm10, %v11845_v12, %v1975_v32  ;;  %v11980_v29 = vmul.f32 0.2, %v11902_v46  ;;  %vm1733_vm1 = vcmp.gt.f32.partialorder %v1300_v25, 0.0  ;;  %4667 = vmatmul.mubr.bf16.gmra.mxu1 %v11647_v28  ;;  %v11997_v38 = vpop.f32.mrf.mxu1 }
 0x24d   : > { %14624 = vst [vmem:[#allocation23_spill] sm:$0xff] %v11965_v19  ;;  %vm1712_vm3 = vcmp.gt.f32.partialorder %v11887_v34, 0.0  ;;  %v11987_v14 = vmul.f32 0.2, %v11935_v47  ;;  %v11989_v2 = vpack.c.bf16 %v2237_v24, %v2229_v45  ;;  %v11992_v11 = vmul.f32 0.2, %v11939_v37  ;;  %v12010_v28 = vpop.f32.mrf.mxu0 }
 0x24e   : > { %v11995_v12 = vmul.f32 0.2, %v11943_v49  ;;  %vm1702_vm4 = vcmp.gt.f32.partialorder %v11816_v7, 0.0  ;;  %v12000_v5 = vpack.c.bf16 %v2239_v33, %v2231_v54  ;;  %v1991_v32 = vmul.f32 0.2, %v11958_v62  ;;  %v14628_v24 = vld [vmem:[#allocation14_spill] sm:$0xff] }
 0x24f   : > { %14625 = vst [vmem:[#allocation161_spill] sm:$0xff] %v11989_v2  ;;  %v12005_v55 = vadd.f32 %v14627_v21, %v10756_v3  ;;  %v12008_v45 = vrot.slane %v2673_v61, %v14628_v24  ;;  %vm1704_vm9 = vcmp.gt.f32.partialorder %v11833_v26, 0.0  ;;  %v12014_v23 = vsel %vm1733_vm1, %v1300_v25, %v1989_v52  ;;  %v12028_v24 = vpop.f32.mrf.mxu1 }
 0x250   : > { %14626 = vst [vmem:[#allocation162_spill] sm:$0xff] %v12000_v5  ;;  %v2182_v33 = vsel %vm1670_vm5, %v11616_v53, %v11660_v30  ;;  %v2190_v54 = vsel %vm1678_vm7, %v11630_v41, %v11673_v1  ;;  %v2184_v21 = vsel %vm1672_vm6, %v11620_v42, %v11663_v50  ;;  %v2192_v53 = vsel %vm1680_vm8, %v11677_v31, %v11742_v9  ;;  %v14630_v30 = vld [vmem:[#allocation15_spill] sm:$0xff]  ;;  %v12041_v41 = vpop.f32.mrf.mxu0  ;;  %v14632_v31 = vld [vmem:[#allocation122_spill] sm:$0xff] }
 0x251   : > { %v4010_v25 = vadd.f32 %v11683_v13, %v12008_v45  ;;  %v12032_v52 = vpack.c.bf16 %v2190_v54, %v2182_v33  ;;  %v12039_v20 = vrot.slane %v2673_v61, %v14630_v30  ;;  %v12043_v1 = vpack.c.bf16 %v2192_v53, %v2184_v21  ;;  %v12053_v33 = vpop.f32.mrf.mxu1  ;;  %v14633_v61 = vld [vmem:[#allocation153_spill] sm:$0xff] }
 0x252   : > { %v4014_v42 = vadd.f32 %v11737_v0, %v12008_v45  ;;  %v4020_v50 = vadd.f32 %v11787_v6, %v12008_v45  ;;  %v2198_v13 = vsel %vm1686_vm11, %v11718_v16, %v11771_v39  ;;  %v2206_v6 = vsel %vm1694_vm12, %v11730_v8, %v11780_v17  ;;  %v12067_v21 = vpop.f32.mrf.mxu0  ;;  %v14634_v16 = vld [vmem:[#allocation96_spill] sm:$0xff]  ;;  %v14638_v8 = vld [vmem:[#allocation154_spill] sm:$0xff]  ;;  %v14639_v30 = vld [vmem:[#allocation129_spill] sm:$0xff] }
 0x253   : > { %14629 = vst [vmem:[#allocation139_spill] sm:$0xff] %v12032_v52  ;;  %14631 = vst [vmem:[#allocation163_spill] sm:$0xff] %v12043_v1  ;;  %v12056_v9 = vadd.f32 %v14632_v31, %v4010_v25  ;;  %4483 = vmatprep.mubr.bf16.mxu0 %v12032_v52  ;;  %v4012_v54 = vadd.f32 %v14633_v61, %v12039_v20  ;;  %v4016_v0 = vadd.f32 %v11761_v18, %v12039_v20  ;;  %v14635_v25 = vld [vmem:[#allocation98_spill] sm:$0xff]  ;;  %v14636_v31 = vld [vmem:[#allocation64_spill] sm:$0xff]  ;;  %v12080_v61 = vpop.f32.mrf.mxu1 }
 0x254   : > { %vm1735_vm5 = vcmp.gt.f32.partialorder %v11958_v62, 0.0  ;;  %4676 = vmatprep.mubr.bf16.mxu1 %v12043_v1  ;;  %v12072_v39 = vadd.f32 %v14634_v16, %v4014_v42  ;;  %v12075_v53 = vadd.f32 %v14635_v25, %v4020_v50  ;;  %4484 = vmatmul.mubr.bf16.gmra.mxu0 %v14636_v31  ;;  %v12078_v18 = vpack.c.bf16 %v2206_v6, %v2198_v13  ;;  %v14640_v1 = vld [vmem:[#allocation128_spill] sm:$0xff]  ;;  %v14641_v42 = vld [vmem:[#allocation155_spill] sm:$0xff] }
 0x255   : > { %vm1726_vm6 = vcmp.gt.f32.partialorder %v11939_v37, 0.0  ;;  %v12084_v17 = vadd.f32 %v14638_v8, %v4012_v54  ;;  %v12087_v52 = vadd.f32 %v14639_v30, %v4016_v0  ;;  %4677 = vmatmul.mubr.bf16.gmra.mxu1 %v14640_v1  ;;  %v2200_v50 = vsel %vm1688_vm13, %v11726_v22, %v14641_v42  ;;  %v14642_v16 = vld [vmem:[#allocation156_spill] sm:$0xff]  ;;  %v14644_v30 = vld [vmem:[#allocation157_spill] sm:$0xff]  ;;  %v14645_v6 = vld [vmem:[#allocation159_spill] sm:$0xff] }
 0x256   : > { %14637 = vst [vmem:[#allocation122_spill] sm:$0xff] %v12078_v18  ;;  %v2208_v13 = vsel %vm1696_vm14, %v11734_v10, %v14642_v16  ;;  %vm1728_vm7 = vcmp.gt.f32.partialorder %v11943_v49, 0.0  ;;  %4493 = vmatprep.mubr.bf16.mxu0 %v12078_v18  ;;  %v4022_v0 = vadd.f32 %v14644_v30, %v12039_v20  ;;  %v4024_v25 = vadd.f32 %v14645_v6, %v12008_v45  ;;  %v14646_v8 = vld [vmem:[#allocation141_spill] sm:$0xff]  ;;  %v4242_v30 = vpop.f32.mrf.mxu1  ;;  %v14648_v6 = vld [vmem:[#allocation158_spill] sm:$0xff]  ;;  %v14657_v31 = vld [vmem:[#allocation104_spill] sm:$0xff] }
 0x257   : > { %v12100_v54 = vpack.c.bf16 %v2208_v13, %v2200_v50  ;;  %v4026_v22 = vadd.f32 %v11858_v44, %v12039_v20  ;;  %vm1718_vm8 = vcmp.gt.f32.partialorder %v11902_v46, 0.0  ;;  %vm1720_vm10 = vcmp.gt.f32.partialorder %v11935_v47, 0.0  ;;  %v14647_v50 = vld [vmem:[#allocation21_spill] sm:$0xff]  ;;  %v4049_v13 = vpop.f32.mrf.mxu0 }
 0x258   : > { %v12113_v10 = vsel %vm1735_vm5, %v11958_v62, %v1991_v32  ;;  %v12117_v42 = vadd.f32 %v14646_v8, %v10768_v4  ;;  %v12121_v16 = vadd.f32 %v14647_v50, %v10666_v59  ;;  %v4030_v44 = vadd.f32 %v11889_v48, %v12008_v45  ;;  %v14650_v50 = vld [vmem:[#allocation69_spill] sm:$0xff] }
 0x259   : > { %14643 = vst [vmem:[#allocation153_spill] sm:$0xff] %v12100_v54  ;;  %4686 = vmatprep.mubr.bf16.mxu1 %v12100_v54  ;;  %v12127_v18 = vadd.f32 %v14648_v6, %v4022_v0  ;;  %v12130_v62 = vadd.f32 %v11848_v63, %v4024_v25  ;;  %v12133_v32 = vadd.f32 %v11872_v36, %v4026_v22  ;;  %v14651_v25 = vld [vmem:[#allocation149_spill] sm:$0xff]  ;;  %v4051_v22 = vpop.f32.mrf.mxu0  ;;  %v4244_v6 = vpop.f32.mrf.mxu1  ;;  %v14652_v54 = vld [vmem:[#allocation142_spill] sm:$0xff]  ;;  %vm1734_vm12 = vcmp.gt.f32.partialorder %v12005_v55, 0.0 }
 0x25a   : > { %v2222_v8 = vsel %vm1710_vm15, %v11883_v27, %v11950_v43  ;;  %v12140_v48 = vadd.f32 %v11896_v56, %v4030_v44  ;;  %v2224_v0 = vsel %vm1712_vm3, %v11887_v34, %v11953_v58  ;;  %v4032_v63 = vadd.f32 %v14650_v50, %v12039_v20  ;;  %v14653_v27 = vld [vmem:[#allocation48_spill] sm:$0xff]  ;;  %v14655_v44 = vld [vmem:[#allocation19_spill] sm:$0xff] }
 0x25b   : > { %v4034_v36 = vadd.f32 %v14651_v25, %v12008_v45  ;;  %v1497_v1 = vadd.f32 %v14652_v54, %v10696_v35  ;;  %v2214_v56 = vsel %vm1702_vm4, %v11816_v7, %v14653_v27  ;;  %v4036_v43 = vadd.f32 %v11961_v51, %v12039_v20  ;;  %v14656_v25 = vld [vmem:[#allocation134_spill] sm:$0xff]  ;;  %v4053_v7 = vpop.f32.mrf.mxu0  ;;  %v4246_v27 = vpop.f32.mrf.mxu1 }
 0x25c   : > { %14649 = vst [vmem:[#allocation96_spill] sm:$0xff] %v12140_v48  ;;  %v4040_v34 = vadd.f32 %v11983_v60, %v12008_v45  ;;  %v12160_v58 = vpack.c.bf16 %v2222_v8, %v2214_v56  ;;  %v2216_v50 = vsel %vm1704_vm9, %v11833_v26, %v14655_v44  ;;  %v12167_v54 = vadd.f32 %v14656_v25, %v4032_v63  ;;  %v14658_v51 = vld [vmem:[#allocation106_spill] sm:$0xff]  ;;  %v14659_v60 = vld [vmem:[#allocation136_spill] sm:$0xff] }
 0x25d   : > { %v12170_v40 = vadd.f32 %v14657_v31, %v4034_v36  ;;  %v12174_v48 = vadd.f32 %v14658_v51, %v10756_v3  ;;  %4494 = vmatmul.mubr.bf16.gmra.mxu0 %v14659_v60  ;;  %v12177_v8 = vpack.c.bf16 %v2224_v0, %v2216_v50  ;;  %v12180_v56 = vadd.f32 %v11970_v15, %v4036_v43  ;;  %v14661_v31 = vld [vmem:[#allocation108_spill] sm:$0xff]  ;;  %v4055_v43 = vpop.f32.mrf.mxu0 }
 0x25e   : > { %14654 = vst [vmem:[#allocation98_spill] sm:$0xff] %v12160_v58  ;;  %v12183_v26 = vadd.f32 %v11997_v38, %v4040_v34  ;;  %v12186_v63 = vmul.f32 0.2, %v12005_v55  ;;  %v12190_v36 = vadd.f32 %v14661_v31, %v10768_v4  ;;  %v14662_v44 = vld [vmem:[#allocation160_spill] sm:$0xff]  ;;  %4503 = vmatprep.mubr.bf16.mxu0 %v12160_v58  ;;  %v4042_v0 = vadd.f32 %v12010_v28, %v12039_v20  ;;  %v4248_v38 = vpop.f32.mrf.mxu1 }
 0x25f   : > { %14660 = vst [vmem:[#allocation154_spill] sm:$0xff] %v12177_v8  ;;  %4687 = vmatmul.mubr.bf16.gmra.mxu1 %v14662_v44  ;;  %v4044_v15 = vadd.f32 %v12041_v41, %v12008_v45  ;;  %vm1741_vm11 = vcmp.gt.f32.partialorder %v12121_v16, 0.0  ;;  %v1997_v34 = vmul.f32 0.2, %v12121_v16  ;;  %v4046_v50 = vadd.f32 %v12067_v21, %v12039_v20  ;;  %v4059_v31 = vpop.f32.mrf.mxu0 }
 0x260   : > { %4696 = vmatprep.mubr.bf16.mxu1 %v12177_v8  ;;  %v4050_v25 = vadd.f32 %v4049_v13, %v12008_v45  ;;  %vm1743_vm0 = vcmp.gt.f32.partialorder %v1497_v1, 0.0  ;;  %v1999_v28 = vmul.f32 0.2, %v1497_v1  ;;  %v12206_v51 = vadd.f32 %v12028_v24, %v4042_v0  ;;  %v4252_v44 = vpop.f32.mrf.mxu1 }
 0x261   : > { %v12209_v41 = vadd.f32 %v12053_v33, %v4044_v15  ;;  %v2238_v8 = vsel %vm1726_vm6, %v11939_v37, %v11992_v11  ;;  %v12216_v21 = vadd.f32 %v12080_v61, %v4046_v50  ;;  %v4052_v58 = vadd.f32 %v4051_v22, %v12039_v20  ;;  %v4061_v37 = vpop.f32.mrf.mxu0 }
 0x262   : > { %v12218_v13 = vadd.f32 %v4242_v30, %v4050_v25  ;;  %v2240_v24 = vsel %vm1728_vm7, %v11943_v49, %v11995_v12  ;;  %v4054_v33 = vadd.f32 %v4053_v7, %v12008_v45  ;;  %v4056_v0 = vadd.f32 %v4055_v43, %v12039_v20  ;;  %v4254_v50 = vpop.f32.mrf.mxu1 }
 0x263   : > { %v4060_v15 = vadd.f32 %v4059_v31, %v12008_v45  ;;  %v1998_v11 = vmul.f32 0.2, %v12174_v48  ;;  %v2230_v61 = vsel %vm1718_vm8, %v11902_v46, %v11980_v29  ;;  %v2232_v49 = vsel %vm1720_vm10, %v11935_v47, %v11987_v14  ;;  %v4063_v25 = vpop.f32.mrf.mxu0 }
 0x264   : > { %v12237_v12 = vadd.f32 %v4244_v6, %v4052_v58  ;;  %v12239_v30 = vpack.c.bf16 %v2238_v8, %v2230_v61  ;;  %v12241_v22 = vadd.f32 %v4246_v27, %v4054_v33  ;;  %v12243_v7 = vadd.f32 %v4248_v38, %v4056_v0  ;;  %v14665_v27 = vld [vmem:[#allocation112_spill] sm:$0xff] }
 0x265   : > { %v12245_v43 = vadd.f32 %v4252_v44, %v4060_v15  ;;  %v2253_v46 = vsel %vm1741_vm11, %v12121_v16, %v1997_v34  ;;  %4504 = vmatmul.mubr.bf16.gmra.mxu0 %v11963_v57  ;;  %v12251_v29 = vpack.c.bf16 %v2240_v24, %v2232_v49  ;;  %v4062_v47 = vadd.f32 %v4061_v37, %v12039_v20  ;;  %v4256_v16 = vpop.f32.mrf.mxu1  ;;  %v4065_v44 = vpop.f32.mrf.mxu0  ;;  %v14667_v24 = vld [vmem:[#allocation144_spill] sm:$0xff]  ;;  %v14669_v37 = vld [vmem:[#allocation117_spill] sm:$0xff] }
 0x266   : > { %14663 = vst [vmem:[#allocation129_spill] sm:$0xff] %v12239_v30  ;;  %v4064_v14 = vadd.f32 %v4063_v25, %v12008_v45  ;;  %v2255_v6 = vsel %vm1743_vm0, %v1497_v1, %v1999_v28  ;;  %vm1742_vm2 = vcmp.gt.f32.partialorder %v12174_v48, 0.0  ;;  %v2000_v58 = vmul.f32 0.2, %v12190_v36  ;;  %4513 = vmatprep.mubr.bf16.mxu0 %v12239_v30 }
 0x267   : > { %14664 = vst [vmem:[#allocation155_spill] sm:$0xff] %v12251_v29  ;;  %v12260_v8 = vadd.f32 %v14665_v27, %v10666_v59  ;;  %4697 = vmatmul.mubr.bf16.gmra.mxu1 %v11965_v19  ;;  %vm1744_vm13 = vcmp.gt.f32.partialorder %v12190_v36, 0.0  ;;  %v12266_v38 = vadd.f32 %v4254_v50, %v4062_v47  ;;  %v4066_v34 = vadd.f32 %v4065_v44, %v12039_v20  ;;  %v4258_v0 = vpop.f32.mrf.mxu1  ;;  %v4069_v25 = vpop.f32.mrf.mxu0 }
 0x268   : > { %4706 = vmatprep.mubr.bf16.mxu1 %v12251_v29  ;;  %v12268_v1 = vadd.f32 %v4256_v16, %v4064_v14  ;;  %vm1736_vm14 = vcmp.gt.f32.partialorder %v12117_v42, 0.0  ;;  %v1992_v28 = vmul.f32 0.2, %v12117_v42  ;;  %v12274_v31 = vpack.c.bf16 %v2253_v46, %v12014_v23  ;;  %v14670_v23 = vld [vmem:[#allocation118_spill] sm:$0xff]  ;;  %v14678_v29 = vld [vmem:[#allocation125_spill] sm:$0xff] }
 0x269   : > { %v12278_v33 = vadd.f32 %v14667_v24, %v10696_v35  ;;  %v12281_v15 = vpack.c.bf16 %v2255_v6, %v12113_v10  ;;  %v1316_v61 = vadd.f32 %v14669_v37, %v10756_v3  ;;  %v2254_v49 = vsel %vm1742_vm2, %v12174_v48, %v1998_v11  ;;  %v14671_v6 = vld [vmem:[#allocation78_spill] sm:$0xff]  ;;  %v14672_v48 = vld [vmem:[#allocation80_spill] sm:$0xff]  ;;  %v4262_v44 = vpop.f32.mrf.mxu1 }
 0x26a   : > { %14666 = vst [vmem:[#allocation156_spill] sm:$0xff] %v12274_v31  ;;  %v12288_v50 = vadd.f32 %v4258_v0, %v4066_v34  ;;  %vm1749_vm15 = vcmp.gt.f32.partialorder %v12260_v8, 0.0  ;;  %v1509_v46 = vadd.f32 %v14670_v23, %v10768_v4  ;;  %v2256_v10 = vsel %vm1744_vm13, %v12190_v36, %v2000_v58  ;;  %v4071_v34 = vpop.f32.mrf.mxu0  ;;  %v14674_v37 = vld [vmem:[#allocation146_spill] sm:$0xff]  ;;  %v14675_v23 = vld [vmem:[#allocation148_spill] sm:$0xff] }
 0x26b   : > { %14668 = vst [vmem:[#allocation157_spill] sm:$0xff] %v12281_v15  ;;  %v4070_v47 = vadd.f32 %v4069_v25, %v12008_v45  ;;  %v2005_v14 = vmul.f32 0.2, %v12260_v8  ;;  %v1312_v27 = vadd.f32 %v14671_v6, %v10756_v3  ;;  %v1505_v11 = vadd.f32 %v14672_v48, %v10768_v4 }
 0x26c   : > { %v2246_v16 = vsel %vm1734_vm12, %v12005_v55, %v12186_v63  ;;  %v2248_v36 = vsel %vm1736_vm14, %v12117_v42, %v1992_v28  ;;  %v4072_v0 = vadd.f32 %v4071_v34, %v12039_v20  ;;  %v1314_v25 = vadd.f32 %v14674_v37, %v10666_v59  ;;  %v4264_v63 = vpop.f32.mrf.mxu1 }
 0x26d   : > { %v12306_v24 = vpack.c.bf16 %v2254_v49, %v2246_v16  ;;  %v12311_v58 = vadd.f32 %v4262_v44, %v4070_v47  ;;  %v1507_v6 = vadd.f32 %v14675_v23, %v10696_v35  ;;  %v2014_v48 = vmul.f32 0.2, %v1316_v61  ;;  %4514 = vmatmul.mubr.bf16.gmra.mxu0 %v11989_v2  ;;  %v4073_v49 = vpop.f32.mrf.mxu0 }
 0x26e   : > { %v12319_v55 = vpack.c.bf16 %v2256_v10, %v2248_v36  ;;  %vm1758_vm1 = vcmp.gt.f32.partialorder %v1316_v61, 0.0  ;;  %v2016_v16 = vmul.f32 0.2, %v1509_v46  ;;  %v12323_v42 = vadd.f32 %v4264_v63, %v4072_v0  ;;  %v4266_v10 = vpop.f32.mrf.mxu1  ;;  %v14677_v63 = vld [vmem:[#allocation124_spill] sm:$0xff] }
 0x26f   : > { %14673 = vst [vmem:[#allocation159_spill] sm:$0xff] %v12306_v24  ;;  %4707 = vmatmul.mubr.bf16.gmra.mxu1 %v12000_v5  ;;  %4523 = vmatprep.mubr.bf16.mxu0 %v12306_v24  ;;  %v4074_v28 = vadd.f32 %v4073_v49, %v12008_v45  ;;  %vm1751_vm3 = vcmp.gt.f32.partialorder %v12278_v33, 0.0  ;;  %v2007_v47 = vmul.f32 0.2, %v12278_v33  ;;  %vm1750_vm4 = vcmp.gt.f32.partialorder %v1312_v27, 0.0  ;;  %v4075_v34 = vpop.f32.mrf.mxu0 }
 0x270   : > { %14676 = vst [vmem:[#allocation141_spill] sm:$0xff] %v12319_v55  ;;  %v2006_v44 = vmul.f32 0.2, %v1312_v27  ;;  %vm1760_vm9 = vcmp.gt.f32.partialorder %v1509_v46, 0.0  ;;  %4716 = vmatprep.mubr.bf16.mxu1 %v12319_v55  ;;  %vm1752_vm5 = vcmp.gt.f32.partialorder %v1505_v11, 0.0  ;;  %v4076_v0 = vadd.f32 %v4075_v34, %v12039_v20  ;;  %v4268_v5 = vpop.f32.mrf.mxu1 }
 0x271   : > { %v2008_v36 = vmul.f32 0.2, %v1505_v11  ;;  %v12329_v37 = vadd.f32 %v4266_v10, %v4074_v28  ;;  %vm1757_vm6 = vcmp.gt.f32.partialorder %v1314_v25, 0.0  ;;  %v2013_v23 = vmul.f32 0.2, %v1314_v25  ;;  %v4079_v57 = vpop.f32.mrf.mxu0  ;;  %v14679_v28 = vld [vmem:[#allocation150_spill] sm:$0xff] }
 0x272   : > { %v1326_v49 = vadd.f32 %v14677_v63, %v10756_v3  ;;  %v2270_v24 = vsel %vm1758_vm1, %v1316_v61, %v2014_v48  ;;  %v2015_v2 = vmul.f32 0.2, %v1507_v6  ;;  %v1519_v55 = vadd.f32 %v14678_v29, %v10768_v4  ;;  %v14680_v48 = vld [vmem:[#allocation88_spill] sm:$0xff] }
 0x273   : > { %v2272_v30 = vsel %vm1760_vm9, %v1509_v46, %v2016_v16  ;;  %v12337_v19 = vadd.f32 %v4268_v5, %v4076_v0  ;;  %vm1759_vm7 = vcmp.gt.f32.partialorder %v1507_v6, 0.0  ;;  %v1322_v10 = vadd.f32 %v14679_v28, %v10756_v3  ;;  %v4272_v46 = vpop.f32.mrf.mxu1  ;;  %v4081_v16 = vpop.f32.mrf.mxu0 }
 0x274   : > { %v2262_v34 = vsel %vm1750_vm4, %v1312_v27, %v2006_v44  ;;  %v4080_v60 = vadd.f32 %v4079_v57, %v12008_v45  ;;  %v2261_v61 = vsel %vm1749_vm15, %v12260_v8, %v2005_v14  ;;  %v1515_v63 = vadd.f32 %v14680_v48, %v10768_v4 }
 0x275   : > { %v12348_v29 = vpack.c.bf16 %v2270_v24, %v2262_v34  ;;  %v2264_v5 = vsel %vm1752_vm5, %v1505_v11, %v2008_v36  ;;  %v2030_v0 = vmul.f32 0.2, %v1326_v49  ;;  %4524 = vmatmul.mubr.bf16.gmra.mxu0 %v12274_v31  ;;  %v4082_v57 = vadd.f32 %v4081_v16, %v12039_v20  ;;  %v4274_v11 = vpop.f32.mrf.mxu1  ;;  %v4083_v24 = vpop.f32.mrf.mxu0  ;;  %v14684_v36 = vld [vmem:[#allocation151_spill] sm:$0xff] }
 0x276   : > { %v12352_v3 = vpack.c.bf16 %v2272_v30, %v2264_v5  ;;  %v12354_v27 = vadd.f32 %v4272_v46, %v4080_v60  ;;  %v2269_v8 = vsel %vm1757_vm6, %v1314_v25, %v2013_v23  ;;  %v2271_v14 = vsel %vm1759_vm7, %v1507_v6, %v2015_v2  ;;  %v14683_v2 = vld [vmem:[#allocation30_spill] sm:$0xff] }
 0x277   : > { %14681 = vst [vmem:[#allocation21_spill] sm:$0xff] %v12348_v29  ;;  %vm1774_vm8 = vcmp.gt.f32.partialorder %v1326_v49, 0.0  ;;  %v2032_v4 = vmul.f32 0.2, %v1519_v55  ;;  %4717 = vmatmul.mubr.bf16.gmra.mxu1 %v12281_v15  ;;  %4533 = vmatprep.mubr.bf16.mxu0 %v12348_v29  ;;  %v2022_v44 = vmul.f32 0.2, %v1322_v10  ;;  %v12362_v60 = vadd.f32 %v4274_v11, %v4082_v57  ;;  %v4276_v28 = vpop.f32.mrf.mxu1  ;;  %v4085_v34 = vpop.f32.mrf.mxu0 }
 0x278   : > { %14682 = vst [vmem:[#allocation158_spill] sm:$0xff] %v12352_v3  ;;  %vm1776_vm10 = vcmp.gt.f32.partialorder %v1519_v55, 0.0  ;;  %4726 = vmatprep.mubr.bf16.mxu1 %v12352_v3  ;;  %v4084_v30 = vadd.f32 %v4083_v24, %v12008_v45  ;;  %vm1766_vm11 = vcmp.gt.f32.partialorder %v1322_v10, 0.0  ;;  %v2024_v25 = vmul.f32 0.2, %v1515_v63  ;;  %v14685_v57 = vld [vmem:[#allocation81_spill] sm:$0xff] }
 0x279   : > { %v1324_v6 = vadd.f32 %v14683_v2, %v10666_v59  ;;  %v1517_v23 = vadd.f32 %v14684_v36, %v10696_v35  ;;  %vm1768_vm12 = vcmp.gt.f32.partialorder %v1515_v63, 0.0  ;;  %v2286_v48 = vsel %vm1774_vm8, %v1326_v49, %v2030_v0  ;;  %v14686_v24 = vld [vmem:[#allocation120_spill] sm:$0xff]  ;;  %v4278_v3 = vpop.f32.mrf.mxu1 }
 0x27a   : > { %v12370_v5 = vadd.f32 %v4276_v28, %v4084_v30  ;;  %v4086_v46 = vadd.f32 %v4085_v34, %v12039_v20  ;;  %v2263_v16 = vsel %vm1751_vm3, %v12278_v33, %v2007_v47  ;;  %v1320_v11 = vadd.f32 %v14685_v57, %v10666_v59  ;;  %v4089_v28 = vpop.f32.mrf.mxu0 }
 0x27b   : > { %v1513_v2 = vadd.f32 %v14686_v24, %v10696_v35  ;;  %v2288_v36 = vsel %vm1776_vm10, %v1519_v55, %v2032_v4  ;;  %v12381_v29 = vpack.c.bf16 %v2269_v8, %v2261_v61  ;;  %v12383_v49 = vpack.c.bf16 %v2271_v14, %v2263_v16  ;;  %v4282_v61 = vpop.f32.mrf.mxu1 }
 0x27c   : > { %v2278_v0 = vsel %vm1766_vm11, %v1322_v10, %v2022_v44  ;;  %v12386_v30 = vadd.f32 %v4278_v3, %v4086_v46  ;;  %v2029_v34 = vmul.f32 0.2, %v1324_v6  ;;  %v2280_v59 = vsel %vm1768_vm12, %v1515_v63, %v2024_v25  ;;  %v4091_v8 = vpop.f32.mrf.mxu0 }
 0x27d   : > { %14687 = vst [vmem:[#allocation69_spill] sm:$0xff] %v12381_v29  ;;  %14688 = vst [vmem:[#allocation149_spill] sm:$0xff] %v12383_v49  ;;  %v12388_v33 = vpack.c.bf16 %v2286_v48, %v2278_v0  ;;  %v4090_v47 = vadd.f32 %v4089_v28, %v12008_v45  ;;  %vm1773_vm0 = vcmp.gt.f32.partialorder %v1324_v6, 0.0  ;;  %v2031_v35 = vmul.f32 0.2, %v1517_v23  ;;  %4534 = vmatmul.mubr.bf16.gmra.mxu0 %v12381_v29  ;;  %v4284_v4 = vpop.f32.mrf.mxu1 }
 0x27e   : > { %v12393_v55 = vpack.c.bf16 %v2288_v36, %v2280_v59  ;;  %v2021_v14 = vmul.f32 0.2, %v1320_v11  ;;  %vm1775_vm2 = vcmp.gt.f32.partialorder %v1517_v23, 0.0  ;;  %v4092_v63 = vadd.f32 %v4091_v8, %v12039_v20  ;;  %v4093_v44 = vpop.f32.mrf.mxu0  ;;  %v8444_v29 = vld [vmem:[#allocation3 + $0x46c] ss:$16 sps:$4 sm:$0xff]  }
 0x27f   : > { %14689 = vst [vmem:[#allocation142_spill] sm:$0xff] %v12388_v33  ;;  %4727 = vmatmul.mubr.bf16.gmra.mxu1 %v12383_v49  ;;  %4543 = vmatprep.mubr.bf16.mxu0 %v12388_v33  ;;  %v12397_v10 = vadd.f32 %v4282_v61, %v4090_v47  ;;  %vm1765_vm13 = vcmp.gt.f32.partialorder %v1320_v11, 0.0  ;;  %v2023_v3 = vmul.f32 0.2, %v1513_v2  ;;  %vm1767_vm14 = vcmp.gt.f32.partialorder %v1513_v2, 0.0  ;;  %v4286_v57 = vpop.f32.mrf.mxu1  ;;  %v14700_v49 = vld [vmem:[#allocation32_spill] sm:$0xff] }
 0x280   : > { %14690 = vst [vmem:[#allocation48_spill] sm:$0xff] %v12393_v55  ;;  %4736 = vmatprep.mubr.bf16.mxu1 %v12393_v55  ;;  %v2285_v25 = vsel %vm1773_vm0, %v1324_v6, %v2029_v34  ;;  %v12402_v48 = vadd.f32 %v4284_v4, %v4092_v63  ;;  %v4094_v46 = vadd.f32 %v4093_v44, %v12008_v45  ;;  %v4095_v24 = vpop.f32.mrf.mxu0 }
 0x281   : > { %v2287_v16 = vsel %vm1775_vm2, %v1517_v23, %v2031_v35  ;;  %v2277_v36 = vsel %vm1765_vm13, %v1320_v11, %v2021_v14  ;;  %v4096_v28 = vadd.f32 %v4095_v24, %v12039_v20  ;;  %v2279_v59 = vsel %vm1767_vm14, %v1513_v2, %v2023_v3  ;;  %v4288_v61 = vpop.f32.mrf.mxu1  ;;  %v14693_v11 = vld [vmem:[#allocation27_spill] sm:$0xff]  ;;  %v14694_v14 = vld [vmem:[#allocation28_spill] sm:$0xff] }
 0x282   : > { %v12405_v0 = vadd.f32 %v4286_v57, %v4094_v46  ;;  %v12408_v47 = vpack.c.bf16 %v2285_v25, %v2277_v36  ;;  %v12410_v8 = vpack.c.bf16 %v2287_v16, %v2279_v59  ;;  %v4099_v6 = vpop.f32.mrf.mxu0  ;;  %v8418_v57 = vld [vmem:[#allocation3 + $0x4e8] ss:$16 sps:$4 sm:$0xff]   ;;  %v8426_v59 = vld [vmem:[#allocation3 + $0x4cc] ss:$16 sps:$4 sm:$0xff]  }
 0x283   : > { %v12412_v55 = vadd.f32 %v4288_v61, %v4096_v28  ;;  %v4100_v23 = vadd.f32 %v4099_v6, %v12008_v45  ;;  %v4292_v34 = vpop.f32.mrf.mxu1  ;;  %v8421_v28 = vld [vmem:[#allocation3 + $0x6e8] ss:$16 sps:$4 sm:$0xff]  }
 0x284   : > { %14691 = vst [vmem:[#allocation19_spill] sm:$0xff] %v12408_v47  ;;  %14692 = vst [vmem:[#allocation134_spill] sm:$0xff] %v12410_v8  ;;  %v4101_v35 = vpop.f32.mrf.mxu0  ;;  %v14695_v6 = vld [vmem:[#allocation25_spill] sm:$0xff] }
 0x285   : > { %4544 = vmatmul.mubr.bf16.gmra.mxu0 %v12408_v47  ;;  %v12419_v2 = vadd.f32 %v4292_v34, %v4100_v23  ;;  %v4102_v63 = vadd.f32 %v4101_v35, %v12039_v20  ;;  %v4294_v3 = vpop.f32.mrf.mxu1  ;;  %v8429_v23 = vld [vmem:[#allocation3 + $0x6cc] ss:$16 sps:$4 sm:$0xff]  }
 0x286   : > { %4779 = vmatprep.mubr.bf16.mxu0 %v14693_v11  ;;  %v4103_v4 = vpop.f32.mrf.mxu0  ;;  %v14696_v34 = vld [vmem:[#allocation26_spill] sm:$0xff]  ;;  %v14697_v35 = vld [vmem:[#allocation35_spill] sm:$0xff] }
 0x287   : > { %4737 = vmatmul.mubr.bf16.gmra.mxu1 %v12410_v8  ;;  %v12422_v44 = vadd.f32 %v4294_v3, %v4102_v63  ;;  %v4104_v25 = vadd.f32 %v4103_v4, %v12008_v45  ;;  %v4296_v46 = vpop.f32.mrf.mxu1  ;;  %v8424_v63 = vld [vmem:[#allocation3 + $0x4c8] ss:$16 sps:$4 sm:$0xff]   ;;  %v8438_v47 = vld [vmem:[#allocation3 + $0x48c] ss:$16 sps:$4 sm:$0xff]  }
 0x288   : > { %4972 = vmatprep.mubr.bf16.mxu1 %v14694_v14  ;;  %v4105_v16 = vpop.f32.mrf.mxu0  ;;  %v14698_v14 = vld [vmem:[#allocation36_spill] sm:$0xff] }
 0x289   : > { %v12425_v24 = vadd.f32 %v4296_v46, %v4104_v25  ;;  %v4106_v36 = vadd.f32 %v4105_v16, %v12039_v20  ;;  %v4298_v61 = vpop.f32.mrf.mxu1  ;;  %v8427_v25 = vld [vmem:[#allocation3 + $0x6c8] ss:$16 sps:$4 sm:$0xff]   ;;  %v8432_v16 = vld [vmem:[#allocation3 + $0x4ac] ss:$16 sps:$4 sm:$0xff]  }
 0x28a   : > { %v4109_v3 = vpop.f32.mrf.mxu0 }
 0x28b   : > { %v12429_v11 = vadd.f32 %v4298_v61, %v4106_v36  ;;  %v4302_v4 = vpop.f32.mrf.mxu1  ;;  %v4110_v46 = vadd.f32 %v4109_v3, %v12008_v45  ;;  %v8435_v61 = vld [vmem:[#allocation3 + $0x6ac] ss:$16 sps:$4 sm:$0xff]  }
 0x28d   : > { %4780 = vmatmul.mubr.bf16.vlgmr.msra.gmra.mxu0 %v14695_v6  ;;  %v4111_v6 = vpop.f32.mrf.mxu0  ;;  %v4304_v36 = vpop.f32.mrf.mxu1  ;;  %v12435_v8 = vadd.f32 %v4302_v4, %v4110_v46  ;;  %v8441_v46 = vld [vmem:[#allocation3 + $0x68c] ss:$16 sps:$4 sm:$0xff]  }
 0x28e   : > { %4789 = vmatprep.mubr.bf16.mxu0 %v14697_v35  ;;  %5134 = vmatpush1.bf16.msra.mxu0 %v8418_v57  ;;  %v8430_v35 = vld [vmem:[#allocation3 + $0x4a8] ss:$16 sps:$4 sm:$0xff]  }
 0x28f   : > { %4973 = vmatmul.mubr.bf16.vlgmr.msra.gmra.mxu1 %v14696_v34  ;;  %5135 = vmatprep.subr.bf16.mxu0 %v8426_v59  ;;  %v4112_v34 = vadd.f32 %v4111_v6, %v12039_v20  ;;  %v4113_v57 = vpop.f32.mrf.mxu0  ;;  %v8433_v59 = vld [vmem:[#allocation3 + $0x6a8] ss:$16 sps:$4 sm:$0xff]  }
 0x290   : > { %4982 = vmatprep.mubr.bf16.mxu1 %v14698_v14  ;;  %5327 = vmatpush1.bf16.msra.mxu1 %v8421_v28  ;;  %v4306_v14 = vpop.f32.mrf.mxu1  ;;  %v4114_v3 = vadd.f32 %v4113_v57, %v12008_v45 }
 0x291   : > { %5328 = vmatprep.subr.bf16.mxu1 %v8429_v23  ;;  %v12438_v28 = vadd.f32 %v4304_v36, %v4112_v34  ;;  %v14699_v23 = vld [vmem:[#allocation31_spill] sm:$0xff]  ;;  %v4115_v33 = vpop.f32.mrf.mxu0 }
 0x292   : > { %5136 = vmatpush1.bf16.msra.mxu0 %v8424_v63  ;;  %v4308_v4 = vpop.f32.mrf.mxu1  ;;  %v14701_v63 = vld [vmem:[#allocation39_spill] sm:$0xff]  ;;  %v12444_v6 = vadd.f32 %v4306_v14, %v4114_v3 }
 0x293   : > { %5137 = vmatprep.subr.bf16.mxu0 %v8432_v16  ;;  %v14702_v16 = vld [vmem:[#allocation41_spill] sm:$0xff]  ;;  %v4119_v57 = vpop.f32.mrf.mxu0 }
 0x294   : > { %5329 = vmatpush1.bf16.msra.mxu1 %v8427_v25  ;;  %v4116_v25 = vadd.f32 %v4115_v33, %v12039_v20  ;;  %v8436_v36 = vld [vmem:[#allocation3 + $0x488] ss:$16 sps:$4 sm:$0xff]  }
 0x295   : > { %4790 = vmatmul.mubr.bf16.gmra.mxu0 %v14699_v23  ;;  %5330 = vmatprep.subr.bf16.mxu1 %v8435_v61  ;;  %v4312_v61 = vpop.f32.mrf.mxu1  ;;  %v8439_v23 = vld [vmem:[#allocation3 + $0x688] ss:$16 sps:$4 sm:$0xff]   ;;  %v4121_v14 = vpop.f32.mrf.mxu0 }
 0x296   : > { %4799 = vmatprep.mubr.bf16.mxu0 %v14701_v63  ;;  %5138 = vmatpush1.bf16.msra.mxu0 %v8430_v35  ;;  %v12448_v34 = vadd.f32 %v4308_v4, %v4116_v25  ;;  %v8447_v63 = vld [vmem:[#allocation3 + $0x66c] ss:$16 sps:$4 sm:$0xff]   ;;  %v4122_v33 = vadd.f32 %v4121_v14, %v12039_v20  ;;  %v8442_v35 = vld [vmem:[#allocation3 + $0x468] ss:$16 sps:$4 sm:$0xff]  }
 0x297   : > { %4983 = vmatmul.mubr.bf16.gmra.mxu1 %v14700_v49  ;;  %5139 = vmatprep.subr.bf16.mxu0 %v8438_v47  ;;  %v4120_v49 = vadd.f32 %v4119_v57, %v12008_v45  ;;  %v4314_v3 = vpop.f32.mrf.mxu1  ;;  %v8445_v25 = vld [vmem:[#allocation3 + $0x668] ss:$16 sps:$4 sm:$0xff]   ;;  %v8450_v47 = vld [vmem:[#allocation3 + $0x44c] ss:$16 sps:$4 sm:$0xff]  }
 0x298   : > { %4992 = vmatprep.mubr.bf16.mxu1 %v14702_v16  ;;  %5331 = vmatpush1.bf16.msra.mxu1 %v8433_v59  ;;  %14703 = vst [vmem:[#allocation104_spill] sm:$0xff] %v12448_v34  ;;  %v4123_v59 = vpop.f32.mrf.mxu0  ;;  %v14705_v16 = vld [vmem:[#allocation40_spill] sm:$0xff]  ;;  %v12455_v31 = vadd.f32 %v4314_v3, %v4122_v33  ;;  %v8451_v3 = vld [vmem:[#allocation3 + $0x648] ss:$16 sps:$4 sm:$0xff]  }
 0x299   : > { %5332 = vmatprep.subr.bf16.mxu1 %v8441_v46  ;;  %v12451_v15 = vadd.f32 %v4312_v61, %v4120_v49  ;;  %v4316_v4 = vpop.f32.mrf.mxu1  ;;  %v4124_v46 = vadd.f32 %v4123_v59, %v12008_v45  ;;  %v8453_v57 = vld [vmem:[#allocation3 + $0x64c] ss:$16 sps:$4 sm:$0xff]  }
 0x29a   : > { %5140 = vmatpush1.bf16.msra.mxu0 %v8436_v36  ;;  %14706 = vst [vmem:[#allocation108_spill] sm:$0xff] %v12455_v31  ;;  %v14707_v61 = vld [vmem:[#allocation42_spill] sm:$0xff]  ;;  %v14708_v36 = vld [vmem:[#allocation45_spill] sm:$0xff]  ;;  %v4125_v49 = vpop.f32.mrf.mxu0 }
 0x29b   : > { %14704 = vst [vmem:[#allocation106_spill] sm:$0xff] %v12451_v15  ;;  %5141 = vmatprep.subr.bf16.mxu0 %v8444_v29  ;;  %v4318_v14 = vpop.f32.mrf.mxu1  ;;  %v12461_v15 = vadd.f32 %v4316_v4, %v4124_v46  ;;  %v4126_v29 = vadd.f32 %v4125_v49, %v12039_v20  ;;  %v8456_v33 = vld [vmem:[#allocation3 + $0x42c] ss:$16 sps:$4 sm:$0xff]   ;;  %v8454_v4 = vld [vmem:[#allocation3 + $0x428] ss:$16 sps:$4 sm:$0xff]  }
 0x29c   : > { %5333 = vmatpush1.bf16.msra.mxu1 %v8439_v23  ;;  %v14709_v23 = vld [vmem:[#allocation50_spill] sm:$0xff]  ;;  %v4129_v59 = vpop.f32.mrf.mxu0 }
 0x29d   : > { %4800 = vmatmul.mubr.bf16.gmra.mxu0 %v14705_v16  ;;  %5334 = vmatprep.subr.bf16.mxu1 %v8447_v63  ;;  %v8448_v16 = vld [vmem:[#allocation3 + $0x448] ss:$16 sps:$4 sm:$0xff]   ;;  %v12464_v63 = vadd.f32 %v4318_v14, %v4126_v29  ;;  %v4322_v31 = vpop.f32.mrf.mxu1  ;;  %v14712_v14 = vld [vmem:[#allocation46_spill] sm:$0xff] }
 0x29e   : > { %4809 = vmatprep.mubr.bf16.mxu0 %v14708_v36  ;;  %5142 = vmatpush1.bf16.msra.mxu0 %v8442_v35  ;;  %v4130_v36 = vadd.f32 %v4129_v59, %v12008_v45  ;;  %v4131_v34 = vpop.f32.mrf.mxu0  ;;  %v14713_v29 = vld [vmem:[#allocation47_spill] sm:$0xff] }
 0x29f   : > { %4993 = vmatmul.mubr.bf16.gmra.mxu1 %v14707_v61  ;;  %5143 = vmatprep.subr.bf16.mxu0 %v8450_v47  ;;  %14710 = vst [vmem:[#allocation112_spill] sm:$0xff] %v12464_v63  ;;  %v8459_v61 = vld [vmem:[#allocation3 + $0x62c] ss:$16 sps:$4 sm:$0xff]   ;;  %v4132_v35 = vadd.f32 %v4131_v34, %v12039_v20  ;;  %v4324_v49 = vpop.f32.mrf.mxu1 }
 0x2a0   : > { %5002 = vmatprep.mubr.bf16.mxu1 %v14709_v23  ;;  %5335 = vmatpush1.bf16.msra.mxu1 %v8445_v25  ;;  %v12467_v46 = vadd.f32 %v4322_v31, %v4130_v36  ;;  %v8457_v25 = vld [vmem:[#allocation3 + $0x628] ss:$16 sps:$4 sm:$0xff]   ;;  %v8462_v47 = vld [vmem:[#allocation3 + $0x40c] ss:$16 sps:$4 sm:$0xff]   ;;  %v4133_v23 = vpop.f32.mrf.mxu0 }
 0x2a1   : > { %5336 = vmatprep.subr.bf16.mxu1 %v8453_v57  ;;  %v8465_v57 = vld [vmem:[#allocation3 + $0x60c] ss:$16 sps:$4 sm:$0xff]   ;;  %v4134_v31 = vadd.f32 %v4133_v23, %v12008_v45  ;;  %v4326_v36 = vpop.f32.mrf.mxu1 }
 0x2a2   : > { %5144 = vmatpush1.bf16.msra.mxu0 %v8448_v16  ;;  %14711 = vst [vmem:[#allocation144_spill] sm:$0xff] %v12467_v46  ;;  %v14714_v59 = vld [vmem:[#allocation55_spill] sm:$0xff]  ;;  %v12473_v16 = vadd.f32 %v4324_v49, %v4132_v35  ;;  %v14716_v34 = vld [vmem:[#allocation56_spill] sm:$0xff] }
 0x2a3   : > { %5145 = vmatprep.subr.bf16.mxu0 %v8456_v33  ;;  %v8460_v33 = vld [vmem:[#allocation3 + $0x408] ss:$16 sps:$4 sm:$0xff]   ;;  %v12477_v46 = vadd.f32 %v4326_v36, %v4134_v31  ;;  %v8468_v63 = vld [vmem:[#allocation3 + $0x5ec] ss:$16 sps:$4 sm:$0xff]  }
 0x2a4   : > { %5337 = vmatpush1.bf16.msra.mxu1 %v8451_v3  ;;  %14715 = vst [vmem:[#allocation117_spill] sm:$0xff] %v12473_v16  ;;  %v4135_v3 = vpop.f32.mrf.mxu0  ;;  %v8471_v35 = vld [vmem:[#allocation3 + $0x7ec] ss:$16 sps:$4 sm:$0xff]   ;;  %v8469_v31 = vld [vmem:[#allocation3 + $0x7e8] ss:$16 sps:$4 sm:$0xff]  }
 0x2a5   : > { %4810 = vmatmul.mubr.bf16.gmra.mxu0 %v14712_v14  ;;  %5338 = vmatprep.subr.bf16.mxu1 %v8459_v61  ;;  %14717 = vst [vmem:[#allocation118_spill] sm:$0xff] %v12477_v46  ;;  %v4136_v14 = vadd.f32 %v4135_v3, %v12039_v20  ;;  %v4328_v61 = vpop.f32.mrf.mxu1  ;;  %v8474_v36 = vld [vmem:[#allocation3 + $0x5cc] ss:$16 sps:$4 sm:$0xff]  }
 0x2a6   : > { %4819 = vmatprep.mubr.bf16.mxu0 %v14714_v59  ;;  %5146 = vmatpush1.bf16.msra.mxu0 %v8454_v4  ;;  %v4139_v23 = vpop.f32.mrf.mxu0  ;;  %v8466_v4 = vld [vmem:[#allocation3 + $0x5e8] ss:$16 sps:$4 sm:$0xff]   ;;  %v14719_v3 = vld [vmem:[#allocation20_spill] sm:$0xff] }
 0x2a7   : > { %5003 = vmatmul.mubr.bf16.gmra.mxu1 %v14713_v29  ;;  %5147 = vmatprep.subr.bf16.mxu0 %v8462_v47  ;;  %v8463_v29 = vld [vmem:[#allocation3 + $0x608] ss:$16 sps:$4 sm:$0xff]   ;;  %v12480_v49 = vadd.f32 %v4328_v61, %v4136_v14  ;;  %v4140_v59 = vadd.f32 %v4139_v23, %v12008_v45  ;;  %v8477_v14 = vld [vmem:[#allocation3 + $0x7cc] ss:$16 sps:$4 sm:$0xff]  }
 0x2a8   : > { %5012 = vmatprep.mubr.bf16.mxu1 %v14716_v34  ;;  %5339 = vmatpush1.bf16.msra.mxu1 %v8457_v25  ;;  %v4332_v34 = vpop.f32.mrf.mxu1  ;;  %v4141_v16 = vpop.f32.mrf.mxu0  ;;  %v14721_v61 = vld [vmem:[#allocation53_spill] sm:$0xff]  ;;  %v14722_v23 = vld [vmem:[#allocation58_spill] sm:$0xff] }
 0x2a9   : > { %5340 = vmatprep.subr.bf16.mxu1 %v8465_v57  ;;  %14718 = vst [vmem:[#allocation78_spill] sm:$0xff] %v12480_v49  ;;  %v12484_v25 = vadd.f32 %v4332_v34, %v4140_v59  ;;  %v4142_v47 = vadd.f32 %v4141_v16, %v12039_v20  ;;  %v14723_v49 = vld [vmem:[#allocation29_spill] sm:$0xff] }
 0x2aa   : > { %5148 = vmatpush1.bf16.msra.mxu0 %v8460_v33  ;;  %v4334_v57 = vpop.f32.mrf.mxu1  ;;  %v4143_v33 = vpop.f32.mrf.mxu0  ;;  %v8472_v59 = vld [vmem:[#allocation3 + $0x5c8] ss:$16 sps:$4 sm:$0xff]  }
 0x2ab   : > { %5149 = vmatprep.subr.bf16.mxu0 %v8468_v63  ;;  %14720 = vst [vmem:[#allocation80_spill] sm:$0xff] %v12484_v25  ;;  %v4144_v63 = vadd.f32 %v4143_v33, %v12008_v45  ;;  %v8475_v16 = vld [vmem:[#allocation3 + $0x7c8] ss:$16 sps:$4 sm:$0xff]   ;;  %v8483_v25 = vld [vmem:[#allocation3 + $0x7ac] ss:$16 sps:$4 sm:$0xff]  }
 0x2ac   : > { %5341 = vmatpush1.bf16.msra.mxu1 %v8463_v29  ;;  %v12490_v29 = vadd.f32 %v4334_v57, %v4142_v47  ;;  %v4336_v46 = vpop.f32.mrf.mxu1  ;;  %v4145_v34 = vpop.f32.mrf.mxu0  ;;  %v8478_v57 = vld [vmem:[#allocation3 + $0x5a8] ss:$16 sps:$4 sm:$0xff]  }
 0x2ad   : > { %4820 = vmatmul.mubr.bf16.gmra.mxu0 %v14719_v3  ;;  %5342 = vmatprep.subr.bf16.mxu1 %v8471_v35  ;;  %v8480_v35 = vld [vmem:[#allocation3 + $0x5ac] ss:$16 sps:$4 sm:$0xff]   ;;  %v12493_v3 = vadd.f32 %v4336_v46, %v4144_v63 }
 0x2ae   : > { %4829 = vmatprep.mubr.bf16.mxu0 %v14722_v23  ;;  %14724 = vst [vmem:[#allocation146_spill] sm:$0xff] %v12490_v29  ;;  %5150 = vmatpush2.bf16.msra.mxu0 %v8466_v4  ;;  %v4338_v23 = vpop.f32.mrf.mxu1  ;;  %v4149_v47 = vpop.f32.mrf.mxu0  ;;  %v14727_v29 = vld [vmem:[#allocation22_spill] sm:$0xff] }
 0x2af   : > { %5013 = vmatmul.mubr.bf16.gmra.mxu1 %v14721_v61  ;;  %5151 = vmatprep.subr.bf16.mxu0 %v8474_v36  ;;  %14725 = vst [vmem:[#allocation148_spill] sm:$0xff] %v12493_v3  ;;  %v4146_v61 = vadd.f32 %v4145_v34, %v12039_v20  ;;  %v4150_v4 = vadd.f32 %v4149_v47, %v12008_v45  ;;  %v8486_v36 = vld [vmem:[#allocation3 + $0x58c] ss:$16 sps:$4 sm:$0xff]  }
 0x2b0   : > { %5022 = vmatprep.mubr.bf16.mxu1 %v14723_v49  ;;  %5343 = vmatpush2.bf16.msra.mxu1 %v8469_v31  ;;  %v4342_v33 = vpop.f32.mrf.mxu1  ;;  %v8481_v31 = vld [vmem:[#allocation3 + $0x7a8] ss:$16 sps:$4 sm:$0xff]   ;;  %v4151_v46 = vpop.f32.mrf.mxu0  ;;  %v8489_v63 = vld [vmem:[#allocation3 + $0x78c] ss:$16 sps:$4 sm:$0xff]  }
 0x2b1   : > { %5344 = vmatprep.subr.bf16.mxu1 %v8477_v14  ;;  %v12496_v49 = vadd.f32 %v4338_v23, %v4146_v61  ;;  %v14728_v34 = vld [vmem:[#allocation57_spill] sm:$0xff]  ;;  %v14729_v14 = vld [vmem:[#allocation34_spill] sm:$0xff]  ;;  %v12502_v61 = vadd.f32 %v4342_v33, %v4150_v4  ;;  %v14731_v47 = vld [vmem:[#allocation63_spill] sm:$0xff] }
 0x2b2   : > { %5152 = vmatpush2.bf16.msra.mxu0 %v8472_v59  ;;  %v4152_v59 = vadd.f32 %v4151_v46, %v12039_v20  ;;  %v4344_v23 = vpop.f32.mrf.mxu1  ;;  %v8492_v3 = vld [vmem:[#allocation3 + $0x56c] ss:$16 sps:$4 sm:$0xff]  }
 0x2b3   : > { %14726 = vst [vmem:[#allocation124_spill] sm:$0xff] %v12496_v49  ;;  %5153 = vmatprep.subr.bf16.mxu0 %v8480_v35  ;;  %14730 = vst [vmem:[#allocation125_spill] sm:$0xff] %v12502_v61  ;;  %v8484_v35 = vld [vmem:[#allocation3 + $0x588] ss:$16 sps:$4 sm:$0xff]   ;;  %v8495_v4 = vld [vmem:[#allocation3 + $0x76c] ss:$16 sps:$4 sm:$0xff]  }
 0x2b4   : > { %5345 = vmatpush2.bf16.msra.mxu1 %v8475_v16  ;;  %v4153_v16 = vpop.f32.mrf.mxu0  ;;  %v12506_v49 = vadd.f32 %v4344_v23, %v4152_v59  ;;  %v8493_v23 = vld [vmem:[#allocation3 + $0x768] ss:$16 sps:$4 sm:$0xff]  }
 0x2b5   : > { %4830 = vmatmul.mubr.bf16.gmra.mxu0 %v14727_v29  ;;  %5346 = vmatprep.subr.bf16.mxu1 %v8483_v25  ;;  %v4154_v29 = vadd.f32 %v4153_v16, %v12008_v45  ;;  %v4346_v25 = vpop.f32.mrf.mxu1 }
 0x2b6   : > { %4839 = vmatprep.mubr.bf16.mxu0 %v14729_v14  ;;  %5154 = vmatpush2.bf16.msra.mxu0 %v8478_v57  ;;  %14732 = vst [vmem:[#allocation150_spill] sm:$0xff] %v12506_v49  ;;  %v4155_v14 = vpop.f32.mrf.mxu0  ;;  %v8490_v57 = vld [vmem:[#allocation3 + $0x568] ss:$16 sps:$4 sm:$0xff]   ;;  %v8507_v49 = vld [vmem:[#allocation3 + $0x72c] ss:$16 sps:$4 sm:$0xff]  }
 0x2b7   : > { %5023 = vmatmul.mubr.bf16.gmra.mxu1 %v14728_v34  ;;  %5155 = vmatprep.subr.bf16.mxu0 %v8486_v36  ;;  %v8487_v34 = vld [vmem:[#allocation3 + $0x788] ss:$16 sps:$4 sm:$0xff]   ;;  %v12509_v33 = vadd.f32 %v4346_v25, %v4154_v29  ;;  %v4156_v46 = vadd.f32 %v4155_v14, %v12039_v20  ;;  %v14735_v36 = vld [vmem:[#allocation60_spill] sm:$0xff] }
 0x2b8   : > { %5032 = vmatprep.mubr.bf16.mxu1 %v14731_v47  ;;  %5347 = vmatpush2.bf16.msra.mxu1 %v8481_v31  ;;  %v4348_v47 = vpop.f32.mrf.mxu1  ;;  %v4159_v59 = vpop.f32.mrf.mxu0  ;;  %v8498_v31 = vld [vmem:[#allocation3 + $0x54c] ss:$16 sps:$4 sm:$0xff]  }
 0x2b9   : > { %5348 = vmatprep.subr.bf16.mxu1 %v8489_v63  ;;  %14733 = vst [vmem:[#allocation88_spill] sm:$0xff] %v12509_v33  ;;  %v12512_v61 = vadd.f32 %v4348_v47, %v4156_v46  ;;  %v4160_v16 = vadd.f32 %v4159_v59, %v12008_v45  ;;  %v8501_v29 = vld [vmem:[#allocation3 + $0x74c] ss:$16 sps:$4 sm:$0xff]   ;;  %v8496_v47 = vld [vmem:[#allocation3 + $0x548] ss:$16 sps:$4 sm:$0xff]  }
 0x2ba   : > { %5156 = vmatpush2.bf16.msra.mxu0 %v8484_v35  ;;  %v4352_v63 = vpop.f32.mrf.mxu1  ;;  %v14736_v25 = vld [vmem:[#allocation61_spill] sm:$0xff]  ;;  %v14737_v14 = vld [vmem:[#allocation67_spill] sm:$0xff]  ;;  %v4161_v35 = vpop.f32.mrf.mxu0 }
 0x2bb   : > { %14734 = vst [vmem:[#allocation30_spill] sm:$0xff] %v12512_v61  ;;  %5157 = vmatprep.subr.bf16.mxu0 %v8492_v3  ;;  %v14738_v33 = vld [vmem:[#allocation71_spill] sm:$0xff]  ;;  %v12519_v46 = vadd.f32 %v4352_v63, %v4160_v16  ;;  %v4162_v3 = vadd.f32 %v4161_v35, %v12039_v20 }
 0x2bc   : > { %5349 = vmatpush2.bf16.msra.mxu1 %v8487_v34  ;;  %v4354_v34 = vpop.f32.mrf.mxu1  ;;  %v8499_v59 = vld [vmem:[#allocation3 + $0x748] ss:$16 sps:$4 sm:$0xff]  }
 0x2bd   : > { %4840 = vmatmul.mubr.bf16.gmra.mxu0 %v14735_v36  ;;  %5350 = vmatprep.subr.bf16.mxu1 %v8495_v4  ;;  %14739 = vst [vmem:[#allocation151_spill] sm:$0xff] %v12519_v46  ;;  %v4163_v36 = vpop.f32.mrf.mxu0  ;;  %v8504_v4 = vld [vmem:[#allocation3 + $0x52c] ss:$16 sps:$4 sm:$0xff]   ;;  %v12522_v61 = vadd.f32 %v4354_v34, %v4162_v3 }
 0x2be   : > { %4849 = vmatprep.mubr.bf16.mxu0 %v14737_v14  ;;  %5158 = vmatpush2.bf16.msra.mxu0 %v8490_v57  ;;  %v4356_v14 = vpop.f32.mrf.mxu1  ;;  %v8502_v57 = vld [vmem:[#allocation3 + $0x528] ss:$16 sps:$4 sm:$0xff]   ;;  %v14740_v46 = vld [vmem:[#allocation38_spill] sm:$0xff] }
 0x2bf   : > { %5033 = vmatmul.mubr.bf16.gmra.mxu1 %v14736_v25  ;;  %5159 = vmatprep.subr.bf16.mxu0 %v8498_v31  ;;  %v4164_v25 = vadd.f32 %v4163_v36, %v12008_v45  ;;  %v8510_v31 = vld [vmem:[#allocation3 + $0x50c] ss:$16 sps:$4 sm:$0xff]  }
 0x2c0   : > { %5042 = vmatprep.mubr.bf16.mxu1 %v14738_v33  ;;  %5351 = vmatpush2.bf16.msra.mxu1 %v8493_v23  ;;  %v4165_v33 = vpop.f32.mrf.mxu0  ;;  %v4358_v35 = vpop.f32.mrf.mxu1  ;;  %v8505_v23 = vld [vmem:[#allocation3 + $0x728] ss:$16 sps:$4 sm:$0xff]   ;;  %v14743_v36 = vld [vmem:[#allocation16_spill] sm:$0xff] }
 0x2c1   : > { %5352 = vmatprep.subr.bf16.mxu1 %v8501_v29  ;;  %v12525_v16 = vadd.f32 %v4356_v14, %v4164_v25  ;;  %v4166_v63 = vadd.f32 %v4165_v33, %v12039_v20  ;;  %v8513_v29 = vld [vmem:[#allocation3 + $0x70c] ss:$16 sps:$4 sm:$0xff]  }
 0x2c2   : > { %5160 = vmatpush2.bf16.msra.mxu0 %v8496_v47  ;;  %v4395_v45 = vpop.f32.mrf.mxu0  ;;  %v14742_v34 = vld [vmem:[#allocation65_spill] sm:$0xff]  ;;  %v4588_v25 = vpop.f32.mrf.mxu1  ;;  %v14744_v47 = vld [vmem:[#allocation75_spill] sm:$0xff] }
 0x2c3   : > { %5161 = vmatprep.subr.bf16.mxu0 %v8504_v4  ;;  %v12529_v3 = vadd.f32 %v4358_v35, %v4166_v63  ;;  %v4396_v20 = vadd.f32 %v4395_v45, %v12056_v9  ;;  %v8508_v4 = vld [vmem:[#allocation3 + $0x508] ss:$16 sps:$4 sm:$0xff]  }
 0x2c4   : > { %5353 = vmatpush2.bf16.msra.mxu1 %v8499_v59  ;;  %v4397_v59 = vpop.f32.mrf.mxu0  ;;  %v4590_v33 = vpop.f32.mrf.mxu1 }
 0x2c5   : > { %4850 = vmatmul.mubr.bf16.gmra.mxu0 %v14740_v46  ;;  %14741 = vst [vmem:[#allocation81_spill] sm:$0xff] %v12529_v3  ;;  %5354 = vmatprep.subr.bf16.mxu1 %v8507_v49  ;;  %v4589_v14 = vadd.f32 %v4588_v25, %v4396_v20  ;;  %v4398_v46 = vadd.f32 %v4397_v59, %v12084_v17  ;;  %v8511_v49 = vld [vmem:[#allocation3 + $0x708] ss:$16 sps:$4 sm:$0xff]  }
 0x2c6   : > { %4859 = vmatprep.mubr.bf16.mxu0 %v14743_v36  ;;  %5162 = vmatpush2.bf16.msra.mxu0 %v8502_v57  ;;  %v4399_v63 = vpop.f32.mrf.mxu0  ;;  %v4592_v36 = vpop.f32.mrf.mxu1  ;;  %v14745_v57 = vld [vmem:[#allocation66_spill] sm:$0xff] }
 0x2c7   : > { %5043 = vmatmul.mubr.bf16.gmra.mxu1 %v14742_v34  ;;  %5163 = vmatprep.subr.bf16.mxu0 %v8510_v31  ;;  %v4591_v35 = vadd.f32 %v4590_v33, %v4398_v46  ;;  %v4400_v34 = vadd.f32 %v4399_v63, %v12072_v39  ;;  %v5647_v45 = vmul.f32 0.2, %v4589_v14  ;;  %vm5519_vm15 = vcmp.gt.f32.partialorder %v4589_v14, 0.0  ;;  %v14747_v31 = vld [vmem:[#allocation24_spill] sm:$0xff]  ;;  %v14748_v39 = vld [vmem:[#allocation54_spill] sm:$0xff]  ;;  %v14759_v63 = vld [vmem:[#allocation85_spill] sm:$0xff] }
 0x2c8   : > { %5052 = vmatprep.mubr.bf16.mxu1 %v14744_v47  ;;  %5355 = vmatpush2.bf16.msra.mxu1 %v8505_v23  ;;  %v4401_v9 = vpop.f32.mrf.mxu0  ;;  %v4594_v3 = vpop.f32.mrf.mxu1  ;;  %v14746_v23 = vld [vmem:[#allocation70_spill] sm:$0xff] }
 0x2c9   : > { %5356 = vmatprep.subr.bf16.mxu1 %v8513_v29  ;;  %v4593_v47 = vadd.f32 %v4592_v36, %v4400_v34  ;;  %v4402_v17 = vadd.f32 %v4401_v9, %v12087_v52  ;;  %v5648_v25 = vmul.f32 0.2, %v4591_v35  ;;  %v12543_v33 = vsel %vm5519_vm15, %v4589_v14, %v5647_v45 }
 0x2ca   : > { %5164 = vmatpush2.bf16.msra.mxu0 %v8508_v4  ;;  %v4405_v20 = vpop.f32.mrf.mxu0  ;;  %v4598_v46 = vpop.f32.mrf.mxu1  ;;  %vm5520_vm3 = vcmp.gt.f32.partialorder %v4591_v35, 0.0 }
 0x2cb   : > { %vm5523_vm1 = vcmp.gt.f32.partialorder %v4593_v47, 0.0  ;;  %v5651_v29 = vmul.f32 0.2, %v4593_v47  ;;  %v4595_v59 = vadd.f32 %v4594_v3, %v4402_v17  ;;  %v4406_v4 = vadd.f32 %v4405_v20, %v12075_v53  ;;  %v8516_v53 = vld [vmem:[%s14056_s5 + $0x74] ss:$8 sps:$4 sm:$0xff]  }
 0x2cc   : > { %5357 = vmatpush2.bf16.msra.mxu1 %v8511_v49  ;;  %v4407_v52 = vpop.f32.mrf.mxu0  ;;  %v4600_v9 = vpop.f32.mrf.mxu1  ;;  %v12554_v45 = vsel %vm5520_vm3, %v4591_v35, %v5648_v25  ;;  %6363 = vmatprep.subr.bf16.mxu0 %v8516_v53  ;;  %v14751_v35 = vld [vmem:[#allocation83_spill] sm:$0xff]  ;;  %v14752_v25 = vld [vmem:[#allocation84_spill] sm:$0xff] }
 0x2cd   : > { %4860 = vmatmul.mubr.bf16.gmra.mxu0 %v14745_v57  ;;  %v12545_v49 = vsel %vm5523_vm1, %v4593_v47, %v5651_v29  ;;  %vm5524_vm4 = vcmp.gt.f32.partialorder %v4595_v59, 0.0  ;;  %v5652_v34 = vmul.f32 0.2, %v4595_v59  ;;  %v4599_v36 = vadd.f32 %v4598_v46, %v4406_v4 }
 0x2ce   : > { %4869 = vmatprep.mubr.bf16.mxu0 %v14747_v31  ;;  %v4408_v57 = vadd.f32 %v4407_v52, %v12127_v18  ;;  %v4602_v14 = vpop.f32.mrf.mxu1  ;;  %v14749_v18 = vld [vmem:[#allocation49_spill] sm:$0xff] }
 0x2cf   : > { %5053 = vmatmul.mubr.bf16.gmra.mxu1 %v14746_v23  ;;  %v4409_v23 = vpop.f32.mrf.mxu0  ;;  %v12556_v47 = vsel %vm5524_vm4, %v4595_v59, %v5652_v34  ;;  %v5655_v17 = vmul.f32 0.2, %v4599_v36  ;;  %vm5527_vm9 = vcmp.gt.f32.partialorder %v4599_v36, 0.0 }
 0x2d0   : > { %5062 = vmatprep.mubr.bf16.mxu1 %v14748_v39  ;;  %v4410_v3 = vadd.f32 %v4409_v23, %v12130_v62  ;;  %v4601_v31 = vadd.f32 %v4600_v9, %v4408_v57  ;;  %v4604_v46 = vpop.f32.mrf.mxu1  ;;  %v14750_v62 = vld [vmem:[#allocation51_spill] sm:$0xff]  ;;  %v14753_v23 = vld [vmem:[#allocation96_spill] sm:$0xff] }
 0x2d1   : > { %v4411_v29 = vpop.f32.mrf.mxu0  ;;  %v12565_v9 = vsel %vm5527_vm9, %v4599_v36, %v5655_v17 }
 0x2d2   : > { %v4603_v39 = vadd.f32 %v4602_v14, %v4410_v3  ;;  %v4412_v4 = vadd.f32 %v4411_v29, %v12133_v32  ;;  %v5656_v57 = vmul.f32 0.2, %v4601_v31  ;;  %vm5528_vm6 = vcmp.gt.f32.partialorder %v4601_v31, 0.0 }
 0x2d3   : > { %v4415_v34 = vpop.f32.mrf.mxu0 }
 0x2d4   : > { %vm5531_vm5 = vcmp.gt.f32.partialorder %v4603_v39, 0.0  ;;  %v5659_v59 = vmul.f32 0.2, %v4603_v39  ;;  %v4605_v52 = vadd.f32 %v4604_v46, %v4412_v4  ;;  %v4416_v53 = vadd.f32 %v4415_v34, %v14753_v23 }
 0x2d5   : > { %4870 = vmatmul.mubr.bf16.gmra.mxu0 %v14749_v18  ;;  %v4608_v18 = vpop.f32.mrf.mxu1  ;;  %v4417_v14 = vpop.f32.mrf.mxu0  ;;  %v12576_v23 = vsel %vm5528_vm6, %v4601_v31, %v5656_v57 }
 0x2d6   : > { %4879 = vmatprep.mubr.bf16.mxu0 %v14751_v35  ;;  %v12568_v3 = vsel %vm5531_vm5, %v4603_v39, %v5659_v59  ;;  %vm5532_vm7 = vcmp.gt.f32.partialorder %v4605_v52, 0.0  ;;  %v5660_v32 = vmul.f32 0.2, %v4605_v52  ;;  %v4418_v35 = vadd.f32 %v4417_v14, %v12167_v54  ;;  %v14754_v39 = vld [vmem:[#allocation52_spill] sm:$0xff]  ;;  %v14756_v54 = vld [vmem:[#allocation37_spill] sm:$0xff] }
 0x2d7   : > { %5063 = vmatmul.mubr.bf16.gmra.mxu1 %v14750_v62  ;;  %v4609_v62 = vadd.f32 %v4608_v18, %v4416_v53  ;;  %v4610_v4 = vpop.f32.mrf.mxu1  ;;  %v4419_v46 = vpop.f32.mrf.mxu0  ;;  %v14755_v53 = vld [vmem:[#allocation17_spill] sm:$0xff] }
 0x2d8   : > { %5072 = vmatprep.mubr.bf16.mxu1 %v14752_v25  ;;  %v12573_v36 = vsel %vm5532_vm7, %v4605_v52, %v5660_v32  ;;  %v4611_v17 = vadd.f32 %v4610_v4, %v4418_v35  ;;  %v4420_v25 = vadd.f32 %v4419_v46, %v12170_v40  ;;  %v14757_v32 = vld [vmem:[#allocation89_spill] sm:$0xff] }
 0x2d9   : > { %v4612_v34 = vpop.f32.mrf.mxu1  ;;  %v4421_v59 = vpop.f32.mrf.mxu0  ;;  %v5663_v29 = vmul.f32 0.2, %v4609_v62  ;;  %vm5535_vm8 = vcmp.gt.f32.partialorder %v4609_v62, 0.0 }
 0x2da   : > { %v4613_v18 = vadd.f32 %v4612_v34, %v4420_v25  ;;  %v4422_v40 = vadd.f32 %v4421_v59, %v12180_v56  ;;  %v5664_v14 = vmul.f32 0.2, %v4611_v17  ;;  %vm5536_vm11 = vcmp.gt.f32.partialorder %v4611_v17, 0.0  ;;  %v14760_v56 = vld [vmem:[#allocation97_spill] sm:$0xff] }
 0x2db   : > { %v4614_v52 = vpop.f32.mrf.mxu1  ;;  %v4425_v57 = vpop.f32.mrf.mxu0 }
 0x2dc   : > { %vm5539_vm10 = vcmp.gt.f32.partialorder %v4613_v18, 0.0  ;;  %v5667_v31 = vmul.f32 0.2, %v4613_v18  ;;  %v4615_v35 = vadd.f32 %v4614_v52, %v4422_v40  ;;  %v4426_v4 = vadd.f32 %v4425_v57, %v12183_v26  ;;  %v14758_v40 = vld [vmem:[#allocation79_spill] sm:$0xff] }
 0x2dd   : > { %4880 = vmatmul.mubr.bf16.gmra.mxu0 %v14754_v39  ;;  %v4618_v46 = vpop.f32.mrf.mxu1  ;;  %v8531_v39 = vld [vmem:[%s14056_s5 + $0x174] ss:$8 sps:$4 sm:$0xff]   ;;  %v4427_v34 = vpop.f32.mrf.mxu0  ;;  %v12598_v57 = vsel %vm5536_vm11, %v4611_v17, %v5664_v14 }
 0x2de   : > { %4889 = vmatprep.mubr.bf16.mxu0 %v14756_v54  ;;  %v12591_v25 = vsel %vm5539_vm10, %v4613_v18, %v5667_v31  ;;  %vm5540_vm12 = vcmp.gt.f32.partialorder %v4615_v35, 0.0  ;;  %v5668_v59 = vmul.f32 0.2, %v4615_v35  ;;  %v4619_v54 = vadd.f32 %v4618_v46, %v4426_v4  ;;  %6556 = vmatprep.subr.bf16.mxu1 %v8531_v39  ;;  %v14761_v39 = vld [vmem:[#allocation68_spill] sm:$0xff] }
 0x2df   : > { %5073 = vmatmul.mubr.bf16.gmra.mxu1 %v14755_v53  ;;  %v12589_v53 = vsel %vm5535_vm8, %v4609_v62, %v5663_v29  ;;  %v4620_v52 = vpop.f32.mrf.mxu1  ;;  %v4428_v26 = vadd.f32 %v4427_v34, %v12206_v51 }
 0x2e0   : > { %5082 = vmatprep.mubr.bf16.mxu1 %v14757_v32  ;;  %v4429_v32 = vpop.f32.mrf.mxu0  ;;  %v12600_v18 = vsel %vm5540_vm12, %v4615_v35, %v5668_v59  ;;  %v5671_v31 = vmul.f32 0.2, %v4619_v54  ;;  %vm5543_vm0 = vcmp.gt.f32.partialorder %v4619_v54, 0.0 }
 0x2e1   : > { %v4430_v29 = vadd.f32 %v4429_v32, %v12209_v41  ;;  %v4622_v62 = vpop.f32.mrf.mxu1  ;;  %v4621_v4 = vadd.f32 %v4620_v52, %v4428_v26 }
 0x2e2   : > { %v4431_v46 = vpop.f32.mrf.mxu0  ;;  %v12608_v32 = vsel %vm5543_vm0, %v4619_v54, %v5671_v31 }
 0x2e3   : > { %v4623_v34 = vadd.f32 %v4622_v62, %v4430_v29  ;;  %v4432_v41 = vadd.f32 %v4431_v46, %v12216_v21  ;;  %v4624_v17 = vpop.f32.mrf.mxu1  ;;  %vm5544_vm13 = vcmp.gt.f32.partialorder %v4621_v4, 0.0 }
 0x2e4   : > { %v4435_v59 = vpop.f32.mrf.mxu0 }
 0x2e5   : > { %4890 = vmatmul.mubr.bf16.gmra.mxu0 %v14758_v40  ;;  %vm5547_vm2 = vcmp.gt.f32.partialorder %v4623_v34, 0.0  ;;  %v5675_v14 = vmul.f32 0.2, %v4623_v34  ;;  %v4625_v35 = vadd.f32 %v4624_v17, %v4432_v41  ;;  %v4628_v52 = vpop.f32.mrf.mxu1  ;;  %v14762_v41 = vld [vmem:[#allocation33_spill] sm:$0xff]  ;;  %v14764_v17 = vld [vmem:[#allocation72_spill] sm:$0xff] }
 0x2e6   : > { %4899 = vmatprep.mubr.bf16.mxu0 %v14760_v56  ;;  %v4436_v56 = vadd.f32 %v4435_v59, %v12218_v13  ;;  %v14763_v13 = vld [vmem:[#allocation87_spill] sm:$0xff] }
 0x2e7   : > { %5083 = vmatmul.mubr.bf16.gmra.mxu1 %v14759_v63  ;;  %v5672_v63 = vmul.f32 0.2, %v4621_v4  ;;  %v12611_v26 = vsel %vm5547_vm2, %v4623_v34, %v5675_v14  ;;  %vm5548_vm14 = vcmp.gt.f32.partialorder %v4625_v35, 0.0  ;;  %v5676_v40 = vmul.f32 0.2, %v4625_v35  ;;  %v4630_v46 = vpop.f32.mrf.mxu1 }
 0x2e8   : > { %5092 = vmatprep.mubr.bf16.mxu1 %v14761_v39  ;;  %v4437_v39 = vpop.f32.mrf.mxu0  ;;  %v4629_v29 = vadd.f32 %v4628_v52, %v4436_v56  ;;  %v14765_v56 = vld [vmem:[#allocation43_spill] sm:$0xff]  ;;  %v14767_v52 = vld [vmem:[#allocation92_spill] sm:$0xff] }
 0x2e9   : > { %v4438_v62 = vadd.f32 %v4437_v39, %v12237_v12  ;;  %v12617_v31 = vsel %vm5548_vm14, %v4625_v35, %v5676_v40  ;;  %v4632_v59 = vpop.f32.mrf.mxu1  ;;  %v12623_v51 = vsel %vm5544_vm13, %v4621_v4, %v5672_v63 }
 0x2ea   : > { %v4439_v54 = vpop.f32.mrf.mxu0  ;;  %v5679_v39 = vmul.f32 0.2, %v4629_v29  ;;  %vm5551_vm15 = vcmp.gt.f32.partialorder %v4629_v29, 0.0 }
 0x2eb   : > { %v4631_v34 = vadd.f32 %v4630_v46, %v4438_v62  ;;  %v4440_v14 = vadd.f32 %v4439_v54, %v12241_v22  ;;  %v4634_v40 = vpop.f32.mrf.mxu1 }
 0x2ec   : > { %v4441_v12 = vpop.f32.mrf.mxu0 }
 0x2ed   : > { %4900 = vmatmul.mubr.bf16.gmra.mxu0 %v14762_v41  ;;  %v4633_v35 = vadd.f32 %v4632_v59, %v4440_v14  ;;  %v4442_v41 = vadd.f32 %v4441_v12, %v12243_v7  ;;  %v5680_v22 = vmul.f32 0.2, %v4631_v34  ;;  %v4638_v63 = vpop.f32.mrf.mxu1  ;;  %vm5552_vm3 = vcmp.gt.f32.partialorder %v4631_v34, 0.0  ;;  %v14766_v12 = vld [vmem:[#allocation91_spill] sm:$0xff] }
 0x2ee   : > { %4909 = vmatprep.mubr.bf16.mxu0 %v14764_v17  ;;  %v4445_v46 = vpop.f32.mrf.mxu0 }
 0x2ef   : > { %5093 = vmatmul.mubr.bf16.gmra.mxu1 %v14763_v13  ;;  %vm5555_vm1 = vcmp.gt.f32.partialorder %v4633_v35, 0.0  ;;  %v5683_v62 = vmul.f32 0.2, %v4633_v35  ;;  %v4635_v54 = vadd.f32 %v4634_v40, %v4442_v41  ;;  %v4446_v4 = vadd.f32 %v4445_v46, %v12245_v43  ;;  %v4640_v21 = vpop.f32.mrf.mxu1  ;;  %v14768_v40 = vld [vmem:[#allocation105_spill] sm:$0xff] }
 0x2f0   : > { %5102 = vmatprep.mubr.bf16.mxu1 %v14765_v56  ;;  %v12630_v13 = vsel %vm5551_vm15, %v4629_v29, %v5679_v39  ;;  %v4447_v56 = vpop.f32.mrf.mxu0  ;;  %v14769_v39 = vld [vmem:[#allocation107_spill] sm:$0xff] }
 0x2f1   : > { %v12632_v17 = vsel %vm5555_vm1, %v4633_v35, %v5683_v62  ;;  %vm5556_vm4 = vcmp.gt.f32.partialorder %v4635_v54, 0.0  ;;  %v5684_v59 = vmul.f32 0.2, %v4635_v54  ;;  %v4639_v7 = vadd.f32 %v4638_v63, %v4446_v4  ;;  %v4642_v41 = vpop.f32.mrf.mxu1 }
 0x2f2   : > { %v4448_v43 = vadd.f32 %v4447_v56, %v12266_v38  ;;  %v4449_v29 = vpop.f32.mrf.mxu0  ;;  %v12643_v62 = vsel %vm5552_vm3, %v4631_v34, %v5680_v22 }
 0x2f3   : > { %v4450_v35 = vadd.f32 %v4449_v29, %v12268_v1  ;;  %v12645_v46 = vsel %vm5556_vm4, %v4635_v54, %v5684_v59  ;;  %v5687_v4 = vmul.f32 0.2, %v4639_v7  ;;  %vm5559_vm9 = vcmp.gt.f32.partialorder %v4639_v7, 0.0  ;;  %v4644_v56 = vpop.f32.mrf.mxu1 }
 0x2f4   : > { %v4641_v63 = vadd.f32 %v4640_v21, %v4448_v43  ;;  %v14770_v43 = vld [vmem:[#allocation100_spill] sm:$0xff] }
 0x2f5   : > { %4910 = vmatmul.mubr.bf16.gmra.mxu0 %v14766_v12  ;;  %v4451_v12 = vpop.f32.mrf.mxu0  ;;  %v12650_v14 = vsel %vm5559_vm9, %v4639_v7, %v5687_v4  ;;  %v14772_v7 = vld [vmem:[#allocation77_spill] sm:$0xff] }
 0x2f6   : > { %4919 = vmatprep.mubr.bf16.mxu0 %v14768_v40  ;;  %v4643_v40 = vadd.f32 %v4642_v41, %v4450_v35  ;;  %v4452_v38 = vadd.f32 %v4451_v12, %v12288_v50  ;;  %v5688_v34 = vmul.f32 0.2, %v4641_v63  ;;  %v4648_v54 = vpop.f32.mrf.mxu1  ;;  %vm5560_vm6 = vcmp.gt.f32.partialorder %v4641_v63, 0.0  ;;  %v14771_v12 = vld [vmem:[#allocation101_spill] sm:$0xff] }
 0x2f7   : > { %5103 = vmatmul.mubr.bf16.gmra.mxu1 %v14767_v52  ;;  %v4455_v29 = vpop.f32.mrf.mxu0 }
 0x2f8   : > { %5112 = vmatprep.mubr.bf16.mxu1 %v14769_v39  ;;  %vm5563_vm5 = vcmp.gt.f32.partialorder %v4643_v40, 0.0  ;;  %v5691_v39 = vmul.f32 0.2, %v4643_v40  ;;  %v4645_v1 = vadd.f32 %v4644_v56, %v4452_v38  ;;  %v4456_v22 = vadd.f32 %v4455_v29, %v12311_v58  ;;  %v4650_v58 = vpop.f32.mrf.mxu1  ;;  %v14773_v38 = vld [vmem:[#allocation82_spill] sm:$0xff] }
 0x2f9   : > { %v4457_v35 = vpop.f32.mrf.mxu0  ;;  %v12666_v52 = vsel %vm5560_vm6, %v4641_v63, %v5688_v34  ;;  %v14774_v63 = vld [vmem:[#allocation44_spill] sm:$0xff] }
 0x2fa   : > { %v12653_v21 = vsel %vm5563_vm5, %v4643_v40, %v5691_v39  ;;  %vm5564_vm7 = vcmp.gt.f32.partialorder %v4645_v1, 0.0  ;;  %v5692_v59 = vmul.f32 0.2, %v4645_v1  ;;  %v4649_v41 = vadd.f32 %v4648_v54, %v4456_v22 }
 0x2fb   : > { %v4458_v4 = vadd.f32 %v4457_v35, %v12323_v42  ;;  %v4459_v40 = vpop.f32.mrf.mxu0 }
 0x2fc   : > { %v12662_v56 = vsel %vm5564_vm7, %v4645_v1, %v5692_v59  ;;  %v4460_v29 = vadd.f32 %v4459_v40, %v12329_v37  ;;  %vm5567_vm8 = vcmp.gt.f32.partialorder %v4649_v41, 0.0 }
 0x2fd   : > { %4920 = vmatmul.mubr.bf16.gmra.mxu0 %v14770_v43  ;;  %v4651_v39 = vadd.f32 %v4650_v58, %v4458_v4  ;;  %v4652_v43 = vpop.f32.mrf.mxu1  ;;  %v4461_v22 = vpop.f32.mrf.mxu0 }
 0x2fe   : > { %4929 = vmatprep.mubr.bf16.mxu0 %v14772_v7  ;;  %v4653_v7 = vadd.f32 %v4652_v43, %v4460_v29  ;;  %v4462_v35 = vadd.f32 %v4461_v22, %v12337_v19  ;;  %v14775_v29 = vld [vmem:[#allocation102_spill] sm:$0xff]  ;;  %v14776_v43 = vld [vmem:[#allocation119_spill] sm:$0xff] }
 0x2ff   : > { %5113 = vmatmul.mubr.bf16.gmra.mxu1 %v14771_v12  ;;  %v5695_v12 = vmul.f32 0.2, %v4649_v41  ;;  %v4654_v42 = vpop.f32.mrf.mxu1  ;;  %v4465_v59 = vpop.f32.mrf.mxu0  ;;  %v5696_v4 = vmul.f32 0.2, %v4651_v39  ;;  %vm5568_vm11 = vcmp.gt.f32.partialorder %v4651_v39, 0.0 }
 0x300   : > { %5122 = vmatprep.mubr.bf16.mxu1 %v14773_v38  ;;  %vm5571_vm10 = vcmp.gt.f32.partialorder %v4653_v7, 0.0  ;;  %v5699_v1 = vmul.f32 0.2, %v4653_v7  ;;  %v4655_v58 = vadd.f32 %v4654_v42, %v4462_v35  ;;  %v4466_v37 = vadd.f32 %v4465_v59, %v12354_v27  ;;  %v14777_v27 = vld [vmem:[#allocation59_spill] sm:$0xff] }
 0x301   : > { %v4658_v38 = vpop.f32.mrf.mxu1  ;;  %v12673_v34 = vsel %vm5567_vm8, %v4649_v41, %v5695_v12  ;;  %v4467_v19 = vpop.f32.mrf.mxu0 }
 0x302   : > { %v12675_v40 = vsel %vm5571_vm10, %v4653_v7, %v5699_v1  ;;  %vm5572_vm12 = vcmp.gt.f32.partialorder %v4655_v58, 0.0  ;;  %v5700_v42 = vmul.f32 0.2, %v4655_v58  ;;  %v4659_v35 = vadd.f32 %v4658_v38, %v4466_v37 }
 0x303   : > { %v4660_v59 = vpop.f32.mrf.mxu1  ;;  %v4468_v41 = vadd.f32 %v4467_v19, %v12362_v60  ;;  %v4469_v12 = vpop.f32.mrf.mxu0  ;;  %v8514_v60 = vld [vmem:[%s14056_s5 + $0x70] ss:$8 sps:$4 sm:$0xff]  }
 0x304   : > { %v4470_v7 = vadd.f32 %v4469_v12, %v12370_v5  ;;  %vm5575_vm0 = vcmp.gt.f32.partialorder %v4659_v35, 0.0  ;;  %v8519_v5 = vld [vmem:[%s14056_s5 + $0x64] ss:$8 sps:$4 sm:$0xff]  }
 0x305   : > { %4930 = vmatmul.mubr.bf16.gmra.mxu0 %v14774_v63  ;;  %v4662_v1 = vpop.f32.mrf.mxu1  ;;  %v12684_v63 = vsel %vm5568_vm11, %v4651_v39, %v5696_v4  ;;  %v4661_v50 = vadd.f32 %v4660_v59, %v4468_v41  ;;  %v4471_v54 = vpop.f32.mrf.mxu0  ;;  %v8529_v39 = vld [vmem:[%s14056_s5 + $0x170] ss:$8 sps:$4 sm:$0xff]  }
 0x306   : > { %5165 = vmatprep.mubr.bf16.mxu0 %v14776_v43  ;;  %v5703_v43 = vmul.f32 0.2, %v4659_v35  ;;  %v4663_v37 = vadd.f32 %v4662_v1, %v4470_v7  ;;  %v4472_v38 = vadd.f32 %v4471_v54, %v12386_v30  ;;  %v8540_v30 = vld [vmem:[%s14056_s5 + $0x164] ss:$8 sps:$4 sm:$0xff]   ;;  %v14779_v7 = vld [vmem:[#allocation111_spill] sm:$0xff] }
 0x307   : > { %5123 = vmatmul.mubr.bf16.gmra.mxu1 %v14775_v29  ;;  %v12686_v29 = vsel %vm5572_vm12, %v4655_v58, %v5700_v42  ;;  %v14778_v42 = vld [vmem:[#allocation109_spill] sm:$0xff]  ;;  %v5704_v59 = vmul.f32 0.2, %v4661_v50  ;;  %vm5576_vm13 = vcmp.gt.f32.partialorder %v4661_v50, 0.0 }
 0x308   : > { %5358 = vmatprep.mubr.bf16.mxu1 %v14777_v27  ;;  %v4664_v27 = vpop.f32.mrf.mxu1  ;;  %vm5579_vm2 = vcmp.gt.f32.partialorder %v4663_v37, 0.0  ;;  %v5707_v4 = vmul.f32 0.2, %v4663_v37  ;;  %v12704_v54 = vsel %vm5575_vm0, %v4659_v35, %v5703_v43  ;;  %v14780_v1 = vld [vmem:[#allocation93_spill] sm:$0xff] }
 0x309   : > { %v4665_v58 = vadd.f32 %v4664_v27, %v4472_v38  ;;  %v14781_v27 = vld [vmem:[#allocation95_spill] sm:$0xff]  ;;  %v8517_v35 = vld [vmem:[%s14056_s5 + $0x60] ss:$8 sps:$4 sm:$0xff]  }
 0x30a   : > { %v12709_v22 = vsel %vm5579_vm2, %v4663_v37, %v5707_v4  ;;  %v8522_v37 = vld [vmem:[%s14056_s5 + $0x54] ss:$8 sps:$4 sm:$0xff]  }
 0x30b   : > { %v4475_v19 = vpop.f32.mrf.mxu0  ;;  %vm5580_vm14 = vcmp.gt.f32.partialorder %v4665_v58, 0.0  ;;  %v5708_v38 = vmul.f32 0.2, %v4665_v58 }
 0x30c   : > { %v4476_v41 = vadd.f32 %v4475_v19, %v12397_v10  ;;  %v4668_v12 = vpop.f32.mrf.mxu1 }
 0x30d   : > { %5166 = vmatmul.mubr.bf16.vlgmr.msra.gmra.mxu0 %v14778_v42  ;;  %v4477_v42 = vpop.f32.mrf.mxu0 }
 0x30e   : > { %5175 = vmatprep.mubr.bf16.mxu0 %v14780_v1  ;;  %6364 = vmatpush1.bf16.msra.mxu0 %v8514_v60  ;;  %v4669_v43 = vadd.f32 %v4668_v12, %v4476_v41  ;;  %v4478_v19 = vadd.f32 %v4477_v42, %v12402_v48  ;;  %v8538_v60 = vld [vmem:[%s14056_s5 + $0x160] ss:$8 sps:$4 sm:$0xff]   ;;  %v8549_v1 = vld [vmem:[%s14056_s5 + $0x154] ss:$8 sps:$4 sm:$0xff]   ;;  %v12728_v41 = vsel %vm5580_vm14, %v4665_v58, %v5708_v38 }
 0x30f   : > { %5359 = vmatmul.mubr.bf16.vlgmr.msra.gmra.mxu1 %v14779_v7  ;;  %v4670_v7 = vpop.f32.mrf.mxu1  ;;  %6365 = vmatprep.subr.bf16.mxu0 %v8519_v5  ;;  %v4479_v4 = vpop.f32.mrf.mxu0 }
 0x310   : > { %5368 = vmatprep.mubr.bf16.mxu1 %v14781_v27  ;;  %6557 = vmatpush1.bf16.msra.mxu1 %v8529_v39  ;;  %v12730_v48 = vadd.f32 %v4670_v7, %v4478_v19  ;;  %v4480_v5 = vadd.f32 %v4479_v4, %v12405_v0  ;;  %v12734_v39 = vsel %vm5576_vm13, %v4661_v50, %v5704_v59  ;;  %v5711_v27 = vmul.f32 0.2, %v4669_v43  ;;  %v8525_v0 = vld [vmem:[%s14056_s5 + $0x44] ss:$8 sps:$4 sm:$0xff]   ;;  %v8547_v50 = vld [vmem:[%s14056_s5 + $0x150] ss:$8 sps:$4 sm:$0xff]  }
 0x311   : > { %6558 = vmatprep.subr.bf16.mxu1 %v8540_v30  ;;  %v4672_v12 = vpop.f32.mrf.mxu1  ;;  %v4481_v42 = vpop.f32.mrf.mxu0  ;;  %v8520_v30 = vld [vmem:[%s14056_s5 + $0x50] ss:$8 sps:$4 sm:$0xff]   ;;  %vm5583_vm15 = vcmp.gt.f32.partialorder %v4669_v43, 0.0  ;;  %v8558_v7 = vld [vmem:[%s14056_s5 + $0x144] ss:$8 sps:$4 sm:$0xff]  }
 0x312   : > { %6366 = vmatpush1.bf16.msra.mxu0 %v8517_v35  ;;  %v4673_v58 = vadd.f32 %v4672_v12, %v4480_v5  ;;  %v4482_v59 = vadd.f32 %v4481_v42, %v12412_v55  ;;  %v14782_v19 = vld [vmem:[#allocation114_spill] sm:$0xff]  ;;  %v14784_v12 = vld [vmem:[#allocation99_spill] sm:$0xff]  ;;  %v12756_v10 = vsel %vm5583_vm15, %v4669_v43, %v5711_v27  ;;  %v14785_v42 = vld [vmem:[#allocation133_spill] sm:$0xff]  ;;  %v5712_v20 = vmul.f32 0.2, %v12730_v48 }
 0x313   : > { %v4674_v38 = vpop.f32.mrf.mxu1  ;;  %6367 = vmatprep.subr.bf16.mxu0 %v8522_v37  ;;  %v8528_v43 = vld [vmem:[%s14056_s5 + $0x34] ss:$8 sps:$4 sm:$0xff]   ;;  %v8556_v27 = vld [vmem:[%s14056_s5 + $0x140] ss:$8 sps:$4 sm:$0xff]   ;;  %vm5584_vm3 = vcmp.gt.f32.partialorder %v12730_v48, 0.0 }
 0x314   : > { %6559 = vmatpush1.bf16.msra.mxu1 %v8538_v60  ;;  %v4485_v35 = vpop.f32.mrf.mxu0  ;;  %vm5587_vm1 = vcmp.gt.f32.partialorder %v4673_v58, 0.0  ;;  %v5715_v37 = vmul.f32 0.2, %v4673_v58  ;;  %v14783_v60 = vld [vmem:[#allocation116_spill] sm:$0xff]  ;;  %v4675_v55 = vadd.f32 %v4674_v38, %v4482_v59 }
 0x315   : > { %5176 = vmatmul.mubr.bf16.gmra.mxu0 %v14782_v19  ;;  %6560 = vmatprep.subr.bf16.mxu1 %v8549_v1  ;;  %v4486_v4 = vadd.f32 %v4485_v35, %v12419_v2  ;;  %v4678_v5 = vpop.f32.mrf.mxu1  ;;  %v8523_v19 = vld [vmem:[%s14056_s5 + $0x40] ss:$8 sps:$4 sm:$0xff]  }
 0x316   : > { %5185 = vmatprep.mubr.bf16.mxu0 %v14784_v12  ;;  %v4487_v1 = vpop.f32.mrf.mxu0  ;;  %6368 = vmatpush1.bf16.msra.mxu0 %v8520_v30  ;;  %v12763_v2 = vsel %vm5587_vm1, %v4673_v58, %v5715_v37  ;;  %vm5588_vm4 = vcmp.gt.f32.partialorder %v4675_v55, 0.0  ;;  %v5716_v58 = vmul.f32 0.2, %v4675_v55  ;;  %v8532_v30 = vld [vmem:[%s14056_s5 + $0x20] ss:$8 sps:$4 sm:$0xff]  }
 0x317   : > { %5369 = vmatmul.mubr.bf16.gmra.mxu1 %v14783_v60  ;;  %v4679_v35 = vadd.f32 %v4678_v5, %v4486_v4  ;;  %v4488_v60 = vadd.f32 %v4487_v1, %v12422_v44  ;;  %v4680_v12 = vpop.f32.mrf.mxu1  ;;  %6369 = vmatprep.subr.bf16.mxu0 %v8525_v0  ;;  %v8567_v44 = vld [vmem:[%s14056_s5 + $0x134] ss:$8 sps:$4 sm:$0xff]   ;;  %v8526_v5 = vld [vmem:[%s14056_s5 + $0x30] ss:$8 sps:$4 sm:$0xff]  }
 0x318   : > { %5378 = vmatprep.mubr.bf16.mxu1 %v14785_v42  ;;  %6561 = vmatpush1.bf16.msra.mxu1 %v8547_v50  ;;  %v4489_v38 = vpop.f32.mrf.mxu0  ;;  %v12784_v42 = vsel %vm5588_vm4, %v4675_v55, %v5716_v58  ;;  %v14786_v58 = vld [vmem:[#allocation62_spill] sm:$0xff] }
 0x319   : > { %6562 = vmatprep.subr.bf16.mxu1 %v8558_v7  ;;  %v12778_v0 = vadd.f32 %v4680_v12, %v4488_v60  ;;  %v4490_v50 = vadd.f32 %v4489_v38, %v12425_v24  ;;  %v4682_v59 = vpop.f32.mrf.mxu1  ;;  %v5719_v37 = vmul.f32 0.2, %v4679_v35  ;;  %vm5591_vm9 = vcmp.gt.f32.partialorder %v4679_v35, 0.0  ;;  %v8534_v60 = vld [vmem:[%s14056_s5 + $0x24] ss:$8 sps:$4 sm:$0xff]  }
 0x31a   : > { %v4491_v4 = vpop.f32.mrf.mxu0  ;;  %6370 = vmatpush1.bf16.msra.mxu0 %v8523_v19  ;;  %v8565_v24 = vld [vmem:[%s14056_s5 + $0x130] ss:$8 sps:$4 sm:$0xff]   ;;  %v12795_v19 = vsel %vm5584_vm3, %v12730_v48, %v5712_v20  ;;  %v14788_v48 = vld [vmem:[#allocation73_spill] sm:$0xff] }
 0x31b   : > { %v4683_v7 = vadd.f32 %v4682_v59, %v4490_v50  ;;  %v4684_v1 = vpop.f32.mrf.mxu1  ;;  %6371 = vmatprep.subr.bf16.mxu0 %v8528_v43  ;;  %v4492_v55 = vadd.f32 %v4491_v4, %v12429_v11  ;;  %v8576_v43 = vld [vmem:[%s14056_s5 + $0x124] ss:$8 sps:$4 sm:$0xff]   ;;  %v14787_v20 = vld [vmem:[#allocation123_spill] sm:$0xff]  ;;  %v12808_v11 = vsel %vm5591_vm9, %v4679_v35, %v5719_v37  ;;  %v8574_v37 = vld [vmem:[%s14056_s5 + $0x120] ss:$8 sps:$4 sm:$0xff]   ;;  %vm5592_vm6 = vcmp.gt.f32.partialorder %v12778_v0, 0.0 }
 0x31c   : > { %6563 = vmatpush1.bf16.msra.mxu1 %v8556_v27  ;;  %14789 = vst [vmem:[#allocation120_spill] sm:$0xff] %v12808_v11  ;;  %v14790_v4 = vld [vmem:[#allocation18_spill] sm:$0xff]  ;;  %v5720_v27 = vmul.f32 0.2, %v12778_v0 }
 0x31d   : > { %v4495_v12 = vpop.f32.mrf.mxu0  ;;  %5186 = vmatmul.mubr.bf16.gmra.mxu0 %v14786_v58  ;;  %6564 = vmatprep.subr.bf16.mxu1 %v8567_v44  ;;  %vm5595_vm5 = vcmp.gt.f32.partialorder %v4683_v7, 0.0  ;;  %v5723_v38 = vmul.f32 0.2, %v4683_v7  ;;  %v4685_v44 = vadd.f32 %v4684_v1, %v4492_v55  ;;  %v8537_v35 = vld [vmem:[%s14056_s5 + $0x14] ss:$8 sps:$4 sm:$0xff]  }
 0x31e   : > { %v4496_v50 = vadd.f32 %v4495_v12, %v12435_v8  ;;  %5195 = vmatprep.mubr.bf16.mxu0 %v14788_v48  ;;  %6372 = vmatpush1.bf16.msra.mxu0 %v8526_v5 }
 0x31f   : > { %v4688_v59 = vpop.f32.mrf.mxu1  ;;  %5379 = vmatmul.mubr.bf16.gmra.mxu1 %v14787_v20  ;;  %v4497_v58 = vpop.f32.mrf.mxu0  ;;  %v12815_v8 = vsel %vm5595_vm5, %v4683_v7, %v5723_v38  ;;  %6373 = vmatprep.subr.bf16.mxu0 %v8534_v60  ;;  %vm5596_vm7 = vcmp.gt.f32.partialorder %v4685_v44, 0.0  ;;  %v5724_v7 = vmul.f32 0.2, %v4685_v44 }
 0x320   : > { %5388 = vmatprep.mubr.bf16.mxu1 %v14790_v4  ;;  %14791 = vst [vmem:[#allocation27_spill] sm:$0xff] %v12815_v8  ;;  %v4689_v12 = vadd.f32 %v4688_v59, %v4496_v50  ;;  %v4498_v20 = vadd.f32 %v4497_v58, %v12438_v28  ;;  %6565 = vmatpush1.bf16.msra.mxu1 %v8565_v24  ;;  %v8582_v28 = vld [vmem:[%s14056_s5 + $0x114] ss:$8 sps:$4 sm:$0xff]   ;;  %v8535_v59 = vld [vmem:[%s14056_s5 + $0x10] ss:$8 sps:$4 sm:$0xff]  }
 0x321   : > { %v4690_v48 = vpop.f32.mrf.mxu1  ;;  %v4499_v1 = vpop.f32.mrf.mxu0  ;;  %6566 = vmatprep.subr.bf16.mxu1 %v8576_v43  ;;  %v12836_v4 = vsel %vm5596_vm7, %v4685_v44, %v5724_v7  ;;  %v14793_v44 = vld [vmem:[#allocation104_spill] sm:$0xff] }
 0x322   : > { %v12830_v60 = vadd.f32 %v4690_v48, %v4498_v20  ;;  %v4500_v24 = vadd.f32 %v4499_v1, %v12444_v6  ;;  %v5727_v38 = vmul.f32 0.2, %v4689_v12  ;;  %6374 = vmatpush1.bf16.msra.mxu0 %v8532_v30  ;;  %vm5599_vm8 = vcmp.gt.f32.partialorder %v4689_v12, 0.0  ;;  %v8543_v20 = vld [vmem:[%s14056_s5 + $0x4] ss:$8 sps:$4 sm:$0xff]  }
 0x323   : > { %v4692_v55 = vpop.f32.mrf.mxu1  ;;  %v4501_v50 = vpop.f32.mrf.mxu0  ;;  %6375 = vmatprep.subr.bf16.mxu0 %v8537_v35  ;;  %v8580_v6 = vld [vmem:[%s14056_s5 + $0x110] ss:$8 sps:$4 sm:$0xff]   ;;  %v12847_v30 = vsel %vm5592_vm6, %v12778_v0, %v5720_v27  ;;  %v8585_v35 = vld [vmem:[%s14056_s5 + $0x104] ss:$8 sps:$4 sm:$0xff]  }
 0x324   : > { %v4693_v43 = vadd.f32 %v4692_v55, %v4500_v24  ;;  %6567 = vmatpush1.bf16.msra.mxu1 %v8574_v37  ;;  %14792 = vst [vmem:[#allocation28_spill] sm:$0xff] %v12847_v30  ;;  %v4502_v48 = vadd.f32 %v4501_v50, %v14793_v44  ;;  %v14794_v1 = vld [vmem:[#allocation126_spill] sm:$0xff]  ;;  %v14796_v0 = vld [vmem:[#allocation127_spill] sm:$0xff]  ;;  %v14797_v27 = vld [vmem:[#allocation76_spill] sm:$0xff]  ;;  %v12860_v50 = vsel %vm5599_vm8, %v4689_v12, %v5727_v38  ;;  %v5728_v8 = vmul.f32 0.2, %v12830_v60 }
 0x325   : > { %v4694_v58 = vpop.f32.mrf.mxu1  ;;  %v4505_v7 = vpop.f32.mrf.mxu0  ;;  %5196 = vmatmul.mubr.bf16.gmra.mxu0 %v14794_v1  ;;  %6568 = vmatprep.subr.bf16.mxu1 %v8582_v28  ;;  %v14795_v55 = vld [vmem:[#allocation106_spill] sm:$0xff]  ;;  %14798 = vst [vmem:[#allocation25_spill] sm:$0xff] %v12860_v50  ;;  %v14799_v44 = vld [vmem:[#allocation143_spill] sm:$0xff]  ;;  %v8541_v37 = vld [vmem:[%s14056_s5] ss:$8 sps:$4 sm:$0xff]   ;;  %vm5600_vm11 = vcmp.gt.f32.partialorder %v12830_v60, 0.0 }
 0x326   : > { %vm5603_vm10 = vcmp.gt.f32.partialorder %v4693_v43, 0.0  ;;  %v5731_v24 = vmul.f32 0.2, %v4693_v43  ;;  %v4506_v5 = vadd.f32 %v4505_v7, %v14795_v55  ;;  %5205 = vmatprep.mubr.bf16.mxu0 %v14797_v27  ;;  %v4695_v28 = vadd.f32 %v4694_v58, %v4502_v48  ;;  %6376 = vmatpush1.bf16.msra.mxu0 %v8535_v59  ;;  %v8546_v12 = vld [vmem:[%s14056_s5 + $0xf4] ss:$8 sps:$4 sm:$0xff]  }
 0x327   : > { %v4698_v11 = vpop.f32.mrf.mxu1  ;;  %5389 = vmatmul.mubr.bf16.gmra.mxu1 %v14796_v0  ;;  %v4507_v1 = vpop.f32.mrf.mxu0  ;;  %v14801_v0 = vld [vmem:[#allocation108_spill] sm:$0xff]  ;;  %6377 = vmatprep.subr.bf16.mxu0 %v8543_v20 }
 0x328   : > { %5398 = vmatprep.mubr.bf16.mxu1 %v14799_v44  ;;  %v12867_v7 = vsel %vm5603_vm10, %v4693_v43, %v5731_v24  ;;  %v4699_v55 = vadd.f32 %v4698_v11, %v4506_v5  ;;  %v4508_v30 = vadd.f32 %v4507_v1, %v14801_v0  ;;  %6569 = vmatpush1.bf16.msra.mxu1 %v8580_v6  ;;  %v8583_v38 = vld [vmem:[%s14056_s5 + $0x100] ss:$8 sps:$4 sm:$0xff]   ;;  %vm5604_vm12 = vcmp.gt.f32.partialorder %v4695_v28, 0.0  ;;  %v8588_v43 = vld [vmem:[%s14056_s5 + $0x1f4] ss:$8 sps:$4 sm:$0xff]  }
 0x329   : > { %14800 = vst [vmem:[#allocation26_spill] sm:$0xff] %v12867_v7  ;;  %v4700_v27 = vpop.f32.mrf.mxu1  ;;  %v5732_v11 = vmul.f32 0.2, %v4695_v28  ;;  %v4509_v5 = vpop.f32.mrf.mxu0  ;;  %6570 = vmatprep.subr.bf16.mxu1 %v8585_v35  ;;  %v8544_v44 = vld [vmem:[%s14056_s5 + $0xf0] ss:$8 sps:$4 sm:$0xff]  }
 0x32a   : > { %v12882_v58 = vadd.f32 %v4700_v27, %v4508_v30  ;;  %v4510_v20 = vadd.f32 %v4509_v5, %v12461_v15  ;;  %v5735_v48 = vmul.f32 0.2, %v4699_v55  ;;  %6378 = vmatpush1.bf16.msra.mxu0 %v8541_v37  ;;  %vm5607_vm0 = vcmp.gt.f32.partialorder %v4699_v55, 0.0  ;;  %v8552_v30 = vld [vmem:[%s14056_s5 + $0xe4] ss:$8 sps:$4 sm:$0xff]  }
 0x32b   : > { %v4702_v6 = vpop.f32.mrf.mxu1  ;;  %v4511_v24 = vpop.f32.mrf.mxu0  ;;  %v12888_v1 = vsel %vm5604_vm12, %v4695_v28, %v5732_v11  ;;  %6379 = vmatprep.subr.bf16.mxu0 %v8546_v12  ;;  %v8586_v15 = vld [vmem:[%s14056_s5 + $0x1f0] ss:$8 sps:$4 sm:$0xff]   ;;  %v12899_v37 = vsel %vm5600_vm11, %v12830_v60, %v5728_v8  ;;  %v14804_v28 = vld [vmem:[#allocation112_spill] sm:$0xff] }
 0x32c   : > { %14802 = vst [vmem:[#allocation35_spill] sm:$0xff] %v12888_v1  ;;  %v4703_v35 = vadd.f32 %v4702_v6, %v4510_v20  ;;  %6571 = vmatpush1.bf16.msra.mxu1 %v8583_v38  ;;  %14803 = vst [vmem:[#allocation36_spill] sm:$0xff] %v12899_v37  ;;  %v4512_v27 = vadd.f32 %v4511_v24, %v14804_v28  ;;  %v14805_v5 = vld [vmem:[#allocation132_spill] sm:$0xff]  ;;  %v14807_v8 = vld [vmem:[#allocation135_spill] sm:$0xff]  ;;  %v12912_v24 = vsel %vm5607_vm0, %v4699_v55, %v5735_v48 }
 0x32d   : > { %v4704_v0 = vpop.f32.mrf.mxu1  ;;  %v4515_v11 = vpop.f32.mrf.mxu0  ;;  %5206 = vmatmul.mubr.bf16.gmra.mxu0 %v14805_v5  ;;  %6572 = vmatprep.subr.bf16.mxu1 %v8588_v43  ;;  %v8591_v12 = vld [vmem:[%s14056_s5 + $0x1e4] ss:$8 sps:$4 sm:$0xff]   ;;  %v14808_v60 = vld [vmem:[#allocation115_spill] sm:$0xff]  ;;  %14809 = vst [vmem:[#allocation31_spill] sm:$0xff] %v12912_v24  ;;  %v8550_v38 = vld [vmem:[%s14056_s5 + $0xe0] ss:$8 sps:$4 sm:$0xff]  }
 0x32e   : > { %vm5611_vm2 = vcmp.gt.f32.partialorder %v4703_v35, 0.0  ;;  %v5739_v20 = vmul.f32 0.2, %v4703_v35  ;;  %v14806_v6 = vld [vmem:[#allocation144_spill] sm:$0xff]  ;;  %5215 = vmatprep.mubr.bf16.mxu0 %v14808_v60  ;;  %v4705_v43 = vadd.f32 %v4704_v0, %v4512_v27  ;;  %v14810_v28 = vld [vmem:[#allocation86_spill] sm:$0xff]  ;;  %6380 = vmatpush2.bf16.msra.mxu0 %v8544_v44  ;;  %vm5608_vm13 = vcmp.gt.f32.partialorder %v12882_v58, 0.0 }
 0x32f   : > { %v4516_v59 = vadd.f32 %v4515_v11, %v14806_v6  ;;  %v4708_v50 = vpop.f32.mrf.mxu1  ;;  %5399 = vmatmul.mubr.bf16.gmra.mxu1 %v14807_v8  ;;  %v4517_v5 = vpop.f32.mrf.mxu0  ;;  %v5736_v7 = vmul.f32 0.2, %v12882_v58  ;;  %v14812_v8 = vld [vmem:[#allocation117_spill] sm:$0xff]  ;;  %6381 = vmatprep.subr.bf16.mxu0 %v8552_v30  ;;  %v8555_v55 = vld [vmem:[%s14056_s5 + $0xd4] ss:$8 sps:$4 sm:$0xff]  }
 0x330   : > { %5408 = vmatprep.mubr.bf16.mxu1 %v14810_v28  ;;  %v12919_v11 = vsel %vm5611_vm2, %v4703_v35, %v5739_v20  ;;  %v4518_v37 = vadd.f32 %v4517_v5, %v14812_v8  ;;  %6573 = vmatpush2.bf16.msra.mxu1 %v8586_v15  ;;  %v8589_v48 = vld [vmem:[%s14056_s5 + $0x1e0] ss:$8 sps:$4 sm:$0xff]   ;;  %vm5612_vm14 = vcmp.gt.f32.partialorder %v4705_v43, 0.0  ;;  %v8594_v35 = vld [vmem:[%s14056_s5 + $0x1d4] ss:$8 sps:$4 sm:$0xff]  }
 0x331   : > { %14811 = vst [vmem:[#allocation32_spill] sm:$0xff] %v12919_v11  ;;  %v4709_v6 = vadd.f32 %v4708_v50, %v4516_v59  ;;  %v4710_v60 = vpop.f32.mrf.mxu1  ;;  %v5740_v50 = vmul.f32 0.2, %v4705_v43  ;;  %v4519_v59 = vpop.f32.mrf.mxu0  ;;  %6574 = vmatprep.subr.bf16.mxu1 %v8591_v12  ;;  %v14813_v30 = vld [vmem:[#allocation118_spill] sm:$0xff] }
 0x332   : > { %v12934_v0 = vadd.f32 %v4710_v60, %v4518_v37  ;;  %v4520_v15 = vadd.f32 %v4519_v59, %v14813_v30  ;;  %6382 = vmatpush2.bf16.msra.mxu0 %v8550_v38  ;;  %v8553_v5 = vld [vmem:[%s14056_s5 + $0xd0] ss:$8 sps:$4 sm:$0xff]   ;;  %v8561_v37 = vld [vmem:[%s14056_s5 + $0xc4] ss:$8 sps:$4 sm:$0xff]   ;;  %v12951_v38 = vsel %vm5608_vm13, %v12882_v58, %v5736_v7 }
 0x333   : > { %v4712_v27 = vpop.f32.mrf.mxu1  ;;  %v5743_v20 = vmul.f32 0.2, %v4709_v6  ;;  %v4521_v28 = vpop.f32.mrf.mxu0  ;;  %v12940_v8 = vsel %vm5612_vm14, %v4705_v43, %v5740_v50  ;;  %vm5615_vm15 = vcmp.gt.f32.partialorder %v4709_v6, 0.0  ;;  %6383 = vmatprep.subr.bf16.mxu0 %v8555_v55  ;;  %v8592_v60 = vld [vmem:[%s14056_s5 + $0x1d0] ss:$8 sps:$4 sm:$0xff]   ;;  %14815 = vst [vmem:[#allocation41_spill] sm:$0xff] %v12951_v38 }
 0x334   : > { %14814 = vst [vmem:[#allocation39_spill] sm:$0xff] %v12940_v8  ;;  %v4713_v12 = vadd.f32 %v4712_v27, %v4520_v15  ;;  %6575 = vmatpush2.bf16.msra.mxu1 %v8589_v48  ;;  %v14816_v43 = vld [vmem:[#allocation78_spill] sm:$0xff]  ;;  %v14817_v30 = vld [vmem:[#allocation137_spill] sm:$0xff]  ;;  %v14818_v15 = vld [vmem:[#allocation80_spill] sm:$0xff]  ;;  %vm5616_vm3 = vcmp.gt.f32.partialorder %v12934_v0, 0.0 }
 0x335   : > { %v4714_v44 = vpop.f32.mrf.mxu1  ;;  %v4522_v50 = vadd.f32 %v4521_v28, %v14816_v43  ;;  %v4525_v59 = vpop.f32.mrf.mxu0  ;;  %5216 = vmatmul.mubr.bf16.gmra.mxu0 %v14817_v30  ;;  %6576 = vmatprep.subr.bf16.mxu1 %v8594_v35  ;;  %v14819_v11 = vld [vmem:[#allocation74_spill] sm:$0xff]  ;;  %v12961_v7 = vsel %vm5615_vm15, %v4709_v6, %v5743_v20  ;;  %v8559_v35 = vld [vmem:[%s14056_s5 + $0xc0] ss:$8 sps:$4 sm:$0xff]  }
 0x336   : > { %vm5619_vm1 = vcmp.gt.f32.partialorder %v4713_v12, 0.0  ;;  %v5747_v48 = vmul.f32 0.2, %v4713_v12  ;;  %v4526_v27 = vadd.f32 %v4525_v59, %v14818_v15  ;;  %v14820_v1 = vld [vmem:[#allocation90_spill] sm:$0xff]  ;;  %14821 = vst [vmem:[#allocation40_spill] sm:$0xff] %v12961_v7  ;;  %6384 = vmatpush2.bf16.msra.mxu0 %v8553_v5  ;;  %v14831_v7 = vld [vmem:[#allocation113_spill] sm:$0xff] }
 0x337   : > { %v4718_v24 = vpop.f32.mrf.mxu1  ;;  %5409 = vmatmul.mubr.bf16.gmra.mxu1 %v14819_v11  ;;  %5225 = vmatprep.mubr.bf16.mxu0 %v14820_v1  ;;  %v4715_v58 = vadd.f32 %v4714_v44, %v4522_v50  ;;  %v14822_v28 = vld [vmem:[#allocation94_spill] sm:$0xff]  ;;  %v4527_v43 = vpop.f32.mrf.mxu0  ;;  %v5744_v11 = vmul.f32 0.2, %v12934_v0  ;;  %v8595_v5 = vld [vmem:[%s14056_s5 + $0x1c0] ss:$8 sps:$4 sm:$0xff]  }
 0x338   : > { %5418 = vmatprep.mubr.bf16.mxu1 %v14822_v28  ;;  %v8564_v59 = vld [vmem:[%s14056_s5 + $0xb4] ss:$8 sps:$4 sm:$0xff]   ;;  %v12971_v30 = vsel %vm5619_vm1, %v4713_v12, %v5747_v48  ;;  %v4719_v1 = vadd.f32 %v4718_v24, %v4526_v27  ;;  %6385 = vmatprep.subr.bf16.mxu0 %v8561_v37  ;;  %v8597_v50 = vld [vmem:[%s14056_s5 + $0x1c4] ss:$8 sps:$4 sm:$0xff]  }
 0x339   : > { %14823 = vst [vmem:[#allocation42_spill] sm:$0xff] %v12971_v30  ;;  %v14824_v6 = vld [vmem:[#allocation146_spill] sm:$0xff]  ;;  %v4720_v44 = vpop.f32.mrf.mxu1  ;;  %6577 = vmatpush2.bf16.msra.mxu1 %v8592_v60  ;;  %vm5620_vm4 = vcmp.gt.f32.partialorder %v4715_v58, 0.0  ;;  %v5748_v24 = vmul.f32 0.2, %v4715_v58  ;;  %v4529_v48 = vpop.f32.mrf.mxu0  ;;  %v14825_v27 = vld [vmem:[#allocation148_spill] sm:$0xff] }
 0x33a   : > { %v4528_v20 = vadd.f32 %v4527_v43, %v14824_v6  ;;  %v4530_v37 = vadd.f32 %v4529_v48, %v14825_v27  ;;  %6578 = vmatprep.subr.bf16.mxu1 %v8597_v50  ;;  %v5751_v28 = vmul.f32 0.2, %v4719_v1  ;;  %6386 = vmatpush2.bf16.msra.mxu0 %v8559_v35  ;;  %v8562_v6 = vld [vmem:[%s14056_s5 + $0xb0] ss:$8 sps:$4 sm:$0xff]   ;;  %vm5623_vm9 = vcmp.gt.f32.partialorder %v4719_v1, 0.0  ;;  %v14828_v35 = vld [vmem:[#allocation124_spill] sm:$0xff] }
 0x33b   : > { %v4722_v60 = vpop.f32.mrf.mxu1  ;;  %v4531_v43 = vpop.f32.mrf.mxu0  ;;  %v12987_v55 = vsel %vm5620_vm4, %v4715_v58, %v5748_v24  ;;  %6387 = vmatprep.subr.bf16.mxu0 %v8564_v59  ;;  %v14829_v27 = vld [vmem:[#allocation140_spill] sm:$0xff]  ;;  %v14830_v24 = vld [vmem:[#allocation125_spill] sm:$0xff]  ;;  %v14836_v58 = vld [vmem:[#allocation150_spill] sm:$0xff] }
 0x33c   : > { %v4721_v15 = vadd.f32 %v4720_v44, %v4528_v20  ;;  %14826 = vst [vmem:[#allocation45_spill] sm:$0xff] %v12987_v55  ;;  %v4723_v38 = vadd.f32 %v4722_v60, %v4530_v37  ;;  %v8570_v20 = vld [vmem:[%s14056_s5 + $0xa4] ss:$8 sps:$4 sm:$0xff]   ;;  %v12995_v44 = vsel %vm5616_vm3, %v12934_v0, %v5744_v11  ;;  %v4532_v50 = vadd.f32 %v4531_v43, %v14828_v35  ;;  %v14834_v43 = vld [vmem:[#allocation131_spill] sm:$0xff] }
 0x33d   : > { %v4724_v12 = vpop.f32.mrf.mxu1  ;;  %6579 = vmatpush2.bf16.msra.mxu1 %v8595_v5  ;;  %14827 = vst [vmem:[#allocation50_spill] sm:$0xff] %v12995_v44  ;;  %v4535_v48 = vpop.f32.mrf.mxu0  ;;  %5226 = vmatmul.mubr.bf16.gmra.mxu0 %v14829_v27  ;;  %v14832_v5 = vld [vmem:[#allocation130_spill] sm:$0xff]  ;;  %v13005_v0 = vsel %vm5623_vm9, %v4719_v1, %v5751_v28  ;;  %v8568_v27 = vld [vmem:[%s14056_s5 + $0xa0] ss:$8 sps:$4 sm:$0xff]  }
 0x33e   : > { %vm5627_vm5 = vcmp.gt.f32.partialorder %v4723_v38, 0.0  ;;  %v5755_v59 = vmul.f32 0.2, %v4723_v38  ;;  %v4536_v37 = vadd.f32 %v4535_v48, %v14830_v24  ;;  %5235 = vmatprep.mubr.bf16.mxu0 %v14832_v5  ;;  %14833 = vst [vmem:[#allocation46_spill] sm:$0xff] %v13005_v0  ;;  %v4725_v11 = vadd.f32 %v4724_v12, %v4532_v50  ;;  %6388 = vmatpush2.bf16.msra.mxu0 %v8562_v6  ;;  %v8573_v48 = vld [vmem:[%s14056_s5 + $0x94] ss:$8 sps:$4 sm:$0xff]  }
 0x33f   : > { %v4728_v60 = vpop.f32.mrf.mxu1  ;;  %5419 = vmatmul.mubr.bf16.gmra.mxu1 %v14831_v7  ;;  %v4537_v35 = vpop.f32.mrf.mxu0  ;;  %v5752_v24 = vmul.f32 0.2, %v4721_v15  ;;  %6389 = vmatprep.subr.bf16.mxu0 %v8570_v20  ;;  %v8598_v12 = vld [vmem:[%s14056_s5 + $0x1b0] ss:$8 sps:$4 sm:$0xff]   ;;  %v8600_v6 = vld [vmem:[%s14056_s5 + $0x1b4] ss:$8 sps:$4 sm:$0xff]  }
 0x340   : > { %5428 = vmatprep.mubr.bf16.mxu1 %v14834_v43  ;;  %v13014_v7 = vsel %vm5627_vm5, %v4723_v38, %v5755_v59  ;;  %v4729_v5 = vadd.f32 %v4728_v60, %v4536_v37  ;;  %v4538_v1 = vadd.f32 %v4537_v35, %v14836_v58  ;;  %vm5624_vm6 = vcmp.gt.f32.partialorder %v4721_v15, 0.0  ;;  %v14837_v60 = vld [vmem:[#allocation88_spill] sm:$0xff]  ;;  %6580 = vmatprep.subr.bf16.mxu1 %v8600_v6  ;;  %v8571_v30 = vld [vmem:[%s14056_s5 + $0x90] ss:$8 sps:$4 sm:$0xff]  }
 0x341   : > { %14835 = vst [vmem:[#allocation47_spill] sm:$0xff] %v13014_v7  ;;  %v4730_v28 = vpop.f32.mrf.mxu1  ;;  %vm5628_vm7 = vcmp.gt.f32.partialorder %v4725_v11, 0.0  ;;  %v5756_v38 = vmul.f32 0.2, %v4725_v11  ;;  %v4539_v59 = vpop.f32.mrf.mxu0  ;;  %6581 = vmatpush2.bf16.msra.mxu1 %v8598_v12  ;;  %v14840_v6 = vld [vmem:[#allocation30_spill] sm:$0xff]  ;;  %v14844_v7 = vld [vmem:[#allocation103_spill] sm:$0xff] }
 0x342   : > { %v4731_v37 = vadd.f32 %v4730_v28, %v4538_v1  ;;  %v4540_v58 = vadd.f32 %v4539_v59, %v14837_v60  ;;  %v5759_v20 = vmul.f32 0.2, %v4729_v5  ;;  %6390 = vmatpush2.bf16.msra.mxu0 %v8568_v27  ;;  %vm5631_vm8 = vcmp.gt.f32.partialorder %v4729_v5, 0.0  ;;  %v8579_v1 = vld [vmem:[%s14056_s5 + $0x84] ss:$8 sps:$4 sm:$0xff]  }
 0x343   : > { %v4732_v43 = vpop.f32.mrf.mxu1  ;;  %v4541_v35 = vpop.f32.mrf.mxu0  ;;  %v13029_v44 = vsel %vm5628_vm7, %v4725_v11, %v5756_v38  ;;  %6391 = vmatprep.subr.bf16.mxu0 %v8573_v48  ;;  %v13035_v28 = vsel %vm5624_vm6, %v4721_v15, %v5752_v24  ;;  %v14841_v60 = vld [vmem:[#allocation145_spill] sm:$0xff]  ;;  %v14842_v38 = vld [vmem:[#allocation151_spill] sm:$0xff] }
 0x344   : > { %14838 = vst [vmem:[#allocation55_spill] sm:$0xff] %v13029_v44  ;;  %v4733_v50 = vadd.f32 %v4732_v43, %v4540_v58  ;;  %14839 = vst [vmem:[#allocation56_spill] sm:$0xff] %v13035_v28  ;;  %v4542_v27 = vadd.f32 %v4541_v35, %v14840_v6  ;;  %v14843_v43 = vld [vmem:[#allocation147_spill] sm:$0xff]  ;;  %v13045_v15 = vsel %vm5631_vm8, %v4729_v5, %v5759_v20  ;;  %v14846_v35 = vld [vmem:[#allocation138_spill] sm:$0xff]  ;;  %v5760_v11 = vmul.f32 0.2, %v4731_v37 }
 0x345   : > { %v4734_v0 = vpop.f32.mrf.mxu1  ;;  %v4545_v59 = vpop.f32.mrf.mxu0  ;;  %5236 = vmatmul.mubr.bf16.gmra.mxu0 %v14841_v60  ;;  %14845 = vst [vmem:[#allocation20_spill] sm:$0xff] %v13045_v15  ;;  %v8577_v60 = vld [vmem:[%s14056_s5 + $0x80] ss:$8 sps:$4 sm:$0xff]   ;;  %vm5632_vm11 = vcmp.gt.f32.partialorder %v4731_v37, 0.0 }
 0x346   : > { %vm5635_vm10 = vcmp.gt.f32.partialorder %v4733_v50, 0.0  ;;  %v5763_v12 = vmul.f32 0.2, %v4733_v50  ;;  %v4546_v58 = vadd.f32 %v4545_v59, %v14842_v38  ;;  %5245 = vmatprep.mubr.bf16.mxu0 %v14844_v7  ;;  %v4735_v24 = vadd.f32 %v4734_v0, %v4542_v27  ;;  %6392 = vmatpush2.bf16.msra.mxu0 %v8571_v30  ;;  %v8601_v0 = vld [vmem:[%s14056_s5 + $0x1a0] ss:$8 sps:$4 sm:$0xff]  }
 0x347   : > { %v4738_v48 = vpop.f32.mrf.mxu1  ;;  %5429 = vmatmul.mubr.bf16.gmra.mxu1 %v14843_v43  ;;  %v4547_v6 = vpop.f32.mrf.mxu0  ;;  %6393 = vmatprep.subr.bf16.mxu0 %v8579_v1  ;;  %v8603_v30 = vld [vmem:[%s14056_s5 + $0x1a4] ss:$8 sps:$4 sm:$0xff]  }
 0x348   : > { %5438 = vmatprep.mubr.bf16.mxu1 %v14846_v35  ;;  %v13051_v28 = vsel %vm5635_vm10, %v4733_v50, %v5763_v12  ;;  %v4739_v59 = vadd.f32 %v4738_v48, %v4546_v58  ;;  %v4548_v38 = vadd.f32 %v4547_v6, %v12522_v61  ;;  %vm5636_vm12 = vcmp.gt.f32.partialorder %v4735_v24, 0.0  ;;  %v8739_v1 = vld [vmem:[#allocation6] sm:$0xf]  ;;  %v14848_v12 = vld [vmem:[#allocation13_spill] sm:$0xff]  ;;  %6582 = vmatprep.subr.bf16.mxu1 %v8603_v30 }
 0x349   : > { %14847 = vst [vmem:[#allocation53_spill] sm:$0xff] %v13051_v28  ;;  %v4740_v43 = vpop.f32.mrf.mxu1  ;;  %v5764_v5 = vmul.f32 0.2, %v4735_v24  ;;  %v4549_v50 = vpop.f32.mrf.mxu0  ;;  %v14849_v58 = vsub.s32 2, %v14848_v12  ;;  %6583 = vmatpush2.bf16.msra.mxu1 %v8601_v0  ;;  %v14854_v30 = vld [vmem:[#allocation121_spill] sm:$0xff] }
 0x34a   : > { %v4741_v20 = vadd.f32 %v4740_v43, %v4548_v38  ;;  %v4550_v61 = vadd.f32 %v4549_v50, %v12525_v16  ;;  %v5767_v35 = vmul.f32 0.2, %v4739_v59  ;;  %6394 = vmatpush2.bf16.msra.mxu0 %v8577_v60  ;;  %vm5639_vm0 = vcmp.gt.f32.partialorder %v4739_v59, 0.0  ;;  %v14853_v50 = vld [vmem:[#allocation81_spill] sm:$0xff] }
 0x34b   : > { %v4742_v27 = vpop.f32.mrf.mxu1  ;;  %v13065_v48 = vrot.slane %v8739_v1, %v14849_v58  ;;  %v4551_v6 = vpop.f32.mrf.mxu0  ;;  %v13067_v44 = vsel %vm5636_vm12, %v4735_v24, %v5764_v5  ;;  %v14851_v38 = vsub.s32 3, %v14848_v12  ;;  %v13074_v16 = vsel %vm5632_vm11, %v4731_v37, %v5760_v11  ;;  %v14858_v12 = vld [vmem:[#allocation163_spill] sm:$0xff] }
 0x34c   : > { %14850 = vst [vmem:[#allocation58_spill] sm:$0xff] %v13067_v44  ;;  %v4743_v7 = vadd.f32 %v4742_v27, %v4550_v61  ;;  %14852 = vst [vmem:[#allocation29_spill] sm:$0xff] %v13074_v16  ;;  %v4552_v58 = vadd.f32 %v4551_v6, %v14853_v50  ;;  %v14855_v61 = vld [vmem:[#allocation152_spill] sm:$0xff]  ;;  %v14856_v27 = vld [vmem:[#allocation139_spill] sm:$0xff]  ;;  %v5768_v37 = vmul.f32 0.2, %v4741_v20 }
 0x34d   : > { %v4744_v15 = vpop.f32.mrf.mxu1  ;;  %v13071_v43 = vrot.slane %v8739_v1, %v14851_v38  ;;  %v4781_v28 = vpop.f32.mrf.mxu0  ;;  %5246 = vmatmul.mubr.bf16.gmra.mxu0 %v14854_v30  ;;  %v13083_v1 = vsel %vm5639_vm0, %v4739_v59, %v5767_v35  ;;  %vm5640_vm13 = vcmp.gt.f32.partialorder %v4741_v20, 0.0 }
 0x34e   : > { %vm5643_vm2 = vcmp.gt.f32.partialorder %v4743_v7, 0.0  ;;  %v5771_v24 = vmul.f32 0.2, %v4743_v7  ;;  %v4782_v0 = vadd.f32 %v4781_v28, %v13065_v48  ;;  %5255 = vmatprep.mubr.bf16.mxu0 %v14856_v27  ;;  %14857 = vst [vmem:[#allocation22_spill] sm:$0xff] %v13083_v1  ;;  %v4745_v11 = vadd.f32 %v4744_v15, %v4552_v58 }
 0x34f   : > { %v4974_v5 = vpop.f32.mrf.mxu1  ;;  %5439 = vmatmul.mubr.bf16.gmra.mxu1 %v14855_v61  ;;  %v4783_v6 = vpop.f32.mrf.mxu0  ;;  %v13096_v60 = vsel %vm5640_vm13, %v4741_v20, %v5768_v37  ;;  %v14862_v37 = vld [vmem:[#allocation64_spill] sm:$0xff] }
 0x350   : > { %5448 = vmatprep.mubr.bf16.mxu1 %v14858_v12  ;;  %v13086_v38 = vsel %vm5643_vm2, %v4743_v7, %v5771_v24  ;;  %v13088_v50 = vadd.f32 %v4974_v5, %v4782_v0  ;;  %v4784_v30 = vadd.f32 %v4783_v6, %v13071_v43  ;;  %vm5644_vm14 = vcmp.gt.f32.partialorder %v4745_v11, 0.0  ;;  %14860 = vst [vmem:[#allocation34_spill] sm:$0xff] %v13096_v60  ;;  %v8604_v6 = vld [vmem:[%s14056_s5 + $0x190] ss:$8 sps:$4 sm:$0xff]  }
 0x351   : > { %14859 = vst [vmem:[#allocation57_spill] sm:$0xff] %v13086_v38  ;;  %v4976_v28 = vpop.f32.mrf.mxu1  ;;  %v5772_v27 = vmul.f32 0.2, %v4745_v11  ;;  %v4785_v59 = vpop.f32.mrf.mxu0 }
 0x352   : > { %v13093_v35 = vadd.f32 %v4976_v28, %v4784_v30  ;;  %v4786_v15 = vadd.f32 %v4785_v59, %v13065_v48  ;;  %v8606_v30 = vld [vmem:[%s14056_s5 + $0x194] ss:$8 sps:$4 sm:$0xff]  }
 0x353   : > { %v4978_v58 = vpop.f32.mrf.mxu1  ;;  %v4787_v12 = vpop.f32.mrf.mxu0  ;;  %v13098_v7 = vsel %vm5644_vm14, %v4745_v11, %v5772_v27  ;;  %6584 = vmatprep.subr.bf16.mxu1 %v8606_v30  ;;  %v8607_v30 = vld [vmem:[%s14056_s5 + $0x180] ss:$8 sps:$4 sm:$0xff]  }
 0x354   : > { %14861 = vst [vmem:[#allocation63_spill] sm:$0xff] %v13098_v7  ;;  %v13100_v24 = vadd.f32 %v4978_v58, %v4786_v15  ;;  %v4788_v0 = vadd.f32 %v4787_v12, %v13071_v43  ;;  %v14863_v15 = vld [vmem:[#allocation128_spill] sm:$0xff]  ;;  %v14864_v58 = vld [vmem:[#allocation122_spill] sm:$0xff]  ;;  %v14865_v12 = vld [vmem:[#allocation153_spill] sm:$0xff]  ;;  %6585 = vmatpush2.bf16.msra.mxu1 %v8604_v6 }
 0x355   : > { %v4980_v5 = vpop.f32.mrf.mxu1  ;;  %v4791_v20 = vpop.f32.mrf.mxu0  ;;  %5256 = vmatmul.mubr.bf16.gmra.mxu0 %v14862_v37 }
 0x356   : > { %v13112_v11 = vadd.f32 %v4980_v5, %v4788_v0  ;;  %v4792_v27 = vadd.f32 %v4791_v20, %v13065_v48  ;;  %5265 = vmatprep.mubr.bf16.mxu0 %v14864_v58 }
 0x357   : > { %v4984_v59 = vpop.f32.mrf.mxu1  ;;  %5449 = vmatmul.mubr.bf16.gmra.mxu1 %v14863_v15  ;;  %v4793_v61 = vpop.f32.mrf.mxu0 }
 0x358   : > { %5458 = vmatprep.mubr.bf16.mxu1 %v14865_v12  ;;  %v13118_v1 = vadd.f32 %v4984_v59, %v4792_v27  ;;  %v4794_v28 = vadd.f32 %v4793_v61, %v13071_v43  ;;  %v8609_v61 = vld [vmem:[%s14056_s5 + $0x184] ss:$8 sps:$4 sm:$0xff]  }
 0x359   : > { %v4986_v38 = vpop.f32.mrf.mxu1  ;;  %v4795_v37 = vpop.f32.mrf.mxu0  ;;  %6586 = vmatprep.subr.bf16.mxu1 %v8609_v61  ;;  %v14872_v61 = vld [vmem:[#allocation110_spill] sm:$0xff] }
 0x35a   : > { %v13121_v0 = vadd.f32 %v4986_v38, %v4794_v28  ;;  %v4796_v5 = vadd.f32 %v4795_v37, %v13065_v48  ;;  %v14866_v38 = vld [vmem:[#allocation136_spill] sm:$0xff]  ;;  %6587 = vmatpush2.bf16.msra.mxu1 %v8607_v30 }
 0x35b   : > { %v4988_v20 = vpop.f32.mrf.mxu1  ;;  %v4797_v60 = vpop.f32.mrf.mxu0  ;;  %v14867_v37 = vld [vmem:[#allocation160_spill] sm:$0xff] }
 0x35c   : > { %v13124_v15 = vadd.f32 %v4988_v20, %v4796_v5  ;;  %v4798_v58 = vadd.f32 %v4797_v60, %v13071_v43  ;;  %v14868_v60 = vld [vmem:[#allocation98_spill] sm:$0xff] }
 0x35d   : > { %v4990_v12 = vpop.f32.mrf.mxu1  ;;  %v4801_v6 = vpop.f32.mrf.mxu0  ;;  %5266 = vmatmul.mubr.bf16.gmra.mxu0 %v14866_v38  ;;  %v14869_v5 = vld [vmem:[#allocation154_spill] sm:$0xff] }
 0x35e   : > { %v13134_v28 = vadd.f32 %v4990_v12, %v4798_v58  ;;  %v4802_v27 = vadd.f32 %v4801_v6, %v13065_v48  ;;  %5275 = vmatprep.mubr.bf16.mxu0 %v14868_v60 }
 0x35f   : > { %v4994_v59 = vpop.f32.mrf.mxu1  ;;  %5459 = vmatmul.mubr.bf16.gmra.mxu1 %v14867_v37  ;;  %v4803_v20 = vpop.f32.mrf.mxu0 }
 0x360   : > { %5468 = vmatprep.mubr.bf16.mxu1 %v14869_v5  ;;  %v13140_v7 = vadd.f32 %v4994_v59, %v4802_v27  ;;  %v4804_v16 = vadd.f32 %v4803_v20, %v13071_v43  ;;  %v14874_v20 = vld [vmem:[#allocation23_spill] sm:$0xff] }
 0x361   : > { %v4996_v44 = vpop.f32.mrf.mxu1  ;;  %v4805_v38 = vpop.f32.mrf.mxu0 }
 0x362   : > { %v13143_v58 = vadd.f32 %v4996_v44, %v4804_v16  ;;  %v4806_v12 = vadd.f32 %v4805_v38, %v13065_v48  ;;  %v14875_v44 = vld [vmem:[#allocation129_spill] sm:$0xff]  ;;  %v14876_v16 = vld [vmem:[#allocation155_spill] sm:$0xff] }
 0x363   : > { %v4998_v6 = vpop.f32.mrf.mxu1  ;;  %v4807_v55 = vpop.f32.mrf.mxu0 }
 0x364   : > { %14870 = vst [vmem:[#allocation60_spill] sm:$0xff] %v13143_v58  ;;  %v13146_v37 = vadd.f32 %v4998_v6, %v4806_v12  ;;  %v4808_v60 = vadd.f32 %v4807_v55, %v13071_v43 }
 0x365   : > { %v5000_v5 = vpop.f32.mrf.mxu1  ;;  %v4811_v8 = vpop.f32.mrf.mxu0  ;;  %5276 = vmatmul.mubr.bf16.gmra.mxu0 %v14872_v61 }
 0x366   : > { %14871 = vst [vmem:[#allocation61_spill] sm:$0xff] %v13146_v37  ;;  %v13150_v27 = vadd.f32 %v5000_v5, %v4808_v60  ;;  %v4812_v59 = vadd.f32 %v4811_v8, %v13065_v48  ;;  %5285 = vmatprep.mubr.bf16.mxu0 %v14875_v44 }
 0x367   : > { %v5004_v30 = vpop.f32.mrf.mxu1  ;;  %5469 = vmatmul.mubr.bf16.gmra.mxu1 %v14874_v20  ;;  %v4813_v38 = vpop.f32.mrf.mxu0 }
 0x368   : > { %14873 = vst [vmem:[#allocation67_spill] sm:$0xff] %v13150_v27  ;;  %5478 = vmatprep.mubr.bf16.mxu1 %v14876_v16  ;;  %v13156_v12 = vadd.f32 %v5004_v30, %v4812_v59  ;;  %v4814_v55 = vadd.f32 %v4813_v38, %v13071_v43  ;;  %v14880_v16 = vld [vmem:[#allocation161_spill] sm:$0xff] }
 0x369   : > { %v5006_v6 = vpop.f32.mrf.mxu1  ;;  %v4815_v37 = vpop.f32.mrf.mxu0 }
 0x36a   : > { %14877 = vst [vmem:[#allocation71_spill] sm:$0xff] %v13156_v12  ;;  %v13159_v58 = vadd.f32 %v5006_v6, %v4814_v55  ;;  %v4816_v60 = vadd.f32 %v4815_v37, %v13065_v48  ;;  %v14881_v12 = vld [vmem:[#allocation162_spill] sm:$0xff]  ;;  %v14882_v55 = vld [vmem:[#allocation159_spill] sm:$0xff]  ;;  %v14883_v37 = vld [vmem:[#allocation141_spill] sm:$0xff] }
 0x36b   : > { %v5008_v5 = vpop.f32.mrf.mxu1  ;;  %v4817_v8 = vpop.f32.mrf.mxu0 }
 0x36c   : > { %14878 = vst [vmem:[#allocation38_spill] sm:$0xff] %v13159_v58  ;;  %v13162_v61 = vadd.f32 %v5008_v5, %v4816_v60  ;;  %v4818_v20 = vadd.f32 %v4817_v8, %v13071_v43 }
 0x36d   : > { %v5010_v44 = vpop.f32.mrf.mxu1  ;;  %v4821_v27 = vpop.f32.mrf.mxu0  ;;  %5286 = vmatmul.mubr.bf16.gmra.mxu0 %v14880_v16 }
 0x36e   : > { %14879 = vst [vmem:[#allocation65_spill] sm:$0xff] %v13162_v61  ;;  %v13166_v59 = vadd.f32 %v5010_v44, %v4818_v20  ;;  %v4822_v30 = vadd.f32 %v4821_v27, %v13065_v48  ;;  %5295 = vmatprep.mubr.bf16.mxu0 %v14882_v55 }
 0x36f   : > { %v5014_v38 = vpop.f32.mrf.mxu1  ;;  %5479 = vmatmul.mubr.bf16.gmra.mxu1 %v14881_v12  ;;  %v4823_v6 = vpop.f32.mrf.mxu0 }
 0x370   : > { %5488 = vmatprep.mubr.bf16.mxu1 %v14883_v37  ;;  %v13172_v60 = vadd.f32 %v5014_v38, %v4822_v30  ;;  %v4824_v5 = vadd.f32 %v4823_v6, %v13071_v43  ;;  %v14889_v37 = vld [vmem:[#allocation156_spill] sm:$0xff]  ;;  %v14890_v6 = vld [vmem:[#allocation157_spill] sm:$0xff] }
 0x371   : > { %v5016_v8 = vpop.f32.mrf.mxu1  ;;  %v4825_v61 = vpop.f32.mrf.mxu0 }
 0x372   : > { %14884 = vst [vmem:[#allocation16_spill] sm:$0xff] %v13172_v60  ;;  %v13175_v58 = vadd.f32 %v5016_v8, %v4824_v5  ;;  %v4826_v20 = vadd.f32 %v4825_v61, %v13065_v48  ;;  %v14891_v60 = vld [vmem:[#allocation21_spill] sm:$0xff]  ;;  %v14892_v5 = vld [vmem:[#allocation158_spill] sm:$0xff] }
 0x373   : > { %v5018_v44 = vpop.f32.mrf.mxu1  ;;  %v13178_v27 = vpop.f32.mrf.mxu0 }
 0x374   : > { %14885 = vst [vmem:[#allocation75_spill] sm:$0xff] %v13175_v58  ;;  %14886 = vst [vmem:[#allocation66_spill] sm:$0xff] %v13178_v27  ;;  %v13180_v16 = vadd.f32 %v5018_v44, %v4826_v20 }
 0x375   : > { %v13182_v12 = vpop.f32.mrf.mxu1  ;;  %v4831_v55 = vpop.f32.mrf.mxu0  ;;  %5296 = vmatmul.mubr.bf16.gmra.mxu0 %v14889_v37 }
 0x376   : > { %14887 = vst [vmem:[#allocation70_spill] sm:$0xff] %v13180_v16  ;;  %14888 = vst [vmem:[#allocation24_spill] sm:$0xff] %v13182_v12  ;;  %v4832_v30 = vadd.f32 %v4831_v55, %v13065_v48  ;;  %5305 = vmatprep.mubr.bf16.mxu0 %v14891_v60 }
 0x377   : > { %v5024_v38 = vpop.f32.mrf.mxu1  ;;  %5489 = vmatmul.mubr.bf16.gmra.mxu1 %v14890_v6  ;;  %v4833_v61 = vpop.f32.mrf.mxu0 }
 0x378   : > { %5498 = vmatprep.mubr.bf16.mxu1 %v14892_v5  ;;  %v13189_v8 = vadd.f32 %v5024_v38, %v4832_v30  ;;  %v4834_v20 = vadd.f32 %v4833_v61, %v13071_v43  ;;  %v14898_v5 = vld [vmem:[#allocation69_spill] sm:$0xff] }
 0x379   : > { %v5026_v44 = vpop.f32.mrf.mxu1  ;;  %v4835_v16 = vpop.f32.mrf.mxu0  ;;  %v14899_v61 = vld [vmem:[#allocation149_spill] sm:$0xff] }
 0x37a   : > { %14893 = vst [vmem:[#allocation54_spill] sm:$0xff] %v13189_v8  ;;  %v13192_v12 = vadd.f32 %v5026_v44, %v4834_v20  ;;  %v4836_v37 = vadd.f32 %v4835_v16, %v13065_v48  ;;  %v14900_v8 = vld [vmem:[#allocation142_spill] sm:$0xff]  ;;  %v14901_v20 = vld [vmem:[#allocation48_spill] sm:$0xff] }
 0x37b   : > { %v5028_v58 = vpop.f32.mrf.mxu1  ;;  %v13195_v55 = vpop.f32.mrf.mxu0 }
 0x37c   : > { %14894 = vst [vmem:[#allocation49_spill] sm:$0xff] %v13192_v12  ;;  %14895 = vst [vmem:[#allocation51_spill] sm:$0xff] %v13195_v55  ;;  %v13197_v27 = vadd.f32 %v5028_v58, %v4836_v37 }
 0x37d   : > { %v13199_v6 = vpop.f32.mrf.mxu1  ;;  %v4841_v60 = vpop.f32.mrf.mxu0  ;;  %5306 = vmatmul.mubr.bf16.gmra.mxu0 %v14898_v5 }
 0x37e   : > { %14896 = vst [vmem:[#allocation83_spill] sm:$0xff] %v13197_v27  ;;  %14897 = vst [vmem:[#allocation84_spill] sm:$0xff] %v13199_v6  ;;  %v4842_v30 = vadd.f32 %v4841_v60, %v13065_v48  ;;  %5315 = vmatprep.mubr.bf16.mxu0 %v14900_v8 }
 0x37f   : > { %v5034_v38 = vpop.f32.mrf.mxu1  ;;  %5499 = vmatmul.mubr.bf16.gmra.mxu1 %v14899_v61  ;;  %v4843_v16 = vpop.f32.mrf.mxu0 }
 0x380   : > { %5508 = vmatprep.mubr.bf16.mxu1 %v14901_v20  ;;  %v13206_v44 = vadd.f32 %v5034_v38, %v4842_v30  ;;  %v4844_v58 = vadd.f32 %v4843_v16, %v13071_v43  ;;  %v14906_v20 = vld [vmem:[#allocation19_spill] sm:$0xff]  ;;  %v14907_v16 = vld [vmem:[#allocation134_spill] sm:$0xff] }
 0x381   : > { %v5036_v37 = vpop.f32.mrf.mxu1  ;;  %v4845_v27 = vpop.f32.mrf.mxu0 }
 0x382   : > { %v13209_v6 = vadd.f32 %v5036_v37, %v4844_v58  ;;  %v4846_v5 = vadd.f32 %v4845_v27, %v13065_v48  ;;  %v14908_v58 = vpack.c.bf16 %v12556_v47, %v12554_v45  ;;  %v14910_v47 = vpack.c.bf16 %v12545_v49, %v12543_v33 }
 0x383   : > { %v5038_v12 = vpop.f32.mrf.mxu1  ;;  %v13212_v60 = vpop.f32.mrf.mxu0 }
 0x384   : > { %14902 = vst [vmem:[#allocation96_spill] sm:$0xff] %v13209_v6  ;;  %14903 = vst [vmem:[#allocation52_spill] sm:$0xff] %v13212_v60  ;;  %v13214_v55 = vadd.f32 %v5038_v12, %v4846_v5 }
 0x385   : > { %v13216_v61 = vpop.f32.mrf.mxu1  ;;  %v4851_v8 = vpop.f32.mrf.mxu0  ;;  %5316 = vmatmul.mubr.bf16.gmra.mxu0 %v14906_v20 }
 0x386   : > { %14904 = vst [vmem:[#allocation17_spill] sm:$0xff] %v13214_v55  ;;  %14905 = vst [vmem:[#allocation37_spill] sm:$0xff] %v13216_v61  ;;  %v4852_v30 = vadd.f32 %v4851_v8, %v13065_v48  ;;  %6395 = vmatprep.mubr.bf16.mxu0 %v14908_v58  ;;  %v14911_v58 = vpack.c.bf16 %v12573_v36, %v12576_v23  ;;  %v14913_v23 = vpack.c.bf16 %v12568_v3, %v12565_v9 }
 0x387   : > { %v5044_v38 = vpop.f32.mrf.mxu1  ;;  %5509 = vmatmul.mubr.bf16.gmra.mxu1 %v14907_v16  ;;  %v4853_v27 = vpop.f32.mrf.mxu0 }
 0x388   : > { %v13224_v37 = vadd.f32 %v5044_v38, %v4852_v30  ;;  %v4854_v12 = vadd.f32 %v4853_v27, %v13071_v43 }
 0x389   : > { %v5046_v5 = vpop.f32.mrf.mxu1  ;;  %v4855_v55 = vpop.f32.mrf.mxu0 }
 0x38a   : > { %v13227_v61 = vadd.f32 %v5046_v5, %v4854_v12  ;;  %v4856_v20 = vadd.f32 %v4855_v55, %v13065_v48 }
 0x38b   : > { %v5048_v6 = vpop.f32.mrf.mxu1  ;;  %v13230_v8 = vpop.f32.mrf.mxu0 }
 0x38c   : > { %v13232_v60 = vadd.f32 %v5048_v6, %v4856_v20 }
 0x38d   : > { %v13234_v16 = vpop.f32.mrf.mxu1  ;;  %v4861_v45 = vpop.f32.mrf.mxu0  ;;  %6396 = vmatmul.mubr.bf16.vlgmr.msra.gmra.mxu0 %v14910_v47 }
 0x38e   : > { %14909 = vst [vmem:[#allocation89_spill] sm:$0xff] %v13234_v16  ;;  %v4862_v30 = vadd.f32 %v4861_v45, %v13065_v48  ;;  %6405 = vmatprep.mubr.bf16.mxu0 %v14911_v58  ;;  %v14914_v58 = vpack.c.bf16 %v12600_v18, %v12598_v57  ;;  %v14916_v18 = vpack.c.bf16 %v12591_v25, %v12589_v53 }
 0x38f   : > { %v5054_v38 = vpop.f32.mrf.mxu1  ;;  %v4863_v55 = vpop.f32.mrf.mxu0 }
 0x390   : > { %v13243_v27 = vadd.f32 %v5054_v38, %v4862_v30  ;;  %v4864_v6 = vadd.f32 %v4863_v55, %v13071_v43 }
 0x391   : > { %v5056_v12 = vpop.f32.mrf.mxu1  ;;  %v4865_v5 = vpop.f32.mrf.mxu0 }
 0x392   : > { %v13246_v20 = vadd.f32 %v5056_v12, %v4864_v6  ;;  %v4866_v16 = vadd.f32 %v4865_v5, %v13065_v48 }
 0x393   : > { %v5058_v33 = vpop.f32.mrf.mxu1  ;;  %v13249_v49 = vpop.f32.mrf.mxu0 }
 0x394   : > { %v13251_v45 = vadd.f32 %v5058_v33, %v4866_v16 }
 0x395   : > { %v13253_v47 = vpop.f32.mrf.mxu1  ;;  %v4871_v36 = vpop.f32.mrf.mxu0  ;;  %6406 = vmatmul.mubr.bf16.gmra.mxu0 %v14913_v23 }
 0x396   : > { %14912 = vst [vmem:[#allocation79_spill] sm:$0xff] %v13253_v47  ;;  %v4872_v30 = vadd.f32 %v4871_v36, %v13065_v48  ;;  %6415 = vmatprep.mubr.bf16.mxu0 %v14914_v58  ;;  %v14917_v58 = vpack.c.bf16 %v12617_v31, %v12623_v51  ;;  %v14919_v31 = vpack.c.bf16 %v12611_v26, %v12608_v32 }
 0x397   : > { %v5064_v38 = vpop.f32.mrf.mxu1  ;;  %v4873_v55 = vpop.f32.mrf.mxu0 }
 0x398   : > { %v13262_v6 = vadd.f32 %v5064_v38, %v4872_v30  ;;  %v4874_v16 = vadd.f32 %v4873_v55, %v13071_v43 }
 0x399   : > { %v5066_v12 = vpop.f32.mrf.mxu1  ;;  %v4875_v5 = vpop.f32.mrf.mxu0 }
 0x39a   : > { %v13265_v33 = vadd.f32 %v5066_v12, %v4874_v16  ;;  %v4876_v47 = vadd.f32 %v4875_v5, %v13065_v48 }
 0x39b   : > { %v5068_v9 = vpop.f32.mrf.mxu1  ;;  %v13268_v3 = vpop.f32.mrf.mxu0 }
 0x39c   : > { %v13270_v36 = vadd.f32 %v5068_v9, %v4876_v47 }
 0x39d   : > { %v13272_v23 = vpop.f32.mrf.mxu1  ;;  %v4881_v57 = vpop.f32.mrf.mxu0  ;;  %6416 = vmatmul.mubr.bf16.gmra.mxu0 %v14916_v18 }
 0x39e   : > { %14915 = vst [vmem:[#allocation85_spill] sm:$0xff] %v13272_v23  ;;  %v4882_v30 = vadd.f32 %v4881_v57, %v13065_v48  ;;  %6425 = vmatprep.mubr.bf16.mxu0 %v14917_v58  ;;  %v14920_v58 = vpack.c.bf16 %v12645_v46, %v12643_v62  ;;  %v14922_v46 = vpack.c.bf16 %v12632_v17, %v12630_v13 }
 0x39f   : > { %v5074_v38 = vpop.f32.mrf.mxu1  ;;  %v4883_v55 = vpop.f32.mrf.mxu0 }
 0x3a0   : > { %v13281_v16 = vadd.f32 %v5074_v38, %v4882_v30  ;;  %v4884_v47 = vadd.f32 %v4883_v55, %v13071_v43 }
 0x3a1   : > { %v5076_v12 = vpop.f32.mrf.mxu1  ;;  %v4885_v5 = vpop.f32.mrf.mxu0 }
 0x3a2   : > { %v13284_v9 = vadd.f32 %v5076_v12, %v4884_v47  ;;  %v4886_v23 = vadd.f32 %v4885_v5, %v13065_v48 }
 0x3a3   : > { %v5078_v53 = vpop.f32.mrf.mxu1  ;;  %v13287_v25 = vpop.f32.mrf.mxu0 }
 0x3a4   : > { %v13289_v57 = vadd.f32 %v5078_v53, %v4886_v23 }
 0x3a5   : > { %v13291_v18 = vpop.f32.mrf.mxu1  ;;  %v4891_v51 = vpop.f32.mrf.mxu0  ;;  %6426 = vmatmul.mubr.bf16.gmra.mxu0 %v14919_v31 }
 0x3a6   : > { %14918 = vst [vmem:[#allocation97_spill] sm:$0xff] %v13291_v18  ;;  %v4892_v30 = vadd.f32 %v4891_v51, %v13065_v48  ;;  %6435 = vmatprep.mubr.bf16.mxu0 %v14920_v58  ;;  %v14923_v58 = vpack.c.bf16 %v12662_v56, %v12666_v52  ;;  %v14925_v56 = vpack.c.bf16 %v12653_v21, %v12650_v14 }
 0x3a7   : > { %v5084_v38 = vpop.f32.mrf.mxu1  ;;  %v4893_v55 = vpop.f32.mrf.mxu0 }
 0x3a8   : > { %v13300_v47 = vadd.f32 %v5084_v38, %v4892_v30  ;;  %v4894_v23 = vadd.f32 %v4893_v55, %v13071_v43 }
 0x3a9   : > { %v5086_v12 = vpop.f32.mrf.mxu1  ;;  %v4895_v5 = vpop.f32.mrf.mxu0 }
 0x3aa   : > { %v13303_v53 = vadd.f32 %v5086_v12, %v4894_v23  ;;  %v4896_v18 = vadd.f32 %v4895_v5, %v13065_v48 }
 0x3ab   : > { %v5088_v32 = vpop.f32.mrf.mxu1  ;;  %v13306_v26 = vpop.f32.mrf.mxu0 }
 0x3ac   : > { %v13308_v51 = vadd.f32 %v5088_v32, %v4896_v18 }
 0x3ad   : > { %v13310_v31 = vpop.f32.mrf.mxu1  ;;  %v4901_v62 = vpop.f32.mrf.mxu0  ;;  %6436 = vmatmul.mubr.bf16.gmra.mxu0 %v14922_v46 }
 0x3ae   : > { %14921 = vst [vmem:[#allocation68_spill] sm:$0xff] %v13310_v31  ;;  %v4902_v30 = vadd.f32 %v4901_v62, %v13065_v48  ;;  %6445 = vmatprep.mubr.bf16.mxu0 %v14923_v58  ;;  %v14926_v58 = vpack.c.bf16 %v12686_v29, %v12684_v63  ;;  %v14928_v29 = vpack.c.bf16 %v12675_v40, %v12673_v34 }
 0x3af   : > { %v5094_v38 = vpop.f32.mrf.mxu1  ;;  %v4903_v55 = vpop.f32.mrf.mxu0 }
 0x3b0   : > { %v13319_v23 = vadd.f32 %v5094_v38, %v4902_v30  ;;  %v4904_v18 = vadd.f32 %v4903_v55, %v13071_v43 }
 0x3b1   : > { %v5096_v12 = vpop.f32.mrf.mxu1  ;;  %v4905_v5 = vpop.f32.mrf.mxu0 }
 0x3b2   : > { %v13322_v32 = vadd.f32 %v5096_v12, %v4904_v18  ;;  %v4906_v31 = vadd.f32 %v4905_v5, %v13065_v48 }
 0x3b3   : > { %v5098_v13 = vpop.f32.mrf.mxu1  ;;  %v13325_v17 = vpop.f32.mrf.mxu0 }
 0x3b4   : > { %v13327_v62 = vadd.f32 %v5098_v13, %v4906_v31 }
 0x3b5   : > { %v13329_v46 = vpop.f32.mrf.mxu1  ;;  %v4911_v52 = vpop.f32.mrf.mxu0  ;;  %6446 = vmatmul.mubr.bf16.gmra.mxu0 %v14925_v56 }
 0x3b6   : > { %14924 = vst [vmem:[#allocation33_spill] sm:$0xff] %v13329_v46  ;;  %v4912_v30 = vadd.f32 %v4911_v52, %v13065_v48  ;;  %6455 = vmatprep.mubr.bf16.mxu0 %v14926_v58  ;;  %v14929_v58 = vpack.c.bf16 %v12728_v41, %v12734_v39  ;;  %v14932_v39 = vpack.c.bf16 %v12709_v22, %v12704_v54 }
 0x3b7   : > { %v5104_v38 = vpop.f32.mrf.mxu1  ;;  %v4913_v55 = vpop.f32.mrf.mxu0 }
 0x3b8   : > { %v13338_v18 = vadd.f32 %v5104_v38, %v4912_v30  ;;  %v4914_v31 = vadd.f32 %v4913_v55, %v13071_v43 }
 0x3b9   : > { %v5106_v12 = vpop.f32.mrf.mxu1  ;;  %v4915_v5 = vpop.f32.mrf.mxu0 }
 0x3ba   : > { %v13341_v13 = vadd.f32 %v5106_v12, %v4914_v31  ;;  %v4916_v46 = vadd.f32 %v4915_v5, %v13065_v48 }
 0x3bb   : > { %v5108_v14 = vpop.f32.mrf.mxu1  ;;  %v13344_v21 = vpop.f32.mrf.mxu0 }
 0x3bc   : > { %v13346_v52 = vadd.f32 %v5108_v14, %v4916_v46 }
 0x3bd   : > { %v13348_v56 = vpop.f32.mrf.mxu1  ;;  %v4921_v63 = vpop.f32.mrf.mxu0  ;;  %6456 = vmatmul.mubr.bf16.gmra.mxu0 %v14928_v29 }
 0x3be   : > { %14927 = vst [vmem:[#allocation87_spill] sm:$0xff] %v13348_v56  ;;  %v4922_v30 = vadd.f32 %v4921_v63, %v13065_v48  ;;  %6465 = vmatprep.mubr.bf16.mxu0 %v14929_v58  ;;  %v14933_v58 = vpack.c.bf16 %v12784_v42, %v12795_v19  ;;  %v14939_v19 = vpack.c.bf16 %v12763_v2, %v12756_v10 }
 0x3bf   : > { %v5114_v38 = vpop.f32.mrf.mxu1  ;;  %v4923_v55 = vpop.f32.mrf.mxu0 }
 0x3c0   : > { %v13357_v31 = vadd.f32 %v5114_v38, %v4922_v30  ;;  %v4924_v46 = vadd.f32 %v4923_v55, %v13071_v43 }
 0x3c1   : > { %v5116_v12 = vpop.f32.mrf.mxu1  ;;  %v4925_v5 = vpop.f32.mrf.mxu0 }
 0x3c2   : > { %v13360_v14 = vadd.f32 %v5116_v12, %v4924_v46  ;;  %v4926_v56 = vadd.f32 %v4925_v5, %v13065_v48 }
 0x3c3   : > { %v5118_v34 = vpop.f32.mrf.mxu1  ;;  %v13363_v40 = vpop.f32.mrf.mxu0 }
 0x3c4   : > { %v13365_v63 = vadd.f32 %v5118_v34, %v4926_v56 }
 0x3c5   : > { %v13367_v29 = vpop.f32.mrf.mxu1  ;;  %v4931_v41 = vpop.f32.mrf.mxu0  ;;  %6466 = vmatmul.mubr.bf16.gmra.mxu0 %v14932_v39 }
 0x3c6   : > { %14930 = vst [vmem:[#allocation72_spill] sm:$0xff] %v13365_v63  ;;  %14931 = vst [vmem:[#allocation43_spill] sm:$0xff] %v13367_v29  ;;  %v4932_v30 = vadd.f32 %v4931_v41, %v13065_v48  ;;  %6475 = vmatprep.mubr.bf16.mxu0 %v14933_v58  ;;  %v14940_v58 = vld [vmem:[#allocation28_spill] sm:$0xff] }
 0x3c7   : > { %v5124_v38 = vpop.f32.mrf.mxu1  ;;  %v4933_v55 = vpop.f32.mrf.mxu0 }
 0x3c8   : > { %v13376_v46 = vadd.f32 %v5124_v38, %v4932_v30  ;;  %v4934_v56 = vadd.f32 %v4933_v55, %v13071_v43  ;;  %v14941_v55 = vpack.c.bf16 %v12836_v4, %v14940_v58  ;;  %v14942_v4 = vld [vmem:[#allocation27_spill] sm:$0xff]  ;;  %v14943_v58 = vld [vmem:[#allocation120_spill] sm:$0xff] }
 0x3c9   : > { %v5126_v12 = vpop.f32.mrf.mxu1  ;;  %v4935_v5 = vpop.f32.mrf.mxu0 }
 0x3ca   : > { %14934 = vst [vmem:[#allocation91_spill] sm:$0xff] %v13376_v46  ;;  %v13379_v34 = vadd.f32 %v5126_v12, %v4934_v56  ;;  %v4936_v29 = vadd.f32 %v4935_v5, %v13065_v48 }
 0x3cb   : > { %v5128_v22 = vpop.f32.mrf.mxu1  ;;  %v13382_v54 = vpop.f32.mrf.mxu0 }
 0x3cc   : > { %14935 = vst [vmem:[#allocation92_spill] sm:$0xff] %v13379_v34  ;;  %14936 = vst [vmem:[#allocation105_spill] sm:$0xff] %v13382_v54  ;;  %v13384_v41 = vadd.f32 %v5128_v22, %v4936_v29 }
 0x3cd   : > { %v13386_v39 = vpop.f32.mrf.mxu1  ;;  %v5167_v42 = vpop.f32.mrf.mxu0  ;;  %6476 = vmatmul.mubr.bf16.gmra.mxu0 %v14939_v19 }
 0x3ce   : > { %14937 = vst [vmem:[#allocation107_spill] sm:$0xff] %v13384_v41  ;;  %14938 = vst [vmem:[#allocation100_spill] sm:$0xff] %v13386_v39  ;;  %v5168_v30 = vadd.f32 %v5167_v42, %v13088_v50  ;;  %6485 = vmatprep.mubr.bf16.mxu0 %v14941_v55  ;;  %v14944_v55 = vpack.c.bf16 %v14942_v4, %v14943_v58 }
 0x3cf   : > { %v5360_v38 = vpop.f32.mrf.mxu1  ;;  %v5169_v48 = vpop.f32.mrf.mxu0 }
 0x3d0   : > { %v5361_v56 = vadd.f32 %v5360_v38, %v5168_v30  ;;  %v5170_v12 = vadd.f32 %v5169_v48, %v13093_v35  ;;  %v14946_v48 = vld [vmem:[#allocation36_spill] sm:$0xff] }
 0x3d1   : > { %v5362_v29 = vpop.f32.mrf.mxu1  ;;  %v5171_v5 = vpop.f32.mrf.mxu0 }
 0x3d2   : > { %v5172_v22 = vadd.f32 %v5171_v5, %v13100_v24  ;;  %v5649_v41 = vmul.f32 0.2, %v5361_v56  ;;  %vm5521_vm15 = vcmp.gt.f32.partialorder %v5361_v56, 0.0  ;;  %v5363_v10 = vadd.f32 %v5362_v29, %v5170_v12  ;;  %v14945_v24 = vld [vmem:[#allocation35_spill] sm:$0xff] }
 0x3d3   : > { %v5364_v39 = vpop.f32.mrf.mxu1  ;;  %v5173_v34 = vpop.f32.mrf.mxu0  ;;  %v14947_v5 = vpack.c.bf16 %v14945_v24, %v14946_v48 }
 0x3d4   : > { %v5365_v2 = vadd.f32 %v5364_v39, %v5172_v22  ;;  %v5174_v42 = vadd.f32 %v5173_v34, %v13112_v11  ;;  %v5777_v54 = vsel %vm5521_vm15, %v5361_v56, %v5649_v41  ;;  %v5650_v29 = vmul.f32 0.2, %v5363_v10 }
 0x3d5   : > { %v5366_v50 = vpop.f32.mrf.mxu1  ;;  %v5177_v19 = vpop.f32.mrf.mxu0  ;;  %6486 = vmatmul.mubr.bf16.gmra.mxu0 %v14944_v55  ;;  %vm5522_vm3 = vcmp.gt.f32.partialorder %v5363_v10, 0.0 }
 0x3d6   : > { %vm5525_vm1 = vcmp.gt.f32.partialorder %v5365_v2, 0.0  ;;  %v5653_v35 = vmul.f32 0.2, %v5365_v2  ;;  %v5178_v30 = vadd.f32 %v5177_v19, %v13118_v1  ;;  %6495 = vmatprep.mubr.bf16.mxu0 %v14947_v5  ;;  %v5367_v12 = vadd.f32 %v5366_v50, %v5174_v42 }
 0x3d7   : > { %v5370_v38 = vpop.f32.mrf.mxu1  ;;  %v5179_v39 = vpop.f32.mrf.mxu0 }
 0x3d8   : > { %v5781_v22 = vsel %vm5525_vm1, %v5365_v2, %v5653_v35  ;;  %v5371_v11 = vadd.f32 %v5370_v38, %v5178_v30  ;;  %v5180_v34 = vadd.f32 %v5179_v39, %v13121_v0  ;;  %vm5526_vm4 = vcmp.gt.f32.partialorder %v5367_v12, 0.0  ;;  %v14948_v35 = vld [vmem:[#allocation26_spill] sm:$0xff]  ;;  %v14949_v30 = vld [vmem:[#allocation25_spill] sm:$0xff] }
 0x3d9   : > { %v5372_v46 = vpop.f32.mrf.mxu1  ;;  %v5905_v4 = vpack.c.bf16 %v5781_v22, %v5777_v54  ;;  %v5654_v58 = vmul.f32 0.2, %v5367_v12  ;;  %v5181_v55 = vpop.f32.mrf.mxu0  ;;  %v5778_v2 = vsel %vm5522_vm3, %v5363_v10, %v5650_v29  ;;  %v14950_v54 = vpack.c.bf16 %v14948_v35, %v14949_v30  ;;  %v14951_v22 = vld [vmem:[#allocation39_spill] sm:$0xff] }
 0x3da   : > { %v5182_v1 = vadd.f32 %v5181_v55, %v13124_v15  ;;  %v5657_v63 = vmul.f32 0.2, %v5371_v11  ;;  %vm5529_vm9 = vcmp.gt.f32.partialorder %v5371_v11, 0.0  ;;  %v5373_v41 = vadd.f32 %v5372_v46, %v5180_v34 }
 0x3db   : > { %v5374_v19 = vpop.f32.mrf.mxu1  ;;  %v5183_v24 = vpop.f32.mrf.mxu0  ;;  %v5782_v48 = vsel %vm5526_vm4, %v5367_v12, %v5654_v58  ;;  %v14952_v12 = vld [vmem:[#allocation41_spill] sm:$0xff] }
 0x3dc   : > { %v5375_v56 = vadd.f32 %v5374_v19, %v5182_v1  ;;  %v5184_v42 = vadd.f32 %v5183_v24, %v13134_v28  ;;  %v5906_v38 = vpack.c.bf16 %v5782_v48, %v5778_v2  ;;  %v14953_v58 = vpack.c.bf16 %v14951_v22, %v14952_v12  ;;  %v14954_v1 = vld [vmem:[#allocation60_spill] sm:$0xff]  ;;  %v14958_v22 = vld [vmem:[#allocation31_spill] sm:$0xff] }
 0x3dd   : > { %v5376_v50 = vpop.f32.mrf.mxu1  ;;  %v5187_v0 = vpop.f32.mrf.mxu0  ;;  %6496 = vmatmul.mubr.bf16.gmra.mxu0 %v14950_v54  ;;  %v5785_v46 = vsel %vm5529_vm9, %v5371_v11, %v5657_v63  ;;  %v5658_v28 = vmul.f32 0.2, %v5373_v41  ;;  %vm5530_vm6 = vcmp.gt.f32.partialorder %v5373_v41, 0.0 }
 0x3de   : > { %vm5533_vm5 = vcmp.gt.f32.partialorder %v5375_v56, 0.0  ;;  %v5661_v5 = vmul.f32 0.2, %v5375_v56  ;;  %v5188_v15 = vadd.f32 %v5187_v0, %v13140_v7  ;;  %6505 = vmatprep.mubr.bf16.mxu0 %v14953_v58  ;;  %v5377_v34 = vadd.f32 %v5376_v50, %v5184_v42  ;;  %6588 = vmatprep.mubr.bf16.mxu1 %v5906_v38  ;;  %v14955_v0 = vld [vmem:[#allocation61_spill] sm:$0xff] }
 0x3df   : > { %v5380_v39 = vpop.f32.mrf.mxu1  ;;  %v5189_v10 = vpop.f32.mrf.mxu0  ;;  %6589 = vmatmul.mubr.bf16.vlgmr.msra.gmra.mxu1 %v5905_v4  ;;  %v5786_v38 = vsel %vm5530_vm6, %v5373_v41, %v5658_v28  ;;  %v14956_v4 = vld [vmem:[#allocation67_spill] sm:$0xff] }
 0x3e0   : > { %v5789_v29 = vsel %vm5533_vm5, %v5375_v56, %v5661_v5  ;;  %v5381_v55 = vadd.f32 %v5380_v39, %v5188_v15  ;;  %v5190_v19 = vadd.f32 %v5189_v10, %v14954_v1  ;;  %vm5534_vm7 = vcmp.gt.f32.partialorder %v5377_v34, 0.0  ;;  %v14957_v39 = vld [vmem:[#allocation32_spill] sm:$0xff]  ;;  %v14960_v10 = vld [vmem:[#allocation71_spill] sm:$0xff] }
 0x3e1   : > { %v5382_v24 = vpop.f32.mrf.mxu1  ;;  %v5909_v48 = vpack.c.bf16 %v5789_v29, %v5785_v46  ;;  %v5662_v7 = vmul.f32 0.2, %v5377_v34  ;;  %v5191_v2 = vpop.f32.mrf.mxu0  ;;  %v14959_v12 = vpack.c.bf16 %v14957_v39, %v14958_v22  ;;  %v14965_v39 = vld [vmem:[#allocation65_spill] sm:$0xff] }
 0x3e2   : > { %v5192_v35 = vadd.f32 %v5191_v2, %v14955_v0  ;;  %v5665_v54 = vmul.f32 0.2, %v5381_v55  ;;  %vm5537_vm8 = vcmp.gt.f32.partialorder %v5381_v55, 0.0  ;;  %v5383_v50 = vadd.f32 %v5382_v24, %v5190_v19  ;;  %v14961_v2 = vld [vmem:[#allocation45_spill] sm:$0xff] }
 0x3e3   : > { %v5384_v30 = vpop.f32.mrf.mxu1  ;;  %v5193_v63 = vpop.f32.mrf.mxu0  ;;  %v5790_v11 = vsel %vm5534_vm7, %v5377_v34, %v5662_v7  ;;  %v14962_v34 = vld [vmem:[#allocation50_spill] sm:$0xff] }
 0x3e4   : > { %v5385_v42 = vadd.f32 %v5384_v30, %v5192_v35  ;;  %v5194_v5 = vadd.f32 %v5193_v63, %v14956_v4  ;;  %v5910_v58 = vpack.c.bf16 %v5790_v11, %v5786_v38  ;;  %v14963_v7 = vpack.c.bf16 %v14961_v2, %v14962_v34  ;;  %v14964_v30 = vld [vmem:[#allocation38_spill] sm:$0xff] }
 0x3e5   : > { %v5386_v56 = vpop.f32.mrf.mxu1  ;;  %v5197_v15 = vpop.f32.mrf.mxu0  ;;  %6506 = vmatmul.mubr.bf16.gmra.mxu0 %v14959_v12  ;;  %v5793_v19 = vsel %vm5537_vm8, %v5381_v55, %v5665_v54  ;;  %v5666_v28 = vmul.f32 0.2, %v5383_v50  ;;  %vm5538_vm11 = vcmp.gt.f32.partialorder %v5383_v50, 0.0 }
 0x3e6   : > { %vm5541_vm10 = vcmp.gt.f32.partialorder %v5385_v42, 0.0  ;;  %v5669_v46 = vmul.f32 0.2, %v5385_v42  ;;  %v5198_v29 = vadd.f32 %v5197_v15, %v14960_v10  ;;  %6515 = vmatprep.mubr.bf16.mxu0 %v14963_v7  ;;  %v5387_v24 = vadd.f32 %v5386_v56, %v5194_v5  ;;  %6598 = vmatprep.mubr.bf16.mxu1 %v5910_v58 }
 0x3e7   : > { %v5390_v1 = vpop.f32.mrf.mxu1  ;;  %v5199_v41 = vpop.f32.mrf.mxu0  ;;  %6599 = vmatmul.mubr.bf16.gmra.mxu1 %v5909_v48  ;;  %v5794_v58 = vsel %vm5538_vm11, %v5383_v50, %v5666_v28 }
 0x3e8   : > { %v5797_v0 = vsel %vm5541_vm10, %v5385_v42, %v5669_v46  ;;  %v5391_v35 = vadd.f32 %v5390_v1, %v5198_v29  ;;  %v5200_v63 = vadd.f32 %v5199_v41, %v14964_v30  ;;  %vm5542_vm12 = vcmp.gt.f32.partialorder %v5387_v24, 0.0  ;;  %v14966_v29 = vld [vmem:[#allocation42_spill] sm:$0xff]  ;;  %v14967_v1 = vld [vmem:[#allocation40_spill] sm:$0xff]  ;;  %v14970_v30 = vld [vmem:[#allocation55_spill] sm:$0xff] }
 0x3e9   : > { %v5392_v11 = vpop.f32.mrf.mxu1  ;;  %v5913_v38 = vpack.c.bf16 %v5797_v0, %v5793_v19  ;;  %v5670_v4 = vmul.f32 0.2, %v5387_v24  ;;  %v5201_v15 = vpop.f32.mrf.mxu0  ;;  %v14968_v2 = vpack.c.bf16 %v14966_v29, %v14967_v1  ;;  %v14969_v19 = vld [vmem:[#allocation16_spill] sm:$0xff]  ;;  %v14975_v1 = vld [vmem:[#allocation70_spill] sm:$0xff] }
 0x3ea   : > { %v5202_v22 = vadd.f32 %v5201_v15, %v14965_v39  ;;  %v5673_v10 = vmul.f32 0.2, %v5391_v35  ;;  %vm5545_vm0 = vcmp.gt.f32.partialorder %v5391_v35, 0.0  ;;  %v5393_v56 = vadd.f32 %v5392_v11, %v5200_v63  ;;  %v14973_v63 = vld [vmem:[#allocation66_spill] sm:$0xff] }
 0x3eb   : > { %v5394_v12 = vpop.f32.mrf.mxu1  ;;  %v5203_v55 = vpop.f32.mrf.mxu0  ;;  %v5798_v54 = vsel %vm5542_vm12, %v5387_v24, %v5670_v4  ;;  %v14971_v24 = vld [vmem:[#allocation56_spill] sm:$0xff]  ;;  %v4828_v50 = vadd.f32 %v14973_v63, %v13071_v43 }
 0x3ec   : > { %v5395_v5 = vadd.f32 %v5394_v12, %v5202_v22  ;;  %v5204_v48 = vadd.f32 %v5203_v55, %v13166_v59  ;;  %v5914_v34 = vpack.c.bf16 %v5798_v54, %v5794_v58  ;;  %v14972_v4 = vpack.c.bf16 %v14970_v30, %v14971_v24  ;;  %v14974_v12 = vld [vmem:[#allocation75_spill] sm:$0xff]  ;;  %v14976_v30 = vld [vmem:[#allocation24_spill] sm:$0xff] }
 0x3ed   : > { %v5396_v42 = vpop.f32.mrf.mxu1  ;;  %v5207_v46 = vpop.f32.mrf.mxu0  ;;  %6516 = vmatmul.mubr.bf16.gmra.mxu0 %v14968_v2  ;;  %v5801_v28 = vsel %vm5545_vm0, %v5391_v35, %v5673_v10  ;;  %v5674_v15 = vmul.f32 0.2, %v5393_v56  ;;  %vm5546_vm13 = vcmp.gt.f32.partialorder %v5393_v56, 0.0  ;;  %v5021_v35 = vadd.f32 %v14976_v30, %v4828_v50  ;;  %v14977_v24 = vld [vmem:[#allocation47_spill] sm:$0xff] }
 0x3ee   : > { %vm5549_vm2 = vcmp.gt.f32.partialorder %v5395_v5, 0.0  ;;  %v5677_v7 = vmul.f32 0.2, %v5395_v5  ;;  %v5208_v41 = vadd.f32 %v5207_v46, %v14969_v19  ;;  %6525 = vmatprep.mubr.bf16.mxu0 %v14972_v4  ;;  %v5397_v59 = vadd.f32 %v5396_v42, %v5204_v48  ;;  %6608 = vmatprep.mubr.bf16.mxu1 %v5914_v34  ;;  %v14978_v4 = vld [vmem:[#allocation46_spill] sm:$0xff] }
 0x3ef   : > { %v5400_v0 = vpop.f32.mrf.mxu1  ;;  %v5209_v11 = vpop.f32.mrf.mxu0  ;;  %6609 = vmatmul.mubr.bf16.gmra.mxu1 %v5913_v38  ;;  %v14979_v63 = vpack.c.bf16 %v14977_v24, %v14978_v4  ;;  %v14986_v4 = vld [vmem:[#allocation83_spill] sm:$0xff] }
 0x3f0   : > { %v5805_v39 = vsel %vm5549_vm2, %v5395_v5, %v5677_v7  ;;  %v5401_v22 = vadd.f32 %v5400_v0, %v5208_v41  ;;  %v5210_v55 = vadd.f32 %v5209_v11, %v14974_v12  ;;  %vm5550_vm14 = vcmp.gt.f32.partialorder %v5397_v59, 0.0 }
 0x3f1   : > { %v5402_v54 = vpop.f32.mrf.mxu1  ;;  %v5917_v58 = vpack.c.bf16 %v5805_v39, %v5801_v28  ;;  %v5678_v46 = vmul.f32 0.2, %v5397_v59  ;;  %v5211_v29 = vpop.f32.mrf.mxu0  ;;  %v5802_v7 = vsel %vm5546_vm13, %v5393_v56, %v5674_v15  ;;  %v14980_v39 = vld [vmem:[#allocation54_spill] sm:$0xff] }
 0x3f2   : > { %v5212_v2 = vadd.f32 %v5211_v29, %v14975_v1  ;;  %v5681_v10 = vmul.f32 0.2, %v5401_v22  ;;  %vm5553_vm15 = vcmp.gt.f32.partialorder %v5401_v22, 0.0  ;;  %v5403_v5 = vadd.f32 %v5402_v54, %v5210_v55  ;;  %v14981_v29 = vld [vmem:[#allocation58_spill] sm:$0xff]  ;;  %v14982_v1 = vld [vmem:[#allocation29_spill] sm:$0xff]  ;;  %v14984_v55 = vld [vmem:[#allocation51_spill] sm:$0xff] }
 0x3f3   : > { %v5404_v19 = vpop.f32.mrf.mxu1  ;;  %v5213_v42 = vpop.f32.mrf.mxu0  ;;  %v5806_v48 = vsel %vm5550_vm14, %v5397_v59, %v5678_v46  ;;  %v14983_v59 = vpack.c.bf16 %v14981_v29, %v14982_v1  ;;  %v4838_v54 = vadd.f32 %v14984_v55, %v13071_v43  ;;  %v14987_v29 = vld [vmem:[#allocation84_spill] sm:$0xff]  ;;  %v14988_v1 = vld [vmem:[#allocation53_spill] sm:$0xff] }
 0x3f4   : > { %v5405_v34 = vadd.f32 %v5404_v19, %v5212_v2  ;;  %v5214_v41 = vadd.f32 %v5213_v42, %v5021_v35  ;;  %v5918_v28 = vpack.c.bf16 %v5806_v48, %v5802_v7  ;;  %v5809_v56 = vsel %vm5553_vm15, %v5401_v22, %v5681_v10  ;;  %v14985_v35 = vld [vmem:[#allocation49_spill] sm:$0xff] }
 0x3f5   : > { %v5406_v38 = vpop.f32.mrf.mxu1  ;;  %v5217_v0 = vpop.f32.mrf.mxu0  ;;  %6526 = vmatmul.mubr.bf16.gmra.mxu0 %v14979_v63  ;;  %v5682_v2 = vmul.f32 0.2, %v5403_v5  ;;  %vm5554_vm3 = vcmp.gt.f32.partialorder %v5403_v5, 0.0  ;;  %v5031_v22 = vadd.f32 %v14987_v29, %v4838_v54  ;;  %v14995_v29 = vld [vmem:[#allocation96_spill] sm:$0xff] }
 0x3f6   : > { %vm5557_vm1 = vcmp.gt.f32.partialorder %v5405_v34, 0.0  ;;  %v5685_v11 = vmul.f32 0.2, %v5405_v34  ;;  %v5218_v12 = vadd.f32 %v5217_v0, %v14980_v39  ;;  %6535 = vmatprep.mubr.bf16.mxu0 %v14983_v59  ;;  %v5407_v15 = vadd.f32 %v5406_v38, %v5214_v41  ;;  %6618 = vmatprep.mubr.bf16.mxu1 %v5918_v28  ;;  %v14989_v59 = vld [vmem:[#allocation20_spill] sm:$0xff] }
 0x3f7   : > { %v5410_v50 = vpop.f32.mrf.mxu1  ;;  %v5219_v46 = vpop.f32.mrf.mxu0  ;;  %6619 = vmatmul.mubr.bf16.gmra.mxu1 %v5917_v58  ;;  %v14990_v55 = vpack.c.bf16 %v14988_v1, %v14989_v59 }
 0x3f8   : > { %v5813_v19 = vsel %vm5557_vm1, %v5405_v34, %v5685_v11  ;;  %v5411_v30 = vadd.f32 %v5410_v50, %v5218_v12  ;;  %v5220_v42 = vadd.f32 %v5219_v46, %v14985_v35  ;;  %vm5558_vm4 = vcmp.gt.f32.partialorder %v5407_v15, 0.0  ;;  %v14991_v35 = vld [vmem:[#allocation63_spill] sm:$0xff] }
 0x3f9   : > { %v5412_v48 = vpop.f32.mrf.mxu1  ;;  %v5921_v7 = vpack.c.bf16 %v5813_v19, %v5809_v56  ;;  %v5686_v0 = vmul.f32 0.2, %v5407_v15  ;;  %v5221_v24 = vpop.f32.mrf.mxu0  ;;  %v5810_v11 = vsel %vm5554_vm3, %v5403_v5, %v5682_v2 }
 0x3fa   : > { %v5222_v63 = vadd.f32 %v5221_v24, %v14986_v4  ;;  %v5689_v10 = vmul.f32 0.2, %v5411_v30  ;;  %vm5561_vm9 = vcmp.gt.f32.partialorder %v5411_v30, 0.0  ;;  %v5413_v34 = vadd.f32 %v5412_v48, %v5220_v42  ;;  %v14992_v24 = vld [vmem:[#allocation34_spill] sm:$0xff]  ;;  %v14994_v42 = vld [vmem:[#allocation52_spill] sm:$0xff] }
 0x3fb   : > { %v5414_v39 = vpop.f32.mrf.mxu1  ;;  %v5223_v38 = vpop.f32.mrf.mxu0  ;;  %v5814_v41 = vsel %vm5558_vm4, %v5407_v15, %v5686_v0  ;;  %v14993_v15 = vpack.c.bf16 %v14991_v35, %v14992_v24  ;;  %v4848_v48 = vadd.f32 %v14994_v42, %v13071_v43  ;;  %v14998_v35 = vld [vmem:[#allocation57_spill] sm:$0xff]  ;;  %v14999_v24 = vld [vmem:[#allocation22_spill] sm:$0xff] }
 0x3fc   : > { %v5415_v28 = vadd.f32 %v5414_v39, %v5222_v63  ;;  %v5224_v12 = vadd.f32 %v5223_v38, %v5031_v22  ;;  %v5922_v56 = vpack.c.bf16 %v5814_v41, %v5810_v11  ;;  %v5817_v5 = vsel %vm5561_vm9, %v5411_v30, %v5689_v10 }
 0x3fd   : > { %v5416_v58 = vpop.f32.mrf.mxu1  ;;  %v5227_v50 = vpop.f32.mrf.mxu0  ;;  %6536 = vmatmul.mubr.bf16.gmra.mxu0 %v14990_v55  ;;  %v5690_v4 = vmul.f32 0.2, %v5413_v34  ;;  %vm5562_vm6 = vcmp.gt.f32.partialorder %v5413_v34, 0.0  ;;  %v14997_v55 = vld [vmem:[#allocation37_spill] sm:$0xff] }
 0x3fe   : > { %vm5565_vm5 = vcmp.gt.f32.partialorder %v5415_v28, 0.0  ;;  %v5693_v46 = vmul.f32 0.2, %v5415_v28  ;;  %v5228_v19 = vadd.f32 %v5227_v50, %v13206_v44  ;;  %6545 = vmatprep.mubr.bf16.mxu0 %v14993_v15  ;;  %v5417_v2 = vadd.f32 %v5416_v58, %v5224_v12  ;;  %6628 = vmatprep.mubr.bf16.mxu1 %v5922_v56  ;;  %v14996_v50 = vld [vmem:[#allocation17_spill] sm:$0xff] }
 0x3ff   : > { %v5420_v54 = vpop.f32.mrf.mxu1  ;;  %v5229_v0 = vpop.f32.mrf.mxu0  ;;  %6629 = vmatmul.mubr.bf16.gmra.mxu1 %v5921_v7  ;;  %v5041_v30 = vadd.f32 %v14997_v55, %v4848_v48  ;;  %v15000_v15 = vpack.c.bf16 %v14998_v35, %v14999_v24 }
 0x400   : > { %v5821_v63 = vsel %vm5565_vm5, %v5415_v28, %v5693_v46  ;;  %v5421_v39 = vadd.f32 %v5420_v54, %v5228_v19  ;;  %v5230_v22 = vadd.f32 %v5229_v0, %v14995_v29  ;;  %vm5566_vm7 = vcmp.gt.f32.partialorder %v5417_v2, 0.0 }
 0x401   : > { %v5422_v38 = vpop.f32.mrf.mxu1  ;;  %v5925_v44 = vpack.c.bf16 %v5821_v63, %v5817_v5  ;;  %v5694_v41 = vmul.f32 0.2, %v5417_v2  ;;  %v5231_v11 = vpop.f32.mrf.mxu0  ;;  %v5818_v46 = vsel %vm5562_vm6, %v5413_v34, %v5690_v4 }
 0x402   : > { %v5232_v1 = vadd.f32 %v5231_v11, %v14996_v50  ;;  %v5697_v10 = vmul.f32 0.2, %v5421_v39  ;;  %vm5569_vm8 = vcmp.gt.f32.partialorder %v5421_v39, 0.0  ;;  %v5423_v28 = vadd.f32 %v5422_v38, %v5230_v22 }
 0x403   : > { %v5424_v59 = vpop.f32.mrf.mxu1  ;;  %v5233_v58 = vpop.f32.mrf.mxu0  ;;  %v5822_v12 = vsel %vm5566_vm7, %v5417_v2, %v5694_v41  ;;  %v4858_v2 = vadd.f32 %v13230_v8, %v13071_v43  ;;  %v15001_v8 = vld [vmem:[#allocation89_spill] sm:$0xff] }
 0x404   : > { %v5425_v56 = vadd.f32 %v5424_v59, %v5232_v1  ;;  %v5234_v19 = vadd.f32 %v5233_v58, %v5041_v30  ;;  %v5926_v42 = vpack.c.bf16 %v5822_v12, %v5818_v46  ;;  %v5825_v63 = vsel %vm5569_vm8, %v5421_v39, %v5697_v10 }
 0x405   : > { %v5426_v7 = vpop.f32.mrf.mxu1  ;;  %v5237_v54 = vpop.f32.mrf.mxu0  ;;  %6546 = vmatmul.mubr.bf16.gmra.mxu0 %v15000_v15  ;;  %v5698_v34 = vmul.f32 0.2, %v5423_v28  ;;  %vm5570_vm11 = vcmp.gt.f32.partialorder %v5423_v28, 0.0  ;;  %v5051_v39 = vadd.f32 %v15001_v8, %v4858_v2 }
 0x406   : > { %vm5573_vm10 = vcmp.gt.f32.partialorder %v5425_v56, 0.0  ;;  %v5701_v5 = vmul.f32 0.2, %v5425_v56  ;;  %v5238_v0 = vadd.f32 %v5237_v54, %v13224_v37  ;;  %v5427_v29 = vadd.f32 %v5426_v7, %v5234_v19  ;;  %6638 = vmatprep.mubr.bf16.mxu1 %v5926_v42 }
 0x407   : > { %v5430_v48 = vpop.f32.mrf.mxu1  ;;  %v5239_v22 = vpop.f32.mrf.mxu0  ;;  %6639 = vmatmul.mubr.bf16.gmra.mxu1 %v5925_v44  ;;  %v5826_v7 = vsel %vm5570_vm11, %v5423_v28, %v5698_v34 }
 0x408   : > { %v5829_v4 = vsel %vm5573_vm10, %v5425_v56, %v5701_v5  ;;  %v5431_v38 = vadd.f32 %v5430_v48, %v5238_v0  ;;  %v5240_v41 = vadd.f32 %v5239_v22, %v13227_v61  ;;  %vm5574_vm12 = vcmp.gt.f32.partialorder %v5427_v29, 0.0 }
 0x409   : > { %v5432_v11 = vpop.f32.mrf.mxu1  ;;  %v5929_v50 = vpack.c.bf16 %v5829_v4, %v5825_v63  ;;  %v5702_v1 = vmul.f32 0.2, %v5427_v29  ;;  %v5241_v37 = vpop.f32.mrf.mxu0 }
 0x40a   : > { %v5242_v59 = vadd.f32 %v5241_v37, %v13232_v60  ;;  %v5705_v30 = vmul.f32 0.2, %v5431_v38  ;;  %vm5577_vm0 = vcmp.gt.f32.partialorder %v5431_v38, 0.0  ;;  %v5433_v12 = vadd.f32 %v5432_v11, %v5240_v41 }
 0x40b   : > { %v5434_v55 = vpop.f32.mrf.mxu1  ;;  %v5243_v10 = vpop.f32.mrf.mxu0  ;;  %v5830_v58 = vsel %vm5574_vm12, %v5427_v29, %v5702_v1  ;;  %v4868_v60 = vadd.f32 %v13249_v49, %v13071_v43  ;;  %v15002_v49 = vld [vmem:[#allocation79_spill] sm:$0xff] }
 0x40c   : > { %v5435_v56 = vadd.f32 %v5434_v55, %v5242_v59  ;;  %v5244_v61 = vadd.f32 %v5243_v10, %v5051_v39  ;;  %v5930_v19 = vpack.c.bf16 %v5830_v58, %v5826_v7  ;;  %v5833_v15 = vsel %vm5577_vm0, %v5431_v38, %v5705_v30 }
 0x40d   : > { %v5436_v44 = vpop.f32.mrf.mxu1  ;;  %v5247_v46 = vpop.f32.mrf.mxu0  ;;  %v5706_v0 = vmul.f32 0.2, %v5433_v12  ;;  %vm5578_vm13 = vcmp.gt.f32.partialorder %v5433_v12, 0.0  ;;  %v5061_v38 = vadd.f32 %v15002_v49, %v4868_v60 }
 0x40e   : > { %vm5581_vm2 = vcmp.gt.f32.partialorder %v5435_v56, 0.0  ;;  %v5709_v54 = vmul.f32 0.2, %v5435_v56  ;;  %v5248_v35 = vadd.f32 %v5247_v46, %v13243_v27  ;;  %v5437_v42 = vadd.f32 %v5436_v44, %v5244_v61  ;;  %6648 = vmatprep.mubr.bf16.mxu1 %v5930_v19 }
 0x40f   : > { %v5440_v24 = vpop.f32.mrf.mxu1  ;;  %v5249_v5 = vpop.f32.mrf.mxu0  ;;  %6649 = vmatmul.mubr.bf16.gmra.mxu1 %v5929_v50  ;;  %v5834_v55 = vsel %vm5578_vm13, %v5433_v12, %v5706_v0 }
 0x410   : > { %v5837_v48 = vsel %vm5581_vm2, %v5435_v56, %v5709_v54  ;;  %v5441_v2 = vadd.f32 %v5440_v24, %v5248_v35  ;;  %v5250_v28 = vadd.f32 %v5249_v5, %v13246_v20  ;;  %vm5582_vm14 = vcmp.gt.f32.partialorder %v5437_v42, 0.0 }
 0x411   : > { %v5442_v63 = vpop.f32.mrf.mxu1  ;;  %v5933_v29 = vpack.c.bf16 %v5837_v48, %v5833_v15  ;;  %v5710_v22 = vmul.f32 0.2, %v5437_v42  ;;  %v5251_v27 = vpop.f32.mrf.mxu0 }
 0x412   : > { %v5252_v34 = vadd.f32 %v5251_v27, %v13251_v45  ;;  %v5713_v41 = vmul.f32 0.2, %v5441_v2  ;;  %vm5585_vm15 = vcmp.gt.f32.partialorder %v5441_v2, 0.0  ;;  %v5443_v37 = vadd.f32 %v5442_v63, %v5250_v28 }
 0x413   : > { %v5444_v4 = vpop.f32.mrf.mxu1  ;;  %v5253_v11 = vpop.f32.mrf.mxu0  ;;  %v5838_v1 = vsel %vm5582_vm14, %v5437_v42, %v5710_v22  ;;  %v4878_v45 = vadd.f32 %v13268_v3, %v13071_v43  ;;  %v15003_v3 = vld [vmem:[#allocation85_spill] sm:$0xff] }
 0x414   : > { %v5445_v59 = vadd.f32 %v5444_v4, %v5252_v34  ;;  %v5254_v20 = vadd.f32 %v5253_v11, %v5061_v38  ;;  %v5934_v39 = vpack.c.bf16 %v5838_v1, %v5834_v55  ;;  %v5841_v56 = vsel %vm5585_vm15, %v5441_v2, %v5713_v41 }
 0x415   : > { %v5446_v50 = vpop.f32.mrf.mxu1  ;;  %v5257_v8 = vpop.f32.mrf.mxu0  ;;  %v5714_v61 = vmul.f32 0.2, %v5443_v37  ;;  %vm5586_vm3 = vcmp.gt.f32.partialorder %v5443_v37, 0.0  ;;  %v5071_v42 = vadd.f32 %v15003_v3, %v4878_v45 }
 0x416   : > { %vm5589_vm1 = vcmp.gt.f32.partialorder %v5445_v59, 0.0  ;;  %v5717_v30 = vmul.f32 0.2, %v5445_v59  ;;  %v5258_v10 = vadd.f32 %v5257_v8, %v13262_v6  ;;  %v5447_v44 = vadd.f32 %v5446_v50, %v5254_v20  ;;  %6658 = vmatprep.mubr.bf16.mxu1 %v5934_v39 }
 0x417   : > { %v5450_v58 = vpop.f32.mrf.mxu1  ;;  %v5259_v7 = vpop.f32.mrf.mxu0  ;;  %6659 = vmatmul.mubr.bf16.gmra.mxu1 %v5933_v29  ;;  %v5842_v29 = vsel %vm5586_vm3, %v5443_v37, %v5714_v61 }
 0x418   : > { %v5845_v46 = vsel %vm5589_vm1, %v5445_v59, %v5717_v30  ;;  %v5451_v19 = vadd.f32 %v5450_v58, %v5258_v10  ;;  %v5260_v12 = vadd.f32 %v5259_v7, %v13265_v33  ;;  %vm5590_vm4 = vcmp.gt.f32.partialorder %v5447_v44, 0.0 }
 0x419   : > { %v5452_v54 = vpop.f32.mrf.mxu1  ;;  %v5937_v35 = vpack.c.bf16 %v5845_v46, %v5841_v56  ;;  %v5718_v24 = vmul.f32 0.2, %v5447_v44  ;;  %v5261_v6 = vpop.f32.mrf.mxu0 }
 0x41a   : > { %v5262_v60 = vadd.f32 %v5261_v6, %v13270_v36  ;;  %v5721_v5 = vmul.f32 0.2, %v5451_v19  ;;  %vm5593_vm9 = vcmp.gt.f32.partialorder %v5451_v19, 0.0  ;;  %v5453_v2 = vadd.f32 %v5452_v54, %v5260_v12 }
 0x41b   : > { %v5454_v15 = vpop.f32.mrf.mxu1  ;;  %v5263_v0 = vpop.f32.mrf.mxu0  ;;  %v5846_v48 = vsel %vm5590_vm4, %v5447_v44, %v5718_v24  ;;  %v4888_v36 = vadd.f32 %v13287_v25, %v13071_v43  ;;  %v15004_v25 = vld [vmem:[#allocation97_spill] sm:$0xff] }
 0x41c   : > { %v5455_v28 = vadd.f32 %v5454_v15, %v5262_v60  ;;  %v5264_v33 = vadd.f32 %v5263_v0, %v5071_v42  ;;  %v5938_v27 = vpack.c.bf16 %v5846_v48, %v5842_v29  ;;  %v5849_v38 = vsel %vm5593_vm9, %v5451_v19, %v5721_v5 }
 0x41d   : > { %v5456_v63 = vpop.f32.mrf.mxu1  ;;  %v5267_v22 = vpop.f32.mrf.mxu0  ;;  %v5722_v1 = vmul.f32 0.2, %v5453_v2  ;;  %vm5594_vm6 = vcmp.gt.f32.partialorder %v5453_v2, 0.0  ;;  %v5081_v10 = vadd.f32 %v15004_v25, %v4888_v36 }
 0x41e   : > { %vm5597_vm5 = vcmp.gt.f32.partialorder %v5455_v28, 0.0  ;;  %v5725_v34 = vmul.f32 0.2, %v5455_v28  ;;  %v5268_v4 = vadd.f32 %v5267_v22, %v13281_v16  ;;  %v5457_v41 = vadd.f32 %v5456_v63, %v5264_v33  ;;  %6668 = vmatprep.mubr.bf16.mxu1 %v5938_v27 }
 0x41f   : > { %v5460_v49 = vpop.f32.mrf.mxu1  ;;  %v5269_v11 = vpop.f32.mrf.mxu0  ;;  %6669 = vmatmul.mubr.bf16.gmra.mxu1 %v5937_v35  ;;  %v5850_v46 = vsel %vm5594_vm6, %v5453_v2, %v5722_v1 }
 0x420   : > { %v5853_v59 = vsel %vm5597_vm5, %v5455_v28, %v5725_v34  ;;  %v5461_v50 = vadd.f32 %v5460_v49, %v5268_v4  ;;  %v5270_v37 = vadd.f32 %v5269_v11, %v13284_v9  ;;  %vm5598_vm7 = vcmp.gt.f32.partialorder %v5457_v41, 0.0 }
 0x421   : > { %v5462_v55 = vpop.f32.mrf.mxu1  ;;  %v5941_v20 = vpack.c.bf16 %v5853_v59, %v5849_v38  ;;  %v5726_v8 = vmul.f32 0.2, %v5457_v41  ;;  %v5271_v16 = vpop.f32.mrf.mxu0 }
 0x422   : > { %v5272_v39 = vadd.f32 %v5271_v16, %v13289_v57  ;;  %v5729_v58 = vmul.f32 0.2, %v5461_v50  ;;  %vm5601_vm8 = vcmp.gt.f32.partialorder %v5461_v50, 0.0  ;;  %v5463_v44 = vadd.f32 %v5462_v55, %v5270_v37 }
 0x423   : > { %v5464_v30 = vpop.f32.mrf.mxu1  ;;  %v5273_v45 = vpop.f32.mrf.mxu0  ;;  %v5854_v56 = vsel %vm5598_vm7, %v5457_v41, %v5726_v8  ;;  %v4898_v57 = vadd.f32 %v13306_v26, %v13071_v43  ;;  %v15005_v26 = vld [vmem:[#allocation68_spill] sm:$0xff] }
 0x424   : > { %v5465_v7 = vadd.f32 %v5464_v30, %v5272_v39  ;;  %v5274_v9 = vadd.f32 %v5273_v45, %v5081_v10  ;;  %v5942_v12 = vpack.c.bf16 %v5854_v56, %v5850_v46  ;;  %v5857_v6 = vsel %vm5601_vm8, %v5461_v50, %v5729_v58 }
 0x425   : > { %v5466_v61 = vpop.f32.mrf.mxu1  ;;  %v5277_v19 = vpop.f32.mrf.mxu0  ;;  %v5730_v3 = vmul.f32 0.2, %v5463_v44  ;;  %vm5602_vm11 = vcmp.gt.f32.partialorder %v5463_v44, 0.0  ;;  %v5091_v33 = vadd.f32 %v15005_v26, %v4898_v57 }
 0x426   : > { %vm5605_vm10 = vcmp.gt.f32.partialorder %v5465_v7, 0.0  ;;  %v5733_v54 = vmul.f32 0.2, %v5465_v7  ;;  %v5278_v35 = vadd.f32 %v5277_v19, %v13300_v47  ;;  %v5467_v60 = vadd.f32 %v5466_v61, %v5274_v9  ;;  %6678 = vmatprep.mubr.bf16.mxu1 %v5942_v12 }
 0x427   : > { %v5470_v24 = vpop.f32.mrf.mxu1  ;;  %v5279_v15 = vpop.f32.mrf.mxu0  ;;  %6679 = vmatmul.mubr.bf16.gmra.mxu1 %v5941_v20  ;;  %v5858_v38 = vsel %vm5602_vm11, %v5463_v44, %v5730_v3 }
 0x428   : > { %v5861_v42 = vsel %vm5605_vm10, %v5465_v7, %v5733_v54  ;;  %v5471_v5 = vadd.f32 %v5470_v24, %v5278_v35  ;;  %v5280_v0 = vadd.f32 %v5279_v15, %v13303_v53  ;;  %vm5606_vm12 = vcmp.gt.f32.partialorder %v5467_v60, 0.0 }
 0x429   : > { %v5472_v48 = vpop.f32.mrf.mxu1  ;;  %v5945_v2 = vpack.c.bf16 %v5861_v42, %v5857_v6  ;;  %v5734_v28 = vmul.f32 0.2, %v5467_v60  ;;  %v5281_v47 = vpop.f32.mrf.mxu0 }
 0x42a   : > { %v5282_v63 = vadd.f32 %v5281_v47, %v13308_v51  ;;  %v5737_v22 = vmul.f32 0.2, %v5471_v5  ;;  %vm5609_vm0 = vcmp.gt.f32.partialorder %v5471_v5, 0.0  ;;  %v5473_v4 = vadd.f32 %v5472_v48, %v5280_v0 }
 0x42b   : > { %v5474_v29 = vpop.f32.mrf.mxu1  ;;  %v5283_v27 = vpop.f32.mrf.mxu0  ;;  %v5862_v34 = vsel %vm5606_vm12, %v5467_v60, %v5734_v28  ;;  %v4908_v51 = vadd.f32 %v13325_v17, %v13071_v43  ;;  %v15006_v17 = vld [vmem:[#allocation33_spill] sm:$0xff] }
 0x42c   : > { %v5475_v49 = vadd.f32 %v5474_v29, %v5282_v63  ;;  %v5284_v53 = vadd.f32 %v5283_v27, %v5091_v33  ;;  %v5946_v11 = vpack.c.bf16 %v5862_v34, %v5858_v38  ;;  %v5865_v37 = vsel %vm5609_vm0, %v5471_v5, %v5737_v22 }
 0x42d   : > { %v5476_v36 = vpop.f32.mrf.mxu1  ;;  %v5287_v41 = vpop.f32.mrf.mxu0  ;;  %v5738_v8 = vmul.f32 0.2, %v5473_v4  ;;  %vm5610_vm13 = vcmp.gt.f32.partialorder %v5473_v4, 0.0  ;;  %v5101_v44 = vadd.f32 %v15006_v17, %v4908_v51 }
 0x42e   : > { %vm5613_vm2 = vcmp.gt.f32.partialorder %v5475_v49, 0.0  ;;  %v5741_v1 = vmul.f32 0.2, %v5475_v49  ;;  %v5288_v59 = vadd.f32 %v5287_v41, %v13319_v23  ;;  %v5477_v55 = vadd.f32 %v5476_v36, %v5284_v53  ;;  %6688 = vmatprep.mubr.bf16.mxu1 %v5946_v11 }
 0x42f   : > { %v5480_v50 = vpop.f32.mrf.mxu1  ;;  %v5289_v20 = vpop.f32.mrf.mxu0  ;;  %6689 = vmatmul.mubr.bf16.gmra.mxu1 %v5945_v2  ;;  %v5866_v54 = vsel %vm5610_vm13, %v5473_v4, %v5738_v8 }
 0x430   : > { %v5869_v16 = vsel %vm5613_vm2, %v5475_v49, %v5741_v1  ;;  %v5481_v39 = vadd.f32 %v5480_v50, %v5288_v59  ;;  %v5290_v30 = vadd.f32 %v5289_v20, %v13322_v32  ;;  %vm5614_vm14 = vcmp.gt.f32.partialorder %v5477_v55, 0.0 }
 0x431   : > { %v5482_v25 = vpop.f32.mrf.mxu1  ;;  %v5949_v10 = vpack.c.bf16 %v5869_v16, %v5865_v37  ;;  %v5742_v58 = vmul.f32 0.2, %v5477_v55  ;;  %v5291_v23 = vpop.f32.mrf.mxu0 }
 0x432   : > { %v5292_v45 = vadd.f32 %v5291_v23, %v13327_v62  ;;  %v5745_v7 = vmul.f32 0.2, %v5481_v39  ;;  %vm5617_vm15 = vcmp.gt.f32.partialorder %v5481_v39, 0.0  ;;  %v5483_v9 = vadd.f32 %v5482_v25, %v5290_v30 }
 0x433   : > { %v5484_v56 = vpop.f32.mrf.mxu1  ;;  %v5293_v61 = vpop.f32.mrf.mxu0  ;;  %v5870_v46 = vsel %vm5614_vm14, %v5477_v55, %v5742_v58  ;;  %v4918_v62 = vadd.f32 %v13344_v21, %v13071_v43  ;;  %v15007_v21 = vld [vmem:[#allocation87_spill] sm:$0xff] }
 0x434   : > { %v5485_v19 = vadd.f32 %v5484_v56, %v5292_v45  ;;  %v5294_v32 = vadd.f32 %v5293_v61, %v5101_v44  ;;  %v5950_v24 = vpack.c.bf16 %v5870_v46, %v5866_v54  ;;  %v5873_v15 = vsel %vm5617_vm15, %v5481_v39, %v5745_v7 }
 0x435   : > { %v5486_v12 = vpop.f32.mrf.mxu1  ;;  %v5297_v35 = vpop.f32.mrf.mxu0  ;;  %v5746_v5 = vmul.f32 0.2, %v5483_v9  ;;  %vm5618_vm3 = vcmp.gt.f32.partialorder %v5483_v9, 0.0  ;;  %v5111_v33 = vadd.f32 %v15007_v21, %v4918_v62 }
 0x436   : > { %vm5621_vm1 = vcmp.gt.f32.partialorder %v5485_v19, 0.0  ;;  %v5749_v57 = vmul.f32 0.2, %v5485_v19  ;;  %v5298_v6 = vadd.f32 %v5297_v35, %v13338_v18  ;;  %v5487_v3 = vadd.f32 %v5486_v12, %v5294_v32  ;;  %6698 = vmatprep.mubr.bf16.mxu1 %v5950_v24  ;;  %v15010_v32 = vld [vmem:[#allocation91_spill] sm:$0xff] }
 0x437   : > { %v5490_v60 = vpop.f32.mrf.mxu1  ;;  %v5299_v42 = vpop.f32.mrf.mxu0  ;;  %6699 = vmatmul.mubr.bf16.gmra.mxu1 %v5949_v10  ;;  %v5874_v38 = vsel %vm5618_vm3, %v5483_v9, %v5746_v5  ;;  %v15008_v10 = vld [vmem:[#allocation72_spill] sm:$0xff] }
 0x438   : > { %v5877_v0 = vsel %vm5621_vm1, %v5485_v19, %v5749_v57  ;;  %v5491_v48 = vadd.f32 %v5490_v60, %v5298_v6  ;;  %v5300_v2 = vadd.f32 %v5299_v42, %v13341_v13  ;;  %vm5622_vm4 = vcmp.gt.f32.partialorder %v5487_v3, 0.0  ;;  %v15011_v57 = vld [vmem:[#allocation105_spill] sm:$0xff] }
 0x439   : > { %v5492_v28 = vpop.f32.mrf.mxu1  ;;  %v5953_v47 = vpack.c.bf16 %v5877_v0, %v5873_v15  ;;  %v5750_v63 = vmul.f32 0.2, %v5487_v3  ;;  %v5301_v18 = vpop.f32.mrf.mxu0  ;;  %v4938_v6 = vadd.f32 %v15011_v57, %v13071_v43  ;;  %v15012_v0 = vld [vmem:[#allocation92_spill] sm:$0xff] }
 0x43a   : > { %v5302_v29 = vadd.f32 %v5301_v18, %v13346_v52  ;;  %v5753_v22 = vmul.f32 0.2, %v5491_v48  ;;  %vm5625_vm9 = vcmp.gt.f32.partialorder %v5491_v48, 0.0  ;;  %v5493_v4 = vadd.f32 %v5492_v28, %v5300_v2  ;;  %v15013_v18 = vld [vmem:[#allocation107_spill] sm:$0xff] }
 0x43b   : > { %v5494_v26 = vpop.f32.mrf.mxu1  ;;  %v5303_v27 = vpop.f32.mrf.mxu0  ;;  %v5878_v34 = vsel %vm5622_vm4, %v5487_v3, %v5750_v63  ;;  %v4928_v52 = vadd.f32 %v13363_v40, %v13071_v43  ;;  %v15009_v40 = vld [vmem:[#allocation43_spill] sm:$0xff]  ;;  %v15014_v43 = vld [vmem:[#allocation100_spill] sm:$0xff] }
 0x43c   : > { %v5495_v49 = vadd.f32 %v5494_v26, %v5302_v29  ;;  %v5304_v13 = vadd.f32 %v5303_v27, %v5111_v33  ;;  %v5954_v41 = vpack.c.bf16 %v5878_v34, %v5874_v38  ;;  %v5881_v50 = vsel %vm5625_vm9, %v5491_v48, %v5753_v22 }
 0x43d   : > { %v5496_v36 = vpop.f32.mrf.mxu1  ;;  %v5307_v53 = vpop.f32.mrf.mxu0  ;;  %v5754_v55 = vmul.f32 0.2, %v5493_v4  ;;  %vm5626_vm6 = vcmp.gt.f32.partialorder %v5493_v4, 0.0  ;;  %v5121_v45 = vadd.f32 %v15009_v40, %v4928_v52  ;;  %v5131_v21 = vadd.f32 %v15014_v43, %v4938_v6  ;;  %v7005_v43 = vld [vmem:[#allocation8] sm:$0x3] }
 0x43e   : > { %vm5629_vm5 = vcmp.gt.f32.partialorder %v5495_v49, 0.0  ;;  %v5757_v11 = vmul.f32 0.2, %v5495_v49  ;;  %v5308_v1 = vadd.f32 %v5307_v53, %v13357_v31  ;;  %v5497_v51 = vadd.f32 %v5496_v36, %v5304_v13  ;;  %6708 = vmatprep.mubr.bf16.mxu1 %v5954_v41 }
 0x43f   : > { %v5500_v59 = vpop.f32.mrf.mxu1  ;;  %v5309_v37 = vpop.f32.mrf.mxu0  ;;  %6709 = vmatmul.mubr.bf16.gmra.mxu1 %v5953_v47  ;;  %v5882_v9 = vsel %vm5626_vm6, %v5493_v4, %v5754_v55 }
 0x440   : > { %v5885_v20 = vsel %vm5629_vm5, %v5495_v49, %v5757_v11  ;;  %v5501_v8 = vadd.f32 %v5500_v59, %v5308_v1  ;;  %v5310_v16 = vadd.f32 %v5309_v37, %v13360_v14  ;;  %vm5630_vm7 = vcmp.gt.f32.partialorder %v5497_v51, 0.0 }
 0x441   : > { %v5502_v39 = vpop.f32.mrf.mxu1  ;;  %v5957_v30 = vpack.c.bf16 %v5885_v20, %v5881_v50  ;;  %v5758_v25 = vmul.f32 0.2, %v5497_v51  ;;  %v5311_v31 = vpop.f32.mrf.mxu0 }
 0x442   : > { %v5312_v58 = vadd.f32 %v5311_v31, %v15008_v10  ;;  %v5761_v56 = vmul.f32 0.2, %v5501_v8  ;;  %vm5633_vm8 = vcmp.gt.f32.partialorder %v5501_v8, 0.0  ;;  %v5503_v7 = vadd.f32 %v5502_v39, %v5310_v16 }
 0x443   : > { %v5504_v23 = vpop.f32.mrf.mxu1  ;;  %v5313_v17 = vpop.f32.mrf.mxu0  ;;  %v5886_v44 = vsel %vm5630_vm7, %v5497_v51, %v5758_v25 }
 0x444   : > { %v5505_v61 = vadd.f32 %v5504_v23, %v5312_v58  ;;  %v5314_v14 = vadd.f32 %v5313_v17, %v5121_v45  ;;  %v5958_v12 = vpack.c.bf16 %v5886_v44, %v5882_v9  ;;  %v5889_v60 = vsel %vm5633_vm8, %v5501_v8, %v5761_v56 }
 0x445   : > { %v5506_v46 = vpop.f32.mrf.mxu1  ;;  %v5317_v19 = vpop.f32.mrf.mxu0  ;;  %v5762_v3 = vmul.f32 0.2, %v5503_v7  ;;  %vm5634_vm11 = vcmp.gt.f32.partialorder %v5503_v7, 0.0 }
 0x446   : > { %vm5637_vm10 = vcmp.gt.f32.partialorder %v5505_v61, 0.0  ;;  %v5765_v54 = vmul.f32 0.2, %v5505_v61  ;;  %v5318_v35 = vadd.f32 %v5317_v19, %v15010_v32  ;;  %v5507_v62 = vadd.f32 %v5506_v46, %v5314_v14  ;;  %6718 = vmatprep.mubr.bf16.mxu1 %v5958_v12 }
 0x447   : > { %v5510_v24 = vpop.f32.mrf.mxu1  ;;  %v5319_v15 = vpop.f32.mrf.mxu0  ;;  %6719 = vmatmul.mubr.bf16.gmra.mxu1 %v5957_v30  ;;  %v5890_v49 = vsel %vm5634_vm11, %v5503_v7, %v5762_v3  ;;  %v6031_v3 = vld [vmem:[%s14057_s6] sm:$0x3] }
 0x448   : > { %v5893_v42 = vsel %vm5637_vm10, %v5505_v61, %v5765_v54  ;;  %v5511_v5 = vadd.f32 %v5510_v24, %v5318_v35  ;;  %v5320_v48 = vadd.f32 %v5319_v15, %v15012_v0  ;;  %vm5638_vm12 = vcmp.gt.f32.partialorder %v5507_v62, 0.0 }
 0x449   : > { %v5512_v2 = vpop.f32.mrf.mxu1  ;;  %v5961_v28 = vpack.c.bf16 %v5893_v42, %v5889_v60  ;;  %v5766_v47 = vmul.f32 0.2, %v5507_v62  ;;  %v5321_v63 = vpop.f32.mrf.mxu0 }
 0x44a   : > { %v5322_v29 = vadd.f32 %v5321_v63, %v15013_v18  ;;  %v5513_v33 = vadd.f32 %v5512_v2, %v5320_v48  ;;  %v5769_v34 = vmul.f32 0.2, %v5511_v5  ;;  %vm5641_vm0 = vcmp.gt.f32.partialorder %v5511_v5, 0.0  ;;  %v15016_v48 = vld [vmem:[#allocation15_spill] sm:$0xff] }
 0x44b   : > { %v5514_v26 = vpop.f32.mrf.mxu1  ;;  %v5323_v22 = vpop.f32.mrf.mxu0  ;;  %v5894_v27 = vsel %vm5638_vm12, %v5507_v62, %v5766_v47  ;;  %v13582_v2 = vrot.slane %v6031_v3, %v15016_v48 }
 0x44c   : > { %v5515_v4 = vadd.f32 %v5514_v26, %v5322_v29  ;;  %v5324_v36 = vadd.f32 %v5323_v22, %v5131_v21  ;;  %v5962_v13 = vpack.c.bf16 %v5894_v27, %v5890_v49  ;;  %v5770_v11 = vmul.f32 0.2, %v5513_v33 }
 0x44d   : > { %v6397_v38 = vpop.f32.mrf.mxu0  ;;  %v5516_v41 = vpop.f32.mrf.mxu1  ;;  %v5897_v52 = vsel %vm5641_vm0, %v5511_v5, %v5769_v34  ;;  %vm5642_vm13 = vcmp.gt.f32.partialorder %v5513_v33, 0.0  ;;  %v15015_v5 = vld [vmem:[#allocation14_spill] sm:$0xff] }
 0x44e   : > { %vm5645_vm2 = vcmp.gt.f32.partialorder %v5515_v4, 0.0  ;;  %v5773_v53 = vmul.f32 0.2, %v5515_v4  ;;  %v5517_v1 = vadd.f32 %v5516_v41, %v5324_v36  ;;  %6728 = vmatprep.mubr.bf16.mxu1 %v5962_v13  ;;  %v5898_v8 = vsel %vm5642_vm13, %v5513_v33, %v5770_v11 }
 0x44f   : > { %v6399_v59 = vpop.f32.mrf.mxu0  ;;  %6729 = vmatmul.mubr.bf16.gmra.mxu1 %v5961_v28  ;;  %v13579_v0 = vrot.slane %v6031_v3, %v15015_v5  ;;  %v13596_v49 = vrot.slane %v7005_v43, %v15015_v5  ;;  %v13599_v36 = vrot.slane %v7005_v43, %v15016_v48 }
 0x450   : > { %v5901_v50 = vsel %vm5645_vm2, %v5515_v4, %v5773_v53  ;;  %vm5646_vm14 = vcmp.gt.f32.partialorder %v5517_v1, 0.0  ;;  %v5774_v37 = vmul.f32 0.2, %v5517_v1  ;;  %v6400_v18 = vadd.f32 %v6399_v59, %v13582_v2 }
 0x451   : > { %v5965_v51 = vpack.c.bf16 %v5901_v50, %v5897_v52  ;;  %v6401_v55 = vpop.f32.mrf.mxu0  ;;  %v6398_v47 = vadd.f32 %v6397_v38, %v13579_v0 }
 0x452   : > { %v5902_v16 = vsel %vm5646_vm14, %v5517_v1, %v5774_v37  ;;  %v6402_v33 = vadd.f32 %v6401_v55, %v13579_v0 }
 0x453   : > { %v6403_v20 = vpop.f32.mrf.mxu0  ;;  %v5966_v39 = vpack.c.bf16 %v5902_v16, %v5898_v8 }
 0x454   : > { %v6404_v34 = vadd.f32 %v6403_v20, %v13582_v2 }
 0x455   : > { %v6407_v30 = vpop.f32.mrf.mxu0  ;;  %6738 = vmatprep.mubr.bf16.mxu1 %v5966_v39 }
 0x456   : > { %v6408_v11 = vadd.f32 %v6407_v30, %v13579_v0 }
 0x457   : > { %v13521_v25 = vpop.f32.mrf.mxu0  ;;  %6739 = vmatmul.mubr.bf16.gmra.mxu1 %v5965_v51 }
 0x458   : > { %v6410_v51 = vadd.f32 %v13521_v25, %v13582_v2 }
 0x459   : > { %v13523_v31 = vpop.f32.mrf.mxu0 }
 0x45a   : > { %v6412_v3 = vadd.f32 %v13523_v31, %v13579_v0 }
 0x45b   : > { %v13525_v10 = vpop.f32.mrf.mxu0 }
 0x45d   : > { %v13527_v58 = vpop.f32.mrf.mxu0 }
 0x45f   : > { %v13529_v23 = vpop.f32.mrf.mxu0 }
 0x461   : > { %v13531_v40 = vpop.f32.mrf.mxu0 }
 0x463   : > { %v13533_v45 = vpop.f32.mrf.mxu0 }
 0x465   : > { %v13535_v56 = vpop.f32.mrf.mxu0 }
 0x467   : > { %v13537_v17 = vpop.f32.mrf.mxu0 }
 0x469   : > { %v13539_v44 = vpop.f32.mrf.mxu0 }
 0x46b   : > { %v13541_v7 = vpop.f32.mrf.mxu0 }
 0x46d   : > { %v13543_v61 = vpop.f32.mrf.mxu0 }
 0x46f   : > { %v13545_v46 = vpop.f32.mrf.mxu0 }
 0x471   : > { %v13547_v9 = vpop.f32.mrf.mxu0 }
 0x473   : > { %v13549_v14 = vpop.f32.mrf.mxu0 }
 0x475   : > { %v13551_v19 = vpop.f32.mrf.mxu0 }
 0x477   : > { %v13553_v12 = vpop.f32.mrf.mxu0 }
 0x479   : > { %v13555_v54 = vpop.f32.mrf.mxu0 }
 0x47b   : > { %v13557_v32 = vpop.f32.mrf.mxu0 }
 0x47d   : > { %v13559_v35 = vpop.f32.mrf.mxu0 }
 0x47f   : > { %v13561_v24 = vpop.f32.mrf.mxu0 }
 0x481   : > { %v13563_v57 = vpop.f32.mrf.mxu0 }
 0x483   : > { %v13565_v6 = vpop.f32.mrf.mxu0 }
 0x485   : > { %v13567_v60 = vpop.f32.mrf.mxu0 }
 0x487   : > { %v13569_v62 = vpop.f32.mrf.mxu0 }
 0x489   : > { %v13571_v15 = vpop.f32.mrf.mxu0 }
 0x48b   : > { %v13576_v42 = vpop.f32.mrf.mxu0 }
 0x48d   : > { %v13584_v28 = vpop.f32.mrf.mxu0 }
 0x48f   : > { %v13591_v29 = vpop.f32.mrf.mxu0 }
 0x491   : > { %v13601_v38 = vpop.f32.mrf.mxu0 }
 0x493   : > { %v13612_v8 = vpop.f32.mrf.mxu0 }
 0x49f   : > { %v6590_v63 = vpop.f32.mrf.mxu1 }
 0x4a0   : > { %v6591_v26 = vadd.f32 %v6590_v63, %v6398_v47 }
 0x4a1   : > { %v6592_v21 = vpop.f32.mrf.mxu1 }
 0x4a2   : > { %vm6749_vm15 = vcmp.gt.f32.partialorder %v6591_v26, 0.0  ;;  %v6813_v22 = vmul.f32 0.2, %v6591_v26  ;;  %v6593_v27 = vadd.f32 %v6592_v21, %v6400_v18  ;;  %v6414_v18 = vadd.f32 %v13525_v10, %v13582_v2 }
 0x4a3   : > { %v6594_v4 = vpop.f32.mrf.mxu1 }
 0x4a4   : > { %vm6750_vm1 = vcmp.gt.f32.partialorder %v6593_v27, 0.0  ;;  %v6814_v13 = vmul.f32 0.2, %v6593_v27  ;;  %v6595_v53 = vadd.f32 %v6594_v4, %v6402_v33  ;;  %v6877_v41 = vsel %vm6749_vm15, %v6591_v26, %v6813_v22  ;;  %v13622_v33 = vpop.f32.mrf.mxu0 }
 0x4a5   : > { %v6596_v1 = vpop.f32.mrf.mxu1  ;;  %6941 = vst [vmem:[%s13604_s12] sm:$0xff] %v6877_v41  ;;  %v7017_v55 = vmul.f32 %v13596_v49, %v6877_v41 }
 0x4a6   : > { %vm6751_vm3 = vcmp.gt.f32.partialorder %v6595_v53, 0.0  ;;  %v6815_v59 = vmul.f32 0.2, %v6595_v53  ;;  %v6597_v52 = vadd.f32 %v6596_v1, %v6404_v34  ;;  %v6878_v50 = vsel %vm6750_vm1, %v6593_v27, %v6814_v13 }
 0x4a7   : > { %v6600_v37 = vpop.f32.mrf.mxu1  ;;  %6942 = vst [vmem:[%s13604_s12 + $0x8] sm:$0xff] %v6878_v50  ;;  %v7018_v20 = vmul.f32 %v13599_v36, %v6878_v50  ;;  %v6418_v34 = vadd.f32 %v13527_v58, %v13579_v0  ;;  %v13632_v50 = vpop.f32.mrf.mxu0 }
 0x4a8   : > { %vm6752_vm4 = vcmp.gt.f32.partialorder %v6597_v52, 0.0  ;;  %v6816_v16 = vmul.f32 0.2, %v6597_v52  ;;  %v6601_v39 = vadd.f32 %v6600_v37, %v6408_v11  ;;  %v6879_v30 = vsel %vm6751_vm3, %v6595_v53, %v6815_v59 }
 0x4a9   : > { %v6602_v5 = vpop.f32.mrf.mxu1  ;;  %v7081_v48 = vadd.f32 %v7018_v20, %v7017_v55  ;;  %6943 = vst [vmem:[%s13604_s12 + $0x10] sm:$0xff] %v6879_v30  ;;  %v7019_v43 = vmul.f32 %v13596_v49, %v6879_v30  ;;  %v6420_v11 = vadd.f32 %v13529_v23, %v13582_v2  ;;  %v6422_v55 = vadd.f32 %v13531_v40, %v13579_v0 }
 0x4aa   : > { %vm6753_vm9 = vcmp.gt.f32.partialorder %v6601_v39, 0.0  ;;  %v6817_v25 = vmul.f32 0.2, %v6601_v39  ;;  %v6603_v47 = vadd.f32 %v6602_v5, %v6410_v51  ;;  %v6880_v63 = vsel %vm6752_vm4, %v6597_v52, %v6816_v16 }
 0x4ab   : > { %v6604_v26 = vpop.f32.mrf.mxu1  ;;  %7082 = vadd.xlane.f32.xlu0 %v7081_v48  ;;  %6944 = vst [vmem:[%s13604_s12 + $0x18] sm:$0xff] %v6880_v63  ;;  %v7020_v21 = vmul.f32 %v13599_v36, %v6880_v63 }
 0x4ac   : > { %vm6754_vm5 = vcmp.gt.f32.partialorder %v6603_v47, 0.0  ;;  %v6818_v31 = vmul.f32 0.2, %v6603_v47  ;;  %v6605_v22 = vadd.f32 %v6604_v26, %v6412_v3  ;;  %v6881_v27 = vsel %vm6753_vm9, %v6601_v39, %v6817_v25 }
 0x4ad   : > { %v6606_v4 = vpop.f32.mrf.mxu1  ;;  %v7084_v13 = vadd.f32 %v7020_v21, %v7019_v43  ;;  %6945 = vst [vmem:[%s13604_s12 + $0x20] sm:$0xff] %v6881_v27  ;;  %v7021_v59 = vmul.f32 %v13596_v49, %v6881_v27  ;;  %v6424_v3 = vadd.f32 %v13533_v45, %v13582_v2  ;;  %v6428_v26 = vadd.f32 %v13535_v56, %v13579_v0 }
 0x4ae   : > { %vm6755_vm6 = vcmp.gt.f32.partialorder %v6605_v22, 0.0  ;;  %v6819_v10 = vmul.f32 0.2, %v6605_v22  ;;  %v6607_v53 = vadd.f32 %v6606_v4, %v6414_v18  ;;  %v6882_v41 = vsel %vm6754_vm5, %v6603_v47, %v6818_v31  ;;  %v13642_v47 = vpop.f32.mrf.mxu0 }
 0x4af   : > { %v6610_v1 = vpop.f32.mrf.mxu1  ;;  %7085 = vadd.xlane.f32.xlu0 %v7084_v13  ;;  %6946 = vst [vmem:[%s13604_s12 + $0x28] sm:$0xff] %v6882_v41  ;;  %v7022_v52 = vmul.f32 %v13599_v36, %v6882_v41  ;;  %v6430_v27 = vadd.f32 %v13537_v17, %v13582_v2 }
 0x4b0   : > { %vm6756_vm7 = vcmp.gt.f32.partialorder %v6607_v53, 0.0  ;;  %v6820_v58 = vmul.f32 0.2, %v6607_v53  ;;  %v6611_v51 = vadd.f32 %v6610_v1, %v6418_v34  ;;  %v6883_v37 = vsel %vm6755_vm6, %v6605_v22, %v6819_v10  ;;  %v13652_v10 = vpop.f32.mrf.mxu0 }
 0x4b1   : > { %v6612_v20 = vpop.f32.mrf.mxu1  ;;  %v7087_v16 = vadd.f32 %v7022_v52, %v7021_v59  ;;  %6947 = vst [vmem:[%s13604_s12 + $0x30] sm:$0xff] %v6883_v37  ;;  %v7023_v48 = vmul.f32 %v13596_v49, %v6883_v37 }
 0x4b2   : > { %vm6757_vm8 = vcmp.gt.f32.partialorder %v6611_v51, 0.0  ;;  %v6821_v23 = vmul.f32 0.2, %v6611_v51  ;;  %v6613_v39 = vadd.f32 %v6612_v20, %v6420_v11  ;;  %v6884_v30 = vsel %vm6756_vm7, %v6607_v53, %v6820_v58 }
 0x4b3   : > { %v6614_v5 = vpop.f32.mrf.mxu1  ;;  %7088 = vadd.xlane.f32.xlu1 %v7087_v16  ;;  %6948 = vst [vmem:[%s13604_s12 + $0x38] sm:$0xff] %v6884_v30  ;;  %v7024_v25 = vmul.f32 %v13599_v36, %v6884_v30  ;;  %v6432_v11 = vadd.f32 %v13539_v44, %v13579_v0  ;;  %v13662_v16 = vpop.f32.mrf.mxu0  ;;  %v6438_v30 = vadd.f32 %v13543_v61, %v13579_v0 }
 0x4b4   : > { %vm6758_vm10 = vcmp.gt.f32.partialorder %v6613_v39, 0.0  ;;  %v6822_v40 = vmul.f32 0.2, %v6613_v39  ;;  %v6615_v63 = vadd.f32 %v6614_v5, %v6422_v55  ;;  %v6885_v18 = vsel %vm6757_vm8, %v6611_v51, %v6821_v23 }
 0x4b5   : > { %v6616_v43 = vpop.f32.mrf.mxu1  ;;  %v7090_v21 = vadd.f32 %v7024_v25, %v7023_v48  ;;  %6949 = vst [vmem:[%s13604_s12 + $0x40] sm:$0xff] %v6885_v18  ;;  %v7025_v4 = vmul.f32 %v13596_v49, %v6885_v18  ;;  %v6434_v51 = vadd.f32 %v13541_v7, %v13582_v2 }
 0x4b6   : > { %vm6759_vm11 = vcmp.gt.f32.partialorder %v6615_v63, 0.0  ;;  %v6823_v45 = vmul.f32 0.2, %v6615_v63  ;;  %v6617_v31 = vadd.f32 %v6616_v43, %v6424_v3  ;;  %v6886_v22 = vsel %vm6758_vm10, %v6613_v39, %v6822_v40  ;;  %v13672_v43 = vpop.f32.mrf.mxu0 }
 0x4b7   : > { %v6620_v34 = vpop.f32.mrf.mxu1  ;;  %7091 = vadd.xlane.f32.xlu1 %v7090_v21  ;;  %6950 = vst [vmem:[%s13604_s12 + $0x48] sm:$0xff] %v6886_v22  ;;  %v7026_v13 = vmul.f32 %v13599_v36, %v6886_v22  ;;  %v6440_v40 = vadd.f32 %v13545_v46, %v13582_v2 }
 0x4b8   : > { %vm6760_vm12 = vcmp.gt.f32.partialorder %v6617_v31, 0.0  ;;  %v6824_v56 = vmul.f32 0.2, %v6617_v31  ;;  %v6621_v53 = vadd.f32 %v6620_v34, %v6428_v26  ;;  %v6887_v41 = vsel %vm6759_vm11, %v6615_v63, %v6823_v45 }
 0x4b9   : > { %v6622_v1 = vpop.f32.mrf.mxu1  ;;  %v7093_v59 = vadd.f32 %v7026_v13, %v7025_v4  ;;  %6951 = vst [vmem:[%s13604_s12 + $0x50] sm:$0xff] %v6887_v41  ;;  %v7027_v55 = vmul.f32 %v13596_v49, %v6887_v41  ;;  %v6444_v13 = vadd.f32 %v13549_v14, %v13582_v2 }
 0x4ba   : > { %vm6761_vm0 = vcmp.gt.f32.partialorder %v6621_v53, 0.0  ;;  %v6825_v17 = vmul.f32 0.2, %v6621_v53  ;;  %v6623_v52 = vadd.f32 %v6622_v1, %v6430_v27  ;;  %v6888_v58 = vsel %vm6760_vm12, %v6617_v31, %v6824_v56 }
 0x4bb   : > { %v6624_v37 = vpop.f32.mrf.mxu1  ;;  %7094 = vadd.xlane.f32.xlu0 %v7093_v59  ;;  %6952 = vst [vmem:[%s13604_s12 + $0x58] sm:$0xff] %v6888_v58  ;;  %v7028_v20 = vmul.f32 %v13599_v36, %v6888_v58  ;;  %v6442_v31 = vadd.f32 %v13547_v9, %v13579_v0 }
 0x4bc   : > { %vm6762_vm2 = vcmp.gt.f32.partialorder %v6623_v52, 0.0  ;;  %v6826_v44 = vmul.f32 0.2, %v6623_v52  ;;  %v6625_v23 = vadd.f32 %v6624_v37, %v6432_v11  ;;  %v6889_v39 = vsel %vm6761_vm0, %v6621_v53, %v6825_v17  ;;  %v13682_v11 = vpop.f32.mrf.mxu0 }
 0x4bd   : > { %v6626_v3 = vpop.f32.mrf.mxu1  ;;  %v7096_v5 = vadd.f32 %v7028_v20, %v7027_v55  ;;  %6953 = vst [vmem:[%s13604_s12 + $0x60] sm:$0xff] %v6889_v39  ;;  %v7029_v18 = vmul.f32 %v13596_v49, %v6889_v39  ;;  %v6448_v17 = vadd.f32 %v13551_v19, %v13579_v0  ;;  %v6450_v55 = vadd.f32 %v13553_v12, %v13582_v2 }
 0x4be   : > { %vm6763_vm13 = vcmp.gt.f32.partialorder %v6625_v23, 0.0  ;;  %v6827_v7 = vmul.f32 0.2, %v6625_v23  ;;  %v6627_v48 = vadd.f32 %v6626_v3, %v6434_v51  ;;  %v6890_v25 = vsel %vm6762_vm2, %v6623_v52, %v6826_v44  ;;  %v13692_v39 = vpop.f32.mrf.mxu0 }
 0x4bf   : > { %v6630_v63 = vpop.f32.mrf.mxu1  ;;  %7097 = vadd.xlane.f32.xlu1 %v7096_v5  ;;  %6954 = vst [vmem:[%s13604_s12 + $0x68] sm:$0xff] %v6890_v25  ;;  %v7030_v26 = vmul.f32 %v13599_v36, %v6890_v25  ;;  %v6452_v5 = vadd.f32 %v13555_v54, %v13579_v0 }
 0x4c0   : > { %vm6764_vm14 = vcmp.gt.f32.partialorder %v6627_v48, 0.0  ;;  %v6828_v61 = vmul.f32 0.2, %v6627_v48  ;;  %v6631_v21 = vadd.f32 %v6630_v63, %v6438_v30  ;;  %v6891_v45 = vsel %vm6763_vm13, %v6625_v23, %v6827_v7 }
 0x4c1   : > { %v6632_v22 = vpop.f32.mrf.mxu1  ;;  %v7099_v27 = vadd.f32 %v7030_v26, %v7029_v18  ;;  %6955 = vst [vmem:[%s13604_s12 + $0x70] sm:$0xff] %v6891_v45  ;;  %v7031_v53 = vmul.f32 %v13596_v49, %v6891_v45  ;;  %v6454_v63 = vadd.f32 %v13557_v32, %v13582_v2 }
 0x4c2   : > { %vm6765_vm15 = vcmp.gt.f32.partialorder %v6631_v21, 0.0  ;;  %v6829_v46 = vmul.f32 0.2, %v6631_v21  ;;  %v6633_v34 = vadd.f32 %v6632_v22, %v6440_v40  ;;  %v6892_v4 = vsel %vm6764_vm14, %v6627_v48, %v6828_v61 }
 0x4c3   : > { %v6634_v56 = vpop.f32.mrf.mxu1  ;;  %7100 = vadd.xlane.f32.xlu0 %v7099_v27  ;;  %6956 = vst [vmem:[%s13604_s12 + $0x78] sm:$0xff] %v6892_v4  ;;  %v7032_v41 = vmul.f32 %v13599_v36, %v6892_v4  ;;  %v6458_v22 = vadd.f32 %v13559_v35, %v13579_v0 }
 0x4c4   : > { %vm6766_vm1 = vcmp.gt.f32.partialorder %v6633_v34, 0.0  ;;  %v6830_v9 = vmul.f32 0.2, %v6633_v34  ;;  %v6635_v1 = vadd.f32 %v6634_v56, %v6442_v31  ;;  %v6893_v59 = vsel %vm6765_vm15, %v6631_v21, %v6829_v46  ;;  %v13702_v21 = vpop.f32.mrf.mxu0 }
 0x4c5   : > { %v6636_v52 = vpop.f32.mrf.mxu1  ;;  %v7102_v58 = vadd.f32 %v7032_v41, %v7031_v53  ;;  %6957 = vst [vmem:[%s13604_s12 + $0x80] sm:$0xff] %v6893_v59  ;;  %v7033_v44 = vmul.f32 %v13596_v49, %v6893_v59 }
 0x4c6   : > { %vm6767_vm3 = vcmp.gt.f32.partialorder %v6635_v1, 0.0  ;;  %v6831_v14 = vmul.f32 0.2, %v6635_v1  ;;  %v6637_v51 = vadd.f32 %v6636_v52, %v6444_v13  ;;  %v6894_v37 = vsel %vm6766_vm1, %v6633_v34, %v6830_v9  ;;  %v13712_v9 = vpop.f32.mrf.mxu0 }
 0x4c7   : > { %v6640_v20 = vpop.f32.mrf.mxu1  ;;  %7103 = vadd.xlane.f32.xlu1 %v7102_v58  ;;  %6958 = vst [vmem:[%s13604_s12 + $0x88] sm:$0xff] %v6894_v37  ;;  %v7034_v23 = vmul.f32 %v13599_v36, %v6894_v37  ;;  %v6460_v13 = vadd.f32 %v13561_v24, %v13582_v2  ;;  %v6464_v37 = vadd.f32 %v13565_v6, %v13582_v2 }
 0x4c8   : > { %vm6768_vm4 = vcmp.gt.f32.partialorder %v6637_v51, 0.0  ;;  %v6832_v19 = vmul.f32 0.2, %v6637_v51  ;;  %v6641_v30 = vadd.f32 %v6640_v20, %v6448_v17  ;;  %v6895_v3 = vsel %vm6767_vm3, %v6635_v1, %v6831_v14 }
 0x4c9   : > { %v6642_v7 = vpop.f32.mrf.mxu1  ;;  %v7105_v48 = vadd.f32 %v7034_v23, %v7033_v44  ;;  %6959 = vst [vmem:[%s13604_s12 + $0x90] sm:$0xff] %v6895_v3  ;;  %v7035_v26 = vmul.f32 %v13596_v49, %v6895_v3  ;;  %v6462_v17 = vadd.f32 %v13563_v57, %v13579_v0  ;;  %v13722_v23 = vpop.f32.mrf.mxu0  ;;  %v6468_v3 = vadd.f32 %v13567_v60, %v13579_v0 }
 0x4ca   : > { %vm6769_vm9 = vcmp.gt.f32.partialorder %v6641_v30, 0.0  ;;  %v6833_v12 = vmul.f32 0.2, %v6641_v30  ;;  %v6643_v25 = vadd.f32 %v6642_v7, %v6450_v55  ;;  %v6896_v40 = vsel %vm6768_vm4, %v6637_v51, %v6832_v19 }
 0x4cb   : > { %v6644_v18 = vpop.f32.mrf.mxu1  ;;  %7106 = vadd.xlane.f32.xlu0 %v7105_v48  ;;  %6960 = vst [vmem:[%s13604_s12 + $0x98] sm:$0xff] %v6896_v40  ;;  %v7036_v61 = vmul.f32 %v13599_v36, %v6896_v40 }
 0x4cc   : > { %vm6770_vm5 = vcmp.gt.f32.partialorder %v6643_v25, 0.0  ;;  %v6834_v54 = vmul.f32 0.2, %v6643_v25  ;;  %v6645_v45 = vadd.f32 %v6644_v18, %v6452_v5  ;;  %v6897_v31 = vsel %vm6769_vm9, %v6641_v30, %v6833_v12 }
 0x4cd   : > { %v6646_v27 = vpop.f32.mrf.mxu1  ;;  %v7108_v46 = vadd.f32 %v7036_v61, %v7035_v26  ;;  %6961 = vst [vmem:[%s13604_s12 + $0xa0] sm:$0xff] %v6897_v31  ;;  %v7037_v53 = vmul.f32 %v13596_v49, %v6897_v31  ;;  %v13732_v26 = vpop.f32.mrf.mxu0 }
 0x4ce   : > { %vm6771_vm6 = vcmp.gt.f32.partialorder %v6645_v45, 0.0  ;;  %v6835_v32 = vmul.f32 0.2, %v6645_v45  ;;  %v6647_v34 = vadd.f32 %v6646_v27, %v6454_v63  ;;  %v6898_v4 = vsel %vm6770_vm5, %v6643_v25, %v6834_v54 }
 0x4cf   : > { %v6650_v56 = vpop.f32.mrf.mxu1  ;;  %7109 = vadd.xlane.f32.xlu1 %v7108_v46  ;;  %6962 = vst [vmem:[%s13604_s12 + $0xa8] sm:$0xff] %v6898_v4  ;;  %v7038_v41 = vmul.f32 %v13599_v36, %v6898_v4  ;;  %v6470_v25 = vadd.f32 %v13569_v62, %v13582_v2 }
 0x4d0   : > { %vm6772_vm7 = vcmp.gt.f32.partialorder %v6647_v34, 0.0  ;;  %v6836_v35 = vmul.f32 0.2, %v6647_v34  ;;  %v6651_v1 = vadd.f32 %v6650_v56, %v6458_v22  ;;  %v6899_v59 = vsel %vm6771_vm6, %v6645_v45, %v6835_v32  ;;  %v13742_v56 = vpop.f32.mrf.mxu0 }
 0x4d1   : > { %v6652_v52 = vpop.f32.mrf.mxu1  ;;  %v7111_v58 = vadd.f32 %v7038_v41, %v7037_v53  ;;  %6963 = vst [vmem:[%s13604_s12 + $0xb0] sm:$0xff] %v6899_v59  ;;  %v7039_v20 = vmul.f32 %v13596_v49, %v6899_v59  ;;  %v6472_v45 = vadd.f32 %v13571_v15, %v13579_v0  ;;  %v6474_v32 = vadd.f32 %v13576_v42, %v13582_v2 }
 0x4d2   : > { %vm6773_vm8 = vcmp.gt.f32.partialorder %v6651_v1, 0.0  ;;  %v6837_v24 = vmul.f32 0.2, %v6651_v1  ;;  %v6653_v14 = vadd.f32 %v6652_v52, %v6460_v13  ;;  %v6900_v51 = vsel %vm6772_vm7, %v6647_v34, %v6836_v35 }
 0x4d3   : > { %v6654_v55 = vpop.f32.mrf.mxu1  ;;  %7112 = vadd.xlane.f32.xlu0 %v7111_v58  ;;  %6964 = vst [vmem:[%s13604_s12 + $0xb8] sm:$0xff] %v6900_v51  ;;  %v7040_v44 = vmul.f32 %v13599_v36, %v6900_v51  ;;  %v6478_v35 = vadd.f32 %v13584_v28, %v13579_v0  ;;  %v6480_v58 = vadd.f32 %v13591_v29, %v13582_v2 }
 0x4d4   : > { %vm6774_vm10 = vcmp.gt.f32.partialorder %v6653_v14, 0.0  ;;  %v6838_v57 = vmul.f32 0.2, %v6653_v14  ;;  %v6655_v19 = vadd.f32 %v6654_v55, %v6462_v17  ;;  %v6901_v30 = vsel %vm6773_vm8, %v6651_v1, %v6837_v24 }
 0x4d5   : > { %v6656_v5 = vpop.f32.mrf.mxu1  ;;  %v7114_v7 = vadd.f32 %v7040_v44, %v7039_v20  ;;  %6965 = vst [vmem:[%s13604_s12 + $0xc0] sm:$0xff] %v6901_v30  ;;  %v7041_v63 = vmul.f32 %v13596_v49, %v6901_v30  ;;  %v6482_v44 = vadd.f32 %v13601_v38, %v13579_v0 }
 0x4d6   : > { %vm6775_vm11 = vcmp.gt.f32.partialorder %v6655_v19, 0.0  ;;  %v6839_v6 = vmul.f32 0.2, %v6655_v19  ;;  %v6657_v48 = vadd.f32 %v6656_v5, %v6464_v37  ;;  %v6902_v12 = vsel %vm6774_vm10, %v6653_v14, %v6838_v57  ;;  %v13752_v37 = vpop.f32.mrf.mxu0 }
 0x4d7   : > { %v6660_v40 = vpop.f32.mrf.mxu1  ;;  %7115 = vadd.xlane.f32.xlu1 %v7114_v7  ;;  %6966 = vst [vmem:[%s13604_s12 + $0xc8] sm:$0xff] %v6902_v12  ;;  %v7042_v18 = vmul.f32 %v13599_v36, %v6902_v12  ;;  %v6484_v5 = vadd.f32 %v13612_v8, %v13582_v2 }
 0x4d8   : > { %vm6776_vm12 = vcmp.gt.f32.partialorder %v6657_v48, 0.0  ;;  %v6840_v60 = vmul.f32 0.2, %v6657_v48  ;;  %v6661_v61 = vadd.f32 %v6660_v40, %v6468_v3  ;;  %v6903_v54 = vsel %vm6775_vm11, %v6655_v19, %v6839_v6  ;;  %v13762_v12 = vpop.f32.mrf.mxu0 }
 0x4d9   : > { %v6662_v31 = vpop.f32.mrf.mxu1  ;;  %v7117_v22 = vadd.f32 %v7042_v18, %v7041_v63  ;;  %6967 = vst [vmem:[%s13604_s12 + $0xd0] sm:$0xff] %v6903_v54  ;;  %v7043_v4 = vmul.f32 %v13596_v49, %v6903_v54  ;;  %v6488_v63 = vadd.f32 %v13622_v33, %v13579_v0 }
 0x4da   : > { %vm6777_vm0 = vcmp.gt.f32.partialorder %v6661_v61, 0.0  ;;  %v6841_v62 = vmul.f32 0.2, %v6661_v61  ;;  %v6663_v27 = vadd.f32 %v6662_v31, %v6470_v25  ;;  %v6904_v46 = vsel %vm6776_vm12, %v6657_v48, %v6840_v60 }
 0x4db   : > { %v6664_v34 = vpop.f32.mrf.mxu1  ;;  %7118 = vadd.xlane.f32.xlu0 %v7117_v22  ;;  %6968 = vst [vmem:[%s13604_s12 + $0xd8] sm:$0xff] %v6904_v46  ;;  %v7044_v13 = vmul.f32 %v13599_v36, %v6904_v46 }
 0x4dc   : > { %vm6778_vm2 = vcmp.gt.f32.partialorder %v6663_v27, 0.0  ;;  %v6842_v15 = vmul.f32 0.2, %v6663_v27  ;;  %v6665_v53 = vadd.f32 %v6664_v34, %v6472_v45  ;;  %v6905_v41 = vsel %vm6777_vm0, %v6661_v61, %v6841_v62 }
 0x4dd   : > { %v6666_v1 = vpop.f32.mrf.mxu1  ;;  %v7120_v59 = vadd.f32 %v7044_v13, %v7043_v4  ;;  %6969 = vst [vmem:[%s13604_s12 + $0xe0] sm:$0xff] %v6905_v41  ;;  %v7045_v14 = vmul.f32 %v13596_v49, %v6905_v41  ;;  %v6490_v45 = vadd.f32 %v13632_v50, %v13582_v2  ;;  %v6492_v34 = vadd.f32 %v13642_v47, %v13579_v0 }
 0x4de   : > { %vm6779_vm13 = vcmp.gt.f32.partialorder %v6665_v53, 0.0  ;;  %v6843_v42 = vmul.f32 0.2, %v6665_v53  ;;  %v6667_v17 = vadd.f32 %v6666_v1, %v6474_v32  ;;  %v6906_v52 = vsel %vm6778_vm2, %v6663_v27, %v6842_v15  ;;  %v13772_v27 = vpop.f32.mrf.mxu0 }
 0x4df   : > { %v6670_v24 = vpop.f32.mrf.mxu1  ;;  %7121 = vadd.xlane.f32.xlu1 %v7120_v59  ;;  %6970 = vst [vmem:[%s13604_s12 + $0xe8] sm:$0xff] %v6906_v52  ;;  %v7046_v51 = vmul.f32 %v13599_v36, %v6906_v52  ;;  %v6494_v41 = vadd.f32 %v13652_v10, %v13582_v2 }
 0x4e0   : > { %vm6780_vm14 = vcmp.gt.f32.partialorder %v6667_v17, 0.0  ;;  %v6844_v28 = vmul.f32 0.2, %v6667_v17  ;;  %v6671_v55 = vadd.f32 %v6670_v24, %v6478_v35  ;;  %v6907_v20 = vsel %vm6779_vm13, %v6665_v53, %v6843_v42  ;;  %v13782_v42 = vpop.f32.mrf.mxu0 }
 0x4e1   : > { %v6672_v57 = vpop.f32.mrf.mxu1  ;;  %v7123_v19 = vadd.f32 %v7046_v51, %v7045_v14  ;;  %6971 = vst [vmem:[%s13604_s12 + $0xf0] sm:$0xff] %v6907_v20  ;;  %v7047_v6 = vmul.f32 %v13596_v49, %v6907_v20 }
 0x4e2   : > { %vm6781_vm15 = vcmp.gt.f32.partialorder %v6671_v55, 0.0  ;;  %v6845_v29 = vmul.f32 0.2, %v6671_v55  ;;  %v6673_v30 = vadd.f32 %v6672_v57, %v6480_v58  ;;  %v6908_v3 = vsel %vm6780_vm14, %v6667_v17, %v6844_v28 }
 0x4e3   : > { %v6674_v7 = vpop.f32.mrf.mxu1  ;;  %7124 = vadd.xlane.f32.xlu0 %v7123_v19  ;;  %6972 = vst [vmem:[%s13604_s12 + $0xf8] sm:$0xff] %v6908_v3  ;;  %v7048_v48 = vmul.f32 %v13599_v36, %v6908_v3  ;;  %v6498_v58 = vadd.f32 %v13662_v16, %v13579_v0  ;;  %v13792_v19 = vpop.f32.mrf.mxu0  ;;  %v6502_v3 = vadd.f32 %v13682_v11, %v13579_v0 }
 0x4e4   : > { %vm6782_vm1 = vcmp.gt.f32.partialorder %v6673_v30, 0.0  ;;  %v6846_v38 = vmul.f32 0.2, %v6673_v30  ;;  %v6675_v25 = vadd.f32 %v6674_v7, %v6482_v44  ;;  %v6909_v40 = vsel %vm6781_vm15, %v6671_v55, %v6845_v29 }
 0x4e5   : > { %v6676_v18 = vpop.f32.mrf.mxu1  ;;  %v7126_v60 = vadd.f32 %v7048_v48, %v7047_v6  ;;  %6973 = vst [vmem:[%s13604_s12 + $0x100] sm:$0xff] %v6909_v40  ;;  %v7049_v22 = vmul.f32 %v13596_v49, %v6909_v40  ;;  %v6500_v55 = vadd.f32 %v13672_v43, %v13582_v2 }
 0x4e6   : > { %vm6783_vm3 = vcmp.gt.f32.partialorder %v6675_v25, 0.0  ;;  %v6847_v8 = vmul.f32 0.2, %v6675_v25  ;;  %v6677_v61 = vadd.f32 %v6676_v18, %v6484_v5  ;;  %v6910_v54 = vsel %vm6782_vm1, %v6673_v30, %v6846_v38  ;;  %v13802_v18 = vpop.f32.mrf.mxu0 }
 0x4e7   : > { %v6680_v31 = vpop.f32.mrf.mxu1  ;;  %7127 = vadd.xlane.f32.xlu1 %v7126_v60  ;;  %6974 = vst [vmem:[%s13604_s12 + $0x108] sm:$0xff] %v6910_v54  ;;  %v7050_v62 = vmul.f32 %v13599_v36, %v6910_v54  ;;  %v6504_v38 = vadd.f32 %v13692_v39, %v13582_v2 }
 0x4e8   : > { %vm6784_vm4 = vcmp.gt.f32.partialorder %v6677_v61, 0.0  ;;  %v6848_v33 = vmul.f32 0.2, %v6677_v61  ;;  %v6681_v46 = vadd.f32 %v6680_v31, %v6488_v63  ;;  %v6911_v32 = vsel %vm6783_vm3, %v6675_v25, %v6847_v8 }
 0x4e9   : > { %v6682_v4 = vpop.f32.mrf.mxu1  ;;  %v7129_v13 = vadd.f32 %v7050_v62, %v7049_v22  ;;  %6975 = vst [vmem:[%s13604_s12 + $0x110] sm:$0xff] %v6911_v32  ;;  %v7051_v1 = vmul.f32 %v13596_v49, %v6911_v32  ;;  %v6510_v62 = vadd.f32 %v13712_v9, %v13582_v2 }
 0x4ea   : > { %vm6785_vm9 = vcmp.gt.f32.partialorder %v6681_v46, 0.0  ;;  %v6849_v50 = vmul.f32 0.2, %v6681_v46  ;;  %v6683_v15 = vadd.f32 %v6682_v4, %v6490_v45  ;;  %v6912_v53 = vsel %vm6784_vm4, %v6677_v61, %v6848_v33 }
 0x4eb   : > { %v6684_v35 = vpop.f32.mrf.mxu1  ;;  %7130 = vadd.xlane.f32.xlu0 %v7129_v13  ;;  %6976 = vst [vmem:[%s13604_s12 + $0x118] sm:$0xff] %v6912_v53  ;;  %v7052_v59 = vmul.f32 %v13599_v36, %v6912_v53  ;;  %v6508_v61 = vadd.f32 %v13702_v21, %v13579_v0 }
 0x4ec   : > { %vm6786_vm5 = vcmp.gt.f32.partialorder %v6683_v15, 0.0  ;;  %v6850_v47 = vmul.f32 0.2, %v6683_v15  ;;  %v6685_v17 = vadd.f32 %v6684_v35, %v6492_v34  ;;  %v6913_v52 = vsel %vm6785_vm9, %v6681_v46, %v6849_v50  ;;  %v13812_v34 = vpop.f32.mrf.mxu0 }
 0x4ed   : > { %v6686_v24 = vpop.f32.mrf.mxu1  ;;  %v7132_v14 = vadd.f32 %v7052_v59, %v7051_v1  ;;  %6977 = vst [vmem:[%s13604_s12 + $0x120] sm:$0xff] %v6913_v52  ;;  %v7053_v44 = vmul.f32 %v13596_v49, %v6913_v52  ;;  %v6512_v50 = vadd.f32 %v13722_v23, %v13579_v0  ;;  %v6514_v1 = vadd.f32 %v13732_v26, %v13582_v2 }
 0x4ee   : > { %vm6787_vm6 = vcmp.gt.f32.partialorder %v6685_v17, 0.0  ;;  %v6851_v10 = vmul.f32 0.2, %v6685_v17  ;;  %v6687_v51 = vadd.f32 %v6686_v24, %v6494_v41  ;;  %v6914_v28 = vsel %vm6786_vm5, %v6683_v15, %v6850_v47  ;;  %v13822_v52 = vpop.f32.mrf.mxu0 }
 0x4ef   : > { %v6690_v20 = vpop.f32.mrf.mxu1  ;;  %7133 = vadd.xlane.f32.xlu1 %v7132_v14  ;;  %6978 = vst [vmem:[%s13604_s12 + $0x128] sm:$0xff] %v6914_v28  ;;  %v7054_v57 = vmul.f32 %v13599_v36, %v6914_v28  ;;  %v6518_v14 = vadd.f32 %v13742_v56, %v13579_v0 }
 0x4f0   : > { %vm6788_vm7 = vcmp.gt.f32.partialorder %v6687_v51, 0.0  ;;  %v6852_v16 = vmul.f32 0.2, %v6687_v51  ;;  %v6691_v29 = vadd.f32 %v6690_v20, %v6498_v58  ;;  %v6915_v30 = vsel %vm6787_vm6, %v6685_v17, %v6851_v10 }
 0x4f1   : > { %v6692_v5 = vpop.f32.mrf.mxu1  ;;  %v7135_v7 = vadd.f32 %v7054_v57, %v7053_v44  ;;  %6979 = vst [vmem:[%s13604_s12 + $0x130] sm:$0xff] %v6915_v30  ;;  %v7055_v40 = vmul.f32 %v13596_v49, %v6915_v30  ;;  %v6520_v20 = vadd.f32 %v13752_v37, %v13582_v2 }
 0x4f2   : > { %vm6789_vm8 = vcmp.gt.f32.partialorder %v6691_v29, 0.0  ;;  %v6853_v43 = vmul.f32 0.2, %v6691_v29  ;;  %v6693_v6 = vadd.f32 %v6692_v5, %v6500_v55  ;;  %v6916_v48 = vsel %vm6788_vm7, %v6687_v51, %v6852_v16 }
 0x4f3   : > { %v6694_v25 = vpop.f32.mrf.mxu1  ;;  %7136 = vadd.xlane.f32.xlu0 %v7135_v7  ;;  %6980 = vst [vmem:[%s13604_s12 + $0x138] sm:$0xff] %v6916_v48  ;;  %v7056_v63 = vmul.f32 %v13599_v36, %v6916_v48  ;;  %v6522_v5 = vadd.f32 %v13762_v12, %v13579_v0 }
 0x4f4   : > { %vm6790_vm10 = vcmp.gt.f32.partialorder %v6693_v6, 0.0  ;;  %v6854_v11 = vmul.f32 0.2, %v6693_v6  ;;  %v6695_v60 = vadd.f32 %v6694_v25, %v6502_v3  ;;  %v6917_v8 = vsel %vm6789_vm8, %v6691_v29, %v6853_v43  ;;  %v13832_v29 = vpop.f32.mrf.mxu0 }
 0x4f5   : > { %v6696_v54 = vpop.f32.mrf.mxu1  ;;  %v7138_v45 = vadd.f32 %v7056_v63, %v7055_v40  ;;  %6981 = vst [vmem:[%s13604_s12 + $0x140] sm:$0xff] %v6917_v8  ;;  %v7057_v46 = vmul.f32 %v13596_v49, %v6917_v8 }
 0x4f6   : > { %vm6791_vm11 = vcmp.gt.f32.partialorder %v6695_v60, 0.0  ;;  %v6855_v39 = vmul.f32 0.2, %v6695_v60  ;;  %v6697_v31 = vadd.f32 %v6696_v54, %v6504_v38  ;;  %v6918_v22 = vsel %vm6790_vm10, %v6693_v6, %v6854_v11  ;;  %v13842_v11 = vpop.f32.mrf.mxu0 }
 0x4f7   : > { %v6700_v33 = vpop.f32.mrf.mxu1  ;;  %7139 = vadd.xlane.f32.xlu1 %v7138_v45  ;;  %6982 = vst [vmem:[%s13604_s12 + $0x148] sm:$0xff] %v6918_v22  ;;  %v7058_v32 = vmul.f32 %v13599_v36, %v6918_v22  ;;  %v6524_v38 = vadd.f32 %v13772_v27, %v13582_v2  ;;  %v6530_v22 = vadd.f32 %v13792_v19, %v13582_v2 }
 0x4f8   : > { %vm6792_vm12 = vcmp.gt.f32.partialorder %v6697_v31, 0.0  ;;  %v6856_v21 = vmul.f32 0.2, %v6697_v31  ;;  %v6701_v4 = vadd.f32 %v6700_v33, %v6508_v61  ;;  %v6919_v13 = vsel %vm6791_vm11, %v6695_v60, %v6855_v39 }
 0x4f9   : > { %v6702_v15 = vpop.f32.mrf.mxu1  ;;  %v7141_v53 = vadd.f32 %v7058_v32, %v7057_v46  ;;  %6983 = vst [vmem:[%s13604_s12 + $0x150] sm:$0xff] %v6919_v13  ;;  %v7059_v47 = vmul.f32 %v13596_v49, %v6919_v13  ;;  %v6528_v61 = vadd.f32 %v13782_v42, %v13579_v0  ;;  %v6543_v32 = vpop.f32.mrf.mxu0  ;;  %v6532_v13 = vadd.f32 %v13802_v18, %v13579_v0 }
 0x4fa   : > { %vm6793_vm0 = vcmp.gt.f32.partialorder %v6701_v4, 0.0  ;;  %v6857_v9 = vmul.f32 0.2, %v6701_v4  ;;  %v6703_v41 = vadd.f32 %v6702_v15, %v6510_v62  ;;  %v6920_v35 = vsel %vm6792_vm12, %v6697_v31, %v6856_v21 }
 0x4fb   : > { %v6704_v59 = vpop.f32.mrf.mxu1  ;;  %7142 = vadd.xlane.f32.xlu0 %v7141_v53  ;;  %6984 = vst [vmem:[%s13604_s12 + $0x158] sm:$0xff] %v6920_v35  ;;  %v7060_v17 = vmul.f32 %v13599_v36, %v6920_v35 }
 0x4fc   : > { %vm6794_vm2 = vcmp.gt.f32.partialorder %v6703_v41, 0.0  ;;  %v6858_v23 = vmul.f32 0.2, %v6703_v41  ;;  %v6705_v58 = vadd.f32 %v6704_v59, %v6512_v50  ;;  %v6921_v24 = vsel %vm6793_vm0, %v6701_v4, %v6857_v9 }
 0x4fd   : > { %v6706_v10 = vpop.f32.mrf.mxu1  ;;  %v7144_v51 = vadd.f32 %v7060_v17, %v7059_v47  ;;  %6985 = vst [vmem:[%s13604_s12 + $0x160] sm:$0xff] %v6921_v24  ;;  %v7061_v57 = vmul.f32 %v13596_v49, %v6921_v24  ;;  %v6547_v47 = vpop.f32.mrf.mxu0 }
 0x4fe   : > { %vm6795_vm13 = vcmp.gt.f32.partialorder %v6705_v58, 0.0  ;;  %v6859_v26 = vmul.f32 0.2, %v6705_v58  ;;  %v6707_v28 = vadd.f32 %v6706_v10, %v6514_v1  ;;  %v6922_v55 = vsel %vm6794_vm2, %v6703_v41, %v6858_v23 }
 0x4ff   : > { %v6710_v44 = vpop.f32.mrf.mxu1  ;;  %7145 = vadd.xlane.f32.xlu1 %v7144_v51  ;;  %6986 = vst [vmem:[%s13604_s12 + $0x168] sm:$0xff] %v6922_v55  ;;  %v7062_v16 = vmul.f32 %v13599_v36, %v6922_v55  ;;  %v6534_v41 = vadd.f32 %v13812_v34, %v13582_v2 }
 0x500   : > { %vm6796_vm14 = vcmp.gt.f32.partialorder %v6707_v28, 0.0  ;;  %v6860_v56 = vmul.f32 0.2, %v6707_v28  ;;  %v6711_v30 = vadd.f32 %v6710_v44, %v6518_v14  ;;  %v6923_v3 = vsel %vm6795_vm13, %v6705_v58, %v6859_v26  ;;  %v6549_v44 = vpop.f32.mrf.mxu0 }
 0x501   : > { %v6712_v7 = vpop.f32.mrf.mxu1  ;;  %v7147_v43 = vadd.f32 %v7062_v16, %v7061_v57  ;;  %6987 = vst [vmem:[%s13604_s12 + $0x170] sm:$0xff] %v6923_v3  ;;  %v7063_v40 = vmul.f32 %v13596_v49, %v6923_v3  ;;  %v6538_v58 = vadd.f32 %v13822_v52, %v13579_v0  ;;  %v6540_v26 = vadd.f32 %v13832_v29, %v13582_v2 }
 0x502   : > { %vm6797_vm15 = vcmp.gt.f32.partialorder %v6711_v30, 0.0  ;;  %v6861_v37 = vmul.f32 0.2, %v6711_v30  ;;  %v6713_v6 = vadd.f32 %v6712_v7, %v6520_v20  ;;  %v6924_v48 = vsel %vm6796_vm14, %v6707_v28, %v6860_v56 }
 0x503   : > { %v6714_v25 = vpop.f32.mrf.mxu1  ;;  %7148 = vadd.xlane.f32.xlu0 %v7147_v43  ;;  %6988 = vst [vmem:[%s13604_s12 + $0x178] sm:$0xff] %v6924_v48  ;;  %v7064_v63 = vmul.f32 %v13599_v36, %v6924_v48  ;;  %v6542_v56 = vadd.f32 %v13842_v11, %v13579_v0  ;;  %v6544_v43 = vadd.f32 %v6543_v32, %v13582_v2 }
 0x504   : > { %vm6798_vm1 = vcmp.gt.f32.partialorder %v6713_v6, 0.0  ;;  %v6862_v12 = vmul.f32 0.2, %v6713_v6  ;;  %v6715_v60 = vadd.f32 %v6714_v25, %v6522_v5  ;;  %v6925_v8 = vsel %vm6797_vm15, %v6711_v30, %v6861_v37 }
 0x505   : > { %v6716_v54 = vpop.f32.mrf.mxu1  ;;  %v7150_v45 = vadd.f32 %v7064_v63, %v7063_v40  ;;  %6989 = vst [vmem:[%s13604_s12 + $0x180] sm:$0xff] %v6925_v8  ;;  %v7065_v33 = vmul.f32 %v13596_v49, %v6925_v8  ;;  %v6548_v11 = vadd.f32 %v6547_v47, %v13579_v0  ;;  %vm7408_vm15 = vcmask 7168  }
 0x506   : > { %vm6799_vm3 = vcmp.gt.f32.partialorder %v6715_v60, 0.0  ;;  %v6863_v27 = vmul.f32 0.2, %v6715_v60  ;;  %v6717_v39 = vadd.f32 %v6716_v54, %v6524_v38  ;;  %v6926_v31 = vsel %vm6798_vm1, %v6713_v6, %v6862_v12  ;;  %v6551_v38 = vpop.f32.mrf.mxu0 }
 0x507   : > { %v6720_v62 = vpop.f32.mrf.mxu1  ;;  %7151 = vadd.xlane.f32.xlu1 %v7150_v45  ;;  %6990 = vst [vmem:[%s13604_s12 + $0x188] sm:$0xff] %v6926_v31  ;;  %v7066_v46 = vmul.f32 %v13599_v36, %v6926_v31  ;;  %v6550_v45 = vadd.f32 %v6549_v44, %v13582_v2  ;;  %v6552_v32 = vadd.f32 %v6551_v38, %v13579_v0 }
 0x508   : > { %vm6800_vm4 = vcmp.gt.f32.partialorder %v6717_v39, 0.0  ;;  %v6864_v42 = vmul.f32 0.2, %v6717_v39  ;;  %v6721_v21 = vadd.f32 %v6720_v62, %v6528_v61  ;;  %v6927_v4 = vsel %vm6799_vm3, %v6715_v60, %v6863_v27 }
 0x509   : > { %v6722_v50 = vpop.f32.mrf.mxu1  ;;  %v7153_v15 = vadd.f32 %v7066_v46, %v7065_v33  ;;  %6991 = vst [vmem:[%s13604_s12 + $0x190] sm:$0xff] %v6927_v4  ;;  %v7067_v1 = vmul.f32 %v13596_v49, %v6927_v4 }
 0x50a   : > { %vm6801_vm9 = vcmp.gt.f32.partialorder %v6721_v21, 0.0  ;;  %v6865_v19 = vmul.f32 0.2, %v6721_v21  ;;  %v6723_v53 = vadd.f32 %v6722_v50, %v6530_v22  ;;  %v6928_v9 = vsel %vm6800_vm4, %v6717_v39, %v6864_v42  ;;  %v6553_v22 = vpop.f32.mrf.mxu0 }
 0x50b   : > { %v6724_v35 = vpop.f32.mrf.mxu1  ;;  %7154 = vadd.xlane.f32.xlu0 %v7153_v15  ;;  %6992 = vst [vmem:[%s13604_s12 + $0x198] sm:$0xff] %v6928_v9  ;;  %v7068_v59 = vmul.f32 %v13599_v36, %v6928_v9  ;;  %v6554_v15 = vadd.f32 %v6553_v22, %v13582_v2 }
 0x50c   : > { %vm6802_vm5 = vcmp.gt.f32.partialorder %v6723_v53, 0.0  ;;  %v6866_v18 = vmul.f32 0.2, %v6723_v53  ;;  %v6725_v17 = vadd.f32 %v6724_v35, %v6532_v13  ;;  %v6929_v23 = vsel %vm6801_vm9, %v6721_v21, %v6865_v19 }
 0x50d   : > { %v6726_v24 = vpop.f32.mrf.mxu1  ;;  %v7156_v14 = vadd.f32 %v7068_v59, %v7067_v1  ;;  %6993 = vst [vmem:[%s13604_s12 + $0x1a0] sm:$0xff] %v6929_v23  ;;  %v7069_v55 = vmul.f32 %v13596_v49, %v6929_v23 }
 0x50e   : > { %vm6803_vm6 = vcmp.gt.f32.partialorder %v6725_v17, 0.0  ;;  %v6867_v34 = vmul.f32 0.2, %v6725_v17  ;;  %v6727_v10 = vadd.f32 %v6726_v24, %v6534_v41  ;;  %v6930_v51 = vsel %vm6802_vm5, %v6723_v53, %v6866_v18 }
 0x50f   : > { %v6730_v28 = vpop.f32.mrf.mxu1  ;;  %7157 = vadd.xlane.f32.xlu1 %v7156_v14  ;;  %6994 = vst [vmem:[%s13604_s12 + $0x1a8] sm:$0xff] %v6930_v51  ;;  %v7070_v20 = vmul.f32 %v13599_v36, %v6930_v51 }
 0x510   : > { %vm6804_vm7 = vcmp.gt.f32.partialorder %v6727_v10, 0.0  ;;  %v6868_v52 = vmul.f32 0.2, %v6727_v10  ;;  %v6731_v57 = vadd.f32 %v6730_v28, %v6538_v58  ;;  %v6931_v16 = vsel %vm6803_vm6, %v6725_v17, %v6867_v34  ;;  %v13895_v28 = vld [vmem:[#allocation2] ss:$0 sm:$0xff] }
 0x511   : > { %v6732_v30 = vpop.f32.mrf.mxu1  ;;  %v7159_v3 = vadd.f32 %v7070_v20, %v7069_v55  ;;  %6995 = vst [vmem:[%s13604_s12 + $0x1b0] sm:$0xff] %v6931_v16  ;;  %v7071_v6 = vmul.f32 %v13596_v49, %v6931_v16 }
 0x512   : > { %vm6805_vm8 = vcmp.gt.f32.partialorder %v6731_v57, 0.0  ;;  %v6869_v29 = vmul.f32 0.2, %v6731_v57  ;;  %v6733_v5 = vadd.f32 %v6732_v30, %v6540_v26  ;;  %v6932_v7 = vsel %vm6804_vm7, %v6727_v10, %v6868_v52 }
 0x513   : > { %v6734_v37 = vpop.f32.mrf.mxu1  ;;  %7160 = vadd.xlane.f32.xlu0 %v7159_v3  ;;  %6996 = vst [vmem:[%s13604_s12 + $0x1b8] sm:$0xff] %v6932_v7  ;;  %v7072_v48 = vmul.f32 %v13599_v36, %v6932_v7 }
 0x514   : > { %vm6806_vm10 = vcmp.gt.f32.partialorder %v6733_v5, 0.0  ;;  %v6870_v25 = vmul.f32 0.2, %v6733_v5  ;;  %v6735_v40 = vadd.f32 %v6734_v37, %v6542_v56  ;;  %v6933_v63 = vsel %vm6805_vm8, %v6731_v57, %v6869_v29 }
 0x515   : > { %v6736_v12 = vpop.f32.mrf.mxu1  ;;  %v7162_v60 = vadd.f32 %v7072_v48, %v7071_v6  ;;  %6997 = vst [vmem:[%s13604_s12 + $0x1c0] sm:$0xff] %v6933_v63  ;;  %v7073_v39 = vmul.f32 %v13596_v49, %v6933_v63 }
 0x516   : > { %vm6807_vm11 = vcmp.gt.f32.partialorder %v6735_v40, 0.0  ;;  %v6871_v8 = vmul.f32 0.2, %v6735_v40  ;;  %v6737_v61 = vadd.f32 %v6736_v12, %v6544_v43  ;;  %v6934_v54 = vsel %vm6806_vm10, %v6733_v5, %v6870_v25 }
 0x517   : > { %v6740_v27 = vpop.f32.mrf.mxu1  ;;  %7163 = vadd.xlane.f32.xlu1 %v7162_v60  ;;  %6998 = vst [vmem:[%s13604_s12 + $0x1c8] sm:$0xff] %v6934_v54  ;;  %v7074_v31 = vmul.f32 %v13599_v36, %v6934_v54 }
 0x518   : > { %vm6808_vm12 = vcmp.gt.f32.partialorder %v6737_v61, 0.0  ;;  %v6872_v62 = vmul.f32 0.2, %v6737_v61  ;;  %v6741_v33 = vadd.f32 %v6740_v27, %v6548_v11  ;;  %v6935_v46 = vsel %vm6807_vm11, %v6735_v40, %v6871_v8 }
 0x519   : > { %v6742_v42 = vpop.f32.mrf.mxu1  ;;  %v7165_v21 = vadd.f32 %v7074_v31, %v7073_v39  ;;  %6999 = vst [vmem:[%s13604_s12 + $0x1d0] sm:$0xff] %v6935_v46  ;;  %v7075_v53 = vmul.f32 %v13596_v49, %v6935_v46 }
 0x51a   : > { %vm6809_vm0 = vcmp.gt.f32.partialorder %v6741_v33, 0.0  ;;  %v6873_v4 = vmul.f32 0.2, %v6741_v33  ;;  %v6743_v13 = vadd.f32 %v6742_v42, %v6550_v45  ;;  %v6936_v50 = vsel %vm6808_vm12, %v6737_v61, %v6872_v62 }
 0x51b   : > { %v6744_v19 = vpop.f32.mrf.mxu1  ;;  %7166 = vadd.xlane.f32.xlu0 %v7165_v21  ;;  %7000 = vst [vmem:[%s13604_s12 + $0x1d8] sm:$0xff] %v6936_v50  ;;  %v7076_v9 = vmul.f32 %v13599_v36, %v6936_v50 }
 0x51c   : > { %vm6810_vm2 = vcmp.gt.f32.partialorder %v6743_v13, 0.0  ;;  %v6874_v0 = vmul.f32 0.2, %v6743_v13  ;;  %v6745_v41 = vadd.f32 %v6744_v19, %v6552_v32  ;;  %v6937_v35 = vsel %vm6809_vm0, %v6741_v33, %v6873_v4 }
 0x51d   : > { %v6746_v1 = vpop.f32.mrf.mxu1  ;;  %v7168_v59 = vadd.f32 %v7076_v9, %v7075_v53  ;;  %7001 = vst [vmem:[%s13604_s12 + $0x1e0] sm:$0xff] %v6937_v35  ;;  %v7077_v17 = vmul.f32 %v13596_v49, %v6937_v35 }
 0x51e   : > { %vm6811_vm13 = vcmp.gt.f32.partialorder %v6745_v41, 0.0  ;;  %v6875_v47 = vmul.f32 0.2, %v6745_v41  ;;  %v6747_v2 = vadd.f32 %v6746_v1, %v6554_v15  ;;  %v6938_v18 = vsel %vm6810_vm2, %v6743_v13, %v6874_v0 }
 0x51f   : > { %7169 = vadd.xlane.f32.xlu1 %v7168_v59  ;;  %7002 = vst [vmem:[%s13604_s12 + $0x1e8] sm:$0xff] %v6938_v18  ;;  %v7078_v23 = vmul.f32 %v13599_v36, %v6938_v18 }
 0x520   : > { %vm6812_vm14 = vcmp.gt.f32.partialorder %v6747_v2, 0.0  ;;  %v6876_v58 = vmul.f32 0.2, %v6747_v2  ;;  %v6939_v24 = vsel %vm6811_vm13, %v6745_v41, %v6875_v47 }
 0x521   : > { %v7171_v14 = vadd.f32 %v7078_v23, %v7077_v17  ;;  %7003 = vst [vmem:[%s13604_s12 + $0x1f0] sm:$0xff] %v6939_v24  ;;  %v7079_v10 = vmul.f32 %v13596_v49, %v6939_v24 }
 0x522   : > { %v6940_v34 = vsel %vm6812_vm14, %v6747_v2, %v6876_v58 }
 0x523   : > { %7172 = vadd.xlane.f32.xlu0 %v7171_v14  ;;  %7004 = vst [vmem:[%s13604_s12 + $0x1f8] sm:$0xff] %v6940_v34  ;;  %v7080_v51 = vmul.f32 %v13599_v36, %v6940_v34  ;;  %s8822_s12 = sshll.u32 %s8894_s29, 4  ;;  %s8823_s12 = int_to_ptr.vmem [resolvable:$false] %s8822_s12 }
 0x524   : > { %s8824_s14 = scalar_lea.vmem %s8823_s12, 16384  ;;  %p8825_p4 = scmp.lt.s32.totalorder %s13920_s22, %s8823_s12 }
 0x525   : > { %v7174_v26 = vadd.f32 %v7080_v51, %v7079_v10  ;;  %p8826_p7 = scmp.lt.s32.totalorder %s8824_s14, %s8818_s28 }
 0x527   : > { %7175 = vadd.xlane.f32.xlu1 %v7174_v26  ;;  %p8827_p5 = por %p8826_p7, %p8825_p4 }
 0x529   : > { %p8828_p6 = pnand %p8827_p5, %p8821_p3 }
 0x534   : > { %v7083_v55 = vpop.xlane.xlu0 %7082 }
 0x535   : > { %v7184_v20 = vadd.f32 %v13895_v28, %v7083_v55 }
 0x537   : > { %v8015_v44 = vmul.f32 -1.442695, %v7184_v20 }
 0x538   : > { %v7086_v52 = vpop.xlane.xlu0 %7085 }
 0x539   : > { %8610 = vpow2.f32 %v8015_v44  ;;  %v7185_v57 = vadd.f32 %v13895_v28, %v7086_v52 }
 0x53b   : > { %v8016_v16 = vmul.f32 -1.442695, %v7185_v57 }
 0x53c   : > { %v7089_v56 = vpop.xlane.xlu1 %7088 }
 0x53d   : > { %8612 = vpow2.f32 %v8016_v16  ;;  %v7186_v30 = vadd.f32 %v13895_v28, %v7089_v56 }
 0x53f   : > { %v8017_v49 = vmul.f32 -1.442695, %v7186_v30 }
 0x540   : > { %v7092_v3 = vpop.xlane.xlu1 %7091 }
 0x541   : > { %8614 = vpow2.f32 %v8017_v49  ;;  %v7187_v36 = vadd.f32 %v13895_v28, %v7092_v3 }
 0x543   : > { %v8018_v29 = vmul.f32 -1.442695, %v7187_v36 }
 0x544   : > { %v7095_v5 = vpop.xlane.xlu0 %7094 }
 0x545   : > { %8616 = vpow2.f32 %v8018_v29  ;;  %v7188_v7 = vadd.f32 %v13895_v28, %v7095_v5 }
 0x546   : > { %v8611_v43 = vpop.eup %8610 }
 0x547   : > { %v7312_v37 = vadd.f32 1.0, %v8611_v43  ;;  %v8019_v6 = vmul.f32 -1.442695, %v7188_v7 }
 0x548   : > { %v7098_v48 = vpop.xlane.xlu1 %7097 }
 0x549   : > { %8618 = vrcp.f32 %v7312_v37  ;;  %v7189_v38 = vadd.f32 %v13895_v28, %v7098_v48 }
 0x54a   : > { %v8613_v25 = vpop.eup %8612  ;;  %8620 = vpow2.f32 %v8019_v6 }
 0x54b   : > { %v7313_v40 = vadd.f32 1.0, %v8613_v25  ;;  %v8020_v63 = vmul.f32 -1.442695, %v7189_v38 }
 0x54c   : > { %v7101_v11 = vpop.xlane.xlu0 %7100 }
 0x54d   : > { %8622 = vrcp.f32 %v7313_v40  ;;  %v7190_v12 = vadd.f32 %v13895_v28, %v7101_v11 }
 0x54e   : > { %v8615_v60 = vpop.eup %8614  ;;  %8624 = vpow2.f32 %v8020_v63 }
 0x54f   : > { %v7314_v8 = vadd.f32 1.0, %v8615_v60  ;;  %v8021_v61 = vmul.f32 -1.442695, %v7190_v12 }
 0x550   : > { %v7104_v54 = vpop.xlane.xlu1 %7103 }
 0x551   : > { %8626 = vrcp.f32 %v7314_v8  ;;  %v7191_v45 = vadd.f32 %v13895_v28, %v7104_v54 }
 0x552   : > { %v8617_v27 = vpop.eup %8616  ;;  %8628 = vpow2.f32 %v8021_v61 }
 0x553   : > { %v7315_v39 = vadd.f32 1.0, %v8617_v27  ;;  %v8022_v31 = vmul.f32 -1.442695, %v7191_v45 }
 0x554   : > { %v7107_v22 = vpop.xlane.xlu0 %7106 }
 0x555   : > { %8630 = vrcp.f32 %v7315_v39  ;;  %v7192_v62 = vadd.f32 %v13895_v28, %v7107_v22 }
 0x556   : > { %v8619_v33 = vpop.eup %8618  ;;  %8632 = vpow2.f32 %v8022_v31 }
 0x557   : > { %v8621_v46 = vpop.eup %8620  ;;  %7409 = vst.msk [vmem:[%s13910_s21] sm:$0xff] %vm7408_vm15, %v8619_v33  ;;  %v8023_v32 = vmul.f32 -1.442695, %v7192_v62 }
 0x558   : > { %v7316_v42 = vadd.f32 1.0, %v8621_v46  ;;  %v7110_v21 = vpop.xlane.xlu1 %7109 }
 0x559   : > { %8831 = shalt.err (!%p8828_p6)
}
 0x55a   : > { %s8832_s27 = scalar_lea.hbm %s13917_s26, 8192  ;;  %s8836_s11 = scalar_lea.hbm %s14061_s10, 16384 }
 0x55b   : > { %p8833_p10 = scmp.ne.s32.totalorder %s13917_s26, %s8832_s27  ;;  %p8837_p11 = scmp.lt.s32.totalorder %s13917_s26, %s14061_s10 }
 0x55c   : > { %p8838_p0 = scmp.lt.s32.totalorder %s8836_s11, %s8832_s27 }
 0x55d   : > { %p8834_p8 = pnand %p8833_p10, %p15017_p2 }
 0x55e   : > { %p8839_p12 = por %p8838_p0, %p8837_p11 }
 0x55f   : > { %p8835_p13 = pneg %p8834_p8 }
 0x561   : > { %p8840_p1 = pnand %p8839_p12, %p8835_p13 }
 0x563   : > { %8843 = shalt.err (!%p8840_p1)
}
 0x564   : > { %s8895_s28 = smov 256   ;;  %s8896_s12 = smov 16   ;;  %8634 = vpow2.f32 %v8023_v32  ;;  %v7193_v4 = vadd.f32 %v13895_v28, %v7110_v21  ;;  %v8623_v13 = vpop.eup %8622  ;;  %v7113_v53 = vpop.xlane.xlu0 %7112 }
 0x565   : > { %8067 = dma.vmem_to_hbm [thread:$0]  (%p15017_p2), %s13920_s22, 8192, %s13917_s26, %s13926_s8, %s8895_s28, %s8895_s28, %s8896_s12   ;;  %8636 = vrcp.f32 %v7316_v42  ;;  %v8625_v50 = vpop.eup %8624  ;;  %v7194_v9 = vadd.f32 %v13895_v28, %v7113_v53  ;;  %v7116_v59 = vpop.xlane.xlu1 %7115 }
 0x566   : > { %7410 = vst.msk [vmem:[%s13910_s21 + $0x8] sm:$0xff] %vm7408_vm15, %v8623_v13  ;;  %v8024_v15 = vmul.f32 -1.442695, %v7193_v4  ;;  %v7317_v19 = vadd.f32 1.0, %v8625_v50  ;;  %v8627_v0 = vpop.eup %8626  ;;  %v7195_v47 = vadd.f32 %v13895_v28, %v7116_v59 }
 0x567   : > { %v8629_v41 = vpop.eup %8628  ;;  %7411 = vst.msk [vmem:[%s13910_s21 + $0x10] sm:$0xff] %vm7408_vm15, %v8627_v0  ;;  %v8025_v35 = vmul.f32 -1.442695, %v7194_v9 }
 0x568   : > { %8638 = vpow2.f32 %v8024_v15  ;;  %v7318_v1 = vadd.f32 1.0, %v8629_v41  ;;  %v8631_v2 = vpop.eup %8630  ;;  %v8026_v17 = vmul.f32 -1.442695, %v7195_v47  ;;  %v7119_v58 = vpop.xlane.xlu0 %7118 }
 0x569   : > { %8640 = vrcp.f32 %v7317_v19  ;;  %v8633_v18 = vpop.eup %8632  ;;  %7412 = vst.msk [vmem:[%s13910_s21 + $0x18] sm:$0xff] %vm7408_vm15, %v8631_v2  ;;  %v7196_v24 = vadd.f32 %v13895_v28, %v7119_v58  ;;  %v7122_v26 = vpop.xlane.xlu1 %7121 }
 0x56a   : > { %8642 = vpow2.f32 %v8025_v35  ;;  %v7319_v23 = vadd.f32 1.0, %v8633_v18  ;;  %v7197_v55 = vadd.f32 %v13895_v28, %v7122_v26 }
 0x56b   : > { %8644 = vrcp.f32 %v7318_v1  ;;  %v8027_v51 = vmul.f32 -1.442695, %v7196_v24 }
 0x56c   : > { %8646 = vpow2.f32 %v8026_v17  ;;  %v8028_v57 = vmul.f32 -1.442695, %v7197_v55  ;;  %v7125_v16 = vpop.xlane.xlu0 %7124 }
 0x56d   : > { %8648 = vrcp.f32 %v7319_v23  ;;  %v7198_v56 = vadd.f32 %v13895_v28, %v7125_v16 }
 0x56f   : > { %v8029_v36 = vmul.f32 -1.442695, %v7198_v56 }
 0x570   : > { %v7128_v29 = vpop.xlane.xlu1 %7127 }
 0x571   : > { %v8635_v14 = vpop.eup %8634  ;;  %v7199_v5 = vadd.f32 %v13895_v28, %v7128_v29 }
 0x572   : > { %v8637_v34 = vpop.eup %8636  ;;  %v7320_v10 = vadd.f32 1.0, %v8635_v14 }
 0x573   : > { %7413 = vst.msk [vmem:[%s13910_s21 + $0x20] sm:$0xff] %vm7408_vm15, %v8637_v34  ;;  %v8030_v6 = vmul.f32 -1.442695, %v7199_v5 }
 0x574   : > { %8650 = vrcp.f32 %v7320_v10  ;;  %v7131_v48 = vpop.xlane.xlu0 %7130 }
 0x575   : > { %v8639_v20 = vpop.eup %8638  ;;  %8652 = vpow2.f32 %v8027_v51  ;;  %v7200_v38 = vadd.f32 %v13895_v28, %v7131_v48 }
 0x576   : > { %v8641_v44 = vpop.eup %8640  ;;  %v7321_v52 = vadd.f32 1.0, %v8639_v20 }
 0x577   : > { %7414 = vst.msk [vmem:[%s13910_s21 + $0x28] sm:$0xff] %vm7408_vm15, %v8641_v44  ;;  %v8643_v30 = vpop.eup %8642  ;;  %v8031_v63 = vmul.f32 -1.442695, %v7200_v38 }
 0x578   : > { %8654 = vrcp.f32 %v7321_v52  ;;  %v8645_v49 = vpop.eup %8644  ;;  %v7322_v3 = vadd.f32 1.0, %v8643_v30  ;;  %v7134_v12 = vpop.xlane.xlu1 %7133 }
 0x579   : > { %8656 = vpow2.f32 %v8028_v57  ;;  %7415 = vst.msk [vmem:[%s13910_s21 + $0x30] sm:$0xff] %vm7408_vm15, %v8645_v49  ;;  %v8647_v7 = vpop.eup %8646  ;;  %v7201_v60 = vadd.f32 %v13895_v28, %v7134_v12 }
 0x57a   : > { %8658 = vrcp.f32 %v7322_v3  ;;  %v8649_v43 = vpop.eup %8648  ;;  %v7323_v37 = vadd.f32 1.0, %v8647_v7 }
 0x57b   : > { %8660 = vpow2.f32 %v8029_v36  ;;  %7416 = vst.msk [vmem:[%s13910_s21 + $0x38] sm:$0xff] %vm7408_vm15, %v8649_v43  ;;  %v8032_v54 = vmul.f32 -1.442695, %v7201_v60 }
 0x57c   : > { %8662 = vrcp.f32 %v7323_v37  ;;  %v7137_v27 = vpop.xlane.xlu0 %7136 }
 0x57d   : > { %8664 = vpow2.f32 %v8030_v6  ;;  %v7202_v39 = vadd.f32 %v13895_v28, %v7137_v27 }
 0x57e   : > { %8666 = vpow2.f32 %v8031_v63 }
 0x57f   : > { %v8033_v62 = vmul.f32 -1.442695, %v7202_v39 }
 0x580   : > { %v7140_v46 = vpop.xlane.xlu1 %7139 }
 0x581   : > { %v8651_v25 = vpop.eup %8650  ;;  %v7203_v32 = vadd.f32 %v13895_v28, %v7140_v46 }
 0x582   : > { %v8653_v40 = vpop.eup %8652  ;;  %7417 = vst.msk [vmem:[%s13910_s21 + $0x40] sm:$0xff] %vm7408_vm15, %v8651_v25 }
 0x583   : > { %v7324_v11 = vadd.f32 1.0, %v8653_v40  ;;  %v8034_v4 = vmul.f32 -1.442695, %v7203_v32 }
 0x584   : > { %v7143_v50 = vpop.xlane.xlu0 %7142 }
 0x585   : > { %v8655_v8 = vpop.eup %8654  ;;  %8668 = vrcp.f32 %v7324_v11  ;;  %v7204_v15 = vadd.f32 %v13895_v28, %v7143_v50 }
 0x586   : > { %v8657_v61 = vpop.eup %8656  ;;  %7418 = vst.msk [vmem:[%s13910_s21 + $0x48] sm:$0xff] %vm7408_vm15, %v8655_v8  ;;  %8670 = vpow2.f32 %v8032_v54 }
 0x587   : > { %v7325_v45 = vadd.f32 1.0, %v8657_v61  ;;  %v8659_v31 = vpop.eup %8658  ;;  %v8035_v0 = vmul.f32 -1.442695, %v7204_v15 }
 0x588   : > { %v8661_v22 = vpop.eup %8660  ;;  %7419 = vst.msk [vmem:[%s13910_s21 + $0x50] sm:$0xff] %vm7408_vm15, %v8659_v31  ;;  %v7146_v41 = vpop.xlane.xlu1 %7145 }
 0x589   : > { %8672 = vrcp.f32 %v7325_v45  ;;  %v7326_v33 = vadd.f32 1.0, %v8661_v22  ;;  %v8663_v42 = vpop.eup %8662  ;;  %v7205_v35 = vadd.f32 %v13895_v28, %v7146_v41 }
 0x58a   : > { %8674 = vpow2.f32 %v8033_v62  ;;  %v8665_v21 = vpop.eup %8664  ;;  %7420 = vst.msk [vmem:[%s13910_s21 + $0x58] sm:$0xff] %vm7408_vm15, %v8663_v42 }
 0x58b   : > { %8676 = vrcp.f32 %v7326_v33  ;;  %v7327_v13 = vadd.f32 1.0, %v8665_v21  ;;  %v8667_v19 = vpop.eup %8666  ;;  %v8036_v2 = vmul.f32 -1.442695, %v7205_v35 }
 0x58c   : > { %8678 = vpow2.f32 %v8034_v4  ;;  %v7328_v9 = vadd.f32 1.0, %v8667_v19  ;;  %v7149_v18 = vpop.xlane.xlu0 %7148 }
 0x58d   : > { %8680 = vrcp.f32 %v7327_v13  ;;  %v7206_v17 = vadd.f32 %v13895_v28, %v7149_v18 }
 0x58e   : > { %8682 = vrcp.f32 %v7328_v9 }
 0x58f   : > { %8684 = vpow2.f32 %v8035_v0  ;;  %v8037_v14 = vmul.f32 -1.442695, %v7206_v17 }
 0x590   : > { %v7152_v34 = vpop.xlane.xlu1 %7151 }
 0x591   : > { %v7207_v10 = vadd.f32 %v13895_v28, %v7152_v34 }
 0x592   : > { %v8669_v53 = vpop.eup %8668 }
 0x593   : > { %7421 = vst.msk [vmem:[%s13910_s21 + $0x60] sm:$0xff] %vm7408_vm15, %v8669_v53  ;;  %v8671_v1 = vpop.eup %8670  ;;  %v8038_v20 = vmul.f32 -1.442695, %v7207_v10 }
 0x594   : > { %v7329_v47 = vadd.f32 1.0, %v8671_v1  ;;  %v7155_v44 = vpop.xlane.xlu0 %7154 }
 0x595   : > { %v7208_v52 = vadd.f32 %v13895_v28, %v7155_v44 }
 0x596   : > { %v8673_v59 = vpop.eup %8672  ;;  %8686 = vrcp.f32 %v7329_v47 }
 0x597   : > { %7422 = vst.msk [vmem:[%s13910_s21 + $0x68] sm:$0xff] %vm7408_vm15, %v8673_v59  ;;  %v8675_v23 = vpop.eup %8674  ;;  %8688 = vpow2.f32 %v8036_v2  ;;  %v8039_v56 = vmul.f32 -1.442695, %v7208_v52 }
 0x598   : > { %v8677_v58 = vpop.eup %8676  ;;  %v7330_v24 = vadd.f32 1.0, %v8675_v23  ;;  %v7158_v49 = vpop.xlane.xlu1 %7157 }
 0x599   : > { %7423 = vst.msk [vmem:[%s13910_s21 + $0x70] sm:$0xff] %vm7408_vm15, %v8677_v58  ;;  %v8679_v51 = vpop.eup %8678  ;;  %v7209_v3 = vadd.f32 %v13895_v28, %v7158_v49 }
 0x59a   : > { %8690 = vrcp.f32 %v7330_v24  ;;  %v8681_v26 = vpop.eup %8680  ;;  %v7331_v55 = vadd.f32 1.0, %v8679_v51 }
 0x59b   : > { %8692 = vpow2.f32 %v8037_v14  ;;  %7424 = vst.msk [vmem:[%s13910_s21 + $0x78] sm:$0xff] %vm7408_vm15, %v8681_v26  ;;  %v8683_v57 = vpop.eup %8682  ;;  %v8040_v5 = vmul.f32 -1.442695, %v7209_v3 }
 0x59c   : > { %8694 = vrcp.f32 %v7331_v55  ;;  %v8685_v16 = vpop.eup %8684  ;;  %7425 = vst.msk [vmem:[%s13910_s21 + $0x80] sm:$0xff] %vm7408_vm15, %v8683_v57  ;;  %v7161_v43 = vpop.xlane.xlu0 %7160 }
 0x59d   : > { %8696 = vpow2.f32 %v8038_v20  ;;  %v7332_v30 = vadd.f32 1.0, %v8685_v16  ;;  %v7210_v37 = vadd.f32 %v13895_v28, %v7161_v43 }
 0x59e   : > { %8698 = vpow2.f32 %v8039_v56 }
 0x59f   : > { %8700 = vrcp.f32 %v7332_v30  ;;  %v8041_v38 = vmul.f32 -1.442695, %v7210_v37 }
 0x5a0   : > { %8702 = vpow2.f32 %v8040_v5  ;;  %v7164_v40 = vpop.xlane.xlu1 %7163 }
 0x5a1   : > { %v7211_v63 = vadd.f32 %v13895_v28, %v7164_v40 }
 0x5a3   : > { %v8687_v36 = vpop.eup %8686  ;;  %v8042_v60 = vmul.f32 -1.442695, %v7211_v63 }
 0x5a4   : > { %v8689_v29 = vpop.eup %8688  ;;  %7426 = vst.msk [vmem:[%s13910_s21 + $0x88] sm:$0xff] %vm7408_vm15, %v8687_v36  ;;  %v7167_v61 = vpop.xlane.xlu0 %7166 }
 0x5a5   : > { %v7333_v7 = vadd.f32 1.0, %v8689_v29  ;;  %v7212_v54 = vadd.f32 %v13895_v28, %v7167_v61 }
 0x5a7   : > { %v8691_v6 = vpop.eup %8690  ;;  %8704 = vrcp.f32 %v7333_v7  ;;  %v8043_v31 = vmul.f32 -1.442695, %v7212_v54 }
 0x5a8   : > { %v8693_v48 = vpop.eup %8692  ;;  %7427 = vst.msk [vmem:[%s13910_s21 + $0x90] sm:$0xff] %vm7408_vm15, %v8691_v6  ;;  %8706 = vpow2.f32 %v8041_v38  ;;  %v7170_v22 = vpop.xlane.xlu1 %7169 }
 0x5a9   : > { %v7334_v25 = vadd.f32 1.0, %v8693_v48  ;;  %v8695_v11 = vpop.eup %8694  ;;  %v7213_v62 = vadd.f32 %v13895_v28, %v7170_v22 }
 0x5aa   : > { %v8697_v12 = vpop.eup %8696  ;;  %7428 = vst.msk [vmem:[%s13910_s21 + $0x98] sm:$0xff] %vm7408_vm15, %v8695_v11 }
 0x5ab   : > { %8708 = vrcp.f32 %v7334_v25  ;;  %v7335_v8 = vadd.f32 1.0, %v8697_v12  ;;  %v8699_v45 = vpop.eup %8698  ;;  %v8044_v42 = vmul.f32 -1.442695, %v7213_v62 }
 0x5ac   : > { %8710 = vpow2.f32 %v8042_v60  ;;  %v8701_v27 = vpop.eup %8700  ;;  %v7336_v39 = vadd.f32 1.0, %v8699_v45  ;;  %v7173_v21 = vpop.xlane.xlu0 %7172 }
 0x5ad   : > { %8712 = vrcp.f32 %v7335_v8  ;;  %7429 = vst.msk [vmem:[%s13910_s21 + $0xa0] sm:$0xff] %vm7408_vm15, %v8701_v27  ;;  %v8703_v33 = vpop.eup %8702  ;;  %v7214_v4 = vadd.f32 %v13895_v28, %v7173_v21 }
 0x5ae   : > { %8714 = vrcp.f32 %v7336_v39  ;;  %v7337_v32 = vadd.f32 1.0, %v8703_v33 }
 0x5af   : > { %8716 = vpow2.f32 %v8043_v31  ;;  %v8045_v19 = vmul.f32 -1.442695, %v7214_v4 }
 0x5b0   : > { %8718 = vrcp.f32 %v7337_v32  ;;  %v7176_v53 = vpop.xlane.xlu1 %7175 }
 0x5b1   : > { %8720 = vpow2.f32 %v8044_v42  ;;  %v7215_v9 = vadd.f32 %v13895_v28, %v7176_v53 }
 0x5b3   : > { %v8046_v1 = vmul.f32 -1.442695, %v7215_v9 }
 0x5b4   : > { %v8705_v46 = vpop.eup %8704 }
 0x5b5   : > { %7430 = vst.msk [vmem:[%s13910_s21 + $0xa8] sm:$0xff] %vm7408_vm15, %v8705_v46  ;;  %v8707_v13 = vpop.eup %8706 }
 0x5b6   : > { %v7338_v15 = vadd.f32 1.0, %v8707_v13 }
 0x5b8   : > { %v8709_v50 = vpop.eup %8708  ;;  %8722 = vrcp.f32 %v7338_v15 }
 0x5b9   : > { %7431 = vst.msk [vmem:[%s13910_s21 + $0xb0] sm:$0xff] %vm7408_vm15, %v8709_v50  ;;  %v8711_v0 = vpop.eup %8710  ;;  %8724 = vpow2.f32 %v8045_v19 }
 0x5ba   : > { %v8713_v41 = vpop.eup %8712  ;;  %v7339_v35 = vadd.f32 1.0, %v8711_v0 }
 0x5bb   : > { %7432 = vst.msk [vmem:[%s13910_s21 + $0xb8] sm:$0xff] %vm7408_vm15, %v8713_v41  ;;  %v8715_v59 = vpop.eup %8714 }
 0x5bc   : > { %8726 = vrcp.f32 %v7339_v35  ;;  %v8717_v47 = vpop.eup %8716  ;;  %7433 = vst.msk [vmem:[%s13910_s21 + $0xc0] sm:$0xff] %vm7408_vm15, %v8715_v59 }
 0x5bd   : > { %8728 = vpow2.f32 %v8046_v1  ;;  %v7340_v2 = vadd.f32 1.0, %v8717_v47  ;;  %v8719_v18 = vpop.eup %8718 }
 0x5be   : > { %v8721_v28 = vpop.eup %8720  ;;  %7434 = vst.msk [vmem:[%s13910_s21 + $0xc8] sm:$0xff] %vm7408_vm15, %v8719_v18 }
 0x5bf   : > { %8730 = vrcp.f32 %v7340_v2  ;;  %v7341_v17 = vadd.f32 1.0, %v8721_v28 }
 0x5c1   : > { %8732 = vrcp.f32 %v7341_v17 }
 0x5c5   : > { %v8723_v23 = vpop.eup %8722 }
 0x5c6   : > { %v8725_v58 = vpop.eup %8724  ;;  %7435 = vst.msk [vmem:[%s13910_s21 + $0xd0] sm:$0xff] %vm7408_vm15, %v8723_v23 }
 0x5c7   : > { %v7342_v24 = vadd.f32 1.0, %v8725_v58 }
 0x5c9   : > { %v8727_v14 = vpop.eup %8726  ;;  %8734 = vrcp.f32 %v7342_v24 }
 0x5ca   : > { %v8729_v34 = vpop.eup %8728  ;;  %7436 = vst.msk [vmem:[%s13910_s21 + $0xd8] sm:$0xff] %vm7408_vm15, %v8727_v14 }
 0x5cb   : > { %v7343_v10 = vadd.f32 1.0, %v8729_v34 }
 0x5cc   : > { %v8731_v51 = vpop.eup %8730 }
 0x5cd   : > { %8736 = vrcp.f32 %v7343_v10  ;;  %7437 = vst.msk [vmem:[%s13910_s21 + $0xe0] sm:$0xff] %vm7408_vm15, %v8731_v51 }
 0x5ce   : > { %v8733_v26 = vpop.eup %8732 }
 0x5cf   : > { %7438 = vst.msk [vmem:[%s13910_s21 + $0xe8] sm:$0xff] %vm7408_vm15, %v8733_v26 }
 0x5d6   : > { %v8735_v55 = vpop.eup %8734 }
 0x5d7   : > { %7439 = vst.msk [vmem:[%s13910_s21 + $0xf0] sm:$0xff] %vm7408_vm15, %v8735_v55 }
 0x5da   : > { %v8737_v20 = vpop.eup %8736 }
 0x5db   : > { %7440 = vst.msk [vmem:[%s13910_s21 + $0xf8] sm:$0xff] %vm7408_vm15, %v8737_v20 }
 0x5dc PF: > { %p8089_p2 = scmp.ge.s32.totalorder %s8886_s18, 2  ;;  %s7488_s24 = sand.u32 1, %s8874_s15  }
 0x5dd   : > { %p15018_p9 = scmp.ne.s32.totalorder %s14231_s25, 0  ;;  %s7489_s26 = scalar_lea.sflag [#allocation5], %s7488_s24 }
 0x5df   : > { %p8080_p3 = pnand %p8089_p2, %p15018_p9 }
 0x5e1   : > { %p8081_p4 = pneg %p8080_p3 }
 0x5e3   : > { %8869 = dma.done.wait (%p8081_p4), %s7489_s26, 8192  }
 0x5e4   : > { %8871 = vsyncadd (%p8081_p4), %s7489_s26, 4294959104  ;;  %p25_p7 = scmp.ge.s32.totalorder %s8980_s20, 4   ;;  %s15019_s15 = smov %s8878_s16 }
 0x5e5   : > { %s15020_s16 = smov %s8882_s17  ;;  %s15021_s17 = smov %s8991_s23 }
 0x5e6   : > { %s15022_s18 = smov %s8980_s20  ;;  %27 = sbr.rel (!%p25_p7) target bundleno = 8 (0x8), region = 116 }
 0x5eb   :  { %7494 = vsyncpa [#allocation4], 1 }
 0x5ec   :  { %7496 = vsyncpa [#allocation4 + $0x1], 1 }
 0x5ed   :  { %7497 = vsyncpa [#allocation7], 1 }
 0x5ee   :  { %7498 = vsyncpa [#allocation5], 1 }
 0x5ef   :  { %7500 = vsyncpa [#allocation5 + $0x1], 1 }

</bundles_post_ra>
